<compile_context>
chip_gen: v7x
topology: tpu7x:2x2x1
jax: 0.10.0
libtpu: 0.0.40
codegen_flags: <defaults>
</compile_context>

<pallas_src>
import functools

import jax
import jax.numpy as jnp
from jax.experimental import pallas as pl
from jax.experimental.pallas import tpu as pltpu

LN_EPS = 1e-5


def _layernorm_fused(h, gamma, beta):
    # One-pass statistics: both lane reductions can issue independently (XLU),
    # dropping one full-tile VPU pass vs. the two-pass mean/var form.
    mu = jnp.mean(h, axis=-1, keepdims=True)
    ms = jnp.mean(h * h, axis=-1, keepdims=True)
    var = ms - mu * mu
    return (h - mu) * jax.lax.rsqrt(var + LN_EPS) * gamma + beta


def _layernorm_ref(h, gamma, beta):
    mu = jnp.mean(h, axis=-1, keepdims=True)
    var = jnp.mean((h - mu) ** 2, axis=-1, keepdims=True)
    return (h - mu) * jax.lax.rsqrt(var + LN_EPS) * gamma + beta


def mlp_kernel(x_ref, w1_ref, b1_ref, g1_ref, be1_ref,
               bw_ref, bb_ref, bg_ref, bbe_ref,
               w2_ref, b2_ref, o_ref):
    # fc1 + LayerNorm (bf16 MXU operands, f32 accumulation; LN math stays f32)
    h = jnp.dot(x_ref[...], w1_ref[...],
                preferred_element_type=jnp.float32) + b1_ref[...]
    h = _layernorm_fused(h, g1_ref[...], be1_ref[...])

    # 4 residual blocks (static Python unroll)
    for i in range(4):
        identity = h
        t = jnp.dot(h.astype(jnp.bfloat16), bw_ref[2 * i],
                    preferred_element_type=jnp.float32) + bb_ref[2 * i]
        t = jnp.maximum(_layernorm_fused(t, bg_ref[2 * i], bbe_ref[2 * i]), 0.0)
        t = jnp.dot(t.astype(jnp.bfloat16), bw_ref[2 * i + 1],
                    preferred_element_type=jnp.float32) + bb_ref[2 * i + 1]
        t = _layernorm_fused(t, bg_ref[2 * i + 1], bbe_ref[2 * i + 1])
        h = jnp.maximum(t + identity, 0.0)

    # Final fc (out_features=1), emitted lane-dense as a (1, tile_b) row:
    # transpose h once (XLU, otherwise idle), broadcast-multiply by the (H, 1)
    # weight column on the VPU, reduce over sublanes.  No MXU use, and the
    # store is a full-lane (1, tile_b) row instead of a masked column.
    h_t = jnp.transpose(h)                                   # (H, tile_b) f32
    out_row = jnp.sum(h_t * w2_ref[...], axis=0, keepdims=True) + b2_ref[...]
    o_ref[...] = out_row.astype(o_ref.dtype)                 # (1, tile_b)


def _num_tensorcores_per_device():
    """2 for dual-TensorCore chips (v7x / v4 / v5p), else 1 (v5e / v6e)."""
    try:
        kind = jax.devices()[0].device_kind.lower()
    except Exception:
        return 2
    if any(tag in kind for tag in ("7x", "v7", "v4", "v5p")):
        return 2
    return 1


def _pick_tile_b(B, max_tile=1024):
    """Smallest grid with one step per TensorCore, lane-friendly tiles."""
    num_tc = _num_tensorcores_per_device()
    for g in range(num_tc, B + 1):
        if B % g:
            continue
        t = B // g
        if t > max_tile:
            continue
        if g == 1 or t % 128 == 0:
            return t
    return B  # fallback: single full-batch tile (block == full array dims)


@functools.partial(jax.jit, static_argnames=("tile_b",))
def _mlp_forward_impl(x, params, tile_b):
    B, F = x.shape
    H = params["w1"].shape[1]
    out_dtype = x.dtype

    # Cast matmul operands to bf16 once in the wrapper (grid-invariant inputs);
    # biases / LN affine params / w2 stay f32 (applied post-accumulation on the VPU).
    x_bf16 = x.astype(jnp.bfloat16)
    w1_bf16 = params["w1"].astype(jnp.bfloat16)
    bw_bf16 = params["bw"].astype(jnp.bfloat16)

    full = lambda *shape: pl.BlockSpec(shape, lambda i: (0,) * len(shape))

    out_row = pl.pallas_call(
        mlp_kernel,
        out_shape=jax.ShapeDtypeStruct((1, B), out_dtype),
        grid_spec=pltpu.PrefetchScalarGridSpec(
            num_scalar_prefetch=0,
            grid=(B // tile_b,),
            in_specs=[
                pl.BlockSpec((tile_b, F), lambda i: (i, 0)),   # x tile (bf16)
                full(F, H),                                    # w1 (bf16)
                full(1, H), full(1, H), full(1, H),            # b1, ln1 gamma, ln1 beta
                full(8, H, H),                                 # stacked block weights (bf16)
                full(8, 1, H), full(8, 1, H), full(8, 1, H),   # block biases, gammas, betas
                full(H, 1), full(1, 1),                        # w2 column, b2
            ],
            out_specs=pl.BlockSpec((1, tile_b), lambda i: (0, i)),  # lane-dense row
        ),
        compiler_params=pltpu.CompilerParams(
            dimension_semantics=("parallel",)),
    )(x_bf16, w1_bf16, params["b1"], params["g1"], params["be1"],
      bw_bf16, params["bb"], params["bg"], params["bbe"],
      params["w2"], params["b2"])

    return out_row.reshape(B, 1)


def mlp_forward(x, params, tile_b=None):
    B = x.shape[0]
    if tile_b is None:
        tile_b = _pick_tile_b(B)
    tile_b = min(int(tile_b), B)
    assert B % tile_b == 0, (B, tile_b)
    return _mlp_forward_impl(x, params, tile_b)


def mlp_reference(x, params):
    """Pure-JAX f32 reference mirroring the PyTorch forward."""
    h = x @ params["w1"] + params["b1"]
    h = _layernorm_ref(h, params["g1"], params["be1"])
    for i in range(4):
        identity = h
        t = h @ params["bw"][2 * i] + params["bb"][2 * i]
        t = jnp.maximum(_layernorm_ref(t, params["bg"][2 * i], params["bbe"][2 * i]), 0.0)
        t = t @ params["bw"][2 * i + 1] + params["bb"][2 * i + 1]
        t = _layernorm_ref(t, params["bg"][2 * i + 1], params["bbe"][2 * i + 1])
        h = jnp.maximum(t + identity, 0.0)
    return h @ params["w2"] + params["b2"]


def init_params(key, input_size, hidden_size):
    ks = jax.random.split(key, 12)
    scale = 0.05
    params = {
        "w1": scale * jax.random.normal(ks[0], (input_size, hidden_size), jnp.float32),
        "b1": scale * jax.random.normal(ks[1], (1, hidden_size), jnp.float32),
        "g1": jnp.ones((1, hidden_size), jnp.float32),
        "be1": jnp.zeros((1, hidden_size), jnp.float32),
        "bw": scale * jax.random.normal(ks[2], (8, hidden_size, hidden_size), jnp.float32),
        "bb": scale * jax.random.normal(ks[3], (8, 1, hidden_size), jnp.float32),
        "bg": jnp.ones((8, 1, hidden_size), jnp.float32),
        "bbe": jnp.zeros((8, 1, hidden_size), jnp.float32),
        "w2": scale * jax.random.normal(ks[4], (hidden_size, 1), jnp.float32),
        "b2": scale * jax.random.normal(ks[5], (1, 1), jnp.float32),
    }
    return params


if __name__ == "__main__":
    key = jax.random.PRNGKey(0)
    k_x, k_p = jax.random.split(key)

    # Batch large enough that the grid can split evenly across both
    # TensorCores on v7x (tile_b=128, grid=2) or run as a single full-batch
    # tile on single-TC v5e/v6e (tile_b=256, grid=1).
    B, INPUT_SIZE, HIDDEN_SIZE = 256, 32, 128
    x = jax.random.normal(k_x, (B, INPUT_SIZE), jnp.float32)
    params = init_params(k_p, INPUT_SIZE, HIDDEN_SIZE)

    out = mlp_forward(x, params)          # tile_b auto-picked per TPU generation
    out = jax.block_until_ready(out)

    ref = mlp_reference(x, params)
    assert out.shape == (B, 1), out.shape
    # Tolerance loosened vs. pure-f32: matmuls run with bf16 operands
    # (f32 accumulation), which bounds per-layer relative error ~0.3%.
    assert jnp.allclose(out, ref, atol=5e-2, rtol=5e-2), (
        jnp.max(jnp.abs(out - ref)), out[:4], ref[:4])

    print("KERNEL_OK")
</pallas_src>

<mosaic_0001>
module attributes {stable_mosaic.version = 11 : i64} {
  func.func @mlp_kernel(%arg0: i32, %arg1: memref<256x32xbf16, #tpu.memory_space<vmem>>, %arg2: memref<32x128xbf16, #tpu.memory_space<vmem>>, %arg3: memref<1x128xf32, #tpu.memory_space<vmem>>, %arg4: memref<1x128xf32, #tpu.memory_space<vmem>>, %arg5: memref<1x128xf32, #tpu.memory_space<vmem>>, %arg6: memref<8x128x128xbf16, #tpu.memory_space<vmem>>, %arg7: memref<8x1x128xf32, #tpu.memory_space<vmem>>, %arg8: memref<8x1x128xf32, #tpu.memory_space<vmem>>, %arg9: memref<8x1x128xf32, #tpu.memory_space<vmem>>, %arg10: memref<128x1xf32, #tpu.memory_space<vmem>>, %arg11: memref<1x1xf32, #tpu.memory_space<vmem>>, %arg12: memref<1x256xf32, #tpu.memory_space<vmem>>) attributes {dimension_semantics = [#tpu.dimension_semantics<parallel>], iteration_bounds = array<i64: 1>, scalar_prefetch = 0 : i64, scratch_operands = 0 : i64, tpu.core_type = #tpu.core_type<tc>, window_params = [{transform_indices = @transform_0, window_bounds = array<i64: 256, 32>}, {pipeline_mode = #tpu.pipeline_mode<synchronous>, transform_indices = @transform_1, window_bounds = array<i64: 32, 128>}, {pipeline_mode = #tpu.pipeline_mode<synchronous>, transform_indices = @transform_2, window_bounds = array<i64: 1, 128>}, {pipeline_mode = #tpu.pipeline_mode<synchronous>, transform_indices = @transform_3, window_bounds = array<i64: 1, 128>}, {pipeline_mode = #tpu.pipeline_mode<synchronous>, transform_indices = @transform_4, window_bounds = array<i64: 1, 128>}, {pipeline_mode = #tpu.pipeline_mode<synchronous>, transform_indices = @transform_5, window_bounds = array<i64: 8, 128, 128>}, {pipeline_mode = #tpu.pipeline_mode<synchronous>, transform_indices = @transform_6, window_bounds = array<i64: 8, 1, 128>}, {pipeline_mode = #tpu.pipeline_mode<synchronous>, transform_indices = @transform_7, window_bounds = array<i64: 8, 1, 128>}, {pipeline_mode = #tpu.pipeline_mode<synchronous>, transform_indices = @transform_8, window_bounds = array<i64: 8, 1, 128>}, {pipeline_mode = #tpu.pipeline_mode<synchronous>, transform_indices = @transform_9, window_bounds = array<i64: 128, 1>}, {pipeline_mode = #tpu.pipeline_mode<synchronous>, transform_indices = @transform_10, window_bounds = array<i64: 1, 1>}, {transform_indices = @transform_11, window_bounds = array<i64: 1, 256>}]} {
    %c0 = arith.constant 0 : index
    %c0_0 = arith.constant 0 : index
    %0 = vector.load %arg1[%c0, %c0_0] : memref<256x32xbf16, #tpu.memory_space<vmem>>, vector<256x32xbf16>
    %c0_1 = arith.constant 0 : index
    %c0_2 = arith.constant 0 : index
    %1 = vector.load %arg2[%c0_1, %c0_2] : memref<32x128xbf16, #tpu.memory_space<vmem>>, vector<32x128xbf16>
    %cst = arith.constant dense<0.000000e+00> : vector<256x128xf32>
    %2 = tpu.matmul %0, %1, %cst {dimension_numbers = #tpu.dot_dimension_numbers<[1], [0], [0], [1], [0, 0, 1, 1], [], []>} : vector<256x32xbf16>, vector<32x128xbf16>, vector<256x128xf32> -> vector<256x128xf32>
    %c0_3 = arith.constant 0 : index
    %c0_4 = arith.constant 0 : index
    %3 = vector.load %arg3[%c0_3, %c0_4] : memref<1x128xf32, #tpu.memory_space<vmem>>, vector<1x128xf32>
    %4 = vector.broadcast %3 : vector<1x128xf32> to vector<256x128xf32>
    %5 = arith.addf %2, %4 : vector<256x128xf32>
    %c0_5 = arith.constant 0 : index
    %c0_6 = arith.constant 0 : index
    %6 = vector.load %arg4[%c0_5, %c0_6] : memref<1x128xf32, #tpu.memory_space<vmem>>, vector<1x128xf32>
    %c0_7 = arith.constant 0 : index
    %c0_8 = arith.constant 0 : index
    %7 = vector.load %arg5[%c0_7, %c0_8] : memref<1x128xf32, #tpu.memory_space<vmem>>, vector<1x128xf32>
    %cst_9 = arith.constant dense<0.000000e+00> : vector<256xf32>
    %8 = vector.multi_reduction <add>, %5, %cst_9 [1] : vector<256x128xf32> to vector<256xf32>
    %9 = vector.shape_cast %8 : vector<256xf32> to vector<256x1xf32>
    %cst_10 = arith.constant 1.280000e+02 : f32
    %10 = vector.broadcast %cst_10 : f32 to vector<256x1xf32>
    %11 = arith.divf %9, %10 : vector<256x1xf32>
    %12 = arith.mulf %5, %5 : vector<256x128xf32>
    %cst_11 = arith.constant dense<0.000000e+00> : vector<256xf32>
    %13 = vector.multi_reduction <add>, %12, %cst_11 [1] : vector<256x128xf32> to vector<256xf32>
    %14 = vector.shape_cast %13 : vector<256xf32> to vector<256x1xf32>
    %cst_12 = arith.constant 1.280000e+02 : f32
    %15 = vector.broadcast %cst_12 : f32 to vector<256x1xf32>
    %16 = arith.divf %14, %15 : vector<256x1xf32>
    %17 = arith.mulf %11, %11 : vector<256x1xf32>
    %18 = arith.subf %16, %17 : vector<256x1xf32>
    %19 = vector.broadcast %11 : vector<256x1xf32> to vector<256x128xf32>
    %20 = arith.subf %5, %19 : vector<256x128xf32>
    %cst_13 = arith.constant 9.99999974E-6 : f32
    %21 = vector.broadcast %cst_13 : f32 to vector<256x1xf32>
    %22 = arith.addf %18, %21 : vector<256x1xf32>
    %23 = math.rsqrt %22 : vector<256x1xf32>
    %24 = vector.broadcast %23 : vector<256x1xf32> to vector<256x128xf32>
    %25 = arith.mulf %20, %24 : vector<256x128xf32>
    %26 = vector.broadcast %6 : vector<1x128xf32> to vector<256x128xf32>
    %27 = arith.mulf %25, %26 : vector<256x128xf32>
    %28 = vector.broadcast %7 : vector<1x128xf32> to vector<256x128xf32>
    %29 = arith.addf %27, %28 : vector<256x128xf32>
    %30 = arith.truncf %29 : vector<256x128xf32> to vector<256x128xbf16>
    %c0_14 = arith.constant 0 : index
    %c0_15 = arith.constant 0 : index
    %c0_16 = arith.constant 0 : index
    %31 = vector.load %arg6[%c0_14, %c0_15, %c0_16] : memref<8x128x128xbf16, #tpu.memory_space<vmem>>, vector<1x128x128xbf16>
    %32 = vector.shape_cast %31 : vector<1x128x128xbf16> to vector<128x128xbf16>
    %cst_17 = arith.constant dense<0.000000e+00> : vector<256x128xf32>
    %33 = tpu.matmul %30, %32, %cst_17 {dimension_numbers = #tpu.dot_dimension_numbers<[1], [0], [0], [1], [0, 0, 1, 1], [], []>} : vector<256x128xbf16>, vector<128x128xbf16>, vector<256x128xf32> -> vector<256x128xf32>
    %c0_18 = arith.constant 0 : index
    %c0_19 = arith.constant 0 : index
    %c0_20 = arith.constant 0 : index
    %34 = vector.load %arg7[%c0_18, %c0_19, %c0_20] : memref<8x1x128xf32, #tpu.memory_space<vmem>>, vector<1x1x128xf32>
    %35 = vector.shape_cast %34 : vector<1x1x128xf32> to vector<1x128xf32>
    %36 = vector.broadcast %35 : vector<1x128xf32> to vector<256x128xf32>
    %37 = arith.addf %33, %36 : vector<256x128xf32>
    %c0_21 = arith.constant 0 : index
    %c0_22 = arith.constant 0 : index
    %c0_23 = arith.constant 0 : index
    %38 = vector.load %arg8[%c0_21, %c0_22, %c0_23] : memref<8x1x128xf32, #tpu.memory_space<vmem>>, vector<1x1x128xf32>
    %39 = vector.shape_cast %38 : vector<1x1x128xf32> to vector<1x128xf32>
    %c0_24 = arith.constant 0 : index
    %c0_25 = arith.constant 0 : index
    %c0_26 = arith.constant 0 : index
    %40 = vector.load %arg9[%c0_24, %c0_25, %c0_26] : memref<8x1x128xf32, #tpu.memory_space<vmem>>, vector<1x1x128xf32>
    %41 = vector.shape_cast %40 : vector<1x1x128xf32> to vector<1x128xf32>
    %cst_27 = arith.constant dense<0.000000e+00> : vector<256xf32>
    %42 = vector.multi_reduction <add>, %37, %cst_27 [1] : vector<256x128xf32> to vector<256xf32>
    %43 = vector.shape_cast %42 : vector<256xf32> to vector<256x1xf32>
    %cst_28 = arith.constant 1.280000e+02 : f32
    %44 = vector.broadcast %cst_28 : f32 to vector<256x1xf32>
    %45 = arith.divf %43, %44 : vector<256x1xf32>
    %46 = arith.mulf %37, %37 : vector<256x128xf32>
    %cst_29 = arith.constant dense<0.000000e+00> : vector<256xf32>
    %47 = vector.multi_reduction <add>, %46, %cst_29 [1] : vector<256x128xf32> to vector<256xf32>
    %48 = vector.shape_cast %47 : vector<256xf32> to vector<256x1xf32>
    %cst_30 = arith.constant 1.280000e+02 : f32
    %49 = vector.broadcast %cst_30 : f32 to vector<256x1xf32>
    %50 = arith.divf %48, %49 : vector<256x1xf32>
    %51 = arith.mulf %45, %45 : vector<256x1xf32>
    %52 = arith.subf %50, %51 : vector<256x1xf32>
    %53 = vector.broadcast %45 : vector<256x1xf32> to vector<256x128xf32>
    %54 = arith.subf %37, %53 : vector<256x128xf32>
    %cst_31 = arith.constant 9.99999974E-6 : f32
    %55 = vector.broadcast %cst_31 : f32 to vector<256x1xf32>
    %56 = arith.addf %52, %55 : vector<256x1xf32>
    %57 = math.rsqrt %56 : vector<256x1xf32>
    %58 = vector.broadcast %57 : vector<256x1xf32> to vector<256x128xf32>
    %59 = arith.mulf %54, %58 : vector<256x128xf32>
    %60 = vector.broadcast %39 : vector<1x128xf32> to vector<256x128xf32>
    %61 = arith.mulf %59, %60 : vector<256x128xf32>
    %62 = vector.broadcast %41 : vector<1x128xf32> to vector<256x128xf32>
    %63 = arith.addf %61, %62 : vector<256x128xf32>
    %cst_32 = arith.constant 0.000000e+00 : f32
    %64 = vector.broadcast %cst_32 : f32 to vector<256x128xf32>
    %65 = arith.maximumf %63, %64 : vector<256x128xf32>
    %66 = arith.truncf %65 : vector<256x128xf32> to vector<256x128xbf16>
    %c1 = arith.constant 1 : index
    %c0_33 = arith.constant 0 : index
    %c0_34 = arith.constant 0 : index
    %67 = vector.load %arg6[%c1, %c0_33, %c0_34] : memref<8x128x128xbf16, #tpu.memory_space<vmem>>, vector<1x128x128xbf16>
    %68 = vector.shape_cast %67 : vector<1x128x128xbf16> to vector<128x128xbf16>
    %cst_35 = arith.constant dense<0.000000e+00> : vector<256x128xf32>
    %69 = tpu.matmul %66, %68, %cst_35 {dimension_numbers = #tpu.dot_dimension_numbers<[1], [0], [0], [1], [0, 0, 1, 1], [], []>} : vector<256x128xbf16>, vector<128x128xbf16>, vector<256x128xf32> -> vector<256x128xf32>
    %c1_36 = arith.constant 1 : index
    %c0_37 = arith.constant 0 : index
    %c0_38 = arith.constant 0 : index
    %70 = vector.load %arg7[%c1_36, %c0_37, %c0_38] : memref<8x1x128xf32, #tpu.memory_space<vmem>>, vector<1x1x128xf32>
    %71 = vector.shape_cast %70 : vector<1x1x128xf32> to vector<1x128xf32>
    %72 = vector.broadcast %71 : vector<1x128xf32> to vector<256x128xf32>
    %73 = arith.addf %69, %72 : vector<256x128xf32>
    %c1_39 = arith.constant 1 : index
    %c0_40 = arith.constant 0 : index
    %c0_41 = arith.constant 0 : index
    %74 = vector.load %arg8[%c1_39, %c0_40, %c0_41] : memref<8x1x128xf32, #tpu.memory_space<vmem>>, vector<1x1x128xf32>
    %75 = vector.shape_cast %74 : vector<1x1x128xf32> to vector<1x128xf32>
    %c1_42 = arith.constant 1 : index
    %c0_43 = arith.constant 0 : index
    %c0_44 = arith.constant 0 : index
    %76 = vector.load %arg9[%c1_42, %c0_43, %c0_44] : memref<8x1x128xf32, #tpu.memory_space<vmem>>, vector<1x1x128xf32>
    %77 = vector.shape_cast %76 : vector<1x1x128xf32> to vector<1x128xf32>
    %cst_45 = arith.constant dense<0.000000e+00> : vector<256xf32>
    %78 = vector.multi_reduction <add>, %73, %cst_45 [1] : vector<256x128xf32> to vector<256xf32>
    %79 = vector.shape_cast %78 : vector<256xf32> to vector<256x1xf32>
    %cst_46 = arith.constant 1.280000e+02 : f32
    %80 = vector.broadcast %cst_46 : f32 to vector<256x1xf32>
    %81 = arith.divf %79, %80 : vector<256x1xf32>
    %82 = arith.mulf %73, %73 : vector<256x128xf32>
    %cst_47 = arith.constant dense<0.000000e+00> : vector<256xf32>
    %83 = vector.multi_reduction <add>, %82, %cst_47 [1] : vector<256x128xf32> to vector<256xf32>
    %84 = vector.shape_cast %83 : vector<256xf32> to vector<256x1xf32>
    %cst_48 = arith.constant 1.280000e+02 : f32
    %85 = vector.broadcast %cst_48 : f32 to vector<256x1xf32>
    %86 = arith.divf %84, %85 : vector<256x1xf32>
    %87 = arith.mulf %81, %81 : vector<256x1xf32>
    %88 = arith.subf %86, %87 : vector<256x1xf32>
    %89 = vector.broadcast %81 : vector<256x1xf32> to vector<256x128xf32>
    %90 = arith.subf %73, %89 : vector<256x128xf32>
    %cst_49 = arith.constant 9.99999974E-6 : f32
    %91 = vector.broadcast %cst_49 : f32 to vector<256x1xf32>
    %92 = arith.addf %88, %91 : vector<256x1xf32>
    %93 = math.rsqrt %92 : vector<256x1xf32>
    %94 = vector.broadcast %93 : vector<256x1xf32> to vector<256x128xf32>
    %95 = arith.mulf %90, %94 : vector<256x128xf32>
    %96 = vector.broadcast %75 : vector<1x128xf32> to vector<256x128xf32>
    %97 = arith.mulf %95, %96 : vector<256x128xf32>
    %98 = vector.broadcast %77 : vector<1x128xf32> to vector<256x128xf32>
    %99 = arith.addf %97, %98 : vector<256x128xf32>
    %100 = arith.addf %99, %29 : vector<256x128xf32>
    %cst_50 = arith.constant 0.000000e+00 : f32
    %101 = vector.broadcast %cst_50 : f32 to vector<256x128xf32>
    %102 = arith.maximumf %100, %101 : vector<256x128xf32>
    %103 = arith.truncf %102 : vector<256x128xf32> to vector<256x128xbf16>
    %c2 = arith.constant 2 : index
    %c0_51 = arith.constant 0 : index
    %c0_52 = arith.constant 0 : index
    %104 = vector.load %arg6[%c2, %c0_51, %c0_52] : memref<8x128x128xbf16, #tpu.memory_space<vmem>>, vector<1x128x128xbf16>
    %105 = vector.shape_cast %104 : vector<1x128x128xbf16> to vector<128x128xbf16>
    %cst_53 = arith.constant dense<0.000000e+00> : vector<256x128xf32>
    %106 = tpu.matmul %103, %105, %cst_53 {dimension_numbers = #tpu.dot_dimension_numbers<[1], [0], [0], [1], [0, 0, 1, 1], [], []>} : vector<256x128xbf16>, vector<128x128xbf16>, vector<256x128xf32> -> vector<256x128xf32>
    %c2_54 = arith.constant 2 : index
    %c0_55 = arith.constant 0 : index
    %c0_56 = arith.constant 0 : index
    %107 = vector.load %arg7[%c2_54, %c0_55, %c0_56] : memref<8x1x128xf32, #tpu.memory_space<vmem>>, vector<1x1x128xf32>
    %108 = vector.shape_cast %107 : vector<1x1x128xf32> to vector<1x128xf32>
    %109 = vector.broadcast %108 : vector<1x128xf32> to vector<256x128xf32>
    %110 = arith.addf %106, %109 : vector<256x128xf32>
    %c2_57 = arith.constant 2 : index
    %c0_58 = arith.constant 0 : index
    %c0_59 = arith.constant 0 : index
    %111 = vector.load %arg8[%c2_57, %c0_58, %c0_59] : memref<8x1x128xf32, #tpu.memory_space<vmem>>, vector<1x1x128xf32>
    %112 = vector.shape_cast %111 : vector<1x1x128xf32> to vector<1x128xf32>
    %c2_60 = arith.constant 2 : index
    %c0_61 = arith.constant 0 : index
    %c0_62 = arith.constant 0 : index
    %113 = vector.load %arg9[%c2_60, %c0_61, %c0_62] : memref<8x1x128xf32, #tpu.memory_space<vmem>>, vector<1x1x128xf32>
    %114 = vector.shape_cast %113 : vector<1x1x128xf32> to vector<1x128xf32>
    %cst_63 = arith.constant dense<0.000000e+00> : vector<256xf32>
    %115 = vector.multi_reduction <add>, %110, %cst_63 [1] : vector<256x128xf32> to vector<256xf32>
    %116 = vector.shape_cast %115 : vector<256xf32> to vector<256x1xf32>
    %cst_64 = arith.constant 1.280000e+02 : f32
    %117 = vector.broadcast %cst_64 : f32 to vector<256x1xf32>
    %118 = arith.divf %116, %117 : vector<256x1xf32>
    %119 = arith.mulf %110, %110 : vector<256x128xf32>
    %cst_65 = arith.constant dense<0.000000e+00> : vector<256xf32>
    %120 = vector.multi_reduction <add>, %119, %cst_65 [1] : vector<256x128xf32> to vector<256xf32>
    %121 = vector.shape_cast %120 : vector<256xf32> to vector<256x1xf32>
    %cst_66 = arith.constant 1.280000e+02 : f32
    %122 = vector.broadcast %cst_66 : f32 to vector<256x1xf32>
    %123 = arith.divf %121, %122 : vector<256x1xf32>
    %124 = arith.mulf %118, %118 : vector<256x1xf32>
    %125 = arith.subf %123, %124 : vector<256x1xf32>
    %126 = vector.broadcast %118 : vector<256x1xf32> to vector<256x128xf32>
    %127 = arith.subf %110, %126 : vector<256x128xf32>
    %cst_67 = arith.constant 9.99999974E-6 : f32
    %128 = vector.broadcast %cst_67 : f32 to vector<256x1xf32>
    %129 = arith.addf %125, %128 : vector<256x1xf32>
    %130 = math.rsqrt %129 : vector<256x1xf32>
    %131 = vector.broadcast %130 : vector<256x1xf32> to vector<256x128xf32>
    %132 = arith.mulf %127, %131 : vector<256x128xf32>
    %133 = vector.broadcast %112 : vector<1x128xf32> to vector<256x128xf32>
    %134 = arith.mulf %132, %133 : vector<256x128xf32>
    %135 = vector.broadcast %114 : vector<1x128xf32> to vector<256x128xf32>
    %136 = arith.addf %134, %135 : vector<256x128xf32>
    %cst_68 = arith.constant 0.000000e+00 : f32
    %137 = vector.broadcast %cst_68 : f32 to vector<256x128xf32>
    %138 = arith.maximumf %136, %137 : vector<256x128xf32>
    %139 = arith.truncf %138 : vector<256x128xf32> to vector<256x128xbf16>
    %c3 = arith.constant 3 : index
    %c0_69 = arith.constant 0 : index
    %c0_70 = arith.constant 0 : index
    %140 = vector.load %arg6[%c3, %c0_69, %c0_70] : memref<8x128x128xbf16, #tpu.memory_space<vmem>>, vector<1x128x128xbf16>
    %141 = vector.shape_cast %140 : vector<1x128x128xbf16> to vector<128x128xbf16>
    %cst_71 = arith.constant dense<0.000000e+00> : vector<256x128xf32>
    %142 = tpu.matmul %139, %141, %cst_71 {dimension_numbers = #tpu.dot_dimension_numbers<[1], [0], [0], [1], [0, 0, 1, 1], [], []>} : vector<256x128xbf16>, vector<128x128xbf16>, vector<256x128xf32> -> vector<256x128xf32>
    %c3_72 = arith.constant 3 : index
    %c0_73 = arith.constant 0 : index
    %c0_74 = arith.constant 0 : index
    %143 = vector.load %arg7[%c3_72, %c0_73, %c0_74] : memref<8x1x128xf32, #tpu.memory_space<vmem>>, vector<1x1x128xf32>
    %144 = vector.shape_cast %143 : vector<1x1x128xf32> to vector<1x128xf32>
    %145 = vector.broadcast %144 : vector<1x128xf32> to vector<256x128xf32>
    %146 = arith.addf %142, %145 : vector<256x128xf32>
    %c3_75 = arith.constant 3 : index
    %c0_76 = arith.constant 0 : index
    %c0_77 = arith.constant 0 : index
    %147 = vector.load %arg8[%c3_75, %c0_76, %c0_77] : memref<8x1x128xf32, #tpu.memory_space<vmem>>, vector<1x1x128xf32>
    %148 = vector.shape_cast %147 : vector<1x1x128xf32> to vector<1x128xf32>
    %c3_78 = arith.constant 3 : index
    %c0_79 = arith.constant 0 : index
    %c0_80 = arith.constant 0 : index
    %149 = vector.load %arg9[%c3_78, %c0_79, %c0_80] : memref<8x1x128xf32, #tpu.memory_space<vmem>>, vector<1x1x128xf32>
    %150 = vector.shape_cast %149 : vector<1x1x128xf32> to vector<1x128xf32>
    %cst_81 = arith.constant dense<0.000000e+00> : vector<256xf32>
    %151 = vector.multi_reduction <add>, %146, %cst_81 [1] : vector<256x128xf32> to vector<256xf32>
    %152 = vector.shape_cast %151 : vector<256xf32> to vector<256x1xf32>
    %cst_82 = arith.constant 1.280000e+02 : f32
    %153 = vector.broadcast %cst_82 : f32 to vector<256x1xf32>
    %154 = arith.divf %152, %153 : vector<256x1xf32>
    %155 = arith.mulf %146, %146 : vector<256x128xf32>
    %cst_83 = arith.constant dense<0.000000e+00> : vector<256xf32>
    %156 = vector.multi_reduction <add>, %155, %cst_83 [1] : vector<256x128xf32> to vector<256xf32>
    %157 = vector.shape_cast %156 : vector<256xf32> to vector<256x1xf32>
    %cst_84 = arith.constant 1.280000e+02 : f32
    %158 = vector.broadcast %cst_84 : f32 to vector<256x1xf32>
    %159 = arith.divf %157, %158 : vector<256x1xf32>
    %160 = arith.mulf %154, %154 : vector<256x1xf32>
    %161 = arith.subf %159, %160 : vector<256x1xf32>
    %162 = vector.broadcast %154 : vector<256x1xf32> to vector<256x128xf32>
    %163 = arith.subf %146, %162 : vector<256x128xf32>
    %cst_85 = arith.constant 9.99999974E-6 : f32
    %164 = vector.broadcast %cst_85 : f32 to vector<256x1xf32>
    %165 = arith.addf %161, %164 : vector<256x1xf32>
    %166 = math.rsqrt %165 : vector<256x1xf32>
    %167 = vector.broadcast %166 : vector<256x1xf32> to vector<256x128xf32>
    %168 = arith.mulf %163, %167 : vector<256x128xf32>
    %169 = vector.broadcast %148 : vector<1x128xf32> to vector<256x128xf32>
    %170 = arith.mulf %168, %169 : vector<256x128xf32>
    %171 = vector.broadcast %150 : vector<1x128xf32> to vector<256x128xf32>
    %172 = arith.addf %170, %171 : vector<256x128xf32>
    %173 = arith.addf %172, %102 : vector<256x128xf32>
    %cst_86 = arith.constant 0.000000e+00 : f32
    %174 = vector.broadcast %cst_86 : f32 to vector<256x128xf32>
    %175 = arith.maximumf %173, %174 : vector<256x128xf32>
    %176 = arith.truncf %175 : vector<256x128xf32> to vector<256x128xbf16>
    %c4 = arith.constant 4 : index
    %c0_87 = arith.constant 0 : index
    %c0_88 = arith.constant 0 : index
    %177 = vector.load %arg6[%c4, %c0_87, %c0_88] : memref<8x128x128xbf16, #tpu.memory_space<vmem>>, vector<1x128x128xbf16>
    %178 = vector.shape_cast %177 : vector<1x128x128xbf16> to vector<128x128xbf16>
    %cst_89 = arith.constant dense<0.000000e+00> : vector<256x128xf32>
    %179 = tpu.matmul %176, %178, %cst_89 {dimension_numbers = #tpu.dot_dimension_numbers<[1], [0], [0], [1], [0, 0, 1, 1], [], []>} : vector<256x128xbf16>, vector<128x128xbf16>, vector<256x128xf32> -> vector<256x128xf32>
    %c4_90 = arith.constant 4 : index
    %c0_91 = arith.constant 0 : index
    %c0_92 = arith.constant 0 : index
    %180 = vector.load %arg7[%c4_90, %c0_91, %c0_92] : memref<8x1x128xf32, #tpu.memory_space<vmem>>, vector<1x1x128xf32>
    %181 = vector.shape_cast %180 : vector<1x1x128xf32> to vector<1x128xf32>
    %182 = vector.broadcast %181 : vector<1x128xf32> to vector<256x128xf32>
    %183 = arith.addf %179, %182 : vector<256x128xf32>
    %c4_93 = arith.constant 4 : index
    %c0_94 = arith.constant 0 : index
    %c0_95 = arith.constant 0 : index
    %184 = vector.load %arg8[%c4_93, %c0_94, %c0_95] : memref<8x1x128xf32, #tpu.memory_space<vmem>>, vector<1x1x128xf32>
    %185 = vector.shape_cast %184 : vector<1x1x128xf32> to vector<1x128xf32>
    %c4_96 = arith.constant 4 : index
    %c0_97 = arith.constant 0 : index
    %c0_98 = arith.constant 0 : index
    %186 = vector.load %arg9[%c4_96, %c0_97, %c0_98] : memref<8x1x128xf32, #tpu.memory_space<vmem>>, vector<1x1x128xf32>
    %187 = vector.shape_cast %186 : vector<1x1x128xf32> to vector<1x128xf32>
    %cst_99 = arith.constant dense<0.000000e+00> : vector<256xf32>
    %188 = vector.multi_reduction <add>, %183, %cst_99 [1] : vector<256x128xf32> to vector<256xf32>
    %189 = vector.shape_cast %188 : vector<256xf32> to vector<256x1xf32>
    %cst_100 = arith.constant 1.280000e+02 : f32
    %190 = vector.broadcast %cst_100 : f32 to vector<256x1xf32>
    %191 = arith.divf %189, %190 : vector<256x1xf32>
    %192 = arith.mulf %183, %183 : vector<256x128xf32>
    %cst_101 = arith.constant dense<0.000000e+00> : vector<256xf32>
    %193 = vector.multi_reduction <add>, %192, %cst_101 [1] : vector<256x128xf32> to vector<256xf32>
    %194 = vector.shape_cast %193 : vector<256xf32> to vector<256x1xf32>
    %cst_102 = arith.constant 1.280000e+02 : f32
    %195 = vector.broadcast %cst_102 : f32 to vector<256x1xf32>
    %196 = arith.divf %194, %195 : vector<256x1xf32>
    %197 = arith.mulf %191, %191 : vector<256x1xf32>
    %198 = arith.subf %196, %197 : vector<256x1xf32>
    %199 = vector.broadcast %191 : vector<256x1xf32> to vector<256x128xf32>
    %200 = arith.subf %183, %199 : vector<256x128xf32>
    %cst_103 = arith.constant 9.99999974E-6 : f32
    %201 = vector.broadcast %cst_103 : f32 to vector<256x1xf32>
    %202 = arith.addf %198, %201 : vector<256x1xf32>
    %203 = math.rsqrt %202 : vector<256x1xf32>
    %204 = vector.broadcast %203 : vector<256x1xf32> to vector<256x128xf32>
    %205 = arith.mulf %200, %204 : vector<256x128xf32>
    %206 = vector.broadcast %185 : vector<1x128xf32> to vector<256x128xf32>
    %207 = arith.mulf %205, %206 : vector<256x128xf32>
    %208 = vector.broadcast %187 : vector<1x128xf32> to vector<256x128xf32>
    %209 = arith.addf %207, %208 : vector<256x128xf32>
    %cst_104 = arith.constant 0.000000e+00 : f32
    %210 = vector.broadcast %cst_104 : f32 to vector<256x128xf32>
    %211 = arith.maximumf %209, %210 : vector<256x128xf32>
    %212 = arith.truncf %211 : vector<256x128xf32> to vector<256x128xbf16>
    %c5 = arith.constant 5 : index
    %c0_105 = arith.constant 0 : index
    %c0_106 = arith.constant 0 : index
    %213 = vector.load %arg6[%c5, %c0_105, %c0_106] : memref<8x128x128xbf16, #tpu.memory_space<vmem>>, vector<1x128x128xbf16>
    %214 = vector.shape_cast %213 : vector<1x128x128xbf16> to vector<128x128xbf16>
    %cst_107 = arith.constant dense<0.000000e+00> : vector<256x128xf32>
    %215 = tpu.matmul %212, %214, %cst_107 {dimension_numbers = #tpu.dot_dimension_numbers<[1], [0], [0], [1], [0, 0, 1, 1], [], []>} : vector<256x128xbf16>, vector<128x128xbf16>, vector<256x128xf32> -> vector<256x128xf32>
    %c5_108 = arith.constant 5 : index
    %c0_109 = arith.constant 0 : index
    %c0_110 = arith.constant 0 : index
    %216 = vector.load %arg7[%c5_108, %c0_109, %c0_110] : memref<8x1x128xf32, #tpu.memory_space<vmem>>, vector<1x1x128xf32>
    %217 = vector.shape_cast %216 : vector<1x1x128xf32> to vector<1x128xf32>
    %218 = vector.broadcast %217 : vector<1x128xf32> to vector<256x128xf32>
    %219 = arith.addf %215, %218 : vector<256x128xf32>
    %c5_111 = arith.constant 5 : index
    %c0_112 = arith.constant 0 : index
    %c0_113 = arith.constant 0 : index
    %220 = vector.load %arg8[%c5_111, %c0_112, %c0_113] : memref<8x1x128xf32, #tpu.memory_space<vmem>>, vector<1x1x128xf32>
    %221 = vector.shape_cast %220 : vector<1x1x128xf32> to vector<1x128xf32>
    %c5_114 = arith.constant 5 : index
    %c0_115 = arith.constant 0 : index
    %c0_116 = arith.constant 0 : index
    %222 = vector.load %arg9[%c5_114, %c0_115, %c0_116] : memref<8x1x128xf32, #tpu.memory_space<vmem>>, vector<1x1x128xf32>
    %223 = vector.shape_cast %222 : vector<1x1x128xf32> to vector<1x128xf32>
    %cst_117 = arith.constant dense<0.000000e+00> : vector<256xf32>
    %224 = vector.multi_reduction <add>, %219, %cst_117 [1] : vector<256x128xf32> to vector<256xf32>
    %225 = vector.shape_cast %224 : vector<256xf32> to vector<256x1xf32>
    %cst_118 = arith.constant 1.280000e+02 : f32
    %226 = vector.broadcast %cst_118 : f32 to vector<256x1xf32>
    %227 = arith.divf %225, %226 : vector<256x1xf32>
    %228 = arith.mulf %219, %219 : vector<256x128xf32>
    %cst_119 = arith.constant dense<0.000000e+00> : vector<256xf32>
    %229 = vector.multi_reduction <add>, %228, %cst_119 [1] : vector<256x128xf32> to vector<256xf32>
    %230 = vector.shape_cast %229 : vector<256xf32> to vector<256x1xf32>
    %cst_120 = arith.constant 1.280000e+02 : f32
    %231 = vector.broadcast %cst_120 : f32 to vector<256x1xf32>
    %232 = arith.divf %230, %231 : vector<256x1xf32>
    %233 = arith.mulf %227, %227 : vector<256x1xf32>
    %234 = arith.subf %232, %233 : vector<256x1xf32>
    %235 = vector.broadcast %227 : vector<256x1xf32> to vector<256x128xf32>
    %236 = arith.subf %219, %235 : vector<256x128xf32>
    %cst_121 = arith.constant 9.99999974E-6 : f32
    %237 = vector.broadcast %cst_121 : f32 to vector<256x1xf32>
    %238 = arith.addf %234, %237 : vector<256x1xf32>
    %239 = math.rsqrt %238 : vector<256x1xf32>
    %240 = vector.broadcast %239 : vector<256x1xf32> to vector<256x128xf32>
    %241 = arith.mulf %236, %240 : vector<256x128xf32>
    %242 = vector.broadcast %221 : vector<1x128xf32> to vector<256x128xf32>
    %243 = arith.mulf %241, %242 : vector<256x128xf32>
    %244 = vector.broadcast %223 : vector<1x128xf32> to vector<256x128xf32>
    %245 = arith.addf %243, %244 : vector<256x128xf32>
    %246 = arith.addf %245, %175 : vector<256x128xf32>
    %cst_122 = arith.constant 0.000000e+00 : f32
    %247 = vector.broadcast %cst_122 : f32 to vector<256x128xf32>
    %248 = arith.maximumf %246, %247 : vector<256x128xf32>
    %249 = arith.truncf %248 : vector<256x128xf32> to vector<256x128xbf16>
    %c6 = arith.constant 6 : index
    %c0_123 = arith.constant 0 : index
    %c0_124 = arith.constant 0 : index
    %250 = vector.load %arg6[%c6, %c0_123, %c0_124] : memref<8x128x128xbf16, #tpu.memory_space<vmem>>, vector<1x128x128xbf16>
    %251 = vector.shape_cast %250 : vector<1x128x128xbf16> to vector<128x128xbf16>
    %cst_125 = arith.constant dense<0.000000e+00> : vector<256x128xf32>
    %252 = tpu.matmul %249, %251, %cst_125 {dimension_numbers = #tpu.dot_dimension_numbers<[1], [0], [0], [1], [0, 0, 1, 1], [], []>} : vector<256x128xbf16>, vector<128x128xbf16>, vector<256x128xf32> -> vector<256x128xf32>
    %c6_126 = arith.constant 6 : index
    %c0_127 = arith.constant 0 : index
    %c0_128 = arith.constant 0 : index
    %253 = vector.load %arg7[%c6_126, %c0_127, %c0_128] : memref<8x1x128xf32, #tpu.memory_space<vmem>>, vector<1x1x128xf32>
    %254 = vector.shape_cast %253 : vector<1x1x128xf32> to vector<1x128xf32>
    %255 = vector.broadcast %254 : vector<1x128xf32> to vector<256x128xf32>
    %256 = arith.addf %252, %255 : vector<256x128xf32>
    %c6_129 = arith.constant 6 : index
    %c0_130 = arith.constant 0 : index
    %c0_131 = arith.constant 0 : index
    %257 = vector.load %arg8[%c6_129, %c0_130, %c0_131] : memref<8x1x128xf32, #tpu.memory_space<vmem>>, vector<1x1x128xf32>
    %258 = vector.shape_cast %257 : vector<1x1x128xf32> to vector<1x128xf32>
    %c6_132 = arith.constant 6 : index
    %c0_133 = arith.constant 0 : index
    %c0_134 = arith.constant 0 : index
    %259 = vector.load %arg9[%c6_132, %c0_133, %c0_134] : memref<8x1x128xf32, #tpu.memory_space<vmem>>, vector<1x1x128xf32>
    %260 = vector.shape_cast %259 : vector<1x1x128xf32> to vector<1x128xf32>
    %cst_135 = arith.constant dense<0.000000e+00> : vector<256xf32>
    %261 = vector.multi_reduction <add>, %256, %cst_135 [1] : vector<256x128xf32> to vector<256xf32>
    %262 = vector.shape_cast %261 : vector<256xf32> to vector<256x1xf32>
    %cst_136 = arith.constant 1.280000e+02 : f32
    %263 = vector.broadcast %cst_136 : f32 to vector<256x1xf32>
    %264 = arith.divf %262, %263 : vector<256x1xf32>
    %265 = arith.mulf %256, %256 : vector<256x128xf32>
    %cst_137 = arith.constant dense<0.000000e+00> : vector<256xf32>
    %266 = vector.multi_reduction <add>, %265, %cst_137 [1] : vector<256x128xf32> to vector<256xf32>
    %267 = vector.shape_cast %266 : vector<256xf32> to vector<256x1xf32>
    %cst_138 = arith.constant 1.280000e+02 : f32
    %268 = vector.broadcast %cst_138 : f32 to vector<256x1xf32>
    %269 = arith.divf %267, %268 : vector<256x1xf32>
    %270 = arith.mulf %264, %264 : vector<256x1xf32>
    %271 = arith.subf %269, %270 : vector<256x1xf32>
    %272 = vector.broadcast %264 : vector<256x1xf32> to vector<256x128xf32>
    %273 = arith.subf %256, %272 : vector<256x128xf32>
    %cst_139 = arith.constant 9.99999974E-6 : f32
    %274 = vector.broadcast %cst_139 : f32 to vector<256x1xf32>
    %275 = arith.addf %271, %274 : vector<256x1xf32>
    %276 = math.rsqrt %275 : vector<256x1xf32>
    %277 = vector.broadcast %276 : vector<256x1xf32> to vector<256x128xf32>
    %278 = arith.mulf %273, %277 : vector<256x128xf32>
    %279 = vector.broadcast %258 : vector<1x128xf32> to vector<256x128xf32>
    %280 = arith.mulf %278, %279 : vector<256x128xf32>
    %281 = vector.broadcast %260 : vector<1x128xf32> to vector<256x128xf32>
    %282 = arith.addf %280, %281 : vector<256x128xf32>
    %cst_140 = arith.constant 0.000000e+00 : f32
    %283 = vector.broadcast %cst_140 : f32 to vector<256x128xf32>
    %284 = arith.maximumf %282, %283 : vector<256x128xf32>
    %285 = arith.truncf %284 : vector<256x128xf32> to vector<256x128xbf16>
    %c7 = arith.constant 7 : index
    %c0_141 = arith.constant 0 : index
    %c0_142 = arith.constant 0 : index
    %286 = vector.load %arg6[%c7, %c0_141, %c0_142] : memref<8x128x128xbf16, #tpu.memory_space<vmem>>, vector<1x128x128xbf16>
    %287 = vector.shape_cast %286 : vector<1x128x128xbf16> to vector<128x128xbf16>
    %cst_143 = arith.constant dense<0.000000e+00> : vector<256x128xf32>
    %288 = tpu.matmul %285, %287, %cst_143 {dimension_numbers = #tpu.dot_dimension_numbers<[1], [0], [0], [1], [0, 0, 1, 1], [], []>} : vector<256x128xbf16>, vector<128x128xbf16>, vector<256x128xf32> -> vector<256x128xf32>
    %c7_144 = arith.constant 7 : index
    %c0_145 = arith.constant 0 : index
    %c0_146 = arith.constant 0 : index
    %289 = vector.load %arg7[%c7_144, %c0_145, %c0_146] : memref<8x1x128xf32, #tpu.memory_space<vmem>>, vector<1x1x128xf32>
    %290 = vector.shape_cast %289 : vector<1x1x128xf32> to vector<1x128xf32>
    %291 = vector.broadcast %290 : vector<1x128xf32> to vector<256x128xf32>
    %292 = arith.addf %288, %291 : vector<256x128xf32>
    %c7_147 = arith.constant 7 : index
    %c0_148 = arith.constant 0 : index
    %c0_149 = arith.constant 0 : index
    %293 = vector.load %arg8[%c7_147, %c0_148, %c0_149] : memref<8x1x128xf32, #tpu.memory_space<vmem>>, vector<1x1x128xf32>
    %294 = vector.shape_cast %293 : vector<1x1x128xf32> to vector<1x128xf32>
    %c7_150 = arith.constant 7 : index
    %c0_151 = arith.constant 0 : index
    %c0_152 = arith.constant 0 : index
    %295 = vector.load %arg9[%c7_150, %c0_151, %c0_152] : memref<8x1x128xf32, #tpu.memory_space<vmem>>, vector<1x1x128xf32>
    %296 = vector.shape_cast %295 : vector<1x1x128xf32> to vector<1x128xf32>
    %cst_153 = arith.constant dense<0.000000e+00> : vector<256xf32>
    %297 = vector.multi_reduction <add>, %292, %cst_153 [1] : vector<256x128xf32> to vector<256xf32>
    %298 = vector.shape_cast %297 : vector<256xf32> to vector<256x1xf32>
    %cst_154 = arith.constant 1.280000e+02 : f32
    %299 = vector.broadcast %cst_154 : f32 to vector<256x1xf32>
    %300 = arith.divf %298, %299 : vector<256x1xf32>
    %301 = arith.mulf %292, %292 : vector<256x128xf32>
    %cst_155 = arith.constant dense<0.000000e+00> : vector<256xf32>
    %302 = vector.multi_reduction <add>, %301, %cst_155 [1] : vector<256x128xf32> to vector<256xf32>
    %303 = vector.shape_cast %302 : vector<256xf32> to vector<256x1xf32>
    %cst_156 = arith.constant 1.280000e+02 : f32
    %304 = vector.broadcast %cst_156 : f32 to vector<256x1xf32>
    %305 = arith.divf %303, %304 : vector<256x1xf32>
    %306 = arith.mulf %300, %300 : vector<256x1xf32>
    %307 = arith.subf %305, %306 : vector<256x1xf32>
    %308 = vector.broadcast %300 : vector<256x1xf32> to vector<256x128xf32>
    %309 = arith.subf %292, %308 : vector<256x128xf32>
    %cst_157 = arith.constant 9.99999974E-6 : f32
    %310 = vector.broadcast %cst_157 : f32 to vector<256x1xf32>
    %311 = arith.addf %307, %310 : vector<256x1xf32>
    %312 = math.rsqrt %311 : vector<256x1xf32>
    %313 = vector.broadcast %312 : vector<256x1xf32> to vector<256x128xf32>
    %314 = arith.mulf %309, %313 : vector<256x128xf32>
    %315 = vector.broadcast %294 : vector<1x128xf32> to vector<256x128xf32>
    %316 = arith.mulf %314, %315 : vector<256x128xf32>
    %317 = vector.broadcast %296 : vector<1x128xf32> to vector<256x128xf32>
    %318 = arith.addf %316, %317 : vector<256x128xf32>
    %319 = arith.addf %318, %248 : vector<256x128xf32>
    %cst_158 = arith.constant 0.000000e+00 : f32
    %320 = vector.broadcast %cst_158 : f32 to vector<256x128xf32>
    %321 = arith.maximumf %319, %320 : vector<256x128xf32>
    %322 = tpu.transpose %321, [1, 0] : vector<256x128xf32> -> vector<128x256xf32>
    %c0_159 = arith.constant 0 : index
    %c0_160 = arith.constant 0 : index
    %323 = vector.load %arg10[%c0_159, %c0_160] : memref<128x1xf32, #tpu.memory_space<vmem>>, vector<128x1xf32>
    %324 = vector.broadcast %323 : vector<128x1xf32> to vector<128x256xf32>
    %325 = arith.mulf %322, %324 : vector<128x256xf32>
    %cst_161 = arith.constant dense<0.000000e+00> : vector<256xf32>
    %326 = vector.multi_reduction <add>, %325, %cst_161 [0] : vector<128x256xf32> to vector<256xf32>
    %327 = vector.shape_cast %326 : vector<256xf32> to vector<1x256xf32>
    %c0_162 = arith.constant 0 : index
    %c0_163 = arith.constant 0 : index
    %328 = vector.load %arg11[%c0_162, %c0_163] : memref<1x1xf32, #tpu.memory_space<vmem>>, vector<1x1xf32>
    %329 = vector.broadcast %328 : vector<1x1xf32> to vector<1x256xf32>
    %330 = arith.addf %327, %329 : vector<1x256xf32>
    %c0_164 = arith.constant 0 : index
    %c0_165 = arith.constant 0 : index
    %331 = vector.load %arg12[%c0_164, %c0_165] : memref<1x256xf32, #tpu.memory_space<vmem>>, vector<1x256xf32>
    tpu.vector_store %arg12[%c0_164, %c0_165], %330 {strides = array<i32>} : memref<1x256xf32, #tpu.memory_space<vmem>>, vector<1x256xf32>,
    return
  }
  func.func @transform_0(%arg0: i32) -> (i32, i32) {
    %c0_i32 = arith.constant 0 : i32
    %c0_i32_0 = arith.constant 0 : i32
    return %arg0, %c0_i32 : i32, i32
  }
  func.func @transform_1(%arg0: i32) -> (i32, i32) {
    %c0_i32 = arith.constant 0 : i32
    %c0_i32_0 = arith.constant 0 : i32
    %c0_i32_1 = arith.constant 0 : i32
    return %c0_i32, %c0_i32_0 : i32, i32
  }
  func.func @transform_2(%arg0: i32) -> (i32, i32) {
    %c0_i32 = arith.constant 0 : i32
    %c0_i32_0 = arith.constant 0 : i32
    %c0_i32_1 = arith.constant 0 : i32
    return %c0_i32, %c0_i32_0 : i32, i32
  }
  func.func @transform_3(%arg0: i32) -> (i32, i32) {
    %c0_i32 = arith.constant 0 : i32
    %c0_i32_0 = arith.constant 0 : i32
    %c0_i32_1 = arith.constant 0 : i32
    return %c0_i32, %c0_i32_0 : i32, i32
  }
  func.func @transform_4(%arg0: i32) -> (i32, i32) {
    %c0_i32 = arith.constant 0 : i32
    %c0_i32_0 = arith.constant 0 : i32
    %c0_i32_1 = arith.constant 0 : i32
    return %c0_i32, %c0_i32_0 : i32, i32
  }
  func.func @transform_5(%arg0: i32) -> (i32, i32, i32) {
    %c0_i32 = arith.constant 0 : i32
    %c0_i32_0 = arith.constant 0 : i32
    %c0_i32_1 = arith.constant 0 : i32
    %c0_i32_2 = arith.constant 0 : i32
    return %c0_i32, %c0_i32_0, %c0_i32_1 : i32, i32, i32
  }
  func.func @transform_6(%arg0: i32) -> (i32, i32, i32) {
    %c0_i32 = arith.constant 0 : i32
    %c0_i32_0 = arith.constant 0 : i32
    %c0_i32_1 = arith.constant 0 : i32
    %c0_i32_2 = arith.constant 0 : i32
    return %c0_i32, %c0_i32_0, %c0_i32_1 : i32, i32, i32
  }
  func.func @transform_7(%arg0: i32) -> (i32, i32, i32) {
    %c0_i32 = arith.constant 0 : i32
    %c0_i32_0 = arith.constant 0 : i32
    %c0_i32_1 = arith.constant 0 : i32
    %c0_i32_2 = arith.constant 0 : i32
    return %c0_i32, %c0_i32_0, %c0_i32_1 : i32, i32, i32
  }
  func.func @transform_8(%arg0: i32) -> (i32, i32, i32) {
    %c0_i32 = arith.constant 0 : i32
    %c0_i32_0 = arith.constant 0 : i32
    %c0_i32_1 = arith.constant 0 : i32
    %c0_i32_2 = arith.constant 0 : i32
    return %c0_i32, %c0_i32_0, %c0_i32_1 : i32, i32, i32
  }
  func.func @transform_9(%arg0: i32) -> (i32, i32) {
    %c0_i32 = arith.constant 0 : i32
    %c0_i32_0 = arith.constant 0 : i32
    %c0_i32_1 = arith.constant 0 : i32
    return %c0_i32, %c0_i32_0 : i32, i32
  }
  func.func @transform_10(%arg0: i32) -> (i32, i32) {
    %c0_i32 = arith.constant 0 : i32
    %c0_i32_0 = arith.constant 0 : i32
    %c0_i32_1 = arith.constant 0 : i32
    return %c0_i32, %c0_i32_0 : i32, i32
  }
  func.func @transform_11(%arg0: i32) -> (i32, i32) {
    %c0_i32 = arith.constant 0 : i32
    %c0_i32_0 = arith.constant 0 : i32
    return %c0_i32, %arg0 : i32, i32
  }
}

</mosaic_0001>

<bundles_post_ra>
// kernel: _mlp_forward_impl.1
= control target key start
LH: loop header
LB: loop body
LE: loop exit
PB: predicated region body
PF: predicated region fallthrough
CT: control target
= control target key end

     0   :  { %s14254_s0 = inlined_call_operand.vmem [shape: bf16[256,32], index: 0, kind: input, shape index: {}]   ;;  %s14255_s1 = inlined_call_operand.vmem [shape: bf16[32,128], index: 1, kind: input, shape index: {}]   ;;  %s14256_s2 = inlined_call_operand.vmem [shape: f32[1,128], index: 2, kind: input, shape index: {}]   ;;  %s14257_s3 = inlined_call_operand.vmem [shape: f32[1,128], index: 3, kind: input, shape index: {}]   ;;  %s14258_s4 = inlined_call_operand.vmem [shape: f32[1,128], index: 4, kind: input, shape index: {}]   ;;  %s14259_s5 = inlined_call_operand.vmem [shape: bf16[8,128,128], index: 5, kind: input, shape index: {}]   ;;  %s14260_s6 = inlined_call_operand.vmem [shape: f32[8,1,128], index: 6, kind: input, shape index: {}]   ;;  %s14261_s7 = inlined_call_operand.vmem [shape: f32[8,1,128], index: 7, kind: input, shape index: {}]   ;;  %s14262_s8 = inlined_call_operand.vmem [shape: f32[8,1,128], index: 8, kind: input, shape index: {}]   ;;  %s14263_s9 = inlined_call_operand.vmem [shape: f32[128,1], index: 9, kind: input, shape index: {}]   ;;  %s14264_s10 = inlined_call_operand.<no memory space> [shape: f32[1,1], index: 10, kind: input, shape index: {}]   ;;  %s14265_s11 = inlined_call_operand.hbm [shape: f32[1,256], index: 11, kind: output, shape index: {}]  }
   0x1   :  { %v16_v0 = vstv %s14264_s10 }
   0x2   :  { %17 = vst [vmem:[#allocation2] sm:$0x1] %v16_v0 }
   0x3   :  { %v8410_v1 = vld [vmem:[%s14255_s1] sm:$0xff]   ;;  %v8411_v2 = vld [vmem:[%s14255_s1 + $0x8] sm:$0xff]   ;;  %vm177_vm0 = vcmask 261120   ;;  %v8416_v7 = vld [vmem:[%s14254_s0 + $0x10] sm:$0xff]  }
   0x4   :  { %7981 = vmatprep.subr.bf16.mxu0 %v8410_v1  ;;  %8401 = vmatprep.subr.bf16.mxu1 %v8410_v1  ;;  %v8412_v3 = vld [vmem:[%s14254_s0] sm:$0xff]   ;;  %v8414_v5 = vld [vmem:[%s14254_s0 + $0x8] sm:$0xff]   ;;  %v8418_v8 = vld [vmem:[%s14254_s0 + $0x50] sm:$0xff]  }
   0x5   :  { %7982 = vmatpush3.bf16.msra.mxu0 %v8410_v1  ;;  %8403 = vmatpush3.bf16.msra.mxu1 %v8410_v1  ;;  %v8413_v4 = vld [vmem:[%s14254_s0 + $0x40] sm:$0xff]   ;;  %v8415_v6 = vld [vmem:[%s14254_s0 + $0x48] sm:$0xff]   ;;  %v8417_v9 = vld [vmem:[%s14254_s0 + $0x18] sm:$0xff]  }
   0x6   :  { %7983 = vmatprep.subr.bf16.mxu0 %v8411_v2  ;;  %8402 = vmatprep.subr.bf16.mxu1 %v8411_v2  ;;  %v8419_v10 = vld [vmem:[%s14254_s0 + $0x58] sm:$0xff]   ;;  %v8420_v11 = vld [vmem:[%s14254_s0 + $0x20] sm:$0xff]   ;;  %v8421_v13 = vld [vmem:[%s14254_s0 + $0x28] sm:$0xff]  }
   0x7   :  { %7985 = vmatprep.mubr.msk.bf16.mxu0 %vm177_vm0, %v8412_v3  ;;  %8001 = vmatprep.mubr.msk.bf16.mxu1 %vm177_vm0, %v8413_v4  ;;  %v8424_v12 = vld [vmem:[%s14254_s0 + $0x60] sm:$0xff]   ;;  %v8425_v14 = vld [vmem:[%s14254_s0 + $0x68] sm:$0xff]   ;;  %v8422_v15 = vld [vmem:[%s14254_s0 + $0x30] sm:$0xff]  }
   0x8   :  { %v8426_v16 = vld [vmem:[%s14254_s0 + $0x70] sm:$0xff]   ;;  %v8423_v17 = vld [vmem:[%s14254_s0 + $0x38] sm:$0xff]  }
   0x9   :  { %7984 = vmatpush3.bf16.msra.mxu0 %v8411_v2  ;;  %8404 = vmatpush3.bf16.msra.mxu1 %v8411_v2  ;;  %v8427_v18 = vld [vmem:[%s14254_s0 + $0x78] sm:$0xff]  }
   0xc   :  { %7986 = vmatmul.mubr.msk.bf16.vlgmr.msra.gmra.mrb[0].mxu0 %vm177_vm0, %v8414_v5  ;;  %8002 = vmatmul.mubr.msk.bf16.vlgmr.msra.gmra.mrb[0].mxu1 %vm177_vm0, %v8415_v6 }
   0xd   :  { %7989 = vmatprep.mubr.msk.bf16.mxu0 %vm177_vm0, %v8416_v7  ;;  %8005 = vmatprep.mubr.msk.bf16.mxu1 %vm177_vm0, %v8418_v8 }
  0x14   :  { %7990 = vmatmul.mubr.msk.bf16.gmra.mrb[4].mxu0 %vm177_vm0, %v8417_v9  ;;  %8006 = vmatmul.mubr.msk.bf16.gmra.mrb[4].mxu1 %vm177_vm0, %v8419_v10 }
  0x15   :  { %7993 = vmatprep.mubr.msk.bf16.mxu0 %vm177_vm0, %v8420_v11  ;;  %8009 = vmatprep.mubr.msk.bf16.mxu1 %vm177_vm0, %v8424_v12 }
  0x1c   :  { %7994 = vmatmul.mubr.msk.bf16.gmra.mrb[8].mxu0 %vm177_vm0, %v8421_v13  ;;  %8010 = vmatmul.mubr.msk.bf16.gmra.mrb[8].mxu1 %vm177_vm0, %v8425_v14 }
  0x1d   :  { %7997 = vmatprep.mubr.msk.bf16.mxu0 %vm177_vm0, %v8422_v15  ;;  %8013 = vmatprep.mubr.msk.bf16.mxu1 %vm177_vm0, %v8426_v16 }
  0x24   :  { %7998 = vmatmul.mubr.msk.bf16.gmra.mrb[12].mxu0 %vm177_vm0, %v8423_v17  ;;  %8014 = vmatmul.mubr.msk.bf16.gmra.mrb[12].mxu1 %vm177_vm0, %v8427_v18 }
  0x25   :  { %18 = vsyncpa [#allocation4], 0  ;;  %v9231_v19 = vld [vmem:[%s14256_s2] ss:$0 sm:$0xff] }
  0xdf   :  { %v7987_v20 = vpop.f32.mrb[0].mxu0  ;;  %v8003_v21 = vpop.f32.mrb[0].mxu1 }
  0xe0   :  { %v9234_v22 = vadd.f32 %v7987_v20, %v9231_v19  ;;  %v9237_v23 = vadd.f32 %v8003_v21, %v9231_v19  ;;  %v260_v24 = vpop.f32.mrb[1].mxu0  ;;  %v324_v25 = vpop.f32.mrb[1].mxu1  ;;  %v8428_v21 = vld [vmem:[%s14259_s5] sm:$0xff]  }
  0xe1   :  { %v7988_v26 = vpop.f32.mrb[2].mxu0  ;;  %v8004_v27 = vpop.f32.mrb[2].mxu1  ;;  %v9242_v30 = vadd.f32 %v9231_v19, %v260_v24  ;;  %v9252_v34 = vadd.f32 %v9231_v19, %v324_v25  ;;  %8017 = vmatprep.subr.bf16.mxu1 %v8428_v21 }
  0xe2   :  { %425 = vadd.xlane.f32.xlu0 %v9237_v23  ;;  %v327_v28 = vpop.f32.mrb[3].mxu1  ;;  %393 = vadd.xlane.f32.xlu1 %v9234_v22  ;;  %v263_v29 = vpop.f32.mrb[3].mxu0  ;;  %v9245_v31 = vadd.f32 %v7988_v26, %v9231_v19  ;;  %v9255_v35 = vadd.f32 %v8004_v27, %v9231_v19  ;;  %v488_v43 = vmul.f32 %v9234_v22, %v9234_v22  ;;  %v8429_v26 = vld [vmem:[%s14259_s5 + $0x8] sm:$0xff]  }
  0xe3   :  { %v9268_v42 = vadd.f32 %v9231_v19, %v327_v28  ;;  %v504_v47 = vmul.f32 %v9237_v23, %v9237_v23  ;;  %v9300_v60 = vadd.f32 %v9231_v19, %v263_v29  ;;  %v486_v1 = vmul.f32 %v9242_v30, %v9242_v30  ;;  %8018 = vmatpush3.bf16.msra.mxu1 %v8428_v21  ;;  %v8430_v29 = vld [vmem:[%s14259_s5 + $0x10] sm:$0xff]  }
  0xe4   :  { %v489_v46 = vmul.f32 %v9245_v31, %v9245_v31  ;;  %v505_v61 = vmul.f32 %v9255_v35, %v9255_v35  ;;  %v502_v17 = vmul.f32 %v9252_v34, %v9252_v34  ;;  %8019 = vmatprep.subr.bf16.mxu1 %v8429_v26 }
  0xe5   :  { %v487_v0 = vmul.f32 %v9300_v60, %v9300_v60  ;;  %v503_v16 = vmul.f32 %v9268_v42, %v9268_v42 }
  0xe6   :  { %395 = vadd.xlane.f32.xlu1 %v9245_v31  ;;  %389 = vadd.xlane.f32.xlu0 %v9242_v30 }
  0xe7   :  { %v7991_v32 = vpop.f32.mrb[4].mxu0  ;;  %v9249_v33 = vpop.f32.mrb[4].mxu1  ;;  %8020 = vmatpush3.bf16.msra.mxu1 %v8429_v26 }
  0xe8   :  { %v9257_v36 = vpop.f32.mrb[5].mxu0  ;;  %v9259_v37 = vpop.f32.mrb[5].mxu1  ;;  %v9338_v18 = vadd.f32 %v7991_v32, %v9231_v19  ;;  %v9350_v24 = vadd.f32 %v9249_v33, %v9231_v19  ;;  %8021 = vmatprep.subr.bf16.mxu1 %v8430_v29 }
  0xe9   :  { %v7992_v38 = vpop.f32.mrb[6].mxu0  ;;  %v8008_v39 = vpop.f32.mrb[6].mxu1  ;;  %v9362_v27 = vadd.f32 %v9231_v19, %v9257_v36  ;;  %v9375_v32 = vadd.f32 %v9231_v19, %v9259_v37  ;;  %v8431_v36 = vld [vmem:[%s14259_s5 + $0x18] sm:$0xff]  }
  0xea   :  { %427 = vadd.xlane.f32.xlu1 %v9255_v35  ;;  %421 = vadd.xlane.f32.xlu0 %v9252_v34  ;;  %v9263_v40 = vpop.f32.mrb[7].mxu0  ;;  %v9265_v41 = vpop.f32.mrb[7].mxu1  ;;  %v9341_v20 = vadd.f32 %v7992_v38, %v9231_v19  ;;  %v9353_v25 = vadd.f32 %v8008_v39, %v9231_v19  ;;  %v492_v37 = vmul.f32 %v9338_v18, %v9338_v18  ;;  %v8432_v39 = vld [vmem:[%s14259_s5 + $0x20] sm:$0xff]  }
  0xeb   :  { %v9366_v28 = vadd.f32 %v9231_v19, %v9263_v40  ;;  %v9379_v33 = vadd.f32 %v9231_v19, %v9265_v41  ;;  %8022 = vmatpush3.bf16.msra.mxu1 %v8430_v29  ;;  %v490_v41 = vmul.f32 %v9362_v27, %v9362_v27 }
  0xec   :  { %8023 = vmatprep.subr.bf16.mxu1 %v8431_v36  ;;  %v493_v38 = vmul.f32 %v9341_v20, %v9341_v20 }
  0xed   :  { %v491_v40 = vmul.f32 %v9366_v28, %v9366_v28 }
  0xee   :  { %423 = vadd.xlane.f32.xlu1 %v9268_v42  ;;  %522 = vadd.xlane.f32.xlu0 %v488_v43  ;;  %v8433_v43 = vld [vmem:[%s14259_s5 + $0x28] sm:$0xff]  }
  0xef   :  { %v9273_v44 = vpop.f32.mrb[8].mxu0  ;;  %v8011_v45 = vpop.f32.mrb[8].mxu1  ;;  %8024 = vmatpush3.bf16.msra.mxu1 %v8431_v36 }
  0xf0   :  { %v292_v48 = vpop.f32.mrb[9].mxu0  ;;  %v9280_v49 = vadd.f32 %v8011_v45, %v9231_v19  ;;  %v356_v50 = vpop.f32.mrb[9].mxu1  ;;  %8025 = vmatprep.subr.bf16.mxu1 %v8432_v39  ;;  %v507_v45 = vmul.f32 %v9379_v33, %v9379_v33 }
  0xf1   :  { %v9283_v51 = vadd.f32 %v9231_v19, %v292_v48  ;;  %v9285_v52 = vpop.f32.mrb[10].mxu0  ;;  %v9288_v53 = vadd.f32 %v9231_v19, %v356_v50  ;;  %v8012_v54 = vpop.f32.mrb[10].mxu1  ;;  %v9409_v48 = vadd.f32 %v9273_v44, %v9231_v19 }
  0xf2   :  { %14491 = vst [vmem:[#allocation6_spill] sm:$0xff] %v9280_v49  ;;  %524 = vadd.xlane.f32.xlu1 %v489_v46  ;;  %554 = vadd.xlane.f32.xlu0 %v504_v47  ;;  %v295_v55 = vpop.f32.mrb[11].mxu0  ;;  %v9291_v56 = vadd.f32 %v8012_v54, %v9231_v19  ;;  %v359_v57 = vpop.f32.mrb[11].mxu1  ;;  %v506_v46 = vmul.f32 %v9375_v32, %v9375_v32  ;;  %v8434_v47 = vld [vmem:[%s14259_s5 + $0x30] sm:$0xff]   ;;  %v8435_v54 = vld [vmem:[%s14259_s5 + $0x38] sm:$0xff]  }
  0xf3   :  { %v9294_v58 = vadd.f32 %v9231_v19, %v295_v55  ;;  %v9297_v59 = vadd.f32 %v9231_v19, %v359_v57  ;;  %8026 = vmatpush3.bf16.msra.mxu1 %v8432_v39  ;;  %v9413_v50 = vadd.f32 %v9285_v52, %v9231_v19  ;;  %v494_v55 = vmul.f32 %v9283_v51, %v9283_v51 }
  0xf4   :  { %14492 = vst [vmem:[#allocation7_spill] sm:$0xff] %v9291_v56  ;;  %8027 = vmatprep.subr.bf16.mxu1 %v8433_v43 }
  0xf5   :  { %v497_v44 = vmul.f32 %v9413_v50, %v9413_v50  ;;  %v495_v52 = vmul.f32 %v9294_v58, %v9294_v58 }
  0xf6   :  { %556 = vadd.xlane.f32.xlu1 %v505_v61  ;;  %391 = vadd.xlane.f32.xlu0 %v9300_v60 }
  0xf7   :  { %v7999_v62 = vpop.f32.mrb[12].mxu0  ;;  %v8015_v63 = vpop.f32.mrb[12].mxu1  ;;  %8028 = vmatpush3.bf16.msra.mxu1 %v8433_v43 }
  0xf8   :  { %v9310_v2 = vadd.f32 %v7999_v62, %v9231_v19  ;;  %v308_v3 = vpop.f32.mrb[13].mxu0  ;;  %v9313_v4 = vadd.f32 %v8015_v63, %v9231_v19  ;;  %v372_v5 = vpop.f32.mrb[13].mxu1  ;;  %8029 = vmatprep.subr.bf16.mxu1 %v8434_v47 }
  0xf9   :  { %v9316_v6 = vadd.f32 %v9231_v19, %v308_v3  ;;  %v8000_v7 = vpop.f32.mrb[14].mxu0  ;;  %v9319_v8 = vadd.f32 %v9231_v19, %v372_v5  ;;  %v8016_v9 = vpop.f32.mrb[14].mxu1  ;;  %v511_v3 = vmul.f32 %v9297_v59, %v9297_v59  ;;  %v510_v5 = vmul.f32 %v9288_v53, %v9288_v53 }
  0xfa   :  { %14493 = vst [vmem:[#allocation8_spill] sm:$0xff] %v9313_v4  ;;  %520 = vadd.xlane.f32.xlu1 %v487_v0  ;;  %518 = vadd.xlane.f32.xlu0 %v486_v1  ;;  %v9322_v10 = vadd.f32 %v8000_v7, %v9231_v19  ;;  %v311_v11 = vpop.f32.mrb[15].mxu0  ;;  %v9325_v12 = vadd.f32 %v8016_v9, %v9231_v19  ;;  %v375_v13 = vpop.f32.mrb[15].mxu1 }
  0xfb   :  { %14494 = vst [vmem:[#allocation9_spill] sm:$0xff] %v9319_v8  ;;  %v9328_v14 = vadd.f32 %v9231_v19, %v311_v11  ;;  %v9331_v15 = vadd.f32 %v9231_v19, %v375_v13  ;;  %8030 = vmatpush3.bf16.msra.mxu1 %v8434_v47  ;;  %v496_v19 = vmul.f32 %v9409_v48, %v9409_v48 }
  0xfc   :  { %14495 = vst [vmem:[#allocation10_spill] sm:$0xff] %v9325_v12  ;;  %8031 = vmatprep.subr.bf16.mxu1 %v8435_v54  ;;  %v501_v57 = vmul.f32 %v9322_v10, %v9322_v10  ;;  %v500_v61 = vmul.f32 %v9310_v2, %v9310_v2  ;;  %v498_v63 = vmul.f32 %v9316_v6, %v9316_v6 }
  0xfd   :  { %14496 = vst [vmem:[#allocation11_spill] sm:$0xff] %v9331_v15  ;;  %v499_v62 = vmul.f32 %v9328_v14, %v9328_v14  ;;  %v509_v0 = vmul.f32 %v9353_v25, %v9353_v25  ;;  %v508_v1 = vmul.f32 %v9350_v24, %v9350_v24  ;;  %v513_v7 = vmul.f32 %v9291_v56, %v9291_v56 }
  0xfe   :  { %552 = vadd.xlane.f32.xlu1 %v503_v16  ;;  %550 = vadd.xlane.f32.xlu0 %v502_v17  ;;  %v512_v9 = vmul.f32 %v9280_v49, %v9280_v49  ;;  %v515_v11 = vmul.f32 %v9331_v15, %v9331_v15  ;;  %v514_v13 = vmul.f32 %v9319_v8, %v9319_v8 }
  0xff   :  { %8032 = vmatpush3.bf16.msra.mxu1 %v8435_v54  ;;  %v517_v16 = vmul.f32 %v9325_v12, %v9325_v12  ;;  %v516_v17 = vmul.f32 %v9313_v4, %v9313_v4 }
 0x102   :  { %403 = vadd.xlane.f32.xlu1 %v9341_v20  ;;  %401 = vadd.xlane.f32.xlu0 %v9338_v18 }
 0x106   :  { %435 = vadd.xlane.f32.xlu1 %v9353_v25  ;;  %433 = vadd.xlane.f32.xlu0 %v9350_v24 }
 0x10a   :  { %399 = vadd.xlane.f32.xlu1 %v9366_v28  ;;  %397 = vadd.xlane.f32.xlu0 %v9362_v27 }
 0x10e   :  { %431 = vadd.xlane.f32.xlu1 %v9379_v33  ;;  %429 = vadd.xlane.f32.xlu0 %v9375_v32 }
 0x112   :  { %532 = vadd.xlane.f32.xlu1 %v493_v38  ;;  %530 = vadd.xlane.f32.xlu0 %v492_v37 }
 0x116   :  { %528 = vadd.xlane.f32.xlu1 %v491_v40  ;;  %526 = vadd.xlane.f32.xlu0 %v490_v41 }
 0x11a   :  { %560 = vadd.xlane.f32.xlu1 %v507_v45  ;;  %558 = vadd.xlane.f32.xlu0 %v506_v46 }
 0x11e   :  { %411 = vadd.xlane.f32.xlu1 %v9413_v50  ;;  %409 = vadd.xlane.f32.xlu0 %v9409_v48 }
 0x122   :  { %407 = vadd.xlane.f32.xlu1 %v9294_v58  ;;  %405 = vadd.xlane.f32.xlu0 %v9283_v51 }
 0x126   :  { %540 = vadd.xlane.f32.xlu1 %v497_v44  ;;  %538 = vadd.xlane.f32.xlu0 %v496_v19 }
 0x12a   :  { %536 = vadd.xlane.f32.xlu1 %v495_v52  ;;  %534 = vadd.xlane.f32.xlu0 %v494_v55 }
 0x12e   :  { %419 = vadd.xlane.f32.xlu1 %v9322_v10  ;;  %417 = vadd.xlane.f32.xlu0 %v9310_v2 }
 0x132   :  { %415 = vadd.xlane.f32.xlu1 %v9328_v14  ;;  %413 = vadd.xlane.f32.xlu0 %v9316_v6 }
 0x136   :  { %548 = vadd.xlane.f32.xlu1 %v501_v57  ;;  %546 = vadd.xlane.f32.xlu0 %v500_v61 }
 0x13a   :  { %544 = vadd.xlane.f32.xlu1 %v499_v62  ;;  %542 = vadd.xlane.f32.xlu0 %v498_v63 }
 0x13e   :  { %564 = vadd.xlane.f32.xlu1 %v509_v0  ;;  %562 = vadd.xlane.f32.xlu0 %v508_v1 }
 0x142   :  { %439 = vadd.xlane.f32.xlu1 %v9297_v59  ;;  %437 = vadd.xlane.f32.xlu0 %v9288_v53 }
 0x146   :  { %443 = vadd.xlane.f32.xlu1 %v9291_v56  ;;  %441 = vadd.xlane.f32.xlu0 %v9280_v49 }
 0x14a   :  { %568 = vadd.xlane.f32.xlu1 %v511_v3  ;;  %566 = vadd.xlane.f32.xlu0 %v510_v5 }
 0x14e   :  { %572 = vadd.xlane.f32.xlu1 %v513_v7  ;;  %570 = vadd.xlane.f32.xlu0 %v512_v9 }
 0x152   :  { %447 = vadd.xlane.f32.xlu1 %v9331_v15  ;;  %445 = vadd.xlane.f32.xlu0 %v9319_v8 }
 0x156   :  { %451 = vadd.xlane.f32.xlu1 %v9325_v12  ;;  %449 = vadd.xlane.f32.xlu0 %v9313_v4 }
 0x15a   :  { %576 = vadd.xlane.f32.xlu1 %v515_v11  ;;  %574 = vadd.xlane.f32.xlu0 %v514_v13 }
 0x15e   :  { %580 = vadd.xlane.f32.xlu1 %v517_v16  ;;  %578 = vadd.xlane.f32.xlu0 %v516_v17 }
 0x16f   :  { %v9470_v21 = vpop.xlane.xlu0 %425  ;;  %v394_v26 = vpop.xlane.xlu1 %393 }
 0x170   :  { %v456_v41 = vmul.f32 0.0078125, %v394_v26 }
 0x172   :  { %v616_v54 = vmul.f32 %v456_v41, %v456_v41 }
 0x173   :  { %v396_v29 = vpop.xlane.xlu1 %395  ;;  %v390_v36 = vpop.xlane.xlu0 %389 }
 0x174   :  { %v457_v43 = vmul.f32 0.0078125, %v396_v29  ;;  %v454_v62 = vmul.f32 0.0078125, %v390_v36 }
 0x176   :  { %v617_v44 = vmul.f32 %v457_v43, %v457_v43  ;;  %v614_v7 = vmul.f32 %v454_v62, %v454_v62 }
 0x177   :  { %v9472_v38 = vpop.xlane.xlu1 %427  ;;  %v9474_v37 = vpop.xlane.xlu0 %421 }
 0x17b   :  { %v9476_v39 = vpop.xlane.xlu1 %423  ;;  %v523_v40 = vpop.xlane.xlu0 %522 }
 0x17c   :  { %v584_v45 = vmul.f32 0.0078125, %v523_v40 }
 0x17e   :  { %v648_v52 = vsub.f32 %v584_v45, %v616_v54 }
 0x17f   :  { %v525_v46 = vpop.xlane.xlu1 %524  ;;  %v9478_v47 = vpop.xlane.xlu0 %554 }
 0x180   :  { %v585_v19 = vmul.f32 0.0078125, %v525_v46  ;;  %v712_v1 = vadd.f32 1e-05, %v648_v52 }
 0x182   :  { %v649_v55 = vsub.f32 %v585_v19, %v617_v44 }
 0x183   :  { %v9480_v57 = vpop.xlane.xlu1 %556  ;;  %v392_v61 = vpop.xlane.xlu0 %391 }
 0x184   :  { %v455_v63 = vmul.f32 0.0078125, %v392_v61  ;;  %v713_v0 = vadd.f32 1e-05, %v649_v55  ;;  %v681_v55 = vsub.f32 %v9245_v31, %v457_v43  ;;  %v680_v61 = vsub.f32 %v9234_v22, %v456_v41 }
 0x186   :  { %v615_v9 = vmul.f32 %v455_v63, %v455_v63  ;;  %8492 = vrsqrt.f32 %v713_v0 }
 0x187   :  { %v521_v3 = vpop.xlane.xlu1 %520  ;;  %v519_v5 = vpop.xlane.xlu0 %518  ;;  %8494 = vrsqrt.f32 %v712_v1 }
 0x188   :  { %v583_v11 = vmul.f32 0.0078125, %v521_v3  ;;  %v582_v13 = vmul.f32 0.0078125, %v519_v5  ;;  %v679_v3 = vsub.f32 %v9300_v60, %v455_v63 }
 0x18a   :  { %v647_v16 = vsub.f32 %v583_v11, %v615_v9  ;;  %v646_v17 = vsub.f32 %v582_v13, %v614_v7  ;;  %v9496_v11 = vld [vmem:[%s14257_s3] ss:$0 sm:$0xff] }
 0x18b   :  { %v9482_v26 = vpop.xlane.xlu1 %552  ;;  %v9484_v29 = vpop.xlane.xlu0 %550 }
 0x18c   :  { %v711_v40 = vadd.f32 1e-05, %v647_v16  ;;  %v710_v45 = vadd.f32 1e-05, %v646_v17  ;;  %v678_v16 = vsub.f32 %v9242_v30, %v454_v62 }
 0x18e   :  { %8496 = vrsqrt.f32 %v711_v40 }
 0x18f   :  { %8498 = vrsqrt.f32 %v710_v45  ;;  %v404_v36 = vpop.xlane.xlu1 %403  ;;  %v402_v46 = vpop.xlane.xlu0 %401 }
 0x190   :  { %v8493_v54 = vpop.eup %8492  ;;  %v461_v40 = vmul.f32 0.0078125, %v404_v36  ;;  %v9506_v45 = vmul.f32 0.0078125, %v402_v46 }
 0x191   :  { %v8495_v52 = vpop.eup %8494  ;;  %v777_v0 = vmul.f32 %v8493_v54, %v681_v55  ;;  %v9511_v54 = vld [vmem:[%s14258_s4] ss:$0 sm:$0xff] }
 0x192   :  { %v776_v1 = vmul.f32 %v8495_v52, %v680_v61 }
 0x193   :  { %v9486_v44 = vpop.xlane.xlu1 %435  ;;  %v9488_v19 = vpop.xlane.xlu0 %433  ;;  %v815_v31 = vmul.f32 %v9496_v11, %v777_v0 }
 0x194   :  { %v814_v63 = vmul.f32 %v9496_v11, %v776_v1 }
 0x195   :  { %v9518_v52 = vadd.f32 %v9511_v54, %v815_v31 }
 0x196   :  { %v9528_v1 = vadd.f32 %v9511_v54, %v814_v63 }
 0x197   :  { %v400_v5 = vpop.xlane.xlu1 %399  ;;  %v398_v7 = vpop.xlane.xlu0 %397  ;;  %14498 = vst [vmem:[#allocation13_spill] sm:$0xff] %v9518_v52 }
 0x198   :  { %v8497_v9 = vpop.eup %8496  ;;  %v9520_v55 = vmul.f32 0.0078125, %v400_v5  ;;  %v9522_v61 = vmul.f32 0.0078125, %v398_v7  ;;  %14500 = vst [vmem:[#allocation15_spill] sm:$0xff] %v9528_v1  ;;  %v883_v31 = vpack.c.bf16 %v9518_v52, %v9528_v1 }
 0x199   :  { %v8499_v13 = vpop.eup %8498  ;;  %v775_v17 = vmul.f32 %v8497_v9, %v679_v3  ;;  %v621_v3 = vmul.f32 %v461_v40, %v461_v40  ;;  %v620_v9 = vmul.f32 %v9506_v45, %v9506_v45 }
 0x19a   :  { %v774_v41 = vmul.f32 %v8499_v13, %v678_v16 }
 0x19b   :  { %v9500_v43 = vpop.xlane.xlu1 %431  ;;  %v9502_v22 = vpop.xlane.xlu0 %429  ;;  %v813_v60 = vmul.f32 %v9496_v11, %v775_v17 }
 0x19c   :  { %v812_v30 = vmul.f32 %v9496_v11, %v774_v41  ;;  %v619_v41 = vmul.f32 %v9520_v55, %v9520_v55 }
 0x19d   :  { %v9515_v62 = vadd.f32 %v9511_v54, %v813_v60  ;;  %v618_v60 = vmul.f32 %v9522_v61, %v9522_v61 }
 0x19e   :  { %v9525_v0 = vadd.f32 %v9511_v54, %v812_v30 }
 0x19f   :  { %14497 = vst [vmem:[#allocation12_spill] sm:$0xff] %v9515_v62  ;;  %v533_v36 = vpop.xlane.xlu1 %532  ;;  %v531_v46 = vpop.xlane.xlu0 %530 }
 0x1a0   :  { %14499 = vst [vmem:[#allocation14_spill] sm:$0xff] %v9525_v0  ;;  %v589_v13 = vmul.f32 0.0078125, %v533_v36  ;;  %v588_v16 = vmul.f32 0.0078125, %v531_v46  ;;  %v882_v5 = vpack.c.bf16 %v9515_v62, %v9525_v0  ;;  %v9545_v62 = vmul.f32 0.0078125, %v9470_v21 }
 0x1a1   :  { %v600_v0 = vmul.f32 0.0078125, %v9478_v47  ;;  %v9557_v21 = vmul.f32 0.0078125, %v9476_v39  ;;  %v601_v39 = vmul.f32 0.0078125, %v9480_v57 }
 0x1a2   :  { %v653_v17 = vsub.f32 %v589_v13, %v621_v3  ;;  %v652_v7 = vsub.f32 %v588_v16, %v620_v9  ;;  %8033 = vmatprep.mubr.bf16.mxu1 %v882_v5 }
 0x1a3   :  { %v529_v63 = vpop.xlane.xlu1 %528  ;;  %v527_v30 = vpop.xlane.xlu0 %526  ;;  %8034 = vmatmul.mubr.bf16.vlgmr.msra.gmra.mrb[16].mxu1 %v883_v31  ;;  %v9554_v31 = vmul.f32 0.0078125, %v9474_v37 }
 0x1a4   :  { %v717_v4 = vadd.f32 1e-05, %v653_v17  ;;  %v716_v36 = vadd.f32 1e-05, %v652_v7  ;;  %v587_v46 = vmul.f32 0.0078125, %v529_v63  ;;  %v586_v12 = vmul.f32 0.0078125, %v527_v30 }
 0x1a5   :  { %v630_v37 = vmul.f32 %v9554_v31, %v9554_v31 }
 0x1a6   :  { %8500 = vrsqrt.f32 %v717_v4  ;;  %v651_v3 = vsub.f32 %v587_v46, %v619_v41  ;;  %v650_v9 = vsub.f32 %v586_v12, %v618_v60  ;;  %v632_v4 = vmul.f32 %v9545_v62, %v9545_v62 }
 0x1a7   :  { %8502 = vrsqrt.f32 %v716_v36  ;;  %v9540_v13 = vpop.xlane.xlu1 %560  ;;  %v9542_v16 = vpop.xlane.xlu0 %558  ;;  %v9551_v12 = vmul.f32 0.0078125, %v9472_v38  ;;  %v685_v60 = vsub.f32 %v9341_v20, %v461_v40  ;;  %v631_v40 = vmul.f32 %v9557_v21, %v9557_v21 }
 0x1a8   :  { %v715_v1 = vadd.f32 1e-05, %v651_v3  ;;  %v714_v5 = vadd.f32 1e-05, %v650_v9  ;;  %v664_v41 = vsub.f32 %v600_v0, %v632_v4  ;;  %v684_v0 = vsub.f32 %v9338_v18, %v9506_v45 }
 0x1a9   :  { %v633_v30 = vmul.f32 %v9551_v12, %v9551_v12  ;;  %v599_v9 = vmul.f32 0.0078125, %v9482_v26 }
 0x1aa   :  { %8504 = vrsqrt.f32 %v715_v1  ;;  %v728_v3 = vadd.f32 1e-05, %v664_v41 }
 0x1ab   :  { %8506 = vrsqrt.f32 %v714_v5  ;;  %v412_v17 = vpop.xlane.xlu1 %411  ;;  %v410_v7 = vpop.xlane.xlu0 %409  ;;  %v683_v5 = vsub.f32 %v9366_v28, %v9520_v55  ;;  %v665_v55 = vsub.f32 %v601_v39, %v633_v30 }
 0x1ac   :  { %v9562_v36 = vmul.f32 0.0078125, %v412_v17  ;;  %v9564_v46 = vmul.f32 0.0078125, %v410_v7  ;;  %v682_v17 = vsub.f32 %v9362_v27, %v9522_v61  ;;  %v598_v27 = vmul.f32 0.0078125, %v9484_v29 }
 0x1ae   :  { %v624_v26 = vmul.f32 %v9564_v46, %v9564_v46 }
 0x1af   :  { %v408_v47 = vpop.xlane.xlu1 %407  ;;  %v406_v1 = vpop.xlane.xlu0 %405 }
 0x1b0   :  { %v8501_v63 = vpop.eup %8500  ;;  %v9578_v7 = vmul.f32 0.0078125, %v408_v47  ;;  %v9580_v4 = vmul.f32 0.0078125, %v406_v1 }
 0x1b1   :  { %v8503_v38 = vpop.eup %8502  ;;  %v781_v20 = vmul.f32 %v8501_v63, %v685_v60  ;;  %v625_v60 = vmul.f32 %v9562_v36, %v9562_v36 }
 0x1b2   :  { %v780_v18 = vmul.f32 %v8503_v38, %v684_v0  ;;  %v663_v0 = vsub.f32 %v599_v9, %v631_v40  ;;  %v623_v49 = vmul.f32 %v9578_v7, %v9578_v7 }
 0x1b3   :  { %v541_v57 = vpop.xlane.xlu1 %540  ;;  %v539_v52 = vpop.xlane.xlu0 %538  ;;  %v819_v47 = vmul.f32 %v9496_v11, %v781_v20 }
 0x1b4   :  { %v8505_v45 = vpop.eup %8504  ;;  %v593_v41 = vmul.f32 0.0078125, %v541_v57  ;;  %v592_v63 = vmul.f32 0.0078125, %v539_v52  ;;  %v818_v38 = vmul.f32 %v9496_v11, %v780_v18  ;;  %v622_v57 = vmul.f32 %v9580_v4, %v9580_v4 }
 0x1b5   :  { %v8507_v28 = vpop.eup %8506  ;;  %v779_v61 = vmul.f32 %v8505_v45, %v683_v5  ;;  %v662_v45 = vsub.f32 %v598_v27, %v630_v37  ;;  %v9599_v40 = vadd.f32 %v9511_v54, %v819_v47  ;;  %v729_v37 = vadd.f32 1e-05, %v665_v55 }
 0x1b6   :  { %v657_v1 = vsub.f32 %v593_v41, %v625_v60  ;;  %v656_v8 = vsub.f32 %v592_v63, %v624_v26  ;;  %v778_v15 = vmul.f32 %v8507_v28, %v682_v17  ;;  %v9602_v26 = vadd.f32 %v9511_v54, %v818_v38 }
 0x1b7   :  { %v537_v52 = vpop.xlane.xlu1 %536  ;;  %v535_v56 = vpop.xlane.xlu0 %534  ;;  %v817_v30 = vmul.f32 %v9496_v11, %v779_v61  ;;  %v727_v28 = vadd.f32 1e-05, %v663_v0  ;;  %v726_v61 = vadd.f32 1e-05, %v662_v45  ;;  %v9619_v0 = vmul.f32 0.0078125, %v9502_v22 }
 0x1b8   :  { %v721_v29 = vadd.f32 1e-05, %v657_v1  ;;  %v720_v39 = vadd.f32 1e-05, %v656_v8  ;;  %v591_v5 = vmul.f32 0.0078125, %v537_v52  ;;  %v590_v20 = vmul.f32 0.0078125, %v535_v56 }
 0x1b9   :  { %v816_v17 = vmul.f32 %v9496_v11, %v778_v15  ;;  %v9596_v18 = vadd.f32 %v9511_v54, %v817_v30  ;;  %v885_v47 = vpack.c.bf16 %v9599_v40, %v9602_v26  ;;  %v603_v52 = vmul.f32 0.0078125, %v9540_v13 }
 0x1ba   :  { %8508 = vrsqrt.f32 %v721_v29  ;;  %v655_v9 = vsub.f32 %v591_v5, %v623_v49  ;;  %v654_v60 = vsub.f32 %v590_v20, %v622_v57  ;;  %v9610_v49 = vmul.f32 0.0078125, %v9500_v43 }
 0x1bb   :  { %8510 = vrsqrt.f32 %v720_v39  ;;  %v420_v41 = vpop.xlane.xlu1 %419  ;;  %v418_v8 = vpop.xlane.xlu0 %417  ;;  %v9605_v56 = vadd.f32 %v9511_v54, %v816_v17  ;;  %v9622_v43 = vmul.f32 0.0078125, %v9486_v44  ;;  %v689_v30 = vsub.f32 %v9413_v50, %v9562_v36 }
 0x1bc   :  { %v719_v15 = vadd.f32 1e-05, %v655_v9  ;;  %v718_v63 = vadd.f32 1e-05, %v654_v60  ;;  %8512 = vrsqrt.f32 %v728_v3  ;;  %v9614_v55 = vmul.f32 0.0078125, %v420_v41 }
 0x1bd   :  { %v884_v27 = vpack.c.bf16 %v9596_v18, %v9605_v56  ;;  %v9616_v3 = vmul.f32 0.0078125, %v418_v8  ;;  %v635_v57 = vmul.f32 %v9610_v49, %v9610_v49  ;;  %v688_v29 = vsub.f32 %v9409_v48, %v9564_v46 }
 0x1be   :  { %8514 = vrsqrt.f32 %v719_v15  ;;  %v629_v44 = vmul.f32 %v9614_v55, %v9614_v55  ;;  %v9640_v50 = vmul.f32 0.0078125, %v9488_v19  ;;  %v634_v48 = vmul.f32 %v9619_v0, %v9619_v0 }
 0x1bf   :  { %8516 = vrsqrt.f32 %v718_v63  ;;  %8037 = vmatprep.mubr.bf16.mxu1 %v884_v27  ;;  %v416_v1 = vpop.xlane.xlu1 %415  ;;  %v414_v38 = vpop.xlane.xlu0 %413  ;;  %v628_v17 = vmul.f32 %v9616_v3, %v9616_v3  ;;  %v602_v36 = vmul.f32 0.0078125, %v9542_v16  ;;  %v667_v41 = vsub.f32 %v603_v52, %v635_v57 }
 0x1c0   :  { %8518 = vrsqrt.f32 %v729_v37  ;;  %8038 = vmatmul.mubr.bf16.gmra.mrb[20].mxu1 %v885_v47  ;;  %v9631_v39 = vmul.f32 0.0078125, %v416_v1  ;;  %v9633_v5 = vmul.f32 0.0078125, %v414_v38  ;;  %v686_v27 = vsub.f32 %v9283_v51, %v9580_v4 }
 0x1c1   :  { %8520 = vrsqrt.f32 %v727_v28  ;;  %v687_v28 = vsub.f32 %v9294_v58, %v9578_v7 }
 0x1c2   :  { %8522 = vrsqrt.f32 %v726_v61  ;;  %v627_v19 = vmul.f32 %v9631_v39, %v9631_v39  ;;  %v626_v61 = vmul.f32 %v9633_v5, %v9633_v5 }
 0x1c3   :  { %v549_v22 = vpop.xlane.xlu1 %548  ;;  %v547_v20 = vpop.xlane.xlu0 %546 }
 0x1c4   :  { %v8509_v45 = vpop.eup %8508  ;;  %v597_v13 = vmul.f32 0.0078125, %v549_v22  ;;  %v596_v9 = vmul.f32 0.0078125, %v547_v20  ;;  %v666_v22 = vsub.f32 %v602_v36, %v634_v48 }
 0x1c5   :  { %v8511_v60 = vpop.eup %8510  ;;  %v785_v46 = vmul.f32 %v8509_v45, %v689_v30 }
 0x1c6   :  { %v661_v8 = vsub.f32 %v597_v13, %v629_v44  ;;  %v660_v37 = vsub.f32 %v596_v9, %v628_v17  ;;  %v784_v15 = vmul.f32 %v8511_v60, %v688_v29  ;;  %v9645_v63 = vpop.eup %8512  ;;  %v697_v13 = vsub.f32 %v9255_v35, %v9551_v12 }
 0x1c7   :  { %v545_v16 = vpop.xlane.xlu1 %544  ;;  %v543_v47 = vpop.xlane.xlu0 %542  ;;  %v823_v51 = vmul.f32 %v9496_v11, %v785_v46  ;;  %v637_v9 = vmul.f32 %v9622_v43, %v9622_v43  ;;  %v730_v12 = vadd.f32 1e-05, %v666_v22 }
 0x1c8   :  { %v8515_v1 = vpop.eup %8514  ;;  %v725_v38 = vadd.f32 1e-05, %v661_v8  ;;  %v724_v57 = vadd.f32 1e-05, %v660_v37  ;;  %v595_v52 = vmul.f32 0.0078125, %v545_v16  ;;  %v594_v30 = vmul.f32 0.0078125, %v543_v47 }
 0x1c9   :  { %v8517_v29 = vpop.eup %8516  ;;  %v783_v20 = vmul.f32 %v8515_v1, %v687_v28  ;;  %v822_v58 = vmul.f32 %v9496_v11, %v784_v15  ;;  %v9672_v47 = vadd.f32 %v9511_v54, %v823_v51  ;;  %v695_v1 = vsub.f32 %v9268_v42, %v9557_v21 }
 0x1ca   :  { %v8519_v7 = vpop.eup %8518  ;;  %8524 = vrsqrt.f32 %v725_v38  ;;  %v659_v4 = vsub.f32 %v595_v52, %v627_v19  ;;  %v658_v45 = vsub.f32 %v594_v30, %v626_v61  ;;  %v782_v44 = vmul.f32 %v8517_v29, %v686_v27 }
 0x1cb   :  { %v8521_v17 = vpop.eup %8520  ;;  %8526 = vrsqrt.f32 %v724_v57  ;;  %v565_v60 = vpop.xlane.xlu1 %564  ;;  %v821_v36 = vmul.f32 %v9496_v11, %v783_v20  ;;  %v636_v27 = vmul.f32 %v9640_v50, %v9640_v50  ;;  %v731_v19 = vadd.f32 1e-05, %v667_v41 }
 0x1cc   :  { %v563_v48 = vpop.xlane.xlu0 %562  ;;  %v8523_v8 = vpop.eup %8522  ;;  %v723_v37 = vadd.f32 1e-05, %v659_v4  ;;  %v722_v46 = vadd.f32 1e-05, %v658_v45  ;;  %v605_v15 = vmul.f32 0.0078125, %v565_v60  ;;  %v820_v61 = vmul.f32 %v9496_v11, %v782_v44 }
 0x1cd   :  { %v604_v28 = vmul.f32 0.0078125, %v563_v48  ;;  %v9666_v35 = vadd.f32 %v9511_v54, %v821_v36  ;;  %v9669_v16 = vadd.f32 %v9511_v54, %v822_v58  ;;  %v694_v30 = vsub.f32 %v9252_v34, %v9554_v31 }
 0x1ce   :  { %8528 = vrsqrt.f32 %v723_v37  ;;  %v669_v38 = vsub.f32 %v605_v15, %v637_v9  ;;  %v9677_v52 = vadd.f32 %v9511_v54, %v820_v61  ;;  %v791_v20 = vmul.f32 %v8521_v17, %v695_v1 }
 0x1cf   :  { %14501 = vst [vmem:[#allocation16_spill] sm:$0xff] %v9666_v35  ;;  %14502 = vst [vmem:[#allocation17_spill] sm:$0xff] %v9669_v16  ;;  %8530 = vrsqrt.f32 %v722_v46  ;;  %v440_v57 = vpop.xlane.xlu1 %439  ;;  %v668_v29 = vsub.f32 %v604_v28, %v636_v27  ;;  %v793_v58 = vmul.f32 %v8519_v7, %v697_v13  ;;  %v696_v42 = vsub.f32 %v9237_v23, %v9545_v62 }
 0x1d0   :  { %v438_v41 = vpop.xlane.xlu0 %437  ;;  %14503 = vst [vmem:[#allocation18_spill] sm:$0xff] %v9677_v52  ;;  %8532 = vrsqrt.f32 %v731_v19  ;;  %v886_v22 = vpack.c.bf16 %v9666_v35, %v9677_v52  ;;  %v887_v21 = vpack.c.bf16 %v9672_v47, %v9669_v16  ;;  %v790_v51 = vmul.f32 %v8523_v8, %v694_v30 }
 0x1d1   :  { %8534 = vrsqrt.f32 %v730_v12  ;;  %v693_v4 = vsub.f32 %v9322_v10, %v9614_v55  ;;  %v733_v45 = vadd.f32 1e-05, %v669_v38  ;;  %v732_v9 = vadd.f32 1e-05, %v668_v29 }
 0x1d2   :  { %8041 = vmatprep.mubr.bf16.mxu1 %v886_v22  ;;  %v9689_v60 = vmul.f32 0.0078125, %v440_v57  ;;  %v9691_v7 = vmul.f32 0.0078125, %v438_v41  ;;  %v792_v23 = vmul.f32 %v9645_v63, %v696_v42  ;;  %v692_v17 = vsub.f32 %v9310_v2, %v9616_v3 }
 0x1d3   :  { %v444_v34 = vpop.xlane.xlu1 %443  ;;  %8042 = vmatmul.mubr.bf16.gmra.mrb[24].mxu1 %v887_v21  ;;  %v829_v10 = vmul.f32 %v9496_v11, %v791_v20  ;;  %v831_v55 = vmul.f32 %v9496_v11, %v793_v58  ;;  %v691_v48 = vsub.f32 %v9328_v14, %v9631_v39  ;;  %v828_v63 = vmul.f32 %v9496_v11, %v790_v51 }
 0x1d4   :  { %v442_v31 = vpop.xlane.xlu0 %441  ;;  %v8525_v44 = vpop.eup %8524  ;;  %v639_v36 = vmul.f32 %v9689_v60, %v9689_v60  ;;  %v638_v8 = vmul.f32 %v9691_v7, %v9691_v7  ;;  %8536 = vrsqrt.f32 %v733_v45  ;;  %v9705_v37 = vmul.f32 0.0078125, %v444_v34 }
 0x1d5   :  { %v8527_v62 = vpop.eup %8526  ;;  %v789_v13 = vmul.f32 %v8525_v44, %v693_v4  ;;  %v9707_v2 = vmul.f32 0.0078125, %v442_v31  ;;  %v690_v14 = vsub.f32 %v9316_v6, %v9633_v5  ;;  %8538 = vrsqrt.f32 %v732_v9 }
 0x1d6   :  { %v788_v15 = vmul.f32 %v8527_v62, %v692_v17  ;;  %v641_v61 = vmul.f32 %v9705_v37, %v9705_v37  ;;  %v699_v6 = vsub.f32 %v9379_v33, %v9610_v49  ;;  %v698_v5 = vsub.f32 %v9375_v32, %v9619_v0 }
 0x1d7   :  { %v569_v3 = vpop.xlane.xlu1 %568  ;;  %v640_v12 = vmul.f32 %v9707_v2, %v9707_v2  ;;  %v827_v38 = vmul.f32 %v9496_v11, %v789_v13  ;;  %v9723_v21 = vadd.f32 %v9511_v54, %v829_v10  ;;  %v9733_v32 = vadd.f32 %v9511_v54, %v828_v63 }
 0x1d8   :  { %v567_v46 = vpop.xlane.xlu0 %566  ;;  %v8529_v28 = vpop.eup %8528  ;;  %v607_v39 = vmul.f32 0.0078125, %v569_v3  ;;  %v826_v29 = vmul.f32 %v9496_v11, %v788_v15  ;;  %v701_v15 = vsub.f32 %v9353_v25, %v9622_v43 }
 0x1d9   :  { %v606_v27 = vmul.f32 0.0078125, %v567_v46  ;;  %v8531_v19 = vpop.eup %8530  ;;  %v787_v1 = vmul.f32 %v8529_v28, %v691_v48  ;;  %14504 = vst [vmem:[#allocation19_spill] sm:$0xff] %v9723_v21  ;;  %v9730_v33 = vadd.f32 %v9511_v54, %v827_v38  ;;  %14507 = vst [vmem:[#allocation22_spill] sm:$0xff] %v9733_v32  ;;  %v830_v46 = vmul.f32 %v9496_v11, %v792_v23 }
 0x1da   :  { %v671_v57 = vsub.f32 %v607_v39, %v639_v36  ;;  %v786_v30 = vmul.f32 %v8531_v19, %v690_v14  ;;  %v8533_v22 = vpop.eup %8532  ;;  %v9736_v62 = vadd.f32 %v9511_v54, %v826_v29  ;;  %v700_v39 = vsub.f32 %v9350_v24, %v9640_v50 }
 0x1db   :  { %v670_v41 = vsub.f32 %v606_v27, %v638_v8  ;;  %v573_v20 = vpop.xlane.xlu1 %572  ;;  %v825_v42 = vmul.f32 %v9496_v11, %v787_v1  ;;  %v8535_v51 = vpop.eup %8534  ;;  %14506 = vst [vmem:[#allocation21_spill] sm:$0xff] %v9730_v33  ;;  %v795_v36 = vmul.f32 %v8533_v22, %v699_v6  ;;  %v9751_v19 = vadd.f32 %v9511_v54, %v831_v55 }
 0x1dc   :  { %v571_v58 = vpop.xlane.xlu0 %570  ;;  %v735_v4 = vadd.f32 1e-05, %v671_v57  ;;  %v609_v34 = vmul.f32 0.0078125, %v573_v20  ;;  %v824_v44 = vmul.f32 %v9496_v11, %v786_v30  ;;  %14508 = vst [vmem:[#allocation23_spill] sm:$0xff] %v9736_v62  ;;  %v794_v48 = vmul.f32 %v8535_v51, %v698_v5 }
 0x1dd   :  { %v734_v45 = vadd.f32 1e-05, %v670_v41  ;;  %v608_v31 = vmul.f32 0.0078125, %v571_v58  ;;  %v9727_v9 = vadd.f32 %v9511_v54, %v825_v42  ;;  %v889_v27 = vpack.c.bf16 %v9730_v33, %v9736_v62  ;;  %14510 = vst [vmem:[#allocation25_spill] sm:$0xff] %v9751_v19 }
 0x1de   :  { %8540 = vrsqrt.f32 %v735_v4  ;;  %v673_v49 = vsub.f32 %v609_v34, %v641_v61  ;;  %v9739_v10 = vadd.f32 %v9511_v54, %v824_v44  ;;  %v8537_v63 = vpop.eup %8536  ;;  %v890_v25 = vpack.c.bf16 %v9723_v21, %v9733_v32 }
 0x1df   :  { %14505 = vst [vmem:[#allocation20_spill] sm:$0xff] %v9727_v9  ;;  %v672_v0 = vsub.f32 %v608_v31, %v640_v12  ;;  %8542 = vrsqrt.f32 %v734_v45  ;;  %v448_v17 = vpop.xlane.xlu1 %447  ;;  %v8539_v14 = vpop.eup %8538  ;;  %v832_v61 = vmul.f32 %v9496_v11, %v794_v48  ;;  %v833_v12 = vmul.f32 %v9496_v11, %v795_v36  ;;  %v14515_v36 = vld [vmem:[#allocation6_spill] sm:$0xff] }
 0x1e0   :  { %v446_v13 = vpop.xlane.xlu0 %445  ;;  %14509 = vst [vmem:[#allocation24_spill] sm:$0xff] %v9739_v10  ;;  %v737_v8 = vadd.f32 1e-05, %v673_v49  ;;  %v888_v28 = vpack.c.bf16 %v9727_v9, %v9739_v10  ;;  %v9757_v1 = vmul.f32 0.0078125, %v448_v17  ;;  %v9762_v50 = vadd.f32 %v9511_v54, %v830_v46 }
 0x1e1   :  { %v736_v3 = vadd.f32 1e-05, %v672_v0  ;;  %v9759_v24 = vmul.f32 0.0078125, %v446_v13  ;;  %v796_v55 = vmul.f32 %v8539_v14, %v700_v39  ;;  %v797_v38 = vmul.f32 %v8537_v63, %v701_v15 }
 0x1e2   :  { %8544 = vrsqrt.f32 %v737_v8  ;;  %8045 = vmatprep.mubr.bf16.mxu1 %v888_v28  ;;  %14511 = vst [vmem:[#allocation26_spill] sm:$0xff] %v9762_v50  ;;  %v643_v57 = vmul.f32 %v9757_v1, %v9757_v1  ;;  %v891_v30 = vpack.c.bf16 %v9751_v19, %v9762_v50  ;;  %v703_v29 = vsub.f32 %v9297_v59, %v9689_v60 }
 0x1e3   :  { %8546 = vrsqrt.f32 %v736_v3  ;;  %v452_v23 = vpop.xlane.xlu1 %451  ;;  %8046 = vmatmul.mubr.bf16.gmra.mrb[28].mxu1 %v889_v27  ;;  %v642_v41 = vmul.f32 %v9759_v24, %v9759_v24  ;;  %v9775_v20 = vadd.f32 %v9511_v54, %v832_v61  ;;  %v9778_v58 = vadd.f32 %v9511_v54, %v833_v12 }
 0x1e4   :  { %v450_v43 = vpop.xlane.xlu0 %449  ;;  %8049 = vmatprep.mubr.bf16.mxu1 %v890_v25  ;;  %v9772_v22 = vmul.f32 0.0078125, %v452_v23  ;;  %v702_v51 = vsub.f32 %v9288_v53, %v9691_v7  ;;  %v834_v60 = vmul.f32 %v9496_v11, %v796_v55  ;;  %v835_v44 = vmul.f32 %v9496_v11, %v797_v38  ;;  %v14514_v53 = vld [vmem:[#allocation7_spill] sm:$0xff] }
 0x1e5   :  { %14512 = vst [vmem:[#allocation27_spill] sm:$0xff] %v9775_v20  ;;  %14513 = vst [vmem:[#allocation28_spill] sm:$0xff] %v9778_v58  ;;  %v9782_v4 = vmul.f32 0.0078125, %v450_v43  ;;  %v705_v7 = vsub.f32 %v14514_v53, %v9705_v37  ;;  %v704_v8 = vsub.f32 %v14515_v36, %v9707_v2  ;;  %v892_v46 = vpack.c.bf16 %v9778_v58, %v9775_v20  ;;  %v14524_v53 = vld [vmem:[#allocation10_spill] sm:$0xff] }
 0x1e6   :  { %v645_v59 = vmul.f32 %v9772_v22, %v9772_v22  ;;  %v9798_v37 = vadd.f32 %v9511_v54, %v834_v60  ;;  %v9801_v2 = vadd.f32 %v9511_v54, %v835_v44  ;;  %v14523_v44 = vld [vmem:[#allocation9_spill] sm:$0xff] }
 0x1e7   :  { %v577_v6 = vpop.xlane.xlu1 %576  ;;  %v644_v0 = vmul.f32 %v9782_v4, %v9782_v4 }
 0x1e8   :  { %v575_v5 = vpop.xlane.xlu0 %574  ;;  %v8541_v42 = vpop.eup %8540  ;;  %v611_v45 = vmul.f32 0.0078125, %v577_v6  ;;  %14516 = vst [vmem:[#allocation7_spill] sm:$0xff] %v9798_v37  ;;  %14517 = vst [vmem:[#allocation6_spill] sm:$0xff] %v9801_v2  ;;  %v893_v6 = vpack.c.bf16 %v9801_v2, %v9798_v37 }
 0x1e9   :  { %v610_v34 = vmul.f32 0.0078125, %v575_v5  ;;  %v8543_v31 = vpop.eup %8542  ;;  %v799_v49 = vmul.f32 %v8541_v42, %v703_v29 }
 0x1ea   :  { %v675_v17 = vsub.f32 %v611_v45, %v643_v57  ;;  %v798_v48 = vmul.f32 %v8543_v31, %v702_v51  ;;  %v14522_v31 = vld [vmem:[#allocation11_spill] sm:$0xff] }
 0x1eb   :  { %v674_v13 = vsub.f32 %v610_v34, %v642_v41  ;;  %v581_v3 = vpop.xlane.xlu1 %580  ;;  %v837_v15 = vmul.f32 %v9496_v11, %v799_v49  ;;  %8050 = vmatmul.mubr.bf16.gmra.mrb[32].mxu1 %v891_v30  ;;  %v706_v49 = vsub.f32 %v14523_v44, %v9759_v24 }
 0x1ec   :  { %v579_v63 = vpop.xlane.xlu0 %578  ;;  %v8545_v28 = vpop.eup %8544  ;;  %v739_v14 = vadd.f32 1e-05, %v675_v17  ;;  %v613_v27 = vmul.f32 0.0078125, %v581_v3  ;;  %8053 = vmatprep.mubr.bf16.mxu1 %v892_v46  ;;  %v836_v43 = vmul.f32 %v9496_v11, %v798_v48  ;;  %v14525_v3 = vld [vmem:[#allocation8_spill] sm:$0xff] }
 0x1ed   :  { %v738_v39 = vadd.f32 1e-05, %v674_v13  ;;  %v612_v23 = vmul.f32 0.0078125, %v579_v63  ;;  %v8547_v25 = vpop.eup %8546  ;;  %v801_v61 = vmul.f32 %v8545_v28, %v705_v7  ;;  %v9808_v41 = vadd.f32 %v9511_v54, %v837_v15 }
 0x1ee   :  { %8548 = vrsqrt.f32 %v739_v14  ;;  %v677_v12 = vsub.f32 %v613_v27, %v645_v59  ;;  %v800_v38 = vmul.f32 %v8547_v25, %v704_v8  ;;  %v9805_v57 = vadd.f32 %v9511_v54, %v836_v43  ;;  %v9855_v43 = vld [vmem:[%s14260_s6] ss:$0 sm:$0xff] }
 0x1ef   :  { %v676_v55 = vsub.f32 %v612_v23, %v644_v0  ;;  %8550 = vrsqrt.f32 %v738_v39  ;;  %14519 = vst [vmem:[#allocation30_spill] sm:$0xff] %v9808_v41  ;;  %v839_v42 = vmul.f32 %v9496_v11, %v801_v61  ;;  %v707_v59 = vsub.f32 %v14522_v31, %v9757_v1  ;;  %v8436_v31 = vld [vmem:[%s14259_s5 + $0x40] sm:$0xff]  }
 0x1f0   :  { %14518 = vst [vmem:[#allocation29_spill] sm:$0xff] %v9805_v57  ;;  %v741_v30 = vadd.f32 1e-05, %v677_v12  ;;  %v838_v5 = vmul.f32 %v9496_v11, %v800_v38  ;;  %v894_v51 = vpack.c.bf16 %v9808_v41, %v9805_v57  ;;  %v709_v7 = vsub.f32 %v14524_v53, %v9772_v22  ;;  %8065 = vmatprep.subr.bf16.mxu0 %v8436_v31  ;;  %v8438_v53 = vld [vmem:[%s14259_s5 + $0x50] sm:$0xff]  }
 0x1f1   :  { %v740_v29 = vadd.f32 1e-05, %v676_v55  ;;  %v9820_v34 = vadd.f32 %v9511_v54, %v839_v42  ;;  %v708_v46 = vsub.f32 %v14525_v3, %v9782_v4  ;;  %8066 = vmatpush3.bf16.msra.mxu0 %v8436_v31 }
 0x1f2   :  { %8552 = vrsqrt.f32 %v741_v30  ;;  %v9817_v45 = vadd.f32 %v9511_v54, %v838_v5 }
 0x1f3   :  { %8554 = vrsqrt.f32 %v740_v29  ;;  %8054 = vmatmul.mubr.bf16.gmra.mrb[36].mxu1 %v893_v6  ;;  %14521 = vst [vmem:[#allocation32_spill] sm:$0xff] %v9820_v34 }
 0x1f4   :  { %8057 = vmatprep.mubr.bf16.mxu1 %v894_v51  ;;  %14520 = vst [vmem:[#allocation31_spill] sm:$0xff] %v9817_v45  ;;  %v895_v13 = vpack.c.bf16 %v9820_v34, %v9817_v45 }
 0x1f8   :  { %v8549_v60 = vpop.eup %8548 }
 0x1f9   :  { %v8551_v0 = vpop.eup %8550  ;;  %v803_v17 = vmul.f32 %v8549_v60, %v707_v59 }
 0x1fa   :  { %v802_v48 = vmul.f32 %v8551_v0, %v706_v49  ;;  %v8437_v49 = vld [vmem:[%s14259_s5 + $0x48] sm:$0xff]  }
 0x1fb   :  { %v841_v36 = vmul.f32 %v9496_v11, %v803_v17  ;;  %8058 = vmatmul.mubr.bf16.gmra.mrb[40].mxu1 %v895_v13  ;;  %8067 = vmatprep.subr.bf16.mxu0 %v8437_v49 }
 0x1fc   :  { %v8553_v8 = vpop.eup %8552  ;;  %v840_v1 = vmul.f32 %v9496_v11, %v802_v48  ;;  %8068 = vmatpush3.bf16.msra.mxu0 %v8437_v49 }
 0x1fd   :  { %v8555_v63 = vpop.eup %8554  ;;  %v9835_v24 = vadd.f32 %v9511_v54, %v841_v36  ;;  %v805_v15 = vmul.f32 %v8553_v8, %v709_v7  ;;  %8069 = vmatprep.subr.bf16.mxu0 %v8438_v53  ;;  %v8439_v8 = vld [vmem:[%s14259_s5 + $0x58] sm:$0xff]  }
 0x1fe   :  { %v9838_v28 = vadd.f32 %v9511_v54, %v840_v1  ;;  %v804_v14 = vmul.f32 %v8555_v63, %v708_v46  ;;  %v8440_v1 = vld [vmem:[%s14259_s5 + $0x60] sm:$0xff]  }
 0x1ff   :  { %14526 = vst [vmem:[#allocation11_spill] sm:$0xff] %v9835_v24  ;;  %v843_v22 = vmul.f32 %v9496_v11, %v805_v15  ;;  %v8441_v15 = vld [vmem:[%s14259_s5 + $0x68] sm:$0xff]  }
 0x200   :  { %14527 = vst [vmem:[#allocation9_spill] sm:$0xff] %v9838_v28  ;;  %v896_v39 = vpack.c.bf16 %v9835_v24, %v9838_v28  ;;  %v842_v27 = vmul.f32 %v9496_v11, %v804_v14  ;;  %8070 = vmatpush3.bf16.msra.mxu0 %v8438_v53 }
 0x201   :  { %v9845_v4 = vadd.f32 %v9511_v54, %v843_v22  ;;  %8071 = vmatprep.subr.bf16.mxu0 %v8439_v8 }
 0x202   :  { %8061 = vmatprep.mubr.bf16.mxu1 %v896_v39  ;;  %v9848_v23 = vadd.f32 %v9511_v54, %v842_v27  ;;  %v8442_v27 = vld [vmem:[%s14259_s5 + $0x70] sm:$0xff]  }
 0x203   :  { %14528 = vst [vmem:[#allocation10_spill] sm:$0xff] %v9845_v4 }
 0x204   :  { %14529 = vst [vmem:[#allocation8_spill] sm:$0xff] %v9848_v23  ;;  %v897_v25 = vpack.c.bf16 %v9845_v4, %v9848_v23  ;;  %8072 = vmatpush3.bf16.msra.mxu0 %v8439_v8 }
 0x205   :  { %8073 = vmatprep.subr.bf16.mxu0 %v8440_v1 }
 0x206   :  { %8062 = vmatmul.mubr.bf16.gmra.mrb[44].mxu1 %v897_v25 }
 0x208   :  { %8074 = vmatpush3.bf16.msra.mxu0 %v8440_v1 }
 0x209   :  { %8075 = vmatprep.subr.bf16.mxu0 %v8441_v15 }
 0x20c   :  { %8076 = vmatpush3.bf16.msra.mxu0 %v8441_v15 }
 0x20d   :  { %8077 = vmatprep.subr.bf16.mxu0 %v8442_v27 }
 0x210   :  { %8078 = vmatpush3.bf16.msra.mxu0 %v8442_v27 }
 0x276   :  { %v8035_v61 = vpop.f32.mrb[16].mxu1 }
 0x277   :  { %v9858_v12 = vadd.f32 %v8035_v61, %v9855_v43  ;;  %v1003_v11 = vpop.f32.mrb[17].mxu1 }
 0x278   :  { %v8036_v55 = vpop.f32.mrb[18].mxu1  ;;  %v9865_v30 = vadd.f32 %v9855_v43, %v1003_v11 }
 0x279   :  { %v9861_v38 = vadd.f32 %v8036_v55, %v9855_v43  ;;  %1136 = vadd.xlane.f32.xlu0 %v9858_v12  ;;  %v1006_v54 = vpop.f32.mrb[19].mxu1  ;;  %v1230_v6 = vmul.f32 %v9858_v12, %v9858_v12 }
 0x27a   :  { %v9869_v29 = vadd.f32 %v9855_v43, %v1006_v54  ;;  %v1228_v42 = vmul.f32 %v9865_v30, %v9865_v30  ;;  %v8443_v54 = vld [vmem:[%s14259_s5 + $0x78] sm:$0xff]  }
 0x27b   :  { %1138 = vadd.xlane.f32.xlu1 %v9861_v38  ;;  %v1231_v5 = vmul.f32 %v9861_v38, %v9861_v38  ;;  %8079 = vmatprep.subr.bf16.mxu0 %v8443_v54 }
 0x27c   :  { %v1229_v51 = vmul.f32 %v9869_v29, %v9869_v29  ;;  %8080 = vmatpush3.bf16.msra.mxu0 %v8443_v54 }
 0x27d   :  { %1132 = vadd.xlane.f32.xlu0 %v9865_v30 }
 0x27f   :  { %1134 = vadd.xlane.f32.xlu1 %v9869_v29 }
 0x281   :  { %1264 = vadd.xlane.f32.xlu0 %v1230_v6 }
 0x283   :  { %1266 = vadd.xlane.f32.xlu1 %v1231_v5 }
 0x285   :  { %1260 = vadd.xlane.f32.xlu0 %v1228_v42 }
 0x287   :  { %1262 = vadd.xlane.f32.xlu1 %v1229_v51 }
 0x293   :  { %v8039_v59 = vpop.f32.mrb[20].mxu1 }
 0x294   :  { %v9885_v60 = vadd.f32 %v8039_v59, %v9855_v43  ;;  %v1019_v44 = vpop.f32.mrb[21].mxu1 }
 0x295   :  { %v8040_v0 = vpop.f32.mrb[22].mxu1  ;;  %v9895_v48 = vadd.f32 %v9855_v43, %v1019_v44 }
 0x296   :  { %v9891_v17 = vadd.f32 %v8040_v0, %v9855_v43  ;;  %1144 = vadd.xlane.f32.xlu0 %v9885_v60  ;;  %v1022_v13 = vpop.f32.mrb[23].mxu1  ;;  %v1234_v36 = vmul.f32 %v9885_v60, %v9885_v60 }
 0x297   :  { %v9902_v7 = vadd.f32 %v9855_v43, %v1022_v13  ;;  %v1232_v46 = vmul.f32 %v9895_v48, %v9895_v48 }
 0x298   :  { %1146 = vadd.xlane.f32.xlu1 %v9891_v17  ;;  %v1235_v3 = vmul.f32 %v9891_v17, %v9891_v17 }
 0x299   :  { %v1233_v63 = vmul.f32 %v9902_v7, %v9902_v7 }
 0x29a   :  { %1140 = vadd.xlane.f32.xlu0 %v9895_v48 }
 0x29c   :  { %1142 = vadd.xlane.f32.xlu1 %v9902_v7 }
 0x29e   :  { %1272 = vadd.xlane.f32.xlu0 %v1234_v36 }
 0x2a0   :  { %1274 = vadd.xlane.f32.xlu1 %v1235_v3 }
 0x2a2   :  { %1268 = vadd.xlane.f32.xlu0 %v1232_v46 }
 0x2a4   :  { %1270 = vadd.xlane.f32.xlu1 %v1233_v63 }
 0x2a6   :  { %v8043_v14 = vpop.f32.mrb[24].mxu1 }
 0x2a7   :  { %v9924_v22 = vadd.f32 %v8043_v14, %v9855_v43  ;;  %v1035_v39 = vpop.f32.mrb[25].mxu1 }
 0x2a8   :  { %v8044_v25 = vpop.f32.mrb[26].mxu1  ;;  %v9934_v55 = vadd.f32 %v9855_v43, %v1035_v39 }
 0x2a9   :  { %v9930_v61 = vadd.f32 %v8044_v25, %v9855_v43  ;;  %1152 = vadd.xlane.f32.xlu0 %v9924_v22  ;;  %v1038_v11 = vpop.f32.mrb[27].mxu1  ;;  %v1238_v5 = vmul.f32 %v9924_v22, %v9924_v22 }
 0x2aa   :  { %v9941_v6 = vadd.f32 %v9855_v43, %v1038_v11  ;;  %v1236_v51 = vmul.f32 %v9934_v55, %v9934_v55 }
 0x2ab   :  { %1154 = vadd.xlane.f32.xlu1 %v9930_v61  ;;  %v1239_v42 = vmul.f32 %v9930_v61, %v9930_v61 }
 0x2ac   :  { %v1237_v31 = vmul.f32 %v9941_v6, %v9941_v6 }
 0x2ad   :  { %1148 = vadd.xlane.f32.xlu0 %v9934_v55 }
 0x2af   :  { %1150 = vadd.xlane.f32.xlu1 %v9941_v6 }
 0x2b1   :  { %1280 = vadd.xlane.f32.xlu0 %v1238_v5 }
 0x2b3   :  { %1282 = vadd.xlane.f32.xlu1 %v1239_v42 }
 0x2b5   :  { %1276 = vadd.xlane.f32.xlu0 %v1236_v51 }
 0x2b6   :  { %v8047_v59 = vpop.f32.mrb[28].mxu1 }
 0x2b7   :  { %v9954_v44 = vadd.f32 %v8047_v59, %v9855_v43  ;;  %1278 = vadd.xlane.f32.xlu1 %v1237_v31  ;;  %v1051_v49 = vpop.f32.mrb[29].mxu1 }
 0x2b8   :  { %v8048_v0 = vpop.f32.mrb[30].mxu1  ;;  %v9961_v36 = vadd.f32 %v9855_v43, %v1051_v49 }
 0x2b9   :  { %v9957_v13 = vadd.f32 %v8048_v0, %v9855_v43  ;;  %1160 = vadd.xlane.f32.xlu0 %v9954_v44  ;;  %v1054_v53 = vpop.f32.mrb[31].mxu1  ;;  %v1242_v1 = vmul.f32 %v9954_v44, %v9954_v44 }
 0x2ba   :  { %v9965_v8 = vadd.f32 %v9855_v43, %v1054_v53  ;;  %v1240_v39 = vmul.f32 %v9961_v36, %v9961_v36 }
 0x2bb   :  { %1162 = vadd.xlane.f32.xlu1 %v9957_v13  ;;  %v1243_v14 = vmul.f32 %v9957_v13, %v9957_v13 }
 0x2bc   :  { %v1241_v27 = vmul.f32 %v9965_v8, %v9965_v8 }
 0x2bd   :  { %1156 = vadd.xlane.f32.xlu0 %v9961_v36 }
 0x2be   :  { %v8051_v3 = vpop.f32.mrb[32].mxu1 }
 0x2bf   :  { %v1067_v46 = vpop.f32.mrb[33].mxu1  ;;  %1158 = vadd.xlane.f32.xlu1 %v9965_v8  ;;  %v9978_v11 = vadd.f32 %v8051_v3, %v9855_v43 }
 0x2c0   :  { %v8052_v63 = vpop.f32.mrb[34].mxu1  ;;  %v9985_v31 = vadd.f32 %v9855_v43, %v1067_v46 }
 0x2c1   :  { %v1070_v15 = vpop.f32.mrb[35].mxu1  ;;  %1288 = vadd.xlane.f32.xlu0 %v1242_v1  ;;  %v9981_v42 = vadd.f32 %v8052_v63, %v9855_v43  ;;  %v1246_v53 = vmul.f32 %v9978_v11, %v9978_v11 }
 0x2c2   :  { %v9989_v59 = vadd.f32 %v9855_v43, %v1070_v15  ;;  %v1244_v63 = vmul.f32 %v9985_v31, %v9985_v31 }
 0x2c3   :  { %1290 = vadd.xlane.f32.xlu1 %v1243_v14  ;;  %v1247_v46 = vmul.f32 %v9981_v42, %v9981_v42 }
 0x2c4   :  { %v1245_v15 = vmul.f32 %v9989_v59, %v9989_v59 }
 0x2c5   :  { %1284 = vadd.xlane.f32.xlu0 %v1240_v39 }
 0x2c6   :  { %v8055_v25 = vpop.f32.mrb[36].mxu1 }
 0x2c7   :  { %1286 = vadd.xlane.f32.xlu1 %v1241_v27  ;;  %v1083_v54 = vpop.f32.mrb[37].mxu1  ;;  %v10002_v14 = vadd.f32 %v8055_v25, %v9855_v43 }
 0x2c8   :  { %v8056_v5 = vpop.f32.mrb[38].mxu1 }
 0x2c9   :  { %1168 = vadd.xlane.f32.xlu0 %v9978_v11  ;;  %v1086_v51 = vpop.f32.mrb[39].mxu1  ;;  %v10005_v27 = vadd.f32 %v8056_v5, %v9855_v43  ;;  %v1250_v25 = vmul.f32 %v10002_v14, %v10002_v14 }
 0x2ca   :  { %v10013_v23 = vadd.f32 %v9855_v43, %v1086_v51 }
 0x2cb   :  { %1170 = vadd.xlane.f32.xlu1 %v9981_v42  ;;  %v1251_v5 = vmul.f32 %v10005_v27, %v10005_v27 }
 0x2cc   :  { %v1249_v51 = vmul.f32 %v10013_v23, %v10013_v23 }
 0x2cd   :  { %1164 = vadd.xlane.f32.xlu0 %v9985_v31 }
 0x2ce   :  { %v8059_v49 = vpop.f32.mrb[40].mxu1 }
 0x2cf   :  { %1166 = vadd.xlane.f32.xlu1 %v9989_v59  ;;  %v1099_v0 = vpop.f32.mrb[41].mxu1 }
 0x2d0   :  { %v8060_v3 = vpop.f32.mrb[42].mxu1 }
 0x2d1   :  { %1296 = vadd.xlane.f32.xlu0 %v1246_v53  ;;  %v1102_v1 = vpop.f32.mrb[43].mxu1  ;;  %v10029_v24 = vadd.f32 %v8060_v3, %v9855_v43 }
 0x2d3   :  { %1298 = vadd.xlane.f32.xlu1 %v1247_v46  ;;  %v10009_v46 = vadd.f32 %v9855_v43, %v1083_v54  ;;  %v1255_v3 = vmul.f32 %v10029_v24, %v10029_v24 }
 0x2d5   :  { %1292 = vadd.xlane.f32.xlu0 %v1244_v63  ;;  %v1248_v54 = vmul.f32 %v10009_v46, %v10009_v46 }
 0x2d7   :  { %1294 = vadd.xlane.f32.xlu1 %v1245_v15  ;;  %v10026_v15 = vadd.f32 %v8059_v49, %v9855_v43 }
 0x2d9   :  { %v8063_v39 = vpop.f32.mrb[44].mxu1  ;;  %1176 = vadd.xlane.f32.xlu0 %v10002_v14  ;;  %v1254_v49 = vmul.f32 %v10026_v15, %v10026_v15 }
 0x2da   :  { %v1115_v53 = vpop.f32.mrb[45].mxu1 }
 0x2db   :  { %v8064_v4 = vpop.f32.mrb[46].mxu1  ;;  %1178 = vadd.xlane.f32.xlu1 %v10005_v27 }
 0x2dc   :  { %v1118_v63 = vpop.f32.mrb[47].mxu1 }
 0x2dd   :  { %1172 = vadd.xlane.f32.xlu0 %v10009_v46 }
 0x2df   :  { %1174 = vadd.xlane.f32.xlu1 %v10013_v23 }
 0x2e1   :  { %1304 = vadd.xlane.f32.xlu0 %v1250_v25  ;;  %v10033_v25 = vadd.f32 %v9855_v43, %v1099_v0 }
 0x2e3   :  { %1306 = vadd.xlane.f32.xlu1 %v1251_v5  ;;  %v10037_v5 = vadd.f32 %v9855_v43, %v1102_v1  ;;  %v1252_v0 = vmul.f32 %v10033_v25, %v10033_v25 }
 0x2e5   :  { %1300 = vadd.xlane.f32.xlu0 %v1248_v54  ;;  %v1253_v1 = vmul.f32 %v10037_v5, %v10037_v5  ;;  %v10050_v54 = vadd.f32 %v8063_v39, %v9855_v43 }
 0x2e7   :  { %1302 = vadd.xlane.f32.xlu1 %v1249_v51  ;;  %v10053_v51 = vadd.f32 %v8064_v4, %v9855_v43 }
 0x2e9   :  { %1184 = vadd.xlane.f32.xlu0 %v10026_v15 }
 0x2eb   :  { %1186 = vadd.xlane.f32.xlu1 %v10029_v24 }
 0x2ed   :  { %1180 = vadd.xlane.f32.xlu0 %v10033_v25 }
 0x2ef   :  { %1182 = vadd.xlane.f32.xlu1 %v10037_v5 }
 0x2f1   :  { %1312 = vadd.xlane.f32.xlu0 %v1254_v49  ;;  %v10057_v49 = vadd.f32 %v9855_v43, %v1115_v53  ;;  %v1258_v53 = vmul.f32 %v10050_v54, %v10050_v54 }
 0x2f3   :  { %1314 = vadd.xlane.f32.xlu1 %v1255_v3  ;;  %v10061_v3 = vadd.f32 %v9855_v43, %v1118_v63  ;;  %v1256_v39 = vmul.f32 %v10057_v49, %v10057_v49  ;;  %v1259_v43 = vmul.f32 %v10053_v51, %v10053_v51 }
 0x2f5   :  { %1308 = vadd.xlane.f32.xlu0 %v1252_v0  ;;  %v1257_v4 = vmul.f32 %v10061_v3, %v10061_v3 }
 0x2f7   :  { %1310 = vadd.xlane.f32.xlu1 %v1253_v1 }
 0x2f9   :  { %1192 = vadd.xlane.f32.xlu0 %v10050_v54 }
 0x2fb   :  { %1194 = vadd.xlane.f32.xlu1 %v10053_v51 }
 0x2fd   :  { %1188 = vadd.xlane.f32.xlu0 %v10057_v49 }
 0x2ff   :  { %1190 = vadd.xlane.f32.xlu1 %v10061_v3 }
 0x301   :  { %1316 = vadd.xlane.f32.xlu0 %v1256_v39 }
 0x303   :  { %1318 = vadd.xlane.f32.xlu1 %v1257_v4 }
 0x305   :  { %1320 = vadd.xlane.f32.xlu0 %v1258_v53 }
 0x306   :  { %v1137_v63 = vpop.xlane.xlu0 %1136 }
 0x307   :  { %1322 = vadd.xlane.f32.xlu1 %v1259_v43  ;;  %v1198_v28 = vmul.f32 0.0078125, %v1137_v63 }
 0x308   :  { %v1139_v0 = vpop.xlane.xlu1 %1138 }
 0x309   :  { %v1199_v45 = vmul.f32 0.0078125, %v1139_v0  ;;  %v1358_v39 = vmul.f32 %v1198_v28, %v1198_v28 }
 0x30a   :  { %v1133_v1 = vpop.xlane.xlu0 %1132 }
 0x30b   :  { %v1196_v34 = vmul.f32 0.0078125, %v1133_v1  ;;  %v1359_v20 = vmul.f32 %v1199_v45, %v1199_v45 }
 0x30c   :  { %v1135_v41 = vpop.xlane.xlu1 %1134 }
 0x30d   :  { %v1197_v37 = vmul.f32 0.0078125, %v1135_v41  ;;  %v1356_v50 = vmul.f32 %v1196_v34, %v1196_v34 }
 0x30e   :  { %v1265_v57 = vpop.xlane.xlu0 %1264 }
 0x30f   :  { %v1326_v58 = vmul.f32 0.0078125, %v1265_v57  ;;  %v1357_v43 = vmul.f32 %v1197_v37, %v1197_v37 }
 0x310   :  { %v1267_v4 = vpop.xlane.xlu1 %1266 }
 0x311   :  { %v1390_v2 = vsub.f32 %v1326_v58, %v1358_v39  ;;  %v1327_v21 = vmul.f32 0.0078125, %v1267_v4  ;;  %v1422_v58 = vsub.f32 %v9858_v12, %v1198_v28  ;;  %v1423_v39 = vsub.f32 %v9861_v38, %v1199_v45 }
 0x312   :  { %v1261_v53 = vpop.xlane.xlu0 %1260 }
 0x313   :  { %v1454_v32 = vadd.f32 1e-05, %v1390_v2  ;;  %v1391_v19 = vsub.f32 %v1327_v21, %v1359_v20  ;;  %v1324_v9 = vmul.f32 0.0078125, %v1261_v53  ;;  %v1420_v20 = vsub.f32 %v9865_v30, %v1196_v34  ;;  %v10087_v34 = vld [vmem:[%s14262_s8] ss:$0 sm:$0xff] }
 0x314   :  { %v1263_v62 = vpop.xlane.xlu1 %1262 }
 0x315   :  { %8556 = vrsqrt.f32 %v1454_v32  ;;  %v1455_v63 = vadd.f32 1e-05, %v1391_v19  ;;  %v1388_v10 = vsub.f32 %v1324_v9, %v1356_v50  ;;  %v1325_v0 = vmul.f32 0.0078125, %v1263_v62  ;;  %v10079_v9 = vld [vmem:[%s14261_s7] ss:$0 sm:$0xff] }
 0x317   :  { %8558 = vrsqrt.f32 %v1455_v63  ;;  %v1452_v33 = vadd.f32 1e-05, %v1388_v10  ;;  %v1389_v1 = vsub.f32 %v1325_v0, %v1357_v43 }
 0x319   :  { %8560 = vrsqrt.f32 %v1452_v33  ;;  %v1453_v57 = vadd.f32 1e-05, %v1389_v1  ;;  %v1421_v33 = vsub.f32 %v9869_v29, %v1197_v37 }
 0x31b   :  { %8562 = vrsqrt.f32 %v1453_v57 }
 0x31f   :  { %v8557_v41 = vpop.eup %8556 }
 0x320   :  { %v1518_v21 = vmul.f32 %v8557_v41, %v1422_v58 }
 0x321   :  { %v8559_v2 = vpop.eup %8558 }
 0x322   :  { %v1519_v4 = vmul.f32 %v8559_v2, %v1423_v39  ;;  %v1556_v45 = vmul.f32 %v10079_v9, %v1518_v21 }
 0x323   :  { %v1145_v32 = vpop.xlane.xlu0 %1144  ;;  %v8561_v62 = vpop.eup %8560 }
 0x324   :  { %v1516_v19 = vmul.f32 %v8561_v62, %v1420_v20  ;;  %v1557_v50 = vmul.f32 %v10079_v9, %v1519_v4  ;;  %v1202_v53 = vmul.f32 0.0078125, %v1145_v32  ;;  %v1594_v1 = vadd.f32 %v10087_v34, %v1556_v45 }
 0x325   :  { %v1147_v10 = vpop.xlane.xlu1 %1146  ;;  %v8563_v28 = vpop.eup %8562 }
 0x326   :  { %v1517_v38 = vmul.f32 %v8563_v28, %v1421_v33  ;;  %v1554_v30 = vmul.f32 %v10079_v9, %v1516_v19  ;;  %v1595_v43 = vadd.f32 %v10087_v34, %v1557_v50  ;;  %v1203_v0 = vmul.f32 0.0078125, %v1147_v10 }
 0x327   :  { %v1141_v12 = vpop.xlane.xlu0 %1140  ;;  %v1362_v39 = vmul.f32 %v1202_v53, %v1202_v53  ;;  %v1626_v28 = vmax.f32 %v1594_v1, 0.0 }
 0x328   :  { %v1555_v29 = vmul.f32 %v10079_v9, %v1517_v38  ;;  %v1592_v63 = vadd.f32 %v10087_v34, %v1554_v30  ;;  %v1200_v57 = vmul.f32 0.0078125, %v1141_v12  ;;  %v1627_v21 = vmax.f32 %v1595_v43, 0.0 }
 0x329   :  { %v1143_v37 = vpop.xlane.xlu1 %1142  ;;  %v1363_v33 = vmul.f32 %v1203_v0, %v1203_v0 }
 0x32a   :  { %v1593_v58 = vadd.f32 %v10087_v34, %v1555_v29  ;;  %v1201_v20 = vmul.f32 0.0078125, %v1143_v37  ;;  %v1624_v32 = vmax.f32 %v1592_v63, 0.0  ;;  %v1360_v38 = vmul.f32 %v1200_v57, %v1200_v57 }
 0x32b   :  { %v1273_v41 = vpop.xlane.xlu0 %1272  ;;  %v1657_v16 = vpack.c.bf16 %v1627_v21, %v1626_v28 }
 0x32c   :  { %v1330_v2 = vmul.f32 0.0078125, %v1273_v41  ;;  %v1625_v62 = vmax.f32 %v1593_v58, 0.0  ;;  %v1361_v52 = vmul.f32 %v1201_v20, %v1201_v20 }
 0x32d   :  { %v1275_v4 = vpop.xlane.xlu1 %1274 }
 0x32e   :  { %v1394_v19 = vsub.f32 %v1330_v2, %v1362_v39  ;;  %v1331_v50 = vmul.f32 0.0078125, %v1275_v4  ;;  %v1656_v10 = vpack.c.bf16 %v1625_v62, %v1624_v32  ;;  %v1426_v4 = vsub.f32 %v9885_v60, %v1202_v53 }
 0x32f   :  { %v1269_v30 = vpop.xlane.xlu0 %1268  ;;  %v1425_v60 = vsub.f32 %v9902_v7, %v1201_v20 }
 0x330   :  { %v1458_v35 = vadd.f32 1e-05, %v1394_v19  ;;  %v1395_v45 = vsub.f32 %v1331_v50, %v1363_v33  ;;  %v1328_v12 = vmul.f32 0.0078125, %v1269_v30  ;;  %8081 = vmatprep.mubr.bf16.mxu0 %v1656_v10 }
 0x331   :  { %v1271_v29 = vpop.xlane.xlu1 %1270  ;;  %8082 = vmatmul.mubr.bf16.vlgmr.msra.gmra.mrb[16].mxu0 %v1657_v16 }
 0x332   :  { %8564 = vrsqrt.f32 %v1458_v35  ;;  %v1459_v43 = vadd.f32 1e-05, %v1395_v45  ;;  %v1392_v37 = vsub.f32 %v1328_v12, %v1360_v38  ;;  %v1329_v41 = vmul.f32 0.0078125, %v1271_v29 }
 0x333   :  { %v1427_v35 = vsub.f32 %v9891_v17, %v1203_v0 }
 0x334   :  { %8566 = vrsqrt.f32 %v1459_v43  ;;  %v1456_v63 = vadd.f32 1e-05, %v1392_v37  ;;  %v1393_v58 = vsub.f32 %v1329_v41, %v1361_v52  ;;  %v1424_v52 = vsub.f32 %v9895_v48, %v1200_v57 }
 0x336   :  { %8568 = vrsqrt.f32 %v1456_v63  ;;  %v1457_v1 = vadd.f32 1e-05, %v1393_v58  ;;  %v1153_v39 = vpop.xlane.xlu0 %1152 }
 0x337   :  { %v10096_v62 = vmul.f32 0.0078125, %v1153_v39 }
 0x338   :  { %8570 = vrsqrt.f32 %v1457_v1  ;;  %v1155_v2 = vpop.xlane.xlu1 %1154 }
 0x339   :  { %v10099_v16 = vmul.f32 0.0078125, %v1155_v2  ;;  %v1366_v53 = vmul.f32 %v10096_v62, %v10096_v62 }
 0x33a   :  { %v1149_v32 = vpop.xlane.xlu0 %1148 }
 0x33b   :  { %v10102_v28 = vmul.f32 0.0078125, %v1149_v32  ;;  %v1367_v57 = vmul.f32 %v10099_v16, %v10099_v16 }
 0x33c   :  { %v8565_v21 = vpop.eup %8564  ;;  %v1151_v33 = vpop.xlane.xlu1 %1150 }
 0x33d   :  { %v1522_v19 = vmul.f32 %v8565_v21, %v1426_v4  ;;  %v10107_v12 = vmul.f32 0.0078125, %v1151_v33  ;;  %v1364_v7 = vmul.f32 %v10102_v28, %v10102_v28 }
 0x33e   :  { %v8567_v50 = vpop.eup %8566  ;;  %v1281_v38 = vpop.xlane.xlu0 %1280 }
 0x33f   :  { %v1523_v30 = vmul.f32 %v8567_v50, %v1427_v35  ;;  %v1334_v45 = vmul.f32 0.0078125, %v1281_v38  ;;  %v1560_v29 = vmul.f32 %v10079_v9, %v1522_v19  ;;  %v1365_v32 = vmul.f32 %v10107_v12, %v10107_v12 }
 0x340   :  { %v8569_v10 = vpop.eup %8568  ;;  %v1283_v17 = vpop.xlane.xlu1 %1282 }
 0x341   :  { %v1520_v0 = vmul.f32 %v8569_v10, %v1424_v52  ;;  %v1561_v43 = vmul.f32 %v10079_v9, %v1523_v30  ;;  %v1398_v37 = vsub.f32 %v1334_v45, %v1366_v53  ;;  %v1335_v41 = vmul.f32 0.0078125, %v1283_v17 }
 0x342   :  { %v8571_v48 = vpop.eup %8570  ;;  %v1277_v20 = vpop.xlane.xlu0 %1276  ;;  %v1598_v19 = vadd.f32 %v10087_v34, %v1560_v29 }
 0x343   :  { %v1521_v63 = vmul.f32 %v8571_v48, %v1425_v60  ;;  %v1558_v58 = vmul.f32 %v10079_v9, %v1520_v0  ;;  %v1462_v1 = vadd.f32 1e-05, %v1398_v37  ;;  %v1399_v39 = vsub.f32 %v1335_v41, %v1367_v57 }
 0x344   :  { %v1332_v2 = vmul.f32 0.0078125, %v1277_v20  ;;  %v1599_v4 = vadd.f32 %v10087_v34, %v1561_v43  ;;  %v1279_v21 = vpop.xlane.xlu1 %1278  ;;  %v1630_v57 = vmax.f32 %v1598_v19, 0.0 }
 0x345   :  { %v1559_v35 = vmul.f32 %v10079_v9, %v1521_v63  ;;  %v1596_v33 = vadd.f32 %v10087_v34, %v1558_v58  ;;  %8572 = vrsqrt.f32 %v1462_v1  ;;  %v1463_v50 = vadd.f32 1e-05, %v1399_v39 }
 0x346   :  { %v1396_v52 = vsub.f32 %v1332_v2, %v1364_v7  ;;  %v1333_v38 = vmul.f32 0.0078125, %v1279_v21  ;;  %v1161_v30 = vpop.xlane.xlu0 %1160  ;;  %v1631_v45 = vmax.f32 %v1599_v4, 0.0  ;;  %v1430_v58 = vsub.f32 %v9924_v22, %v10096_v62 }
 0x347   :  { %v1597_v10 = vadd.f32 %v10087_v34, %v1559_v35  ;;  %8574 = vrsqrt.f32 %v1463_v50  ;;  %v1628_v0 = vmax.f32 %v1596_v33, 0.0  ;;  %v10123_v29 = vmul.f32 0.0078125, %v1161_v30 }
 0x348   :  { %v1460_v60 = vadd.f32 1e-05, %v1396_v52  ;;  %v1397_v53 = vsub.f32 %v1333_v38, %v1365_v32  ;;  %v1163_v17 = vpop.xlane.xlu1 %1162  ;;  %v1659_v7 = vpack.c.bf16 %v1631_v45, %v1630_v57  ;;  %v1431_v21 = vsub.f32 %v9930_v61, %v10099_v16 }
 0x349   :  { %v1629_v43 = vmax.f32 %v1597_v10, 0.0  ;;  %v10125_v63 = vmul.f32 0.0078125, %v1163_v17  ;;  %v1370_v2 = vmul.f32 %v10123_v29, %v10123_v29  ;;  %v1428_v38 = vsub.f32 %v9934_v55, %v10102_v28 }
 0x34a   :  { %8576 = vrsqrt.f32 %v1460_v60  ;;  %v1461_v48 = vadd.f32 1e-05, %v1397_v53  ;;  %v1157_v37 = vpop.xlane.xlu0 %1156  ;;  %v1429_v30 = vsub.f32 %v9941_v6, %v10107_v12 }
 0x34b   :  { %v1658_v41 = vpack.c.bf16 %v1629_v43, %v1628_v0  ;;  %v10131_v4 = vmul.f32 0.0078125, %v1157_v37  ;;  %v1371_v52 = vmul.f32 %v10125_v63, %v10125_v63 }
 0x34c   :  { %8578 = vrsqrt.f32 %v1461_v48  ;;  %v1159_v20 = vpop.xlane.xlu1 %1158 }
 0x34d   :  { %8085 = vmatprep.mubr.bf16.mxu0 %v1658_v41  ;;  %v10135_v35 = vmul.f32 0.0078125, %v1159_v20  ;;  %v1368_v61 = vmul.f32 %v10131_v4, %v10131_v4 }
 0x34e   :  { %8086 = vmatmul.mubr.bf16.gmra.mrb[20].mxu0 %v1659_v7  ;;  %v1289_v1 = vpop.xlane.xlu0 %1288 }
 0x34f   :  { %v8573_v39 = vpop.eup %8572  ;;  %v1338_v32 = vmul.f32 0.0078125, %v1289_v1  ;;  %v1369_v0 = vmul.f32 %v10135_v35, %v10135_v35 }
 0x350   :  { %v1291_v33 = vpop.xlane.xlu1 %1290  ;;  %v1526_v19 = vmul.f32 %v8573_v39, %v1430_v58 }
 0x351   :  { %v8575_v50 = vpop.eup %8574  ;;  %v1402_v22 = vsub.f32 %v1338_v32, %v1370_v2  ;;  %v1339_v62 = vmul.f32 0.0078125, %v1291_v33 }
 0x352   :  { %v1285_v10 = vpop.xlane.xlu0 %1284  ;;  %v1527_v60 = vmul.f32 %v8575_v50, %v1431_v21  ;;  %v1564_v57 = vmul.f32 %v10079_v9, %v1526_v19 }
 0x353   :  { %v1466_v16 = vadd.f32 1e-05, %v1402_v22  ;;  %v1403_v45 = vsub.f32 %v1339_v62, %v1371_v52  ;;  %v1336_v17 = vmul.f32 0.0078125, %v1285_v10 }
 0x354   :  { %v8577_v53 = vpop.eup %8576  ;;  %v1287_v43 = vpop.xlane.xlu1 %1286  ;;  %v1565_v55 = vmul.f32 %v10079_v9, %v1527_v60  ;;  %v1602_v19 = vadd.f32 %v10087_v34, %v1564_v57 }
 0x355   :  { %v1524_v48 = vmul.f32 %v8577_v53, %v1428_v38  ;;  %8580 = vrsqrt.f32 %v1466_v16  ;;  %v1467_v6 = vadd.f32 1e-05, %v1403_v45  ;;  %v1400_v12 = vsub.f32 %v1336_v17, %v1368_v61 }
 0x356   :  { %v8579_v28 = vpop.eup %8578  ;;  %v1337_v37 = vmul.f32 0.0078125, %v1287_v43  ;;  %v1169_v41 = vpop.xlane.xlu0 %1168  ;;  %v1603_v39 = vadd.f32 %v10087_v34, %v1565_v55  ;;  %v1634_v53 = vmax.f32 %v1602_v19, 0.0  ;;  %v1434_v61 = vsub.f32 %v9954_v44, %v10123_v29 }
 0x357   :  { %v1525_v7 = vmul.f32 %v8579_v28, %v1429_v30  ;;  %v1562_v20 = vmul.f32 %v10079_v9, %v1524_v48  ;;  %8582 = vrsqrt.f32 %v1467_v6  ;;  %v1464_v58 = vadd.f32 1e-05, %v1400_v12 }
 0x358   :  { %v1401_v1 = vsub.f32 %v1337_v37, %v1369_v0  ;;  %v1171_v2 = vpop.xlane.xlu1 %1170  ;;  %v10155_v22 = vmul.f32 0.0078125, %v1169_v41  ;;  %v1635_v62 = vmax.f32 %v1603_v39, 0.0  ;;  %v1435_v55 = vsub.f32 %v9957_v13, %v10125_v63 }
 0x359   :  { %v1563_v32 = vmul.f32 %v10079_v9, %v1525_v7  ;;  %v1600_v21 = vadd.f32 %v10087_v34, %v1562_v20  ;;  %8584 = vrsqrt.f32 %v1464_v58  ;;  %v10157_v60 = vmul.f32 0.0078125, %v1171_v2 }
 0x35a   :  { %v1465_v33 = vadd.f32 1e-05, %v1401_v1  ;;  %v1165_v50 = vpop.xlane.xlu0 %1164  ;;  %v1374_v0 = vmul.f32 %v10155_v22, %v10155_v22  ;;  %v1661_v57 = vpack.c.bf16 %v1635_v62, %v1634_v53  ;;  %v1432_v7 = vsub.f32 %v9961_v36, %v10131_v4 }
 0x35b   :  { %v1601_v52 = vadd.f32 %v10087_v34, %v1563_v32  ;;  %v1632_v30 = vmax.f32 %v1600_v21, 0.0  ;;  %v10163_v43 = vmul.f32 0.0078125, %v1165_v50  ;;  %v1375_v44 = vmul.f32 %v10157_v60, %v10157_v60 }
 0x35c   :  { %8586 = vrsqrt.f32 %v1465_v33  ;;  %v1167_v38 = vpop.xlane.xlu1 %1166  ;;  %v1433_v20 = vsub.f32 %v9965_v8, %v10135_v35 }
 0x35d   :  { %v1633_v10 = vmax.f32 %v1601_v52, 0.0  ;;  %v10167_v28 = vmul.f32 0.0078125, %v1167_v38  ;;  %v1372_v1 = vmul.f32 %v10163_v43, %v10163_v43 }
 0x35e   :  { %v1297_v16 = vpop.xlane.xlu0 %1296 }
 0x35f   :  { %v1660_v45 = vpack.c.bf16 %v1633_v10, %v1632_v30  ;;  %v8581_v17 = vpop.eup %8580  ;;  %v1342_v48 = vmul.f32 0.0078125, %v1297_v16  ;;  %v1373_v21 = vmul.f32 %v10167_v28, %v10167_v28 }
 0x360   :  { %v1299_v6 = vpop.xlane.xlu1 %1298  ;;  %v1530_v12 = vmul.f32 %v8581_v17, %v1434_v61 }
 0x361   :  { %8089 = vmatprep.mubr.bf16.mxu0 %v1660_v45  ;;  %v8583_v37 = vpop.eup %8582  ;;  %v1406_v29 = vsub.f32 %v1342_v48, %v1374_v0  ;;  %v1343_v41 = vmul.f32 0.0078125, %v1299_v6 }
 0x362   :  { %8090 = vmatmul.mubr.bf16.gmra.mrb[24].mxu0 %v1661_v57  ;;  %v1293_v58 = vpop.xlane.xlu0 %1292  ;;  %v1531_v13 = vmul.f32 %v8583_v37, %v1435_v55  ;;  %v1568_v50 = vmul.f32 %v10079_v9, %v1530_v12 }
 0x363   :  { %v8585_v63 = vpop.eup %8584  ;;  %v1470_v39 = vadd.f32 1e-05, %v1406_v29  ;;  %v1407_v2 = vsub.f32 %v1343_v41, %v1375_v44  ;;  %v1340_v32 = vmul.f32 0.0078125, %v1293_v58 }
 0x364   :  { %v1295_v33 = vpop.xlane.xlu1 %1294  ;;  %v1528_v19 = vmul.f32 %v8585_v63, %v1432_v7  ;;  %v1569_v36 = vmul.f32 %v10079_v9, %v1531_v13  ;;  %v1606_v48 = vadd.f32 %v10087_v34, %v1568_v50 }
 0x365   :  { %8588 = vrsqrt.f32 %v1470_v39  ;;  %v1471_v8 = vadd.f32 1e-05, %v1407_v2  ;;  %v1404_v35 = vsub.f32 %v1340_v32, %v1372_v1  ;;  %v1341_v52 = vmul.f32 0.0078125, %v1295_v33 }
 0x366   :  { %v8587_v4 = vpop.eup %8586  ;;  %v1177_v62 = vpop.xlane.xlu0 %1176  ;;  %v1566_v30 = vmul.f32 %v10079_v9, %v1528_v19  ;;  %v1607_v61 = vadd.f32 %v10087_v34, %v1569_v36  ;;  %v1638_v7 = vmax.f32 %v1606_v48, 0.0 }
 0x367   :  { %v1529_v38 = vmul.f32 %v8587_v4, %v1433_v20  ;;  %8590 = vrsqrt.f32 %v1471_v8  ;;  %v1468_v10 = vadd.f32 1e-05, %v1404_v35  ;;  %v1405_v53 = vsub.f32 %v1341_v52, %v1373_v21 }
 0x368   :  { %v1179_v16 = vpop.xlane.xlu1 %1178  ;;  %v1604_v17 = vadd.f32 %v10087_v34, %v1566_v30  ;;  %v10187_v6 = vmul.f32 0.0078125, %v1177_v62  ;;  %v1639_v12 = vmax.f32 %v1607_v61, 0.0  ;;  %v1438_v20 = vsub.f32 %v9978_v11, %v10155_v22 }
 0x369   :  { %v1567_v45 = vmul.f32 %v10079_v9, %v1529_v38  ;;  %8592 = vrsqrt.f32 %v1468_v10  ;;  %v1469_v0 = vadd.f32 1e-05, %v1405_v53  ;;  %v10189_v41 = vmul.f32 0.0078125, %v1179_v16 }
 0x36a   :  { %v1173_v57 = vpop.xlane.xlu0 %1172  ;;  %v1636_v44 = vmax.f32 %v1604_v17, 0.0  ;;  %v1378_v1 = vmul.f32 %v10187_v6, %v10187_v6  ;;  %v1663_v32 = vpack.c.bf16 %v1639_v12, %v1638_v7  ;;  %v1439_v21 = vsub.f32 %v9981_v42, %v10157_v60 }
 0x36b   :  { %v1605_v55 = vadd.f32 %v10087_v34, %v1567_v45  ;;  %8594 = vrsqrt.f32 %v1469_v0  ;;  %v10195_v39 = vmul.f32 0.0078125, %v1173_v57  ;;  %v1379_v11 = vmul.f32 %v10189_v41, %v10189_v41 }
 0x36c   :  { %v1175_v37 = vpop.xlane.xlu1 %1174  ;;  %v1436_v8 = vsub.f32 %v9985_v31, %v10163_v43  ;;  %v1437_v35 = vsub.f32 %v9989_v59, %v10167_v28 }
 0x36d   :  { %v1637_v29 = vmax.f32 %v1605_v55, 0.0  ;;  %v10199_v33 = vmul.f32 0.0078125, %v1175_v37  ;;  %v1376_v62 = vmul.f32 %v10195_v39, %v10195_v39 }
 0x36e   :  { %v1305_v58 = vpop.xlane.xlu0 %1304 }
 0x36f   :  { %v1662_v13 = vpack.c.bf16 %v1637_v29, %v1636_v44  ;;  %v8589_v63 = vpop.eup %8588  ;;  %v1346_v2 = vmul.f32 0.0078125, %v1305_v58  ;;  %v1377_v53 = vmul.f32 %v10199_v33, %v10199_v33 }
 0x370   :  { %v1307_v19 = vpop.xlane.xlu1 %1306  ;;  %v1534_v50 = vmul.f32 %v8589_v63, %v1438_v20 }
 0x371   :  { %8093 = vmatprep.mubr.bf16.mxu0 %v1662_v13  ;;  %v8591_v36 = vpop.eup %8590  ;;  %v1410_v22 = vsub.f32 %v1346_v2, %v1378_v1  ;;  %v1347_v4 = vmul.f32 0.0078125, %v1307_v19 }
 0x372   :  { %8094 = vmatmul.mubr.bf16.gmra.mrb[28].mxu0 %v1663_v32  ;;  %v1301_v52 = vpop.xlane.xlu0 %1300  ;;  %v1535_v42 = vmul.f32 %v8591_v36, %v1439_v21  ;;  %v1572_v45 = vmul.f32 %v10079_v9, %v1534_v50 }
 0x373   :  { %v8593_v60 = vpop.eup %8592  ;;  %v1474_v38 = vadd.f32 1e-05, %v1410_v22  ;;  %v1411_v30 = vsub.f32 %v1347_v4, %v1379_v11  ;;  %v1344_v10 = vmul.f32 0.0078125, %v1301_v52  ;;  %v1442_v11 = vsub.f32 %v10002_v14, %v10187_v6 }
 0x374   :  { %v1303_v61 = vpop.xlane.xlu1 %1302  ;;  %v1532_v16 = vmul.f32 %v8593_v60, %v1436_v8  ;;  %v1573_v31 = vmul.f32 %v10079_v9, %v1535_v42  ;;  %v1610_v58 = vadd.f32 %v10087_v34, %v1572_v45  ;;  %v1441_v45 = vsub.f32 %v10013_v23, %v10199_v33 }
 0x375   :  { %v8595_v43 = vpop.eup %8594  ;;  %8596 = vrsqrt.f32 %v1474_v38  ;;  %v1475_v59 = vadd.f32 1e-05, %v1411_v30  ;;  %v1408_v28 = vsub.f32 %v1344_v10, %v1376_v62  ;;  %v1345_v17 = vmul.f32 0.0078125, %v1303_v61 }
 0x376   :  { %v1185_v0 = vpop.xlane.xlu0 %1184  ;;  %v1533_v48 = vmul.f32 %v8595_v43, %v1437_v35  ;;  %v1570_v57 = vmul.f32 %v10079_v9, %v1532_v16  ;;  %v1611_v37 = vadd.f32 %v10087_v34, %v1573_v31  ;;  %v1642_v36 = vmax.f32 %v1610_v58, 0.0 }
 0x377   :  { %8598 = vrsqrt.f32 %v1475_v59  ;;  %v1472_v55 = vadd.f32 1e-05, %v1408_v28  ;;  %v1409_v12 = vsub.f32 %v1345_v17, %v1377_v53  ;;  %v10219_v1 = vmul.f32 0.0078125, %v1185_v0 }
 0x378   :  { %v1187_v44 = vpop.xlane.xlu1 %1186  ;;  %v1571_v29 = vmul.f32 %v10079_v9, %v1533_v48  ;;  %v1608_v7 = vadd.f32 %v10087_v34, %v1570_v57  ;;  %v1643_v2 = vmax.f32 %v1611_v37, 0.0  ;;  %v1443_v62 = vsub.f32 %v10005_v27, %v10189_v41 }
 0x379   :  { %8600 = vrsqrt.f32 %v1472_v55  ;;  %v1473_v20 = vadd.f32 1e-05, %v1409_v12  ;;  %v10221_v50 = vmul.f32 0.0078125, %v1187_v44  ;;  %v1382_v35 = vmul.f32 %v10219_v1, %v10219_v1 }
 0x37a   :  { %v1181_v13 = vpop.xlane.xlu0 %1180  ;;  %v1609_v63 = vadd.f32 %v10087_v34, %v1571_v29  ;;  %v1640_v21 = vmax.f32 %v1608_v7, 0.0  ;;  %v1665_v60 = vpack.c.bf16 %v1643_v2, %v1642_v36  ;;  %v1440_v16 = vsub.f32 %v10009_v46, %v10195_v39 }
 0x37b   :  { %8602 = vrsqrt.f32 %v1473_v20  ;;  %v10227_v52 = vmul.f32 0.0078125, %v1181_v13  ;;  %v1383_v14 = vmul.f32 %v10221_v50, %v10221_v50 }
 0x37c   :  { %v1183_v32 = vpop.xlane.xlu1 %1182  ;;  %v1641_v19 = vmax.f32 %v1609_v63, 0.0 }
 0x37d   :  { %v10231_v38 = vmul.f32 0.0078125, %v1183_v32  ;;  %v1380_v43 = vmul.f32 %v10227_v52, %v10227_v52 }
 0x37e   :  { %v1313_v22 = vpop.xlane.xlu0 %1312  ;;  %v1664_v4 = vpack.c.bf16 %v1641_v19, %v1640_v21 }
 0x37f   :  { %v8597_v8 = vpop.eup %8596  ;;  %v1350_v42 = vmul.f32 0.0078125, %v1313_v22  ;;  %v1381_v0 = vmul.f32 %v10231_v38, %v10231_v38 }
 0x380   :  { %v1315_v30 = vpop.xlane.xlu1 %1314  ;;  %8097 = vmatprep.mubr.bf16.mxu0 %v1664_v4  ;;  %v1538_v10 = vmul.f32 %v8597_v8, %v1442_v11 }
 0x381   :  { %v8599_v53 = vpop.eup %8598  ;;  %v1414_v6 = vsub.f32 %v1350_v42, %v1382_v35  ;;  %v1351_v61 = vmul.f32 0.0078125, %v1315_v30  ;;  %8098 = vmatmul.mubr.bf16.gmra.mrb[32].mxu0 %v1665_v60 }
 0x382   :  { %v1309_v31 = vpop.xlane.xlu0 %1308  ;;  %v1539_v27 = vmul.f32 %v8599_v53, %v1443_v62  ;;  %v1576_v55 = vmul.f32 %v10079_v9, %v1538_v10  ;;  %v1446_v62 = vsub.f32 %v10026_v15, %v10219_v1 }
 0x383   :  { %v8601_v41 = vpop.eup %8600  ;;  %v1478_v59 = vadd.f32 1e-05, %v1414_v6  ;;  %v1415_v28 = vsub.f32 %v1351_v61, %v1383_v14  ;;  %v1348_v17 = vmul.f32 0.0078125, %v1309_v31 }
 0x384   :  { %v1311_v48 = vpop.xlane.xlu1 %1310  ;;  %v1536_v57 = vmul.f32 %v8601_v41, %v1440_v16  ;;  %v1577_v46 = vmul.f32 %v10079_v9, %v1539_v27  ;;  %v1614_v21 = vadd.f32 %v10087_v34, %v1576_v55 }
 0x385   :  { %v8603_v39 = vpop.eup %8602  ;;  %8604 = vrsqrt.f32 %v1478_v59  ;;  %v1479_v23 = vadd.f32 1e-05, %v1415_v28  ;;  %v1412_v33 = vsub.f32 %v1348_v17, %v1380_v43  ;;  %v1349_v12 = vmul.f32 0.0078125, %v1311_v48 }
 0x386   :  { %v1193_v37 = vpop.xlane.xlu0 %1192  ;;  %v1537_v44 = vmul.f32 %v8603_v39, %v1441_v45  ;;  %v1574_v29 = vmul.f32 %v10079_v9, %v1536_v57  ;;  %v1615_v58 = vadd.f32 %v10087_v34, %v1577_v46  ;;  %v1646_v60 = vmax.f32 %v1614_v21, 0.0 }
 0x387   :  { %8606 = vrsqrt.f32 %v1479_v23  ;;  %v1476_v7 = vadd.f32 1e-05, %v1412_v33  ;;  %v1413_v20 = vsub.f32 %v1349_v12, %v1381_v0  ;;  %v10257_v14 = vmul.f32 0.0078125, %v1193_v37 }
 0x388   :  { %v1195_v13 = vpop.xlane.xlu1 %1194  ;;  %v1575_v63 = vmul.f32 %v10079_v9, %v1537_v44  ;;  %v1612_v2 = vadd.f32 %v10087_v34, %v1574_v29  ;;  %v1647_v22 = vmax.f32 %v1615_v58, 0.0  ;;  %v1447_v45 = vsub.f32 %v10029_v24, %v10221_v50 }
 0x389   :  { %8608 = vrsqrt.f32 %v1476_v7  ;;  %v1477_v32 = vadd.f32 1e-05, %v1413_v20  ;;  %v10263_v31 = vmul.f32 0.0078125, %v1195_v13  ;;  %v1444_v28 = vsub.f32 %v10033_v25, %v10227_v52 }
 0x38a   :  { %v1189_v19 = vpop.xlane.xlu0 %1188  ;;  %v1613_v36 = vadd.f32 %v10087_v34, %v1575_v63  ;;  %v1644_v8 = vmax.f32 %v1612_v2, 0.0  ;;  %v1667_v16 = vpack.c.bf16 %v1647_v22, %v1646_v60  ;;  %v1445_v17 = vsub.f32 %v10037_v5, %v10231_v38 }
 0x38b   :  { %8610 = vrsqrt.f32 %v1477_v32  ;;  %v10251_v11 = vmul.f32 0.0078125, %v1189_v19  ;;  %v1386_v48 = vmul.f32 %v10257_v14, %v10257_v14  ;;  %v1387_v39 = vmul.f32 %v10263_v31, %v10263_v31 }
 0x38c   :  { %v1191_v4 = vpop.xlane.xlu1 %1190  ;;  %v1645_v35 = vmax.f32 %v1613_v36, 0.0 }
 0x38d   :  { %v10253_v42 = vmul.f32 0.0078125, %v1191_v4  ;;  %v1384_v6 = vmul.f32 %v10251_v11, %v10251_v11 }
 0x38e   :  { %v1317_v30 = vpop.xlane.xlu0 %1316  ;;  %v1666_v10 = vpack.c.bf16 %v1645_v35, %v1644_v8  ;;  %v1448_v8 = vsub.f32 %v10057_v49, %v10251_v11  ;;  %v1451_v49 = vsub.f32 %v10053_v51, %v10263_v31 }
 0x38f   :  { %v8605_v53 = vpop.eup %8604  ;;  %v1352_v61 = vmul.f32 0.0078125, %v1317_v30  ;;  %v1385_v15 = vmul.f32 %v10253_v42, %v10253_v42  ;;  %v1449_v30 = vsub.f32 %v10061_v3, %v10253_v42 }
 0x390   :  { %v1319_v27 = vpop.xlane.xlu1 %1318  ;;  %8101 = vmatprep.mubr.bf16.mxu0 %v1666_v10  ;;  %v1542_v41 = vmul.f32 %v8605_v53, %v1446_v62 }
 0x391   :  { %v8607_v43 = vpop.eup %8606  ;;  %v1416_v1 = vsub.f32 %v1352_v61, %v1384_v6  ;;  %v1353_v59 = vmul.f32 0.0078125, %v1319_v27  ;;  %8102 = vmatmul.mubr.bf16.gmra.mrb[36].mxu0 %v1667_v16  ;;  %v1450_v6 = vsub.f32 %v10050_v54, %v10257_v14 }
 0x392   :  { %v1321_v0 = vpop.xlane.xlu0 %1320  ;;  %v1543_v24 = vmul.f32 %v8607_v43, %v1447_v45  ;;  %v1580_v12 = vmul.f32 %v10079_v9, %v1542_v41 }
 0x393   :  { %v8609_v50 = vpop.eup %8608  ;;  %v1480_v57 = vadd.f32 1e-05, %v1416_v1  ;;  %v1417_v55 = vsub.f32 %v1353_v59, %v1385_v15  ;;  %v1354_v46 = vmul.f32 0.0078125, %v1321_v0 }
 0x394   :  { %v1323_v23 = vpop.xlane.xlu1 %1322  ;;  %v1540_v33 = vmul.f32 %v8609_v50, %v1444_v28  ;;  %v1581_v25 = vmul.f32 %v10079_v9, %v1543_v24  ;;  %v1618_v32 = vadd.f32 %v10087_v34, %v1580_v12  ;;  %v10302_v24 = vld [vmem:[%s14260_s6 + $0x1] ss:$0 sm:$0xff] }
 0x395   :  { %v8611_v52 = vpop.eup %8610  ;;  %8612 = vrsqrt.f32 %v1480_v57  ;;  %v1481_v5 = vadd.f32 1e-05, %v1417_v55  ;;  %v1418_v38 = vsub.f32 %v1354_v46, %v1386_v48  ;;  %v1355_v37 = vmul.f32 0.0078125, %v1323_v23  ;;  %v8444_v12 = vld [vmem:[%s14259_s5 + $0x80] sm:$0xff]  }
 0x396   :  { %v1541_v44 = vmul.f32 %v8611_v52, %v1445_v17  ;;  %v1578_v29 = vmul.f32 %v10079_v9, %v1540_v33  ;;  %v1619_v58 = vadd.f32 %v10087_v34, %v1581_v25  ;;  %v1650_v4 = vmax.f32 %v1618_v32, 0.0  ;;  %8113 = vmatprep.subr.bf16.mxu1 %v8444_v12 }
 0x397   :  { %8614 = vrsqrt.f32 %v1481_v5  ;;  %v1482_v7 = vadd.f32 1e-05, %v1418_v38  ;;  %v1419_v20 = vsub.f32 %v1355_v37, %v1387_v39  ;;  %8114 = vmatpush3.bf16.msra.mxu1 %v8444_v12  ;;  %v8445_v5 = vld [vmem:[%s14259_s5 + $0x88] sm:$0xff]  }
 0x398   :  { %v1579_v13 = vmul.f32 %v10079_v9, %v1541_v44  ;;  %v1616_v63 = vadd.f32 %v10087_v34, %v1578_v29  ;;  %v1651_v19 = vmax.f32 %v1619_v58, 0.0  ;;  %8115 = vmatprep.subr.bf16.mxu1 %v8445_v5 }
 0x399   :  { %8616 = vrsqrt.f32 %v1482_v7  ;;  %v1483_v2 = vadd.f32 1e-05, %v1419_v20 }
 0x39a   :  { %v1617_v21 = vadd.f32 %v10087_v34, %v1579_v13  ;;  %v1648_v36 = vmax.f32 %v1616_v63, 0.0  ;;  %v1669_v62 = vpack.c.bf16 %v1651_v19, %v1650_v4  ;;  %v8446_v63 = vld [vmem:[%s14259_s5 + $0x90] sm:$0xff]  }
 0x39b   :  { %8618 = vrsqrt.f32 %v1483_v2  ;;  %8116 = vmatpush3.bf16.msra.mxu1 %v8445_v5 }
 0x39c   :  { %v1649_v22 = vmax.f32 %v1617_v21, 0.0  ;;  %8117 = vmatprep.subr.bf16.mxu1 %v8446_v63  ;;  %v8447_v21 = vld [vmem:[%s14259_s5 + $0x98] sm:$0xff]  }
 0x39e   :  { %v1668_v35 = vpack.c.bf16 %v1649_v22, %v1648_v36  ;;  %v8448_v22 = vld [vmem:[%s14259_s5 + $0xa0] sm:$0xff]  }
 0x39f   :  { %v8613_v60 = vpop.eup %8612  ;;  %8118 = vmatpush3.bf16.msra.mxu1 %v8446_v63 }
 0x3a0   :  { %8105 = vmatprep.mubr.bf16.mxu0 %v1668_v35  ;;  %v1544_v10 = vmul.f32 %v8613_v60, %v1448_v8  ;;  %8119 = vmatprep.subr.bf16.mxu1 %v8447_v21  ;;  %v8449_v8 = vld [vmem:[%s14259_s5 + $0xa8] sm:$0xff]  }
 0x3a1   :  { %v8615_v53 = vpop.eup %8614  ;;  %8106 = vmatmul.mubr.bf16.gmra.mrb[40].mxu0 %v1669_v62 }
 0x3a2   :  { %v1545_v61 = vmul.f32 %v8615_v53, %v1449_v30  ;;  %v1582_v16 = vmul.f32 %v10079_v9, %v1544_v10  ;;  %v8450_v53 = vld [vmem:[%s14259_s5 + $0xb0] sm:$0xff]  }
 0x3a3   :  { %v8617_v45 = vpop.eup %8616  ;;  %8120 = vmatpush3.bf16.msra.mxu1 %v8447_v21 }
 0x3a4   :  { %v1583_v11 = vmul.f32 %v10079_v9, %v1545_v61  ;;  %v1620_v27 = vadd.f32 %v10087_v34, %v1582_v16  ;;  %v1546_v41 = vmul.f32 %v8617_v45, %v1450_v6  ;;  %8121 = vmatprep.subr.bf16.mxu1 %v8448_v22  ;;  %v8451_v16 = vld [vmem:[%s14259_s5 + $0xb8] sm:$0xff]  }
 0x3a5   :  { %v8619_v3 = vpop.eup %8618 }
 0x3a6   :  { %v1621_v42 = vadd.f32 %v10087_v34, %v1583_v11  ;;  %v1547_v43 = vmul.f32 %v8619_v3, %v1451_v49  ;;  %v1584_v15 = vmul.f32 %v10079_v9, %v1546_v41  ;;  %v1652_v1 = vmax.f32 %v1620_v27, 0.0 }
 0x3a7   :  { %8122 = vmatpush3.bf16.msra.mxu1 %v8448_v22 }
 0x3a8   :  { %v1653_v54 = vmax.f32 %v1621_v42, 0.0  ;;  %v1585_v14 = vmul.f32 %v10079_v9, %v1547_v43  ;;  %v1622_v59 = vadd.f32 %v10087_v34, %v1584_v15  ;;  %8123 = vmatprep.subr.bf16.mxu1 %v8449_v8 }
 0x3aa   :  { %v1670_v28 = vpack.c.bf16 %v1653_v54, %v1652_v1  ;;  %v1623_v51 = vadd.f32 %v10087_v34, %v1585_v14  ;;  %v1654_v31 = vmax.f32 %v1622_v59, 0.0 }
 0x3ab   :  { %8124 = vmatpush3.bf16.msra.mxu1 %v8449_v8 }
 0x3ac   :  { %8109 = vmatprep.mubr.bf16.mxu0 %v1670_v28  ;;  %v1655_v17 = vmax.f32 %v1623_v51, 0.0  ;;  %8125 = vmatprep.subr.bf16.mxu1 %v8450_v53 }
 0x3ae   :  { %v1671_v0 = vpack.c.bf16 %v1655_v17, %v1654_v31 }
 0x3af   :  { %8126 = vmatpush3.bf16.msra.mxu1 %v8450_v53 }
 0x3b0   :  { %8110 = vmatmul.mubr.bf16.gmra.mrb[44].mxu0 %v1671_v0  ;;  %8127 = vmatprep.subr.bf16.mxu1 %v8451_v16 }
 0x3b3   :  { %8128 = vmatpush3.bf16.msra.mxu1 %v8451_v16 }
 0x404   :  { %v8083_v50 = vpop.f32.mrb[16].mxu0 }
 0x405   :  { %v10305_v48 = vadd.f32 %v8083_v50, %v10302_v24  ;;  %v1779_v9 = vpop.f32.mrb[17].mxu0 }
 0x406   :  { %v8084_v57 = vpop.f32.mrb[18].mxu0  ;;  %v10312_v46 = vadd.f32 %v10302_v24, %v1779_v9 }
 0x407   :  { %v10308_v55 = vadd.f32 %v8084_v57, %v10302_v24  ;;  %1914 = vadd.xlane.f32.xlu0 %v10305_v48  ;;  %v1782_v34 = vpop.f32.mrb[19].mxu0  ;;  %v2008_v23 = vmul.f32 %v10305_v48, %v10305_v48 }
 0x408   :  { %v10316_v39 = vadd.f32 %v10302_v24, %v1782_v34  ;;  %v2006_v25 = vmul.f32 %v10312_v46, %v10312_v46 }
 0x409   :  { %1916 = vadd.xlane.f32.xlu1 %v10308_v55  ;;  %v2009_v33 = vmul.f32 %v10308_v55, %v10308_v55 }
 0x40a   :  { %v2007_v52 = vmul.f32 %v10316_v39, %v10316_v39 }
 0x40b   :  { %1910 = vadd.xlane.f32.xlu0 %v10312_v46 }
 0x40d   :  { %1912 = vadd.xlane.f32.xlu1 %v10316_v39 }
 0x40f   :  { %2042 = vadd.xlane.f32.xlu0 %v2008_v23 }
 0x411   :  { %2044 = vadd.xlane.f32.xlu1 %v2009_v33 }
 0x413   :  { %2038 = vadd.xlane.f32.xlu0 %v2006_v25 }
 0x415   :  { %2040 = vadd.xlane.f32.xlu1 %v2007_v52 }
 0x421   :  { %v8087_v38 = vpop.f32.mrb[20].mxu0 }
 0x422   :  { %v10335_v37 = vadd.f32 %v8087_v38, %v10302_v24  ;;  %v1795_v44 = vpop.f32.mrb[21].mxu0 }
 0x423   :  { %v8088_v29 = vpop.f32.mrb[22].mxu0  ;;  %v10342_v58 = vadd.f32 %v10302_v24, %v1795_v44 }
 0x424   :  { %v10338_v7 = vadd.f32 %v8088_v29, %v10302_v24  ;;  %1922 = vadd.xlane.f32.xlu0 %v10335_v37  ;;  %v1798_v20 = vpop.f32.mrb[23].mxu0  ;;  %v2012_v2 = vmul.f32 %v10335_v37, %v10335_v37 }
 0x425   :  { %v10346_v13 = vadd.f32 %v10302_v24, %v1798_v20  ;;  %v2010_v19 = vmul.f32 %v10342_v58, %v10342_v58 }
 0x426   :  { %1924 = vadd.xlane.f32.xlu1 %v10338_v7  ;;  %v2013_v32 = vmul.f32 %v10338_v7, %v10338_v7 }
 0x427   :  { %v2011_v36 = vmul.f32 %v10346_v13, %v10346_v13 }
 0x428   :  { %1918 = vadd.xlane.f32.xlu0 %v10342_v58 }
 0x42a   :  { %1920 = vadd.xlane.f32.xlu1 %v10346_v13 }
 0x42c   :  { %2050 = vadd.xlane.f32.xlu0 %v2012_v2 }
 0x42e   :  { %2052 = vadd.xlane.f32.xlu1 %v2013_v32 }
 0x430   :  { %2046 = vadd.xlane.f32.xlu0 %v2010_v19 }
 0x432   :  { %2048 = vadd.xlane.f32.xlu1 %v2011_v36 }
 0x435   :  { %v8091_v4 = vpop.f32.mrb[24].mxu0 }
 0x436   :  { %v10371_v35 = vadd.f32 %v8091_v4, %v10302_v24  ;;  %v1811_v60 = vpop.f32.mrb[25].mxu0 }
 0x437   :  { %v8092_v62 = vpop.f32.mrb[26].mxu0  ;;  %v10381_v6 = vadd.f32 %v10302_v24, %v1811_v60 }
 0x438   :  { %v10374_v30 = vadd.f32 %v8092_v62, %v10302_v24  ;;  %1930 = vadd.xlane.f32.xlu0 %v10371_v35  ;;  %v1814_v10 = vpop.f32.mrb[27].mxu0  ;;  %v2016_v45 = vmul.f32 %v10371_v35, %v10371_v35 }
 0x439   :  { %v10385_v61 = vadd.f32 %v10302_v24, %v1814_v10  ;;  %v2014_v11 = vmul.f32 %v10381_v6, %v10381_v6 }
 0x43a   :  { %1932 = vadd.xlane.f32.xlu1 %v10374_v30  ;;  %v2017_v49 = vmul.f32 %v10374_v30, %v10374_v30 }
 0x43b   :  { %v2015_v27 = vmul.f32 %v10385_v61, %v10385_v61 }
 0x43c   :  { %1926 = vadd.xlane.f32.xlu0 %v10381_v6 }
 0x43e   :  { %1928 = vadd.xlane.f32.xlu1 %v10385_v61 }
 0x440   :  { %2058 = vadd.xlane.f32.xlu0 %v2016_v45 }
 0x442   :  { %2060 = vadd.xlane.f32.xlu1 %v2017_v49 }
 0x444   :  { %2054 = vadd.xlane.f32.xlu0 %v2014_v11 }
 0x445   :  { %v8095_v41 = vpop.f32.mrb[28].mxu0 }
 0x446   :  { %v10401_v3 = vadd.f32 %v8095_v41, %v10302_v24  ;;  %2056 = vadd.xlane.f32.xlu1 %v2015_v27  ;;  %v1827_v42 = vpop.f32.mrb[29].mxu0 }
 0x447   :  { %v8096_v43 = vpop.f32.mrb[30].mxu0  ;;  %v10408_v54 = vadd.f32 %v10302_v24, %v1827_v42 }
 0x448   :  { %v10404_v15 = vadd.f32 %v8096_v43, %v10302_v24  ;;  %1938 = vadd.xlane.f32.xlu0 %v10401_v3  ;;  %v1830_v1 = vpop.f32.mrb[31].mxu0  ;;  %v2020_v59 = vmul.f32 %v10401_v3, %v10401_v3 }
 0x449   :  { %v10412_v14 = vadd.f32 %v10302_v24, %v1830_v1  ;;  %v2018_v51 = vmul.f32 %v10408_v54, %v10408_v54 }
 0x44a   :  { %1940 = vadd.xlane.f32.xlu1 %v10404_v15  ;;  %v2021_v28 = vmul.f32 %v10404_v15, %v10404_v15 }
 0x44b   :  { %v2019_v31 = vmul.f32 %v10412_v14, %v10412_v14 }
 0x44c   :  { %1934 = vadd.xlane.f32.xlu0 %v10408_v54 }
 0x44e   :  { %1936 = vadd.xlane.f32.xlu1 %v10412_v14 }
 0x450   :  { %2066 = vadd.xlane.f32.xlu0 %v2020_v59 }
 0x452   :  { %2068 = vadd.xlane.f32.xlu1 %v2021_v28 }
 0x454   :  { %2062 = vadd.xlane.f32.xlu0 %v2018_v51  ;;  %v8099_v17 = vpop.f32.mrb[32].mxu0 }
 0x455   :  { %v10425_v0 = vadd.f32 %v8099_v17, %v10302_v24  ;;  %v1843_v50 = vpop.f32.mrb[33].mxu0 }
 0x456   :  { %2064 = vadd.xlane.f32.xlu1 %v2019_v31  ;;  %v8100_v9 = vpop.f32.mrb[34].mxu0  ;;  %v10432_v23 = vadd.f32 %v10302_v24, %v1843_v50 }
 0x457   :  { %v10428_v57 = vadd.f32 %v8100_v9, %v10302_v24  ;;  %v1846_v34 = vpop.f32.mrb[35].mxu0  ;;  %v2024_v12 = vmul.f32 %v10425_v0, %v10425_v0 }
 0x458   :  { %1946 = vadd.xlane.f32.xlu0 %v10425_v0  ;;  %v10436_v33 = vadd.f32 %v10302_v24, %v1846_v34  ;;  %v2022_v52 = vmul.f32 %v10432_v23, %v10432_v23 }
 0x459   :  { %v2025_v25 = vmul.f32 %v10428_v57, %v10428_v57 }
 0x45a   :  { %1948 = vadd.xlane.f32.xlu1 %v10428_v57  ;;  %v2023_v5 = vmul.f32 %v10436_v33, %v10436_v33 }
 0x45c   :  { %1942 = vadd.xlane.f32.xlu0 %v10432_v23 }
 0x45e   :  { %1944 = vadd.xlane.f32.xlu1 %v10436_v33 }
 0x460   :  { %2074 = vadd.xlane.f32.xlu0 %v2024_v12 }
 0x462   :  { %2076 = vadd.xlane.f32.xlu1 %v2025_v25 }
 0x464   :  { %2070 = vadd.xlane.f32.xlu0 %v2022_v52  ;;  %v8103_v38 = vpop.f32.mrb[36].mxu0 }
 0x465   :  { %v10449_v44 = vadd.f32 %v8103_v38, %v10302_v24  ;;  %v1859_v29 = vpop.f32.mrb[37].mxu0 }
 0x466   :  { %2072 = vadd.xlane.f32.xlu1 %v2023_v5  ;;  %v8104_v20 = vpop.f32.mrb[38].mxu0  ;;  %v10456_v32 = vadd.f32 %v10302_v24, %v1859_v29 }
 0x467   :  { %v10452_v63 = vadd.f32 %v8104_v20, %v10302_v24  ;;  %v1862_v2 = vpop.f32.mrb[39].mxu0  ;;  %v2028_v19 = vmul.f32 %v10449_v44, %v10449_v44 }
 0x468   :  { %1954 = vadd.xlane.f32.xlu0 %v10449_v44  ;;  %v10460_v21 = vadd.f32 %v10302_v24, %v1862_v2  ;;  %v2026_v22 = vmul.f32 %v10456_v32, %v10456_v32 }
 0x469   :  { %v2029_v36 = vmul.f32 %v10452_v63, %v10452_v63 }
 0x46a   :  { %1956 = vadd.xlane.f32.xlu1 %v10452_v63  ;;  %v2027_v4 = vmul.f32 %v10460_v21, %v10460_v21 }
 0x46c   :  { %1950 = vadd.xlane.f32.xlu0 %v10456_v32 }
 0x46e   :  { %1952 = vadd.xlane.f32.xlu1 %v10460_v21 }
 0x470   :  { %2082 = vadd.xlane.f32.xlu0 %v2028_v19 }
 0x472   :  { %2084 = vadd.xlane.f32.xlu1 %v2029_v36 }
 0x474   :  { %2078 = vadd.xlane.f32.xlu0 %v2026_v22  ;;  %v8107_v8 = vpop.f32.mrb[40].mxu0 }
 0x475   :  { %v10473_v60 = vadd.f32 %v8107_v8, %v10302_v24  ;;  %v1875_v62 = vpop.f32.mrb[41].mxu0 }
 0x476   :  { %2080 = vadd.xlane.f32.xlu1 %v2027_v4  ;;  %v8108_v10 = vpop.f32.mrb[42].mxu0  ;;  %v10480_v45 = vadd.f32 %v10302_v24, %v1875_v62 }
 0x477   :  { %v10476_v53 = vadd.f32 %v8108_v10, %v10302_v24  ;;  %v1878_v16 = vpop.f32.mrb[43].mxu0  ;;  %v2032_v11 = vmul.f32 %v10473_v60, %v10473_v60 }
 0x478   :  { %1962 = vadd.xlane.f32.xlu0 %v10473_v60  ;;  %v10484_v49 = vadd.f32 %v10302_v24, %v1878_v16  ;;  %v2030_v41 = vmul.f32 %v10480_v45, %v10480_v45 }
 0x479   :  { %v2033_v27 = vmul.f32 %v10476_v53, %v10476_v53 }
 0x47a   :  { %1964 = vadd.xlane.f32.xlu1 %v10476_v53  ;;  %v2031_v43 = vmul.f32 %v10484_v49, %v10484_v49 }
 0x47c   :  { %1958 = vadd.xlane.f32.xlu0 %v10480_v45 }
 0x47e   :  { %1960 = vadd.xlane.f32.xlu1 %v10484_v49 }
 0x480   :  { %2090 = vadd.xlane.f32.xlu0 %v2032_v11 }
 0x482   :  { %2092 = vadd.xlane.f32.xlu1 %v2033_v27 }
 0x483   :  { %v8111_v42 = vpop.f32.mrb[44].mxu0 }
 0x484   :  { %2086 = vadd.xlane.f32.xlu0 %v2030_v41  ;;  %v10497_v1 = vadd.f32 %v8111_v42, %v10302_v24  ;;  %v1891_v59 = vpop.f32.mrb[45].mxu0 }
 0x485   :  { %v8112_v28 = vpop.f32.mrb[46].mxu0  ;;  %v10504_v17 = vadd.f32 %v10302_v24, %v1891_v59 }
 0x486   :  { %2088 = vadd.xlane.f32.xlu1 %v2031_v43  ;;  %v10500_v51 = vadd.f32 %v8112_v28, %v10302_v24  ;;  %v1894_v31 = vpop.f32.mrb[47].mxu0  ;;  %v2036_v12 = vmul.f32 %v10497_v1, %v10497_v1 }
 0x487   :  { %v10508_v50 = vadd.f32 %v10302_v24, %v1894_v31  ;;  %v2034_v9 = vmul.f32 %v10504_v17, %v10504_v17 }
 0x488   :  { %1970 = vadd.xlane.f32.xlu0 %v10497_v1  ;;  %v2037_v24 = vmul.f32 %v10500_v51, %v10500_v51 }
 0x489   :  { %v2035_v34 = vmul.f32 %v10508_v50, %v10508_v50 }
 0x48a   :  { %1972 = vadd.xlane.f32.xlu1 %v10500_v51 }
 0x48c   :  { %1966 = vadd.xlane.f32.xlu0 %v10504_v17 }
 0x48e   :  { %1968 = vadd.xlane.f32.xlu1 %v10508_v50 }
 0x490   :  { %2094 = vadd.xlane.f32.xlu0 %v2034_v9 }
 0x492   :  { %2096 = vadd.xlane.f32.xlu1 %v2035_v34 }
 0x494   :  { %2098 = vadd.xlane.f32.xlu0 %v2036_v12  ;;  %v1915_v25 = vpop.xlane.xlu0 %1914 }
 0x495   :  { %v1976_v38 = vmul.f32 0.0078125, %v1915_v25 }
 0x496   :  { %2100 = vadd.xlane.f32.xlu1 %v2037_v24  ;;  %v1917_v52 = vpop.xlane.xlu1 %1916 }
 0x497   :  { %v1977_v20 = vmul.f32 0.0078125, %v1917_v52  ;;  %v2136_v19 = vmul.f32 %v1976_v38, %v1976_v38  ;;  %v2200_v52 = vsub.f32 %v10305_v48, %v1976_v38  ;;  %v10532_v48 = vld [vmem:[%s14262_s8 + $0x1] ss:$0 sm:$0xff] }
 0x498   :  { %v1911_v5 = vpop.xlane.xlu0 %1910 }
 0x499   :  { %v1974_v36 = vmul.f32 0.0078125, %v1911_v5  ;;  %v2137_v62 = vmul.f32 %v1977_v20, %v1977_v20 }
 0x49a   :  { %v1913_v29 = vpop.xlane.xlu1 %1912 }
 0x49b   :  { %v1975_v4 = vmul.f32 0.0078125, %v1913_v29  ;;  %v2134_v27 = vmul.f32 %v1974_v36, %v1974_v36  ;;  %v10524_v29 = vld [vmem:[%s14261_s7 + $0x1] ss:$0 sm:$0xff] }
 0x49c   :  { %v2043_v2 = vpop.xlane.xlu0 %2042 }
 0x49d   :  { %v2104_v22 = vmul.f32 0.0078125, %v2043_v2  ;;  %v2135_v59 = vmul.f32 %v1975_v4, %v1975_v4  ;;  %v2201_v2 = vsub.f32 %v10308_v55, %v1977_v20  ;;  %v2199_v38 = vsub.f32 %v10316_v39, %v1975_v4  ;;  %v14530_v39 = vld [vmem:[#allocation13_spill] sm:$0xff] }
 0x49e   :  { %v2045_v8 = vpop.xlane.xlu1 %2044 }
 0x49f   :  { %v2168_v10 = vsub.f32 %v2104_v22, %v2136_v19  ;;  %v2105_v16 = vmul.f32 0.0078125, %v2045_v8  ;;  %v2198_v8 = vsub.f32 %v10312_v46, %v1974_v36 }
 0x4a0   :  { %v2039_v11 = vpop.xlane.xlu0 %2038 }
 0x4a1   :  { %v2232_v41 = vadd.f32 1e-05, %v2168_v10  ;;  %v2169_v42 = vsub.f32 %v2105_v16, %v2137_v62  ;;  %v2102_v43 = vmul.f32 0.0078125, %v2039_v11 }
 0x4a2   :  { %v2041_v28 = vpop.xlane.xlu1 %2040 }
 0x4a3   :  { %8620 = vrsqrt.f32 %v2232_v41  ;;  %v2233_v31 = vadd.f32 1e-05, %v2169_v42  ;;  %v2166_v9 = vsub.f32 %v2102_v43, %v2134_v27  ;;  %v2103_v34 = vmul.f32 0.0078125, %v2041_v28 }
 0x4a5   :  { %8622 = vrsqrt.f32 %v2233_v31  ;;  %v2230_v12 = vadd.f32 1e-05, %v2166_v9  ;;  %v2167_v24 = vsub.f32 %v2103_v34, %v2135_v59 }
 0x4a7   :  { %8624 = vrsqrt.f32 %v2230_v12  ;;  %v2231_v25 = vadd.f32 1e-05, %v2167_v24 }
 0x4a9   :  { %8626 = vrsqrt.f32 %v2231_v25 }
 0x4ad   :  { %v8621_v5 = vpop.eup %8620 }
 0x4ae   :  { %v2296_v19 = vmul.f32 %v8621_v5, %v2200_v52  ;;  %v14531_v52 = vld [vmem:[#allocation14_spill] sm:$0xff] }
 0x4af   :  { %v8623_v22 = vpop.eup %8622 }
 0x4b0   :  { %v2334_v62 = vmul.f32 %v10524_v29, %v2296_v19  ;;  %v2297_v10 = vmul.f32 %v8623_v22, %v2201_v2  ;;  %v14532_v2 = vld [vmem:[#allocation15_spill] sm:$0xff] }
 0x4b1   :  { %v1923_v16 = vpop.xlane.xlu0 %1922  ;;  %v8625_v11 = vpop.eup %8624 }
 0x4b2   :  { %v2335_v27 = vmul.f32 %v10524_v29, %v2297_v10  ;;  %v2294_v55 = vmul.f32 %v8625_v11, %v2198_v8  ;;  %v2372_v36 = vadd.f32 %v10532_v48, %v2334_v62  ;;  %v1980_v28 = vmul.f32 0.0078125, %v1923_v16  ;;  %v14533_v11 = vld [vmem:[#allocation12_spill] sm:$0xff] }
 0x4b3   :  { %v1925_v41 = vpop.xlane.xlu1 %1924  ;;  %v8627_v20 = vpop.eup %8626 }
 0x4b4   :  { %v2295_v43 = vmul.f32 %v8627_v20, %v2199_v38  ;;  %v2332_v46 = vmul.f32 %v10524_v29, %v2294_v55  ;;  %v2373_v59 = vadd.f32 %v10532_v48, %v2335_v27  ;;  %v1981_v12 = vmul.f32 0.0078125, %v1925_v41 }
 0x4b5   :  { %v1919_v42 = vpop.xlane.xlu0 %1918  ;;  %v10549_v19 = vadd.f32 %v2372_v36, %v14532_v2  ;;  %v2140_v22 = vmul.f32 %v1980_v28, %v1980_v28 }
 0x4b6   :  { %v2333_v9 = vmul.f32 %v10524_v29, %v2295_v43  ;;  %v2370_v34 = vadd.f32 %v10532_v48, %v2332_v46  ;;  %v10542_v4 = vadd.f32 %v2373_v59, %v14530_v39  ;;  %v1978_v8 = vmul.f32 0.0078125, %v1919_v42 }
 0x4b7   :  { %v1921_v31 = vpop.xlane.xlu1 %1920  ;;  %v2141_v41 = vmul.f32 %v1981_v12, %v1981_v12  ;;  %v14330_v36 = vmax.f32 %v10549_v19, 0.0 }
 0x4b8   :  { %v2371_v25 = vadd.f32 %v10532_v48, %v2333_v9  ;;  %v10546_v5 = vadd.f32 %v2370_v34, %v14531_v52  ;;  %v1979_v10 = vmul.f32 0.0078125, %v1921_v31  ;;  %v14331_v27 = vmax.f32 %v10542_v4, 0.0 }
 0x4b9   :  { %v2051_v24 = vpop.xlane.xlu0 %2050  ;;  %v2138_v9 = vmul.f32 %v1978_v8, %v1978_v8 }
 0x4ba   :  { %v2108_v62 = vmul.f32 0.0078125, %v2051_v24  ;;  %v10552_v38 = vadd.f32 %v2371_v25, %v14533_v11  ;;  %v14300_v46 = vmax.f32 %v10546_v5, 0.0  ;;  %v2139_v39 = vmul.f32 %v1979_v10, %v1979_v10 }
 0x4bb   :  { %v2053_v16 = vpop.xlane.xlu1 %2052  ;;  %v2467_v52 = vpack.c.bf16 %v14331_v27, %v14330_v36 }
 0x4bc   :  { %14534 = vst [vmem:[#allocation13_spill] sm:$0xff] %v10552_v38  ;;  %v2172_v55 = vsub.f32 %v2108_v62, %v2140_v22  ;;  %v2109_v20 = vmul.f32 0.0078125, %v2053_v16  ;;  %v14299_v59 = vmax.f32 %v10552_v38, 0.0 }
 0x4bd   :  { %v2047_v43 = vpop.xlane.xlu0 %2046 }
 0x4be   :  { %v2236_v42 = vadd.f32 1e-05, %v2172_v55  ;;  %v2173_v34 = vsub.f32 %v2109_v20, %v2141_v41  ;;  %v2106_v31 = vmul.f32 0.0078125, %v2047_v43  ;;  %v2466_v25 = vpack.c.bf16 %v14299_v59, %v14300_v46 }
 0x4bf   :  { %v2049_v24 = vpop.xlane.xlu1 %2048  ;;  %v2204_v43 = vsub.f32 %v10335_v37, %v1980_v28 }
 0x4c0   :  { %8628 = vrsqrt.f32 %v2236_v42  ;;  %v2237_v2 = vadd.f32 1e-05, %v2173_v34  ;;  %v2170_v22 = vsub.f32 %v2106_v31, %v2138_v9  ;;  %v2107_v62 = vmul.f32 0.0078125, %v2049_v24  ;;  %8129 = vmatprep.mubr.bf16.mxu1 %v2466_v25 }
 0x4c1   :  { %8130 = vmatmul.mubr.bf16.vlgmr.msra.gmra.mrb[48].mxu1 %v2467_v52  ;;  %v2205_v42 = vsub.f32 %v10338_v7, %v1981_v12  ;;  %v2203_v7 = vsub.f32 %v10346_v13, %v1979_v10 }
 0x4c2   :  { %8630 = vrsqrt.f32 %v2237_v2  ;;  %v2234_v16 = vadd.f32 1e-05, %v2170_v22  ;;  %v2171_v11 = vsub.f32 %v2107_v62, %v2139_v39  ;;  %v2202_v39 = vsub.f32 %v10342_v58, %v1978_v8 }
 0x4c4   :  { %8632 = vrsqrt.f32 %v2234_v16  ;;  %v2235_v41 = vadd.f32 1e-05, %v2171_v11 }
 0x4c5   :  { %v1931_v55 = vpop.xlane.xlu0 %1930 }
 0x4c6   :  { %8634 = vrsqrt.f32 %v2235_v41  ;;  %v10567_v38 = vmul.f32 0.0078125, %v1931_v55 }
 0x4c7   :  { %v1933_v20 = vpop.xlane.xlu1 %1932 }
 0x4c8   :  { %v10570_v24 = vmul.f32 0.0078125, %v1933_v20  ;;  %v2144_v37 = vmul.f32 %v10567_v38, %v10567_v38 }
 0x4c9   :  { %v1927_v59 = vpop.xlane.xlu0 %1926 }
 0x4ca   :  { %v8629_v46 = vpop.eup %8628  ;;  %v10573_v25 = vmul.f32 0.0078125, %v1927_v59  ;;  %v2145_v8 = vmul.f32 %v10570_v24, %v10570_v24 }
 0x4cb   :  { %v1929_v9 = vpop.xlane.xlu1 %1928  ;;  %v2300_v34 = vmul.f32 %v8629_v46, %v2204_v43 }
 0x4cc   :  { %v8631_v31 = vpop.eup %8630  ;;  %v10579_v12 = vmul.f32 0.0078125, %v1929_v9  ;;  %v2142_v55 = vmul.f32 %v10573_v25, %v10573_v25 }
 0x4cd   :  { %v2059_v52 = vpop.xlane.xlu0 %2058  ;;  %v2301_v2 = vmul.f32 %v8631_v31, %v2205_v42  ;;  %v2338_v62 = vmul.f32 %v10524_v29, %v2300_v34 }
 0x4ce   :  { %v8633_v22 = vpop.eup %8632  ;;  %v2112_v28 = vmul.f32 0.0078125, %v2059_v52 }
 0x4cf   :  { %v2061_v46 = vpop.xlane.xlu1 %2060  ;;  %v2298_v16 = vmul.f32 %v8633_v22, %v2202_v39  ;;  %v2339_v11 = vmul.f32 %v10524_v29, %v2301_v2  ;;  %v2376_v31 = vadd.f32 %v10532_v48, %v2338_v62  ;;  %v2143_v39 = vmul.f32 %v10579_v12, %v10579_v12 }
 0x4d0   :  { %v8635_v58 = vpop.eup %8634  ;;  %v2176_v59 = vsub.f32 %v2112_v28, %v2144_v37  ;;  %v2113_v41 = vmul.f32 0.0078125, %v2061_v46 }
 0x4d1   :  { %v2055_v20 = vpop.xlane.xlu0 %2054  ;;  %v2299_v43 = vmul.f32 %v8635_v58, %v2203_v7  ;;  %v2336_v42 = vmul.f32 %v10524_v29, %v2298_v16  ;;  %v2377_v13 = vadd.f32 %v10532_v48, %v2339_v11 }
 0x4d2   :  { %v2240_v10 = vadd.f32 1e-05, %v2176_v59  ;;  %v2177_v9 = vsub.f32 %v2113_v41, %v2145_v8  ;;  %v2110_v34 = vmul.f32 0.0078125, %v2055_v20  ;;  %v10601_v59 = vadd.f32 %v2376_v31, %v9602_v26 }
 0x4d3   :  { %v2057_v52 = vpop.xlane.xlu1 %2056  ;;  %v2337_v2 = vmul.f32 %v10524_v29, %v2299_v43  ;;  %v2374_v22 = vadd.f32 %v10532_v48, %v2336_v42  ;;  %v10594_v37 = vadd.f32 %v2377_v13, %v9599_v40  ;;  %v2208_v31 = vsub.f32 %v10371_v35, %v10567_v38 }
 0x4d4   :  { %8636 = vrsqrt.f32 %v2240_v10  ;;  %v2241_v28 = vadd.f32 1e-05, %v2177_v9  ;;  %v2174_v7 = vsub.f32 %v2110_v34, %v2142_v55  ;;  %v2111_v46 = vmul.f32 0.0078125, %v2057_v52  ;;  %14535 = vst [vmem:[#allocation14_spill] sm:$0xff] %v10601_v59 }
 0x4d5   :  { %v1939_v16 = vpop.xlane.xlu0 %1938  ;;  %v2375_v11 = vadd.f32 %v10532_v48, %v2337_v2  ;;  %v10598_v62 = vadd.f32 %v2374_v22, %v9605_v56  ;;  %v14329_v55 = vmax.f32 %v10594_v37, 0.0  ;;  %v14327_v10 = vmax.f32 %v10601_v59, 0.0 }
 0x4d6   :  { %8638 = vrsqrt.f32 %v2241_v28  ;;  %v2238_v58 = vadd.f32 1e-05, %v2174_v7  ;;  %v2175_v8 = vsub.f32 %v2111_v46, %v2143_v39  ;;  %v10609_v13 = vmul.f32 0.0078125, %v1939_v16 }
 0x4d7   :  { %v1941_v41 = vpop.xlane.xlu1 %1940  ;;  %v10604_v40 = vadd.f32 %v2375_v11, %v9596_v18  ;;  %v14328_v42 = vmax.f32 %v10598_v62, 0.0  ;;  %v2469_v34 = vpack.c.bf16 %v14329_v55, %v14327_v10  ;;  %v2209_v7 = vsub.f32 %v10374_v30, %v10570_v24 }
 0x4d8   :  { %8640 = vrsqrt.f32 %v2238_v58  ;;  %v2239_v20 = vadd.f32 1e-05, %v2175_v8  ;;  %v10616_v9 = vmul.f32 0.0078125, %v1941_v41  ;;  %v2148_v22 = vmul.f32 %v10609_v13, %v10609_v13 }
 0x4d9   :  { %14536 = vst [vmem:[#allocation15_spill] sm:$0xff] %v10604_v40  ;;  %v1935_v43 = vpop.xlane.xlu0 %1934  ;;  %v14302_v56 = vmax.f32 %v10604_v40, 0.0  ;;  %v2206_v41 = vsub.f32 %v10381_v6, %v10573_v25 }
 0x4da   :  { %8642 = vrsqrt.f32 %v2239_v20  ;;  %v10624_v39 = vmul.f32 0.0078125, %v1935_v43  ;;  %v2149_v35 = vmul.f32 %v10616_v9, %v10616_v9 }
 0x4db   :  { %v1937_v26 = vpop.xlane.xlu1 %1936  ;;  %v2468_v18 = vpack.c.bf16 %v14302_v56, %v14328_v42 }
 0x4dc   :  { %v10630_v46 = vmul.f32 0.0078125, %v1937_v26  ;;  %v2146_v20 = vmul.f32 %v10624_v39, %v10624_v39 }
 0x4dd   :  { %8133 = vmatprep.mubr.bf16.mxu1 %v2468_v18  ;;  %v2067_v52 = vpop.xlane.xlu0 %2066 }
 0x4de   :  { %v8637_v2 = vpop.eup %8636  ;;  %v2116_v28 = vmul.f32 0.0078125, %v2067_v52  ;;  %8134 = vmatmul.mubr.bf16.gmra.mrb[52].mxu1 %v2469_v34  ;;  %v2207_v52 = vsub.f32 %v10385_v61, %v10579_v12 }
 0x4df   :  { %v2069_v16 = vpop.xlane.xlu1 %2068  ;;  %v2304_v11 = vmul.f32 %v8637_v2, %v2208_v31  ;;  %v2147_v2 = vmul.f32 %v10630_v46, %v10630_v46 }
 0x4e0   :  { %v8639_v58 = vpop.eup %8638  ;;  %v2180_v38 = vsub.f32 %v2116_v28, %v2148_v22  ;;  %v2117_v8 = vmul.f32 0.0078125, %v2069_v16 }
 0x4e1   :  { %v2063_v43 = vpop.xlane.xlu0 %2062  ;;  %v2305_v18 = vmul.f32 %v8639_v58, %v2209_v7  ;;  %v2342_v31 = vmul.f32 %v10524_v29, %v2304_v11 }
 0x4e2   :  { %v8641_v34 = vpop.eup %8640  ;;  %v2244_v30 = vadd.f32 1e-05, %v2180_v38  ;;  %v2181_v24 = vsub.f32 %v2117_v8, %v2149_v35  ;;  %v2114_v26 = vmul.f32 0.0078125, %v2063_v43 }
 0x4e3   :  { %v2065_v22 = vpop.xlane.xlu1 %2064  ;;  %v2302_v28 = vmul.f32 %v8641_v34, %v2206_v41  ;;  %v2343_v6 = vmul.f32 %v10524_v29, %v2305_v18  ;;  %v2380_v43 = vadd.f32 %v10532_v48, %v2342_v31  ;;  %v14540_v31 = vld [vmem:[#allocation17_spill] sm:$0xff] }
 0x4e4   :  { %v8643_v25 = vpop.eup %8642  ;;  %8644 = vrsqrt.f32 %v2244_v30  ;;  %v2245_v16 = vadd.f32 1e-05, %v2181_v24  ;;  %v2178_v7 = vsub.f32 %v2114_v26, %v2146_v20  ;;  %v2115_v58 = vmul.f32 0.0078125, %v2065_v22  ;;  %v14538_v26 = vld [vmem:[#allocation18_spill] sm:$0xff] }
 0x4e5   :  { %v1947_v38 = vpop.xlane.xlu0 %1946  ;;  %v2303_v35 = vmul.f32 %v8643_v25, %v2207_v52  ;;  %v2340_v8 = vmul.f32 %v10524_v29, %v2302_v28  ;;  %v2381_v11 = vadd.f32 %v10532_v48, %v2343_v6  ;;  %v10659_v22 = vadd.f32 %v2380_v43, %v14540_v31  ;;  %v14542_v6 = vld [vmem:[#allocation16_spill] sm:$0xff] }
 0x4e6   :  { %8646 = vrsqrt.f32 %v2245_v16  ;;  %v2242_v61 = vadd.f32 1e-05, %v2178_v7  ;;  %v2179_v12 = vsub.f32 %v2115_v58, %v2147_v2  ;;  %v10656_v2 = vmul.f32 0.0078125, %v1947_v38 }
 0x4e7   :  { %v1949_v56 = vpop.xlane.xlu1 %1948  ;;  %v2341_v41 = vmul.f32 %v10524_v29, %v2303_v35  ;;  %v2378_v18 = vadd.f32 %v10532_v48, %v2340_v8  ;;  %v10650_v20 = vadd.f32 %v2381_v11, %v9672_v47  ;;  %14541 = vst [vmem:[#allocation17_spill] sm:$0xff] %v10659_v22  ;;  %v2212_v7 = vsub.f32 %v10401_v3, %v10609_v13 }
 0x4e8   :  { %8648 = vrsqrt.f32 %v2242_v61  ;;  %v2243_v34 = vadd.f32 1e-05, %v2179_v12  ;;  %v10664_v16 = vmul.f32 0.0078125, %v1949_v56  ;;  %v2152_v61 = vmul.f32 %v10656_v2, %v10656_v2 }
 0x4e9   :  { %14537 = vst [vmem:[#allocation12_spill] sm:$0xff] %v10650_v20  ;;  %v1943_v30 = vpop.xlane.xlu0 %1942  ;;  %v2379_v24 = vadd.f32 %v10532_v48, %v2341_v41  ;;  %v10654_v52 = vadd.f32 %v2378_v18, %v14538_v26  ;;  %v14326_v47 = vmax.f32 %v10650_v20, 0.0  ;;  %v14304_v56 = vmax.f32 %v10659_v22, 0.0 }
 0x4ea   :  { %8650 = vrsqrt.f32 %v2243_v34  ;;  %v10669_v58 = vmul.f32 0.0078125, %v1943_v30  ;;  %v2213_v43 = vsub.f32 %v10404_v15, %v10616_v9  ;;  %v2153_v30 = vmul.f32 %v10664_v16, %v10664_v16 }
 0x4eb   :  { %14539 = vst [vmem:[#allocation18_spill] sm:$0xff] %v10654_v52  ;;  %v1945_v28 = vpop.xlane.xlu1 %1944  ;;  %v10662_v25 = vadd.f32 %v2379_v24, %v14542_v6  ;;  %v14305_v38 = vmax.f32 %v10654_v52, 0.0  ;;  %v2471_v15 = vpack.c.bf16 %v14326_v47, %v14304_v56  ;;  %v2210_v9 = vsub.f32 %v10408_v54, %v10624_v39 }
 0x4ec   :  { %v10678_v41 = vmul.f32 0.0078125, %v1945_v28  ;;  %v2150_v31 = vmul.f32 %v10669_v58, %v10669_v58 }
 0x4ed   :  { %14543 = vst [vmem:[#allocation16_spill] sm:$0xff] %v10662_v25  ;;  %v2075_v35 = vpop.xlane.xlu0 %2074  ;;  %v14303_v8 = vmax.f32 %v10662_v25, 0.0 }
 0x4ee   :  { %v8645_v11 = vpop.eup %8644  ;;  %v2120_v12 = vmul.f32 0.0078125, %v2075_v35 }
 0x4ef   :  { %v2077_v3 = vpop.xlane.xlu1 %2076  ;;  %v2470_v13 = vpack.c.bf16 %v14303_v8, %v14305_v38  ;;  %v2308_v18 = vmul.f32 %v8645_v11, %v2212_v7 }
 0x4f0   :  { %v8647_v34 = vpop.eup %8646  ;;  %v2184_v24 = vsub.f32 %v2120_v12, %v2152_v61  ;;  %v2121_v26 = vmul.f32 0.0078125, %v2077_v3  ;;  %v2211_v12 = vsub.f32 %v10412_v14, %v10630_v46  ;;  %v2151_v3 = vmul.f32 %v10678_v41, %v10678_v41 }
 0x4f1   :  { %8137 = vmatprep.mubr.bf16.mxu1 %v2470_v13  ;;  %v2071_v28 = vpop.xlane.xlu0 %2070  ;;  %v2309_v6 = vmul.f32 %v8647_v34, %v2213_v43  ;;  %v2346_v61 = vmul.f32 %v10524_v29, %v2308_v18 }
 0x4f2   :  { %v8649_v7 = vpop.eup %8648  ;;  %v2248_v35 = vadd.f32 1e-05, %v2184_v24  ;;  %v2185_v11 = vsub.f32 %v2121_v26, %v2153_v30  ;;  %v2118_v8 = vmul.f32 0.0078125, %v2071_v28  ;;  %8138 = vmatmul.mubr.bf16.gmra.mrb[56].mxu1 %v2471_v15 }
 0x4f3   :  { %v2073_v54 = vpop.xlane.xlu1 %2072  ;;  %v2306_v39 = vmul.f32 %v8649_v7, %v2210_v9  ;;  %v2347_v56 = vmul.f32 %v10524_v29, %v2309_v6  ;;  %v2384_v28 = vadd.f32 %v10532_v48, %v2346_v61  ;;  %v14548_v61 = vld [vmem:[#allocation23_spill] sm:$0xff] }
 0x4f4   :  { %v8651_v13 = vpop.eup %8650  ;;  %8652 = vrsqrt.f32 %v2248_v35  ;;  %v2249_v43 = vadd.f32 1e-05, %v2185_v11  ;;  %v2182_v34 = vsub.f32 %v2118_v8, %v2150_v31  ;;  %v2119_v24 = vmul.f32 0.0078125, %v2073_v54  ;;  %v14544_v8 = vld [vmem:[#allocation21_spill] sm:$0xff] }
 0x4f5   :  { %v1955_v30 = vpop.xlane.xlu0 %1954  ;;  %v2307_v26 = vmul.f32 %v8651_v13, %v2211_v12  ;;  %v2344_v15 = vmul.f32 %v10524_v29, %v2306_v39  ;;  %v2385_v18 = vadd.f32 %v10532_v48, %v2347_v56  ;;  %v14546_v12 = vld [vmem:[#allocation24_spill] sm:$0xff]  ;;  %v10715_v54 = vadd.f32 %v2384_v28, %v14548_v61 }
 0x4f6   :  { %8654 = vrsqrt.f32 %v2249_v43  ;;  %v2246_v14 = vadd.f32 1e-05, %v2182_v34  ;;  %v2183_v46 = vsub.f32 %v2119_v24, %v2151_v3  ;;  %v10712_v3 = vmul.f32 0.0078125, %v1955_v30  ;;  %v14550_v13 = vld [vmem:[#allocation20_spill] sm:$0xff] }
 0x4f7   :  { %v1957_v38 = vpop.xlane.xlu1 %1956  ;;  %v2345_v9 = vmul.f32 %v10524_v29, %v2307_v26  ;;  %v2382_v6 = vadd.f32 %v10532_v48, %v2344_v15  ;;  %v10706_v31 = vadd.f32 %v2385_v18, %v14544_v8  ;;  %14549 = vst [vmem:[#allocation23_spill] sm:$0xff] %v10715_v54  ;;  %v2216_v26 = vsub.f32 %v10425_v0, %v10656_v2 }
 0x4f8   :  { %8656 = vrsqrt.f32 %v2246_v14  ;;  %v2247_v7 = vadd.f32 1e-05, %v2183_v46  ;;  %v10720_v34 = vmul.f32 0.0078125, %v1957_v38  ;;  %v2156_v28 = vmul.f32 %v10712_v3, %v10712_v3 }
 0x4f9   :  { %14545 = vst [vmem:[#allocation21_spill] sm:$0xff] %v10706_v31  ;;  %v1951_v35 = vpop.xlane.xlu0 %1950  ;;  %v2383_v11 = vadd.f32 %v10532_v48, %v2345_v9  ;;  %v10710_v56 = vadd.f32 %v2382_v6, %v14546_v12  ;;  %v14309_v24 = vmax.f32 %v10706_v31, 0.0  ;;  %v14308_v38 = vmax.f32 %v10715_v54, 0.0 }
 0x4fa   :  { %8658 = vrsqrt.f32 %v2247_v7  ;;  %v10725_v15 = vmul.f32 0.0078125, %v1951_v35  ;;  %v2217_v6 = vsub.f32 %v10428_v57, %v10664_v16  ;;  %v2214_v16 = vsub.f32 %v10432_v23, %v10669_v58 }
 0x4fb   :  { %14547 = vst [vmem:[#allocation24_spill] sm:$0xff] %v10710_v56  ;;  %v1953_v39 = vpop.xlane.xlu1 %1952  ;;  %v10718_v43 = vadd.f32 %v2383_v11, %v14550_v13  ;;  %v14307_v30 = vmax.f32 %v10710_v56, 0.0  ;;  %v2157_v11 = vmul.f32 %v10720_v34, %v10720_v34  ;;  %v2473_v57 = vpack.c.bf16 %v14309_v24, %v14308_v38 }
 0x4fc   :  { %v10734_v7 = vmul.f32 0.0078125, %v1953_v39  ;;  %v2154_v39 = vmul.f32 %v10725_v15, %v10725_v15 }
 0x4fd   :  { %14551 = vst [vmem:[#allocation20_spill] sm:$0xff] %v10718_v43  ;;  %v2083_v18 = vpop.xlane.xlu0 %2082  ;;  %v14306_v14 = vmax.f32 %v10718_v43, 0.0 }
 0x4fe   :  { %v8653_v46 = vpop.eup %8652  ;;  %v2124_v9 = vmul.f32 0.0078125, %v2083_v18 }
 0x4ff   :  { %v2085_v0 = vpop.xlane.xlu1 %2084  ;;  %v2472_v2 = vpack.c.bf16 %v14306_v14, %v14307_v30  ;;  %v2312_v8 = vmul.f32 %v8653_v46, %v2216_v26 }
 0x500   :  { %v8655_v35 = vpop.eup %8654  ;;  %v2188_v12 = vsub.f32 %v2124_v9, %v2156_v28  ;;  %v2125_v61 = vmul.f32 0.0078125, %v2085_v0  ;;  %v2215_v9 = vsub.f32 %v10436_v33, %v10678_v41  ;;  %v2155_v0 = vmul.f32 %v10734_v7, %v10734_v7 }
 0x501   :  { %8141 = vmatprep.mubr.bf16.mxu1 %v2472_v2  ;;  %v2079_v13 = vpop.xlane.xlu0 %2078  ;;  %v2313_v26 = vmul.f32 %v8655_v35, %v2217_v6  ;;  %v2350_v28 = vmul.f32 %v10524_v29, %v2312_v8 }
 0x502   :  { %v8657_v18 = vpop.eup %8656  ;;  %v2252_v46 = vadd.f32 1e-05, %v2188_v12  ;;  %v2189_v14 = vsub.f32 %v2125_v61, %v2157_v11  ;;  %v2122_v30 = vmul.f32 0.0078125, %v2079_v13  ;;  %8142 = vmatmul.mubr.bf16.gmra.mrb[60].mxu1 %v2473_v57 }
 0x503   :  { %v2081_v23 = vpop.xlane.xlu1 %2080  ;;  %v2310_v58 = vmul.f32 %v8657_v18, %v2214_v16  ;;  %v2351_v38 = vmul.f32 %v10524_v29, %v2313_v26  ;;  %v2388_v13 = vadd.f32 %v10532_v48, %v2350_v28  ;;  %v14556_v28 = vld [vmem:[#allocation26_spill] sm:$0xff] }
 0x504   :  { %v8659_v2 = vpop.eup %8658  ;;  %8660 = vrsqrt.f32 %v2252_v46  ;;  %v2253_v6 = vadd.f32 1e-05, %v2189_v14  ;;  %v2186_v35 = vsub.f32 %v2122_v30, %v2154_v39  ;;  %v2123_v12 = vmul.f32 0.0078125, %v2081_v23  ;;  %v14552_v30 = vld [vmem:[#allocation25_spill] sm:$0xff] }
 0x505   :  { %v1963_v11 = vpop.xlane.xlu0 %1962  ;;  %v2311_v61 = vmul.f32 %v8659_v2, %v2215_v9  ;;  %v2348_v57 = vmul.f32 %v10524_v29, %v2310_v58  ;;  %v2389_v8 = vadd.f32 %v10532_v48, %v2351_v38  ;;  %v14554_v9 = vld [vmem:[#allocation22_spill] sm:$0xff]  ;;  %v10771_v23 = vadd.f32 %v2388_v13, %v14556_v28  ;;  %v14558_v2 = vld [vmem:[#allocation19_spill] sm:$0xff] }
 0x506   :  { %8662 = vrsqrt.f32 %v2253_v6  ;;  %v2250_v33 = vadd.f32 1e-05, %v2186_v35  ;;  %v2187_v41 = vsub.f32 %v2123_v12, %v2155_v0  ;;  %v10768_v0 = vmul.f32 0.0078125, %v1963_v11 }
 0x507   :  { %v1965_v24 = vpop.xlane.xlu1 %1964  ;;  %v2349_v16 = vmul.f32 %v10524_v29, %v2311_v61  ;;  %v2386_v26 = vadd.f32 %v10532_v48, %v2348_v57  ;;  %v10762_v39 = vadd.f32 %v2389_v8, %v14552_v30  ;;  %14557 = vst [vmem:[#allocation26_spill] sm:$0xff] %v10771_v23  ;;  %v2220_v61 = vsub.f32 %v10449_v44, %v10712_v3 }
 0x508   :  { %8664 = vrsqrt.f32 %v2250_v33  ;;  %v2251_v14 = vadd.f32 1e-05, %v2187_v41  ;;  %v10776_v35 = vmul.f32 0.0078125, %v1965_v24  ;;  %v2160_v13 = vmul.f32 %v10768_v0, %v10768_v0 }
 0x509   :  { %14553 = vst [vmem:[#allocation25_spill] sm:$0xff] %v10762_v39  ;;  %v1959_v18 = vpop.xlane.xlu0 %1958  ;;  %v2387_v46 = vadd.f32 %v10532_v48, %v2349_v16  ;;  %v10766_v38 = vadd.f32 %v2386_v26, %v14554_v9  ;;  %v14313_v12 = vmax.f32 %v10762_v39, 0.0  ;;  %v14312_v24 = vmax.f32 %v10771_v23, 0.0 }
 0x50a   :  { %8666 = vrsqrt.f32 %v2251_v14  ;;  %v10781_v57 = vmul.f32 0.0078125, %v1959_v18  ;;  %v2221_v26 = vsub.f32 %v10452_v63, %v10720_v34  ;;  %v2218_v34 = vsub.f32 %v10456_v32, %v10725_v15 }
 0x50b   :  { %14555 = vst [vmem:[#allocation22_spill] sm:$0xff] %v10766_v38  ;;  %v1961_v58 = vpop.xlane.xlu1 %1960  ;;  %v10774_v6 = vadd.f32 %v2387_v46, %v14558_v2  ;;  %v14311_v11 = vmax.f32 %v10766_v38, 0.0  ;;  %v2161_v46 = vmul.f32 %v10776_v35, %v10776_v35  ;;  %v2475_v63 = vpack.c.bf16 %v14313_v12, %v14312_v24 }
 0x50c   :  { %v10790_v14 = vmul.f32 0.0078125, %v1961_v58  ;;  %v2158_v58 = vmul.f32 %v10781_v57, %v10781_v57 }
 0x50d   :  { %14559 = vst [vmem:[#allocation19_spill] sm:$0xff] %v10774_v6  ;;  %v2091_v8 = vpop.xlane.xlu0 %2090  ;;  %v14310_v33 = vmax.f32 %v10774_v6, 0.0 }
 0x50e   :  { %v8661_v41 = vpop.eup %8660  ;;  %v2128_v16 = vmul.f32 0.0078125, %v2091_v8 }
 0x50f   :  { %v2093_v44 = vpop.xlane.xlu1 %2092  ;;  %v2474_v3 = vpack.c.bf16 %v14310_v33, %v14311_v11  ;;  %v2316_v30 = vmul.f32 %v8661_v41, %v2220_v61 }
 0x510   :  { %v8663_v18 = vpop.eup %8662  ;;  %v2192_v9 = vsub.f32 %v2128_v16, %v2160_v13  ;;  %v2129_v28 = vmul.f32 0.0078125, %v2093_v44  ;;  %v2219_v16 = vsub.f32 %v10460_v21, %v10734_v7  ;;  %v2159_v44 = vmul.f32 %v10790_v14, %v10790_v14 }
 0x511   :  { %8145 = vmatprep.mubr.bf16.mxu1 %v2474_v3  ;;  %v2087_v2 = vpop.xlane.xlu0 %2086  ;;  %v2317_v61 = vmul.f32 %v8663_v18, %v2221_v26  ;;  %v2354_v13 = vmul.f32 %v10524_v29, %v2316_v30 }
 0x512   :  { %v8665_v8 = vpop.eup %8664  ;;  %v2256_v41 = vadd.f32 1e-05, %v2192_v9  ;;  %v2193_v33 = vsub.f32 %v2129_v28, %v2161_v46  ;;  %v2126_v11 = vmul.f32 0.0078125, %v2087_v2  ;;  %8146 = vmatmul.mubr.bf16.gmra.mrb[64].mxu1 %v2475_v63 }
 0x513   :  { %v2089_v32 = vpop.xlane.xlu1 %2088  ;;  %v2314_v15 = vmul.f32 %v8665_v8, %v2218_v34  ;;  %v2355_v24 = vmul.f32 %v10524_v29, %v2317_v61  ;;  %v2392_v2 = vadd.f32 %v10532_v48, %v2354_v13  ;;  %v14564_v13 = vld [vmem:[#allocation7_spill] sm:$0xff] }
 0x514   :  { %v8667_v3 = vpop.eup %8666  ;;  %8668 = vrsqrt.f32 %v2256_v41  ;;  %v2257_v26 = vadd.f32 1e-05, %v2193_v33  ;;  %v2190_v18 = vsub.f32 %v2126_v11, %v2158_v58  ;;  %v2127_v9 = vmul.f32 0.0078125, %v2089_v32  ;;  %v14560_v11 = vld [vmem:[#allocation6_spill] sm:$0xff] }
 0x515   :  { %v1971_v46 = vpop.xlane.xlu0 %1970  ;;  %v2315_v28 = vmul.f32 %v8667_v3, %v2219_v16  ;;  %v2352_v63 = vmul.f32 %v10524_v29, %v2314_v15  ;;  %v2393_v30 = vadd.f32 %v10532_v48, %v2355_v24  ;;  %v14562_v16 = vld [vmem:[#allocation27_spill] sm:$0xff]  ;;  %v10827_v32 = vadd.f32 %v2392_v2, %v14564_v13  ;;  %v14566_v3 = vld [vmem:[#allocation28_spill] sm:$0xff] }
 0x516   :  { %8670 = vrsqrt.f32 %v2257_v26  ;;  %v2254_v21 = vadd.f32 1e-05, %v2190_v18  ;;  %v2191_v7 = vsub.f32 %v2127_v9, %v2159_v44 }
 0x517   :  { %v1973_v12 = vpop.xlane.xlu1 %1972  ;;  %v2353_v34 = vmul.f32 %v10524_v29, %v2315_v28  ;;  %v2390_v61 = vadd.f32 %v10532_v48, %v2352_v63  ;;  %v10818_v58 = vadd.f32 %v2393_v30, %v14560_v11  ;;  %14565 = vst [vmem:[#allocation7_spill] sm:$0xff] %v10827_v32  ;;  %v2224_v28 = vsub.f32 %v10473_v60, %v10768_v0 }
 0x518   :  { %8672 = vrsqrt.f32 %v2254_v21  ;;  %v2255_v33 = vadd.f32 1e-05, %v2191_v7  ;;  %v10837_v63 = vmul.f32 0.0078125, %v1971_v46  ;;  %v2225_v11 = vsub.f32 %v10476_v53, %v10776_v35 }
 0x519   :  { %14561 = vst [vmem:[#allocation6_spill] sm:$0xff] %v10818_v58  ;;  %v1967_v8 = vpop.xlane.xlu0 %1966  ;;  %v2391_v41 = vadd.f32 %v10532_v48, %v2353_v34  ;;  %v10822_v24 = vadd.f32 %v2390_v61, %v14562_v16  ;;  %v14325_v9 = vmax.f32 %v10818_v58, 0.0  ;;  %v2222_v35 = vsub.f32 %v10480_v45, %v10781_v57 }
 0x51a   :  { %8674 = vrsqrt.f32 %v2255_v33  ;;  %v10824_v44 = vmul.f32 0.0078125, %v1967_v8  ;;  %v14316_v33 = vmax.f32 %v10827_v32, 0.0  ;;  %v10846_v8 = vmul.f32 0.0078125, %v1973_v12 }
 0x51b   :  { %14563 = vst [vmem:[#allocation27_spill] sm:$0xff] %v10822_v24  ;;  %v1969_v15 = vpop.xlane.xlu1 %1968  ;;  %v10830_v26 = vadd.f32 %v2391_v41, %v14566_v3  ;;  %v14315_v21 = vmax.f32 %v10822_v24, 0.0  ;;  %v2164_v12 = vmul.f32 %v10837_v63, %v10837_v63 }
 0x51c   :  { %v10832_v18 = vmul.f32 0.0078125, %v1969_v15  ;;  %v2162_v34 = vmul.f32 %v10824_v44, %v10824_v44  ;;  %v2477_v53 = vpack.c.bf16 %v14325_v9, %v14316_v33 }
 0x51d   :  { %14567 = vst [vmem:[#allocation28_spill] sm:$0xff] %v10830_v26  ;;  %v2095_v30 = vpop.xlane.xlu0 %2094  ;;  %v14314_v7 = vmax.f32 %v10830_v26, 0.0 }
 0x51e   :  { %v8669_v2 = vpop.eup %8668  ;;  %v2130_v61 = vmul.f32 0.0078125, %v2095_v30  ;;  %v2163_v16 = vmul.f32 %v10832_v18, %v10832_v18 }
 0x51f   :  { %v2097_v60 = vpop.xlane.xlu1 %2096  ;;  %v2476_v0 = vpack.c.bf16 %v14314_v7, %v14315_v21  ;;  %v2320_v46 = vmul.f32 %v8669_v2, %v2224_v28 }
 0x520   :  { %v8671_v41 = vpop.eup %8670  ;;  %v2194_v13 = vsub.f32 %v2130_v61, %v2162_v34  ;;  %v2131_v15 = vmul.f32 0.0078125, %v2097_v60  ;;  %v2223_v61 = vsub.f32 %v10484_v49, %v10790_v14  ;;  %v2165_v60 = vmul.f32 %v10846_v8, %v10846_v8 }
 0x521   :  { %8149 = vmatprep.mubr.bf16.mxu1 %v2476_v0  ;;  %v2099_v3 = vpop.xlane.xlu0 %2098  ;;  %v2321_v28 = vmul.f32 %v8671_v41, %v2225_v11  ;;  %v2358_v34 = vmul.f32 %v10524_v29, %v2320_v46 }
 0x522   :  { %v8673_v30 = vpop.eup %8672  ;;  %v2258_v2 = vadd.f32 1e-05, %v2194_v13  ;;  %v2195_v7 = vsub.f32 %v2131_v15, %v2163_v16  ;;  %v2132_v21 = vmul.f32 0.0078125, %v2099_v3  ;;  %8150 = vmatmul.mubr.bf16.gmra.mrb[68].mxu1 %v2477_v53 }
 0x523   :  { %v2101_v45 = vpop.xlane.xlu1 %2100  ;;  %v2318_v57 = vmul.f32 %v8673_v30, %v2222_v35  ;;  %v2359_v33 = vmul.f32 %v10524_v29, %v2321_v28  ;;  %v2396_v14 = vadd.f32 %v10532_v48, %v2358_v34  ;;  %v14568_v30 = vld [vmem:[#allocation32_spill] sm:$0xff] }
 0x524   :  { %v8675_v0 = vpop.eup %8674  ;;  %8676 = vrsqrt.f32 %v2258_v2  ;;  %v2259_v11 = vadd.f32 1e-05, %v2195_v7  ;;  %v2196_v41 = vsub.f32 %v2132_v21, %v2164_v12  ;;  %v2133_v13 = vmul.f32 0.0078125, %v2101_v45  ;;  %v14570_v12 = vld [vmem:[#allocation29_spill] sm:$0xff] }
 0x525   :  { %v2319_v16 = vmul.f32 %v8675_v0, %v2223_v61  ;;  %v2356_v15 = vmul.f32 %v10524_v29, %v2318_v57  ;;  %v2397_v46 = vadd.f32 %v10532_v48, %v2359_v33  ;;  %v14572_v33 = vld [vmem:[#allocation31_spill] sm:$0xff]  ;;  %v2226_v57 = vsub.f32 %v10504_v17, %v10824_v44 }
 0x526   :  { %8678 = vrsqrt.f32 %v2259_v11  ;;  %v2260_v53 = vadd.f32 1e-05, %v2196_v41  ;;  %v2197_v49 = vsub.f32 %v2133_v13, %v2165_v60  ;;  %v10881_v61 = vadd.f32 %v2396_v14, %v14572_v33  ;;  %v14574_v60 = vld [vmem:[#allocation30_spill] sm:$0xff] }
 0x527   :  { %v2357_v3 = vmul.f32 %v10524_v29, %v2319_v16  ;;  %v2394_v35 = vadd.f32 %v10532_v48, %v2356_v15  ;;  %v10874_v7 = vadd.f32 %v2397_v46, %v14568_v30  ;;  %v2227_v16 = vsub.f32 %v10508_v50, %v10832_v18 }
 0x528   :  { %8680 = vrsqrt.f32 %v2260_v53  ;;  %v2261_v28 = vadd.f32 1e-05, %v2197_v49  ;;  %14573 = vst [vmem:[#allocation31_spill] sm:$0xff] %v10881_v61  ;;  %v14322_v13 = vmax.f32 %v10881_v61, 0.0  ;;  %v2228_v44 = vsub.f32 %v10497_v1, %v10837_v63 }
 0x529   :  { %14569 = vst [vmem:[#allocation32_spill] sm:$0xff] %v10874_v7  ;;  %v2395_v21 = vadd.f32 %v10532_v48, %v2357_v3  ;;  %v10878_v2 = vadd.f32 %v2394_v35, %v14570_v12  ;;  %v14324_v45 = vmax.f32 %v10874_v7, 0.0  ;;  %v2229_v18 = vsub.f32 %v10500_v51, %v10846_v8  ;;  %v14576_v12 = vld [vmem:[#allocation9_spill] sm:$0xff] }
 0x52a   :  { %8682 = vrsqrt.f32 %v2261_v28 }
 0x52b   :  { %14571 = vst [vmem:[#allocation29_spill] sm:$0xff] %v10878_v2  ;;  %v10884_v34 = vadd.f32 %v2395_v21, %v14574_v60  ;;  %v14323_v0 = vmax.f32 %v10878_v2, 0.0  ;;  %v2479_v17 = vpack.c.bf16 %v14324_v45, %v14322_v13  ;;  %v14578_v60 = vld [vmem:[#allocation11_spill] sm:$0xff] }
 0x52d   :  { %14575 = vst [vmem:[#allocation30_spill] sm:$0xff] %v10884_v34  ;;  %v14321_v11 = vmax.f32 %v10884_v34, 0.0 }
 0x52e   :  { %v8677_v41 = vpop.eup %8676 }
 0x52f   :  { %v2478_v15 = vpack.c.bf16 %v14321_v11, %v14323_v0  ;;  %v2322_v46 = vmul.f32 %v8677_v41, %v2226_v57 }
 0x530   :  { %v8679_v53 = vpop.eup %8678 }
 0x531   :  { %8153 = vmatprep.mubr.bf16.mxu1 %v2478_v15  ;;  %v2323_v49 = vmul.f32 %v8679_v53, %v2227_v16  ;;  %v2360_v14 = vmul.f32 %v10524_v29, %v2322_v46  ;;  %v14580_v46 = vld [vmem:[#allocation8_spill] sm:$0xff] }
 0x532   :  { %v8681_v50 = vpop.eup %8680  ;;  %8154 = vmatmul.mubr.bf16.gmra.mrb[72].mxu1 %v2479_v17 }
 0x533   :  { %v2361_v3 = vmul.f32 %v10524_v29, %v2323_v49  ;;  %v2398_v35 = vadd.f32 %v10532_v48, %v2360_v14  ;;  %v2324_v28 = vmul.f32 %v8681_v50, %v2228_v44  ;;  %v14582_v44 = vld [vmem:[#allocation10_spill] sm:$0xff]  ;;  %v10941_v50 = vld [vmem:[%s14260_s6 + $0x2] ss:$0 sm:$0xff] }
 0x534   :  { %v8683_v30 = vpop.eup %8682 }
 0x535   :  { %v2399_v21 = vadd.f32 %v10532_v48, %v2361_v3  ;;  %v10911_v33 = vadd.f32 %v2398_v35, %v14576_v12  ;;  %v2325_v1 = vmul.f32 %v8683_v30, %v2229_v18  ;;  %v2362_v63 = vmul.f32 %v10524_v29, %v2324_v28 }
 0x537   :  { %14577 = vst [vmem:[#allocation9_spill] sm:$0xff] %v10911_v33  ;;  %v10915_v57 = vadd.f32 %v2399_v21, %v14578_v60  ;;  %v2363_v41 = vmul.f32 %v10524_v29, %v2325_v1  ;;  %v2400_v51 = vadd.f32 %v10532_v48, %v2362_v63  ;;  %v14320_v8 = vmax.f32 %v10911_v33, 0.0  ;;  %v8452_v60 = vld [vmem:[%s14259_s5 + $0xc0] sm:$0xff]  }
 0x538   :  { %8161 = vmatprep.subr.bf16.mxu0 %v8452_v60 }
 0x539   :  { %14579 = vst [vmem:[#allocation11_spill] sm:$0xff] %v10915_v57  ;;  %v14319_v16 = vmax.f32 %v10915_v57, 0.0  ;;  %v2401_v15 = vadd.f32 %v10532_v48, %v2363_v41  ;;  %v10923_v53 = vadd.f32 %v2400_v51, %v14580_v46  ;;  %8162 = vmatpush3.bf16.msra.mxu0 %v8452_v60  ;;  %v8453_v46 = vld [vmem:[%s14259_s5 + $0xc8] sm:$0xff]  }
 0x53a   :  { %8163 = vmatprep.subr.bf16.mxu0 %v8453_v46 }
 0x53b   :  { %14581 = vst [vmem:[#allocation8_spill] sm:$0xff] %v10923_v53  ;;  %v2480_v17 = vpack.c.bf16 %v14319_v16, %v14320_v8  ;;  %v10930_v49 = vadd.f32 %v2401_v15, %v14582_v44  ;;  %v14318_v29 = vmax.f32 %v10923_v53, 0.0 }
 0x53d   :  { %14583 = vst [vmem:[#allocation10_spill] sm:$0xff] %v10930_v49  ;;  %8157 = vmatprep.mubr.bf16.mxu1 %v2480_v17  ;;  %v14317_v14 = vmax.f32 %v10930_v49, 0.0  ;;  %8164 = vmatpush3.bf16.msra.mxu0 %v8453_v46 }
 0x53f   :  { %v2481_v48 = vpack.c.bf16 %v14317_v14, %v14318_v29 }
 0x541   :  { %8158 = vmatmul.mubr.bf16.gmra.mrb[76].mxu1 %v2481_v48 }
 0x594   :  { %v8131_v18 = vpop.f32.mrb[48].mxu1 }
 0x595   :  { %v10944_v3 = vadd.f32 %v8131_v18, %v10941_v50  ;;  %v2589_v35 = vpop.f32.mrb[49].mxu1 }
 0x596   :  { %v8132_v28 = vpop.f32.mrb[50].mxu1  ;;  %v10951_v12 = vadd.f32 %v10941_v50, %v2589_v35 }
 0x597   :  { %v10947_v30 = vadd.f32 %v8132_v28, %v10941_v50  ;;  %2724 = vadd.xlane.f32.xlu0 %v10944_v3  ;;  %v2592_v21 = vpop.f32.mrb[51].mxu1  ;;  %v2818_v63 = vmul.f32 %v10944_v3, %v10944_v3 }
 0x598   :  { %v10955_v1 = vadd.f32 %v10941_v50, %v2592_v21  ;;  %v2816_v51 = vmul.f32 %v10951_v12, %v10951_v12 }
 0x599   :  { %2726 = vadd.xlane.f32.xlu1 %v10947_v30  ;;  %v2819_v41 = vmul.f32 %v10947_v30, %v10947_v30 }
 0x59a   :  { %v2817_v15 = vmul.f32 %v10955_v1, %v10955_v1 }
 0x59b   :  { %2720 = vadd.xlane.f32.xlu0 %v10951_v12 }
 0x59d   :  { %2722 = vadd.xlane.f32.xlu1 %v10955_v1 }
 0x59f   :  { %2852 = vadd.xlane.f32.xlu0 %v2818_v63  ;;  %v8454_v63 = vld [vmem:[%s14259_s5 + $0xd0] sm:$0xff]  }
 0x5a0   :  { %8165 = vmatprep.subr.bf16.mxu0 %v8454_v63 }
 0x5a1   :  { %2854 = vadd.xlane.f32.xlu1 %v2819_v41  ;;  %8166 = vmatpush3.bf16.msra.mxu0 %v8454_v63 }
 0x5a3   :  { %2848 = vadd.xlane.f32.xlu0 %v2816_v51  ;;  %v8455_v51 = vld [vmem:[%s14259_s5 + $0xd8] sm:$0xff]  }
 0x5a4   :  { %8167 = vmatprep.subr.bf16.mxu0 %v8455_v51 }
 0x5a5   :  { %2850 = vadd.xlane.f32.xlu1 %v2817_v15  ;;  %8168 = vmatpush3.bf16.msra.mxu0 %v8455_v51 }
 0x5b1   :  { %v8135_v17 = vpop.f32.mrb[52].mxu1 }
 0x5b2   :  { %v10974_v44 = vadd.f32 %v8135_v17, %v10941_v50  ;;  %v2605_v48 = vpop.f32.mrb[53].mxu1  ;;  %v8456_v17 = vld [vmem:[%s14259_s5 + $0xe0] sm:$0xff]  }
 0x5b3   :  { %v8136_v18 = vpop.f32.mrb[54].mxu1  ;;  %v10981_v21 = vadd.f32 %v10941_v50, %v2605_v48  ;;  %8169 = vmatprep.subr.bf16.mxu0 %v8456_v17 }
 0x5b4   :  { %v10977_v35 = vadd.f32 %v8136_v18, %v10941_v50  ;;  %2732 = vadd.xlane.f32.xlu0 %v10974_v44  ;;  %v2608_v28 = vpop.f32.mrb[55].mxu1  ;;  %v2822_v41 = vmul.f32 %v10974_v44, %v10974_v44  ;;  %8170 = vmatpush3.bf16.msra.mxu0 %v8456_v17  ;;  %v8457_v18 = vld [vmem:[%s14259_s5 + $0xe8] sm:$0xff]  }
 0x5b5   :  { %v10988_v60 = vadd.f32 %v10941_v50, %v2608_v28  ;;  %v2820_v46 = vmul.f32 %v10981_v21, %v10981_v21  ;;  %8171 = vmatprep.subr.bf16.mxu0 %v8457_v18 }
 0x5b6   :  { %2734 = vadd.xlane.f32.xlu1 %v10977_v35  ;;  %v2823_v15 = vmul.f32 %v10977_v35, %v10977_v35 }
 0x5b7   :  { %v2821_v48 = vmul.f32 %v10988_v60, %v10988_v60 }
 0x5b8   :  { %2728 = vadd.xlane.f32.xlu0 %v10981_v21  ;;  %8172 = vmatpush3.bf16.msra.mxu0 %v8457_v18  ;;  %v8459_v18 = vld [vmem:[%s14259_s5 + $0xf8] sm:$0xff]  }
 0x5ba   :  { %2730 = vadd.xlane.f32.xlu1 %v10988_v60 }
 0x5bc   :  { %2860 = vadd.xlane.f32.xlu0 %v2822_v41 }
 0x5be   :  { %2862 = vadd.xlane.f32.xlu1 %v2823_v15  ;;  %v8458_v15 = vld [vmem:[%s14259_s5 + $0xf0] sm:$0xff]  }
 0x5bf   :  { %8173 = vmatprep.subr.bf16.mxu0 %v8458_v15 }
 0x5c0   :  { %2856 = vadd.xlane.f32.xlu0 %v2820_v46  ;;  %8174 = vmatpush3.bf16.msra.mxu0 %v8458_v15 }
 0x5c1   :  { %8175 = vmatprep.subr.bf16.mxu0 %v8459_v18 }
 0x5c2   :  { %2858 = vadd.xlane.f32.xlu1 %v2821_v48 }
 0x5c4   :  { %8176 = vmatpush3.bf16.msra.mxu0 %v8459_v18 }
 0x5c5   :  { %v8139_v28 = vpop.f32.mrb[56].mxu1 }
 0x5c6   :  { %v11010_v63 = vadd.f32 %v8139_v28, %v10941_v50  ;;  %v2621_v41 = vpop.f32.mrb[57].mxu1 }
 0x5c7   :  { %v8140_v51 = vpop.f32.mrb[58].mxu1  ;;  %v11020_v48 = vadd.f32 %v10941_v50, %v2621_v41 }
 0x5c8   :  { %v11016_v46 = vadd.f32 %v8140_v51, %v10941_v50  ;;  %2740 = vadd.xlane.f32.xlu0 %v11010_v63  ;;  %v2624_v17 = vpop.f32.mrb[59].mxu1  ;;  %v2826_v51 = vmul.f32 %v11010_v63, %v11010_v63 }
 0x5c9   :  { %v11027_v28 = vadd.f32 %v10941_v50, %v2624_v17  ;;  %v2824_v15 = vmul.f32 %v11020_v48, %v11020_v48 }
 0x5ca   :  { %2742 = vadd.xlane.f32.xlu1 %v11016_v46  ;;  %v2827_v41 = vmul.f32 %v11016_v46, %v11016_v46 }
 0x5cb   :  { %v2825_v17 = vmul.f32 %v11027_v28, %v11027_v28 }
 0x5cc   :  { %2736 = vadd.xlane.f32.xlu0 %v11020_v48 }
 0x5ce   :  { %2738 = vadd.xlane.f32.xlu1 %v11027_v28 }
 0x5d0   :  { %2868 = vadd.xlane.f32.xlu0 %v2826_v51 }
 0x5d2   :  { %2870 = vadd.xlane.f32.xlu1 %v2827_v41 }
 0x5d4   :  { %2864 = vadd.xlane.f32.xlu0 %v2824_v15 }
 0x5d5   :  { %v8143_v14 = vpop.f32.mrb[60].mxu1 }
 0x5d6   :  { %v11040_v29 = vadd.f32 %v8143_v14, %v10941_v50  ;;  %2866 = vadd.xlane.f32.xlu1 %v2825_v17  ;;  %v2637_v16 = vpop.f32.mrb[61].mxu1 }
 0x5d7   :  { %v8144_v8 = vpop.f32.mrb[62].mxu1  ;;  %v11047_v41 = vadd.f32 %v10941_v50, %v2637_v16 }
 0x5d8   :  { %v11043_v18 = vadd.f32 %v8144_v8, %v10941_v50  ;;  %2748 = vadd.xlane.f32.xlu0 %v11040_v29  ;;  %v2640_v51 = vpop.f32.mrb[63].mxu1  ;;  %v2830_v14 = vmul.f32 %v11040_v29, %v11040_v29 }
 0x5d9   :  { %v11051_v15 = vadd.f32 %v10941_v50, %v2640_v51  ;;  %v2828_v16 = vmul.f32 %v11047_v41, %v11047_v41 }
 0x5da   :  { %2750 = vadd.xlane.f32.xlu1 %v11043_v18  ;;  %v2831_v8 = vmul.f32 %v11043_v18, %v11043_v18 }
 0x5db   :  { %v2829_v17 = vmul.f32 %v11051_v15, %v11051_v15 }
 0x5dc   :  { %2744 = vadd.xlane.f32.xlu0 %v11047_v41 }
 0x5de   :  { %2746 = vadd.xlane.f32.xlu1 %v11051_v15 }
 0x5e0   :  { %2876 = vadd.xlane.f32.xlu0 %v2830_v14 }
 0x5e2   :  { %2878 = vadd.xlane.f32.xlu1 %v2831_v8 }
 0x5e4   :  { %2872 = vadd.xlane.f32.xlu0 %v2828_v16 }
 0x5e5   :  { %v8147_v51 = vpop.f32.mrb[64].mxu1 }
 0x5e6   :  { %v11064_v11 = vadd.f32 %v8147_v51, %v10941_v50  ;;  %2874 = vadd.xlane.f32.xlu1 %v2829_v17  ;;  %v2653_v13 = vpop.f32.mrb[65].mxu1 }
 0x5e7   :  { %v8148_v0 = vpop.f32.mrb[66].mxu1  ;;  %v11071_v45 = vadd.f32 %v10941_v50, %v2653_v13 }
 0x5e8   :  { %v11067_v14 = vadd.f32 %v8148_v0, %v10941_v50  ;;  %2756 = vadd.xlane.f32.xlu0 %v11064_v11  ;;  %v2656_v8 = vpop.f32.mrb[67].mxu1  ;;  %v2834_v17 = vmul.f32 %v11064_v11, %v11064_v11 }
 0x5e9   :  { %v11075_v16 = vadd.f32 %v10941_v50, %v2656_v8  ;;  %v2832_v13 = vmul.f32 %v11071_v45, %v11071_v45 }
 0x5ea   :  { %2758 = vadd.xlane.f32.xlu1 %v11067_v14  ;;  %v2835_v0 = vmul.f32 %v11067_v14, %v11067_v14 }
 0x5eb   :  { %v2833_v51 = vmul.f32 %v11075_v16, %v11075_v16 }
 0x5ec   :  { %2752 = vadd.xlane.f32.xlu0 %v11071_v45 }
 0x5ee   :  { %2754 = vadd.xlane.f32.xlu1 %v11075_v16 }
 0x5f0   :  { %2884 = vadd.xlane.f32.xlu0 %v2834_v17 }
 0x5f2   :  { %2886 = vadd.xlane.f32.xlu1 %v2835_v0 }
 0x5f4   :  { %2880 = vadd.xlane.f32.xlu0 %v2832_v13 }
 0x5f5   :  { %v8151_v8 = vpop.f32.mrb[68].mxu1 }
 0x5f6   :  { %v11088_v9 = vadd.f32 %v8151_v8, %v10941_v50  ;;  %2882 = vadd.xlane.f32.xlu1 %v2833_v51  ;;  %v2669_v47 = vpop.f32.mrb[69].mxu1 }
 0x5f7   :  { %v8152_v10 = vpop.f32.mrb[70].mxu1  ;;  %v11095_v42 = vadd.f32 %v10941_v50, %v2669_v47 }
 0x5f8   :  { %v11091_v17 = vadd.f32 %v8152_v10, %v10941_v50  ;;  %2764 = vadd.xlane.f32.xlu0 %v11088_v9  ;;  %v2672_v0 = vpop.f32.mrb[71].mxu1  ;;  %v2838_v51 = vmul.f32 %v11088_v9, %v11088_v9 }
 0x5f9   :  { %v11099_v13 = vadd.f32 %v10941_v50, %v2672_v0  ;;  %v2836_v47 = vmul.f32 %v11095_v42, %v11095_v42 }
 0x5fa   :  { %2766 = vadd.xlane.f32.xlu1 %v11091_v17  ;;  %v2839_v10 = vmul.f32 %v11091_v17, %v11091_v17 }
 0x5fb   :  { %v2837_v8 = vmul.f32 %v11099_v13, %v11099_v13 }
 0x5fc   :  { %2760 = vadd.xlane.f32.xlu0 %v11095_v42 }
 0x5fe   :  { %2762 = vadd.xlane.f32.xlu1 %v11099_v13 }
 0x600   :  { %2892 = vadd.xlane.f32.xlu0 %v2838_v51 }
 0x602   :  { %2894 = vadd.xlane.f32.xlu1 %v2839_v10 }
 0x604   :  { %2888 = vadd.xlane.f32.xlu0 %v2836_v47 }
 0x605   :  { %v8155_v0 = vpop.f32.mrb[72].mxu1 }
 0x606   :  { %v11112_v55 = vadd.f32 %v8155_v0, %v10941_v50  ;;  %2890 = vadd.xlane.f32.xlu1 %v2837_v8  ;;  %v2685_v36 = vpop.f32.mrb[73].mxu1 }
 0x607   :  { %v8156_v27 = vpop.f32.mrb[74].mxu1  ;;  %v11119_v49 = vadd.f32 %v10941_v50, %v2685_v36 }
 0x608   :  { %v11115_v51 = vadd.f32 %v8156_v27, %v10941_v50  ;;  %2772 = vadd.xlane.f32.xlu0 %v11112_v55  ;;  %v2688_v10 = vpop.f32.mrb[75].mxu1  ;;  %v2842_v8 = vmul.f32 %v11112_v55, %v11112_v55 }
 0x609   :  { %v11123_v47 = vadd.f32 %v10941_v50, %v2688_v10  ;;  %v2840_v36 = vmul.f32 %v11119_v49, %v11119_v49 }
 0x60a   :  { %2774 = vadd.xlane.f32.xlu1 %v11115_v51  ;;  %v2843_v27 = vmul.f32 %v11115_v51, %v11115_v51 }
 0x60b   :  { %v2841_v10 = vmul.f32 %v11123_v47, %v11123_v47 }
 0x60c   :  { %2768 = vadd.xlane.f32.xlu0 %v11119_v49 }
 0x60e   :  { %2770 = vadd.xlane.f32.xlu1 %v11123_v47 }
 0x610   :  { %2900 = vadd.xlane.f32.xlu0 %v2842_v8 }
 0x612   :  { %2902 = vadd.xlane.f32.xlu1 %v2843_v27 }
 0x614   :  { %2896 = vadd.xlane.f32.xlu0 %v2840_v36  ;;  %v8159_v0 = vpop.f32.mrb[76].mxu1 }
 0x615   :  { %v11136_v53 = vadd.f32 %v8159_v0, %v10941_v50  ;;  %v2701_v57 = vpop.f32.mrb[77].mxu1 }
 0x616   :  { %2898 = vadd.xlane.f32.xlu1 %v2841_v10  ;;  %v8160_v33 = vpop.f32.mrb[78].mxu1  ;;  %v11143_v27 = vadd.f32 %v10941_v50, %v2701_v57 }
 0x617   :  { %v11139_v8 = vadd.f32 %v8160_v33, %v10941_v50  ;;  %v2704_v34 = vpop.f32.mrb[79].mxu1  ;;  %v2846_v57 = vmul.f32 %v11136_v53, %v11136_v53 }
 0x618   :  { %2780 = vadd.xlane.f32.xlu0 %v11136_v53  ;;  %v11147_v36 = vadd.f32 %v10941_v50, %v2704_v34  ;;  %v2844_v0 = vmul.f32 %v11143_v27, %v11143_v27 }
 0x619   :  { %v2847_v34 = vmul.f32 %v11139_v8, %v11139_v8 }
 0x61a   :  { %2782 = vadd.xlane.f32.xlu1 %v11139_v8  ;;  %v2845_v33 = vmul.f32 %v11147_v36, %v11147_v36 }
 0x61c   :  { %2776 = vadd.xlane.f32.xlu0 %v11143_v27 }
 0x61e   :  { %2778 = vadd.xlane.f32.xlu1 %v11147_v36 }
 0x620   :  { %2904 = vadd.xlane.f32.xlu0 %v2844_v0 }
 0x622   :  { %2906 = vadd.xlane.f32.xlu1 %v2845_v33 }
 0x624   :  { %2908 = vadd.xlane.f32.xlu0 %v2846_v57  ;;  %v2725_v50 = vpop.xlane.xlu0 %2724 }
 0x625   :  { %v2786_v2 = vmul.f32 0.0078125, %v2725_v50 }
 0x626   :  { %2910 = vadd.xlane.f32.xlu1 %v2847_v34  ;;  %v2727_v10 = vpop.xlane.xlu1 %2726 }
 0x627   :  { %v2787_v26 = vmul.f32 0.0078125, %v2727_v10  ;;  %v2946_v0 = vmul.f32 %v2786_v2, %v2786_v2 }
 0x628   :  { %v2721_v61 = vpop.xlane.xlu0 %2720 }
 0x629   :  { %v2784_v24 = vmul.f32 0.0078125, %v2721_v61  ;;  %v2947_v23 = vmul.f32 %v2787_v26, %v2787_v26 }
 0x62a   :  { %v2723_v7 = vpop.xlane.xlu1 %2722 }
 0x62b   :  { %v2785_v6 = vmul.f32 0.0078125, %v2723_v7  ;;  %v2944_v43 = vmul.f32 %v2784_v24, %v2784_v24 }
 0x62c   :  { %v2853_v32 = vpop.xlane.xlu0 %2852 }
 0x62d   :  { %v2914_v58 = vmul.f32 0.0078125, %v2853_v32  ;;  %v2945_v34 = vmul.f32 %v2785_v6, %v2785_v6 }
 0x62e   :  { %v2855_v33 = vpop.xlane.xlu1 %2854 }
 0x62f   :  { %v2978_v38 = vsub.f32 %v2914_v58, %v2946_v0  ;;  %v2915_v39 = vmul.f32 0.0078125, %v2855_v33  ;;  %v3010_v58 = vsub.f32 %v10944_v3, %v2786_v2  ;;  %v3011_v0 = vsub.f32 %v10947_v30, %v2787_v26 }
 0x630   :  { %v2849_v57 = vpop.xlane.xlu0 %2848 }
 0x631   :  { %v3042_v54 = vadd.f32 1e-05, %v2978_v38  ;;  %v2979_v56 = vsub.f32 %v2915_v39, %v2947_v23  ;;  %v2912_v31 = vmul.f32 0.0078125, %v2849_v57  ;;  %v3008_v23 = vsub.f32 %v10951_v12, %v2784_v24  ;;  %v11173_v24 = vld [vmem:[%s14262_s8 + $0x2] ss:$0 sm:$0xff] }
 0x632   :  { %v2851_v25 = vpop.xlane.xlu1 %2850 }
 0x633   :  { %8684 = vrsqrt.f32 %v3042_v54  ;;  %v3043_v50 = vadd.f32 1e-05, %v2979_v56  ;;  %v2976_v22 = vsub.f32 %v2912_v31, %v2944_v43  ;;  %v2913_v10 = vmul.f32 0.0078125, %v2851_v25  ;;  %v11165_v25 = vld [vmem:[%s14261_s7 + $0x2] ss:$0 sm:$0xff] }
 0x635   :  { %8686 = vrsqrt.f32 %v3043_v50  ;;  %v3040_v52 = vadd.f32 1e-05, %v2976_v22  ;;  %v2977_v61 = vsub.f32 %v2913_v10, %v2945_v34 }
 0x637   :  { %8688 = vrsqrt.f32 %v3040_v52  ;;  %v3041_v32 = vadd.f32 1e-05, %v2977_v61  ;;  %v3009_v52 = vsub.f32 %v10955_v1, %v2785_v6 }
 0x639   :  { %8690 = vrsqrt.f32 %v3041_v32 }
 0x63d   :  { %v8685_v7 = vpop.eup %8684 }
 0x63e   :  { %v3106_v39 = vmul.f32 %v8685_v7, %v3010_v58 }
 0x63f   :  { %v8687_v38 = vpop.eup %8686 }
 0x640   :  { %v3107_v33 = vmul.f32 %v8687_v38, %v3011_v0  ;;  %v3144_v26 = vmul.f32 %v11165_v25, %v3106_v39 }
 0x641   :  { %v2733_v54 = vpop.xlane.xlu0 %2732  ;;  %v8689_v22 = vpop.eup %8688 }
 0x642   :  { %v3104_v56 = vmul.f32 %v8689_v22, %v3008_v23  ;;  %v3145_v43 = vmul.f32 %v11165_v25, %v3107_v33  ;;  %v2790_v57 = vmul.f32 0.0078125, %v2733_v54  ;;  %v3182_v61 = vadd.f32 %v11173_v24, %v3144_v26 }
 0x643   :  { %v2735_v31 = vpop.xlane.xlu1 %2734  ;;  %v8691_v2 = vpop.eup %8690 }
 0x644   :  { %v3105_v30 = vmul.f32 %v8691_v2, %v3009_v52  ;;  %v3142_v12 = vmul.f32 %v11165_v25, %v3104_v56  ;;  %v3183_v34 = vadd.f32 %v11173_v24, %v3145_v43  ;;  %v2791_v10 = vmul.f32 0.0078125, %v2735_v31 }
 0x645   :  { %v2729_v3 = vpop.xlane.xlu0 %2728  ;;  %v2950_v0 = vmul.f32 %v2790_v57, %v2790_v57  ;;  %v3214_v2 = vmax.f32 %v3182_v61, 0.0 }
 0x646   :  { %v3143_v1 = vmul.f32 %v11165_v25, %v3105_v30  ;;  %v3180_v50 = vadd.f32 %v11173_v24, %v3142_v12  ;;  %v2788_v32 = vmul.f32 0.0078125, %v2729_v3  ;;  %v3215_v39 = vmax.f32 %v3183_v34, 0.0 }
 0x647   :  { %v2731_v6 = vpop.xlane.xlu1 %2730  ;;  %v2951_v52 = vmul.f32 %v2791_v10, %v2791_v10 }
 0x648   :  { %v3181_v58 = vadd.f32 %v11173_v24, %v3143_v1  ;;  %v2789_v23 = vmul.f32 0.0078125, %v2731_v6  ;;  %v3212_v54 = vmax.f32 %v3180_v50, 0.0  ;;  %v2948_v30 = vmul.f32 %v2788_v32, %v2788_v32 }
 0x649   :  { %v2861_v7 = vpop.xlane.xlu0 %2860  ;;  %v3245_v40 = vpack.c.bf16 %v3215_v39, %v3214_v2 }
 0x64a   :  { %v2918_v38 = vmul.f32 0.0078125, %v2861_v7  ;;  %v3213_v22 = vmax.f32 %v3181_v58, 0.0  ;;  %v2949_v59 = vmul.f32 %v2789_v23, %v2789_v23 }
 0x64b   :  { %v2863_v33 = vpop.xlane.xlu1 %2862 }
 0x64c   :  { %v2982_v56 = vsub.f32 %v2918_v38, %v2950_v0  ;;  %v2919_v43 = vmul.f32 0.0078125, %v2863_v33  ;;  %v3244_v31 = vpack.c.bf16 %v3213_v22, %v3212_v54  ;;  %v3014_v33 = vsub.f32 %v10974_v44, %v2790_v57 }
 0x64d   :  { %v2857_v12 = vpop.xlane.xlu0 %2856  ;;  %v3013_v44 = vsub.f32 %v10988_v60, %v2789_v23 }
 0x64e   :  { %v3046_v20 = vadd.f32 1e-05, %v2982_v56  ;;  %v2983_v26 = vsub.f32 %v2919_v43, %v2951_v52  ;;  %v2916_v3 = vmul.f32 0.0078125, %v2857_v12  ;;  %8177 = vmatprep.mubr.bf16.mxu0 %v3244_v31 }
 0x64f   :  { %v2859_v1 = vpop.xlane.xlu1 %2858  ;;  %8178 = vmatmul.mubr.bf16.vlgmr.msra.gmra.mrb[48].mxu0 %v3245_v40 }
 0x650   :  { %8692 = vrsqrt.f32 %v3046_v20  ;;  %v3047_v34 = vadd.f32 1e-05, %v2983_v26  ;;  %v2980_v6 = vsub.f32 %v2916_v3, %v2948_v30  ;;  %v2917_v7 = vmul.f32 0.0078125, %v2859_v1 }
 0x651   :  { %v3015_v20 = vsub.f32 %v10977_v35, %v2791_v10 }
 0x652   :  { %8694 = vrsqrt.f32 %v3047_v34  ;;  %v3044_v50 = vadd.f32 1e-05, %v2980_v6  ;;  %v2981_v58 = vsub.f32 %v2917_v7, %v2949_v59  ;;  %v3012_v59 = vsub.f32 %v10981_v21, %v2788_v32 }
 0x654   :  { %8696 = vrsqrt.f32 %v3044_v50  ;;  %v3045_v61 = vadd.f32 1e-05, %v2981_v58 }
 0x655   :  { %v2741_v0 = vpop.xlane.xlu0 %2740 }
 0x656   :  { %8698 = vrsqrt.f32 %v3045_v61  ;;  %v11182_v22 = vmul.f32 0.0078125, %v2741_v0 }
 0x657   :  { %v2743_v38 = vpop.xlane.xlu1 %2742 }
 0x658   :  { %v11185_v40 = vmul.f32 0.0078125, %v2743_v38  ;;  %v2954_v57 = vmul.f32 %v11182_v22, %v11182_v22 }
 0x659   :  { %v2737_v54 = vpop.xlane.xlu0 %2736 }
 0x65a   :  { %v8693_v39 = vpop.eup %8692  ;;  %v11188_v2 = vmul.f32 0.0078125, %v2737_v54  ;;  %v2955_v32 = vmul.f32 %v11185_v40, %v11185_v40 }
 0x65b   :  { %v2739_v52 = vpop.xlane.xlu1 %2738  ;;  %v3110_v56 = vmul.f32 %v8693_v39, %v3014_v33 }
 0x65c   :  { %v8695_v43 = vpop.eup %8694  ;;  %v11193_v3 = vmul.f32 0.0078125, %v2739_v52  ;;  %v2952_v60 = vmul.f32 %v11188_v2, %v11188_v2 }
 0x65d   :  { %v2869_v30 = vpop.xlane.xlu0 %2868  ;;  %v3111_v12 = vmul.f32 %v8695_v43, %v3015_v20  ;;  %v3148_v1 = vmul.f32 %v11165_v25, %v3110_v56 }
 0x65e   :  { %v8697_v31 = vpop.eup %8696  ;;  %v2922_v26 = vmul.f32 0.0078125, %v2869_v30  ;;  %v2953_v54 = vmul.f32 %v11193_v3, %v11193_v3 }
 0x65f   :  { %v2871_v35 = vpop.xlane.xlu1 %2870  ;;  %v3108_v10 = vmul.f32 %v8697_v31, %v3012_v59  ;;  %v3149_v34 = vmul.f32 %v11165_v25, %v3111_v12  ;;  %v3186_v56 = vadd.f32 %v11173_v24, %v3148_v1 }
 0x660   :  { %v8699_v21 = vpop.eup %8698  ;;  %v2986_v6 = vsub.f32 %v2922_v26, %v2954_v57  ;;  %v2923_v7 = vmul.f32 0.0078125, %v2871_v35 }
 0x661   :  { %v2865_v23 = vpop.xlane.xlu0 %2864  ;;  %v3109_v50 = vmul.f32 %v8699_v21, %v3013_v44  ;;  %v3146_v58 = vmul.f32 %v11165_v25, %v3108_v10  ;;  %v3187_v33 = vadd.f32 %v11173_v24, %v3149_v34 }
 0x662   :  { %v3050_v61 = vadd.f32 1e-05, %v2986_v6  ;;  %v2987_v0 = vsub.f32 %v2923_v7, %v2955_v32  ;;  %v2920_v38 = vmul.f32 0.0078125, %v2865_v23  ;;  %v3218_v32 = vmax.f32 %v3186_v56, 0.0 }
 0x663   :  { %v2867_v39 = vpop.xlane.xlu1 %2866  ;;  %v3147_v20 = vmul.f32 %v11165_v25, %v3109_v50  ;;  %v3184_v52 = vadd.f32 %v11173_v24, %v3146_v58  ;;  %v3219_v26 = vmax.f32 %v3187_v33, 0.0  ;;  %v3018_v58 = vsub.f32 %v11010_v63, %v11182_v22 }
 0x664   :  { %8700 = vrsqrt.f32 %v3050_v61  ;;  %v3051_v43 = vadd.f32 1e-05, %v2987_v0  ;;  %v2984_v59 = vsub.f32 %v2920_v38, %v2952_v60  ;;  %v2921_v30 = vmul.f32 0.0078125, %v2867_v39 }
 0x665   :  { %v2749_v12 = vpop.xlane.xlu0 %2748  ;;  %v3185_v31 = vadd.f32 %v11173_v24, %v3147_v20  ;;  %v3216_v10 = vmax.f32 %v3184_v52, 0.0  ;;  %v3247_v60 = vpack.c.bf16 %v3219_v26, %v3218_v32  ;;  %v3019_v39 = vsub.f32 %v11016_v46, %v11185_v40 }
 0x666   :  { %8702 = vrsqrt.f32 %v3051_v43  ;;  %v3048_v44 = vadd.f32 1e-05, %v2984_v59  ;;  %v2985_v57 = vsub.f32 %v2921_v30, %v2953_v54  ;;  %v11209_v1 = vmul.f32 0.0078125, %v2749_v12 }
 0x667   :  { %v2751_v35 = vpop.xlane.xlu1 %2750  ;;  %v3217_v34 = vmax.f32 %v3185_v31, 0.0  ;;  %v3016_v30 = vsub.f32 %v11020_v48, %v11188_v2  ;;  %v3017_v12 = vsub.f32 %v11027_v28, %v11193_v3 }
 0x668   :  { %8704 = vrsqrt.f32 %v3048_v44  ;;  %v3049_v21 = vadd.f32 1e-05, %v2985_v57  ;;  %v11211_v50 = vmul.f32 0.0078125, %v2751_v35  ;;  %v2958_v38 = vmul.f32 %v11209_v1, %v11209_v1 }
 0x669   :  { %v2745_v6 = vpop.xlane.xlu0 %2744  ;;  %v3246_v7 = vpack.c.bf16 %v3217_v34, %v3216_v10 }
 0x66a   :  { %8706 = vrsqrt.f32 %v3049_v21  ;;  %v11217_v33 = vmul.f32 0.0078125, %v2745_v6  ;;  %v2959_v59 = vmul.f32 %v11211_v50, %v11211_v50 }
 0x66b   :  { %v2747_v23 = vpop.xlane.xlu1 %2746  ;;  %8181 = vmatprep.mubr.bf16.mxu0 %v3246_v7 }
 0x66c   :  { %8182 = vmatmul.mubr.bf16.gmra.mrb[52].mxu0 %v3247_v60  ;;  %v11221_v20 = vmul.f32 0.0078125, %v2747_v23  ;;  %v2956_v46 = vmul.f32 %v11217_v33, %v11217_v33 }
 0x66d   :  { %v2877_v61 = vpop.xlane.xlu0 %2876 }
 0x66e   :  { %v8701_v0 = vpop.eup %8700  ;;  %v2926_v54 = vmul.f32 0.0078125, %v2877_v61  ;;  %v2957_v10 = vmul.f32 %v11221_v20, %v11221_v20 }
 0x66f   :  { %v2879_v52 = vpop.xlane.xlu1 %2878  ;;  %v3114_v56 = vmul.f32 %v8701_v0, %v3018_v58 }
 0x670   :  { %v8703_v43 = vpop.eup %8702  ;;  %v2990_v63 = vsub.f32 %v2926_v54, %v2958_v38  ;;  %v2927_v22 = vmul.f32 0.0078125, %v2879_v52 }
 0x671   :  { %v2873_v31 = vpop.xlane.xlu0 %2872  ;;  %v3115_v44 = vmul.f32 %v8703_v43, %v3019_v39  ;;  %v3152_v32 = vmul.f32 %v11165_v25, %v3114_v56 }
 0x672   :  { %v8705_v57 = vpop.eup %8704  ;;  %v3054_v40 = vadd.f32 1e-05, %v2990_v63  ;;  %v2991_v26 = vsub.f32 %v2927_v22, %v2959_v59  ;;  %v2924_v35 = vmul.f32 0.0078125, %v2873_v31 }
 0x673   :  { %v2875_v34 = vpop.xlane.xlu1 %2874  ;;  %v3112_v21 = vmul.f32 %v8705_v57, %v3016_v30  ;;  %v3153_v48 = vmul.f32 %v11165_v25, %v3115_v44  ;;  %v3190_v56 = vadd.f32 %v11173_v24, %v3152_v32 }
 0x674   :  { %v8707_v2 = vpop.eup %8706  ;;  %8708 = vrsqrt.f32 %v3054_v40  ;;  %v3055_v28 = vadd.f32 1e-05, %v2991_v26  ;;  %v2988_v3 = vsub.f32 %v2924_v35, %v2956_v46  ;;  %v2925_v6 = vmul.f32 0.0078125, %v2875_v34 }
 0x675   :  { %v2757_v7 = vpop.xlane.xlu0 %2756  ;;  %v3113_v60 = vmul.f32 %v8707_v2, %v3017_v12  ;;  %v3150_v23 = vmul.f32 %v11165_v25, %v3112_v21  ;;  %v3191_v0 = vadd.f32 %v11173_v24, %v3153_v48  ;;  %v3222_v57 = vmax.f32 %v3190_v56, 0.0 }
 0x676   :  { %8710 = vrsqrt.f32 %v3055_v28  ;;  %v3052_v58 = vadd.f32 1e-05, %v2988_v3  ;;  %v2989_v61 = vsub.f32 %v2925_v6, %v2957_v10  ;;  %v11241_v63 = vmul.f32 0.0078125, %v2757_v7 }
 0x677   :  { %v2759_v38 = vpop.xlane.xlu1 %2758  ;;  %v3151_v54 = vmul.f32 %v11165_v25, %v3113_v60  ;;  %v3188_v39 = vadd.f32 %v11173_v24, %v3150_v23  ;;  %v3223_v22 = vmax.f32 %v3191_v0, 0.0  ;;  %v3022_v46 = vsub.f32 %v11040_v29, %v11209_v1 }
 0x678   :  { %8712 = vrsqrt.f32 %v3052_v58  ;;  %v3053_v52 = vadd.f32 1e-05, %v2989_v61  ;;  %v11243_v44 = vmul.f32 0.0078125, %v2759_v38  ;;  %v2962_v10 = vmul.f32 %v11241_v63, %v11241_v63 }
 0x679   :  { %v2753_v43 = vpop.xlane.xlu0 %2752  ;;  %v3189_v59 = vadd.f32 %v11173_v24, %v3151_v54  ;;  %v3220_v12 = vmax.f32 %v3188_v39, 0.0  ;;  %v3249_v32 = vpack.c.bf16 %v3223_v22, %v3222_v57  ;;  %v3023_v48 = vsub.f32 %v11043_v18, %v11211_v50 }
 0x67a   :  { %8714 = vrsqrt.f32 %v3053_v52  ;;  %v11249_v34 = vmul.f32 0.0078125, %v2753_v43  ;;  %v2963_v29 = vmul.f32 %v11243_v44, %v11243_v44  ;;  %v3020_v60 = vsub.f32 %v11047_v41, %v11217_v33 }
 0x67b   :  { %v2755_v30 = vpop.xlane.xlu1 %2754  ;;  %v3221_v31 = vmax.f32 %v3189_v59, 0.0  ;;  %v3021_v23 = vsub.f32 %v11051_v15, %v11221_v20 }
 0x67c   :  { %v11253_v2 = vmul.f32 0.0078125, %v2755_v30  ;;  %v2960_v61 = vmul.f32 %v11249_v34, %v11249_v34 }
 0x67d   :  { %v2885_v40 = vpop.xlane.xlu0 %2884  ;;  %v3248_v26 = vpack.c.bf16 %v3221_v31, %v3220_v12 }
 0x67e   :  { %v8709_v35 = vpop.eup %8708  ;;  %v2930_v21 = vmul.f32 0.0078125, %v2885_v40  ;;  %v2961_v39 = vmul.f32 %v11253_v2, %v11253_v2 }
 0x67f   :  { %v2887_v28 = vpop.xlane.xlu1 %2886  ;;  %8185 = vmatprep.mubr.bf16.mxu0 %v3248_v26  ;;  %v3118_v3 = vmul.f32 %v8709_v35, %v3022_v46 }
 0x680   :  { %v8711_v6 = vpop.eup %8710  ;;  %v2994_v1 = vsub.f32 %v2930_v21, %v2962_v10  ;;  %v2931_v7 = vmul.f32 0.0078125, %v2887_v28  ;;  %8186 = vmatmul.mubr.bf16.gmra.mrb[56].mxu0 %v3249_v32 }
 0x681   :  { %v2881_v58 = vpop.xlane.xlu0 %2880  ;;  %v3119_v18 = vmul.f32 %v8711_v6, %v3023_v48  ;;  %v3156_v43 = vmul.f32 %v11165_v25, %v3118_v3 }
 0x682   :  { %v8713_v50 = vpop.eup %8712  ;;  %v3058_v0 = vadd.f32 1e-05, %v2994_v1  ;;  %v2995_v38 = vsub.f32 %v2931_v7, %v2963_v29  ;;  %v2928_v54 = vmul.f32 0.0078125, %v2881_v58 }
 0x683   :  { %v2883_v52 = vpop.xlane.xlu1 %2882  ;;  %v3116_v56 = vmul.f32 %v8713_v50, %v3020_v60  ;;  %v3157_v41 = vmul.f32 %v11165_v25, %v3119_v18  ;;  %v3194_v21 = vadd.f32 %v11173_v24, %v3156_v43 }
 0x684   :  { %v8715_v33 = vpop.eup %8714  ;;  %8716 = vrsqrt.f32 %v3058_v0  ;;  %v3059_v15 = vadd.f32 1e-05, %v2995_v38  ;;  %v2992_v20 = vsub.f32 %v2928_v54, %v2960_v61  ;;  %v2929_v59 = vmul.f32 0.0078125, %v2883_v52 }
 0x685   :  { %v2765_v22 = vpop.xlane.xlu0 %2764  ;;  %v3117_v30 = vmul.f32 %v8715_v33, %v3021_v23  ;;  %v3154_v12 = vmul.f32 %v11165_v25, %v3116_v56  ;;  %v3195_v46 = vadd.f32 %v11173_v24, %v3157_v41  ;;  %v3226_v60 = vmax.f32 %v3194_v21, 0.0 }
 0x686   :  { %8718 = vrsqrt.f32 %v3059_v15  ;;  %v3056_v31 = vadd.f32 1e-05, %v2992_v20  ;;  %v2993_v57 = vsub.f32 %v2929_v59, %v2961_v39  ;;  %v11273_v28 = vmul.f32 0.0078125, %v2765_v22 }
 0x687   :  { %v2767_v40 = vpop.xlane.xlu1 %2766  ;;  %v3155_v26 = vmul.f32 %v11165_v25, %v3117_v30  ;;  %v3192_v35 = vadd.f32 %v11173_v24, %v3154_v12  ;;  %v3227_v3 = vmax.f32 %v3195_v46, 0.0  ;;  %v3026_v23 = vsub.f32 %v11064_v11, %v11241_v63 }
 0x688   :  { %8720 = vrsqrt.f32 %v3056_v31  ;;  %v3057_v10 = vadd.f32 1e-05, %v2993_v57  ;;  %v11275_v7 = vmul.f32 0.0078125, %v2767_v40  ;;  %v2966_v61 = vmul.f32 %v11273_v28, %v11273_v28 }
 0x689   :  { %v2761_v32 = vpop.xlane.xlu0 %2760  ;;  %v3193_v48 = vadd.f32 %v11173_v24, %v3155_v26  ;;  %v3224_v29 = vmax.f32 %v3192_v35, 0.0  ;;  %v3251_v54 = vpack.c.bf16 %v3227_v3, %v3226_v60  ;;  %v3027_v39 = vsub.f32 %v11067_v14, %v11243_v44 }
 0x68a   :  { %8722 = vrsqrt.f32 %v3057_v10  ;;  %v11281_v0 = vmul.f32 0.0078125, %v2761_v32  ;;  %v2967_v11 = vmul.f32 %v11275_v7, %v11275_v7  ;;  %v3024_v15 = vsub.f32 %v11071_v45, %v11249_v34 }
 0x68b   :  { %v2763_v6 = vpop.xlane.xlu1 %2762  ;;  %v3225_v1 = vmax.f32 %v3193_v48, 0.0  ;;  %v3025_v20 = vsub.f32 %v11075_v16, %v11253_v2 }
 0x68c   :  { %v11285_v52 = vmul.f32 0.0078125, %v2763_v6  ;;  %v2964_v22 = vmul.f32 %v11281_v0, %v11281_v0 }
 0x68d   :  { %v2893_v58 = vpop.xlane.xlu0 %2892  ;;  %v3250_v18 = vpack.c.bf16 %v3225_v1, %v3224_v29 }
 0x68e   :  { %v8717_v50 = vpop.eup %8716  ;;  %v2934_v38 = vmul.f32 0.0078125, %v2893_v58  ;;  %v2965_v57 = vmul.f32 %v11285_v52, %v11285_v52 }
 0x68f   :  { %v2895_v56 = vpop.xlane.xlu1 %2894  ;;  %8189 = vmatprep.mubr.bf16.mxu0 %v3250_v18  ;;  %v3122_v43 = vmul.f32 %v8717_v50, %v3026_v23 }
 0x690   :  { %v8719_v41 = vpop.eup %8718  ;;  %v2998_v63 = vsub.f32 %v2934_v38, %v2966_v61  ;;  %v2935_v33 = vmul.f32 0.0078125, %v2895_v56  ;;  %8190 = vmatmul.mubr.bf16.gmra.mrb[60].mxu0 %v3251_v54 }
 0x691   :  { %v2889_v59 = vpop.xlane.xlu0 %2888  ;;  %v3123_v14 = vmul.f32 %v8719_v41, %v3027_v39  ;;  %v3160_v26 = vmul.f32 %v11165_v25, %v3122_v43 }
 0x692   :  { %v8721_v44 = vpop.eup %8720  ;;  %v3062_v30 = vadd.f32 1e-05, %v2998_v63  ;;  %v2999_v12 = vsub.f32 %v2935_v33, %v2967_v11  ;;  %v2932_v31 = vmul.f32 0.0078125, %v2889_v59  ;;  %v3030_v11 = vsub.f32 %v11088_v9, %v11273_v28 }
 0x693   :  { %v2891_v46 = vpop.xlane.xlu1 %2890  ;;  %v3120_v40 = vmul.f32 %v8721_v44, %v3024_v15  ;;  %v3161_v45 = vmul.f32 %v11165_v25, %v3123_v14  ;;  %v3198_v58 = vadd.f32 %v11173_v24, %v3160_v26  ;;  %v3029_v26 = vsub.f32 %v11099_v13, %v11285_v52 }
 0x694   :  { %v8723_v34 = vpop.eup %8722  ;;  %8724 = vrsqrt.f32 %v3062_v30  ;;  %v3063_v16 = vadd.f32 1e-05, %v2999_v12  ;;  %v2996_v2 = vsub.f32 %v2932_v31, %v2964_v22  ;;  %v2933_v35 = vmul.f32 0.0078125, %v2891_v46 }
 0x695   :  { %v2773_v10 = vpop.xlane.xlu0 %2772  ;;  %v3121_v21 = vmul.f32 %v8723_v34, %v3025_v20  ;;  %v3158_v32 = vmul.f32 %v11165_v25, %v3120_v40  ;;  %v3199_v6 = vadd.f32 %v11173_v24, %v3161_v45  ;;  %v3230_v41 = vmax.f32 %v3198_v58, 0.0 }
 0x696   :  { %8726 = vrsqrt.f32 %v3063_v16  ;;  %v3060_v48 = vadd.f32 1e-05, %v2996_v2  ;;  %v2997_v3 = vsub.f32 %v2933_v35, %v2965_v57  ;;  %v11305_v61 = vmul.f32 0.0078125, %v2773_v10 }
 0x697   :  { %v2775_v29 = vpop.xlane.xlu1 %2774  ;;  %v3159_v1 = vmul.f32 %v11165_v25, %v3121_v21  ;;  %v3196_v60 = vadd.f32 %v11173_v24, %v3158_v32  ;;  %v3231_v38 = vmax.f32 %v3199_v6, 0.0  ;;  %v3031_v22 = vsub.f32 %v11091_v17, %v11275_v7 }
 0x698   :  { %8728 = vrsqrt.f32 %v3060_v48  ;;  %v3061_v23 = vadd.f32 1e-05, %v2997_v3  ;;  %v11307_v43 = vmul.f32 0.0078125, %v2775_v29  ;;  %v2970_v20 = vmul.f32 %v11305_v61, %v11305_v61 }
 0x699   :  { %v2769_v18 = vpop.xlane.xlu0 %2768  ;;  %v3197_v50 = vadd.f32 %v11173_v24, %v3159_v1  ;;  %v3228_v39 = vmax.f32 %v3196_v60, 0.0  ;;  %v3253_v44 = vpack.c.bf16 %v3231_v38, %v3230_v41  ;;  %v3028_v40 = vsub.f32 %v11095_v42, %v11281_v0 }
 0x69a   :  { %8730 = vrsqrt.f32 %v3061_v23  ;;  %v11313_v59 = vmul.f32 0.0078125, %v2769_v18  ;;  %v2971_v9 = vmul.f32 %v11307_v43, %v11307_v43 }
 0x69b   :  { %v2771_v54 = vpop.xlane.xlu1 %2770  ;;  %v3229_v56 = vmax.f32 %v3197_v50, 0.0 }
 0x69c   :  { %v11317_v30 = vmul.f32 0.0078125, %v2771_v54  ;;  %v2968_v34 = vmul.f32 %v11313_v59, %v11313_v59 }
 0x69d   :  { %v2901_v63 = vpop.xlane.xlu0 %2900  ;;  %v3252_v33 = vpack.c.bf16 %v3229_v56, %v3228_v39 }
 0x69e   :  { %v8725_v15 = vpop.eup %8724  ;;  %v2938_v14 = vmul.f32 0.0078125, %v2901_v63  ;;  %v2969_v10 = vmul.f32 %v11317_v30, %v11317_v30 }
 0x69f   :  { %v2903_v12 = vpop.xlane.xlu1 %2902  ;;  %8193 = vmatprep.mubr.bf16.mxu0 %v3252_v33  ;;  %v3126_v31 = vmul.f32 %v8725_v15, %v3030_v11 }
 0x6a0   :  { %v8727_v57 = vpop.eup %8726  ;;  %v3002_v28 = vsub.f32 %v2938_v14, %v2970_v20  ;;  %v2939_v46 = vmul.f32 0.0078125, %v2903_v12  ;;  %8194 = vmatmul.mubr.bf16.gmra.mrb[64].mxu0 %v3253_v44 }
 0x6a1   :  { %v2897_v45 = vpop.xlane.xlu0 %2896  ;;  %v3127_v17 = vmul.f32 %v8727_v57, %v3031_v22  ;;  %v3164_v48 = vmul.f32 %v11165_v25, %v3126_v31  ;;  %v3034_v22 = vsub.f32 %v11112_v55, %v11305_v61 }
 0x6a2   :  { %v8729_v7 = vpop.eup %8728  ;;  %v3066_v16 = vadd.f32 1e-05, %v3002_v28  ;;  %v3003_v2 = vsub.f32 %v2939_v46, %v2971_v9  ;;  %v2936_v35 = vmul.f32 0.0078125, %v2897_v45 }
 0x6a3   :  { %v2899_v21 = vpop.xlane.xlu1 %2898  ;;  %v3124_v32 = vmul.f32 %v8729_v7, %v3028_v40  ;;  %v3165_v42 = vmul.f32 %v11165_v25, %v3127_v17  ;;  %v3202_v39 = vadd.f32 %v11173_v24, %v3164_v48 }
 0x6a4   :  { %v8731_v0 = vpop.eup %8730  ;;  %8732 = vrsqrt.f32 %v3066_v16  ;;  %v3067_v13 = vadd.f32 1e-05, %v3003_v2  ;;  %v3000_v52 = vsub.f32 %v2936_v35, %v2968_v34  ;;  %v2937_v3 = vmul.f32 0.0078125, %v2899_v21 }
 0x6a5   :  { %v2781_v6 = vpop.xlane.xlu0 %2780  ;;  %v3125_v29 = vmul.f32 %v8731_v0, %v3029_v26  ;;  %v3162_v1 = vmul.f32 %v11165_v25, %v3124_v32  ;;  %v3203_v58 = vadd.f32 %v11173_v24, %v3165_v42  ;;  %v3234_v44 = vmax.f32 %v3202_v39, 0.0 }
 0x6a6   :  { %8734 = vrsqrt.f32 %v3067_v13  ;;  %v3064_v60 = vadd.f32 1e-05, %v3000_v52  ;;  %v3001_v23 = vsub.f32 %v2937_v3, %v2969_v10  ;;  %v11343_v9 = vmul.f32 0.0078125, %v2781_v6 }
 0x6a7   :  { %v2783_v18 = vpop.xlane.xlu1 %2782  ;;  %v3163_v50 = vmul.f32 %v11165_v25, %v3125_v29  ;;  %v3200_v38 = vadd.f32 %v11173_v24, %v3162_v1  ;;  %v3235_v63 = vmax.f32 %v3203_v58, 0.0  ;;  %v3035_v26 = vsub.f32 %v11115_v51, %v11307_v43 }
 0x6a8   :  { %8736 = vrsqrt.f32 %v3064_v60  ;;  %v3065_v54 = vadd.f32 1e-05, %v3001_v23  ;;  %v11349_v45 = vmul.f32 0.0078125, %v2783_v18  ;;  %v3032_v2 = vsub.f32 %v11119_v49, %v11313_v59 }
 0x6a9   :  { %v2777_v56 = vpop.xlane.xlu0 %2776  ;;  %v3201_v41 = vadd.f32 %v11173_v24, %v3163_v50  ;;  %v3232_v15 = vmax.f32 %v3200_v38, 0.0  ;;  %v3255_v40 = vpack.c.bf16 %v3235_v63, %v3234_v44  ;;  %v3033_v35 = vsub.f32 %v11123_v47, %v11317_v30 }
 0x6aa   :  { %8738 = vrsqrt.f32 %v3065_v54  ;;  %v11337_v11 = vmul.f32 0.0078125, %v2777_v56  ;;  %v2974_v21 = vmul.f32 %v11343_v9, %v11343_v9  ;;  %v2975_v0 = vmul.f32 %v11349_v45, %v11349_v45 }
 0x6ab   :  { %v2779_v33 = vpop.xlane.xlu1 %2778  ;;  %v3233_v20 = vmax.f32 %v3201_v41, 0.0 }
 0x6ac   :  { %v11339_v14 = vmul.f32 0.0078125, %v2779_v33  ;;  %v2972_v28 = vmul.f32 %v11337_v11, %v11337_v11 }
 0x6ad   :  { %v2905_v12 = vpop.xlane.xlu0 %2904  ;;  %v3254_v31 = vpack.c.bf16 %v3233_v20, %v3232_v15  ;;  %v3036_v15 = vsub.f32 %v11143_v27, %v11337_v11  ;;  %v3039_v27 = vsub.f32 %v11139_v8, %v11349_v45 }
 0x6ae   :  { %v8733_v57 = vpop.eup %8732  ;;  %v2940_v46 = vmul.f32 0.0078125, %v2905_v12  ;;  %v2973_v55 = vmul.f32 %v11339_v14, %v11339_v14  ;;  %v3037_v12 = vsub.f32 %v11147_v36, %v11339_v14 }
 0x6af   :  { %v2907_v17 = vpop.xlane.xlu1 %2906  ;;  %8197 = vmatprep.mubr.bf16.mxu0 %v3254_v31  ;;  %v3130_v7 = vmul.f32 %v8733_v57, %v3034_v22 }
 0x6b0   :  { %v8735_v34 = vpop.eup %8734  ;;  %v3004_v61 = vsub.f32 %v2940_v46, %v2972_v28  ;;  %v2941_v16 = vmul.f32 0.0078125, %v2907_v17  ;;  %8198 = vmatmul.mubr.bf16.gmra.mrb[68].mxu0 %v3255_v40  ;;  %v3038_v28 = vsub.f32 %v11136_v53, %v11343_v9 }
 0x6b1   :  { %v2909_v10 = vpop.xlane.xlu0 %2908  ;;  %v3131_v51 = vmul.f32 %v8735_v34, %v3035_v26  ;;  %v3168_v3 = vmul.f32 %v11165_v25, %v3130_v7 }
 0x6b2   :  { %v8737_v43 = vpop.eup %8736  ;;  %v3068_v32 = vadd.f32 1e-05, %v3004_v61  ;;  %v3005_v48 = vsub.f32 %v2941_v16, %v2973_v55  ;;  %v2942_v42 = vmul.f32 0.0078125, %v2909_v10 }
 0x6b3   :  { %v2911_v13 = vpop.xlane.xlu1 %2910  ;;  %v3128_v52 = vmul.f32 %v8737_v43, %v3032_v2  ;;  %v3169_v49 = vmul.f32 %v11165_v25, %v3131_v51  ;;  %v3206_v54 = vadd.f32 %v11173_v24, %v3168_v3  ;;  %v11388_v51 = vld [vmem:[%s14260_s6 + $0x3] ss:$0 sm:$0xff] }
 0x6b4   :  { %v8739_v59 = vpop.eup %8738  ;;  %8740 = vrsqrt.f32 %v3068_v32  ;;  %v3069_v47 = vadd.f32 1e-05, %v3005_v48  ;;  %v3006_v30 = vsub.f32 %v2942_v42, %v2974_v21  ;;  %v2943_v6 = vmul.f32 0.0078125, %v2911_v13  ;;  %v8460_v3 = vld [vmem:[%s14259_s5 + $0x100] sm:$0xff]  }
 0x6b5   :  { %v3129_v29 = vmul.f32 %v8739_v59, %v3033_v35  ;;  %v3166_v1 = vmul.f32 %v11165_v25, %v3128_v52  ;;  %v3207_v58 = vadd.f32 %v11173_v24, %v3169_v49  ;;  %v3238_v33 = vmax.f32 %v3206_v54, 0.0  ;;  %8209 = vmatprep.subr.bf16.mxu1 %v8460_v3 }
 0x6b6   :  { %8742 = vrsqrt.f32 %v3069_v47  ;;  %v3070_v60 = vadd.f32 1e-05, %v3006_v30  ;;  %v3007_v23 = vsub.f32 %v2943_v6, %v2975_v0  ;;  %8210 = vmatpush3.bf16.msra.mxu1 %v8460_v3  ;;  %v8461_v47 = vld [vmem:[%s14259_s5 + $0x108] sm:$0xff]  }
 0x6b7   :  { %v3167_v18 = vmul.f32 %v11165_v25, %v3129_v29  ;;  %v3204_v50 = vadd.f32 %v11173_v24, %v3166_v1  ;;  %v3239_v56 = vmax.f32 %v3207_v58, 0.0  ;;  %8211 = vmatprep.subr.bf16.mxu1 %v8461_v47 }
 0x6b8   :  { %8744 = vrsqrt.f32 %v3070_v60  ;;  %v3071_v38 = vadd.f32 1e-05, %v3007_v23 }
 0x6b9   :  { %v3205_v39 = vadd.f32 %v11173_v24, %v3167_v18  ;;  %v3236_v41 = vmax.f32 %v3204_v50, 0.0  ;;  %v3257_v22 = vpack.c.bf16 %v3239_v56, %v3238_v33  ;;  %v8462_v50 = vld [vmem:[%s14259_s5 + $0x110] sm:$0xff]  }
 0x6ba   :  { %8746 = vrsqrt.f32 %v3071_v38  ;;  %8212 = vmatpush3.bf16.msra.mxu1 %v8461_v47 }
 0x6bb   :  { %v3237_v63 = vmax.f32 %v3205_v39, 0.0  ;;  %8213 = vmatprep.subr.bf16.mxu1 %v8462_v50  ;;  %v8463_v39 = vld [vmem:[%s14259_s5 + $0x118] sm:$0xff]  }
 0x6bd   :  { %v3256_v20 = vpack.c.bf16 %v3237_v63, %v3236_v41  ;;  %v8464_v63 = vld [vmem:[%s14259_s5 + $0x120] sm:$0xff]  }
 0x6be   :  { %v8741_v44 = vpop.eup %8740  ;;  %8214 = vmatpush3.bf16.msra.mxu1 %v8462_v50 }
 0x6bf   :  { %8201 = vmatprep.mubr.bf16.mxu0 %v3256_v20  ;;  %v3132_v31 = vmul.f32 %v8741_v44, %v3036_v15  ;;  %8215 = vmatprep.subr.bf16.mxu1 %v8463_v39  ;;  %v8465_v15 = vld [vmem:[%s14259_s5 + $0x128] sm:$0xff]  }
 0x6c0   :  { %v8743_v57 = vpop.eup %8742  ;;  %8202 = vmatmul.mubr.bf16.gmra.mrb[72].mxu0 %v3257_v22 }
 0x6c1   :  { %v3133_v46 = vmul.f32 %v8743_v57, %v3037_v12  ;;  %v3170_v40 = vmul.f32 %v11165_v25, %v3132_v31  ;;  %v8466_v57 = vld [vmem:[%s14259_s5 + $0x130] sm:$0xff]  }
 0x6c2   :  { %v8745_v26 = vpop.eup %8744  ;;  %8216 = vmatpush3.bf16.msra.mxu1 %v8463_v39 }
 0x6c3   :  { %v3171_v11 = vmul.f32 %v11165_v25, %v3133_v46  ;;  %v3208_v17 = vadd.f32 %v11173_v24, %v3170_v40  ;;  %v3134_v7 = vmul.f32 %v8745_v26, %v3038_v28  ;;  %8217 = vmatprep.subr.bf16.mxu1 %v8464_v63  ;;  %v8467_v40 = vld [vmem:[%s14259_s5 + $0x138] sm:$0xff]  }
 0x6c4   :  { %v8747_v36 = vpop.eup %8746 }
 0x6c5   :  { %v3209_v14 = vadd.f32 %v11173_v24, %v3171_v11  ;;  %v3135_v34 = vmul.f32 %v8747_v36, %v3039_v27  ;;  %v3172_v55 = vmul.f32 %v11165_v25, %v3134_v7  ;;  %v3240_v61 = vmax.f32 %v3208_v17, 0.0 }
 0x6c6   :  { %8218 = vmatpush3.bf16.msra.mxu1 %v8464_v63 }
 0x6c7   :  { %v3241_v53 = vmax.f32 %v3209_v14, 0.0  ;;  %v3173_v9 = vmul.f32 %v11165_v25, %v3135_v34  ;;  %v3210_v16 = vadd.f32 %v11173_v24, %v3172_v55  ;;  %8219 = vmatprep.subr.bf16.mxu1 %v8465_v15 }
 0x6c9   :  { %v3258_v2 = vpack.c.bf16 %v3241_v53, %v3240_v61  ;;  %v3211_v8 = vadd.f32 %v11173_v24, %v3173_v9  ;;  %v3242_v45 = vmax.f32 %v3210_v16, 0.0 }
 0x6ca   :  { %8220 = vmatpush3.bf16.msra.mxu1 %v8465_v15 }
 0x6cb   :  { %8205 = vmatprep.mubr.bf16.mxu0 %v3258_v2  ;;  %v3243_v35 = vmax.f32 %v3211_v8, 0.0  ;;  %8221 = vmatprep.subr.bf16.mxu1 %v8466_v57 }
 0x6cd   :  { %v3259_v10 = vpack.c.bf16 %v3243_v35, %v3242_v45 }
 0x6ce   :  { %8222 = vmatpush3.bf16.msra.mxu1 %v8466_v57 }
 0x6cf   :  { %8206 = vmatmul.mubr.bf16.gmra.mrb[76].mxu0 %v3259_v10  ;;  %8223 = vmatprep.subr.bf16.mxu1 %v8467_v40 }
 0x6d2   :  { %8224 = vmatpush3.bf16.msra.mxu1 %v8467_v40 }
 0x722   :  { %v8179_v43 = vpop.f32.mrb[48].mxu0 }
 0x723   :  { %v11391_v21 = vadd.f32 %v8179_v43, %v11388_v51  ;;  %v3367_v25 = vpop.f32.mrb[49].mxu0 }
 0x724   :  { %v8180_v32 = vpop.f32.mrb[50].mxu0  ;;  %v11398_v42 = vadd.f32 %v11388_v51, %v3367_v25 }
 0x725   :  { %v11394_v48 = vadd.f32 %v8180_v32, %v11388_v51  ;;  %3502 = vadd.xlane.f32.xlu0 %v11391_v21  ;;  %v3370_v24 = vpop.f32.mrb[51].mxu0  ;;  %v3596_v13 = vmul.f32 %v11391_v21, %v11391_v21 }
 0x726   :  { %v11402_v0 = vadd.f32 %v11388_v51, %v3370_v24  ;;  %v3594_v49 = vmul.f32 %v11398_v42, %v11398_v42 }
 0x727   :  { %3504 = vadd.xlane.f32.xlu1 %v11394_v48  ;;  %v3597_v52 = vmul.f32 %v11394_v48, %v11394_v48 }
 0x728   :  { %v3595_v59 = vmul.f32 %v11402_v0, %v11402_v0 }
 0x729   :  { %3498 = vadd.xlane.f32.xlu0 %v11398_v42 }
 0x72b   :  { %3500 = vadd.xlane.f32.xlu1 %v11402_v0 }
 0x72d   :  { %3630 = vadd.xlane.f32.xlu0 %v3596_v13 }
 0x72f   :  { %3632 = vadd.xlane.f32.xlu1 %v3597_v52 }
 0x731   :  { %3626 = vadd.xlane.f32.xlu0 %v3594_v49 }
 0x733   :  { %3628 = vadd.xlane.f32.xlu1 %v3595_v59 }
 0x73f   :  { %v8183_v30 = vpop.f32.mrb[52].mxu0 }
 0x740   :  { %v11421_v6 = vadd.f32 %v8183_v30, %v11388_v51  ;;  %v3383_v29 = vpop.f32.mrb[53].mxu0 }
 0x741   :  { %v8184_v1 = vpop.f32.mrb[54].mxu0  ;;  %v11428_v58 = vadd.f32 %v11388_v51, %v3383_v29 }
 0x742   :  { %v11424_v60 = vadd.f32 %v8184_v1, %v11388_v51  ;;  %3510 = vadd.xlane.f32.xlu0 %v11421_v6  ;;  %v3386_v23 = vpop.f32.mrb[55].mxu0  ;;  %v3600_v38 = vmul.f32 %v11421_v6, %v11421_v6 }
 0x743   :  { %v11432_v18 = vadd.f32 %v11388_v51, %v3386_v23  ;;  %v3598_v56 = vmul.f32 %v11428_v58, %v11428_v58 }
 0x744   :  { %3512 = vadd.xlane.f32.xlu1 %v11424_v60  ;;  %v3601_v54 = vmul.f32 %v11424_v60, %v11424_v60 }
 0x745   :  { %v3599_v41 = vmul.f32 %v11432_v18, %v11432_v18 }
 0x746   :  { %3506 = vadd.xlane.f32.xlu0 %v11428_v58 }
 0x748   :  { %3508 = vadd.xlane.f32.xlu1 %v11432_v18 }
 0x74a   :  { %3638 = vadd.xlane.f32.xlu0 %v3600_v38 }
 0x74c   :  { %3640 = vadd.xlane.f32.xlu1 %v3601_v54 }
 0x74e   :  { %3634 = vadd.xlane.f32.xlu0 %v3598_v56 }
 0x750   :  { %3636 = vadd.xlane.f32.xlu1 %v3599_v41 }
 0x753   :  { %v8187_v33 = vpop.f32.mrb[56].mxu0 }
 0x754   :  { %v11457_v20 = vadd.f32 %v8187_v33, %v11388_v51  ;;  %v3399_v44 = vpop.f32.mrb[57].mxu0 }
 0x755   :  { %v8188_v22 = vpop.f32.mrb[58].mxu0  ;;  %v11467_v28 = vadd.f32 %v11388_v51, %v3399_v44 }
 0x756   :  { %v11460_v12 = vadd.f32 %v8188_v22, %v11388_v51  ;;  %3518 = vadd.xlane.f32.xlu0 %v11457_v20  ;;  %v3402_v31 = vpop.f32.mrb[59].mxu0  ;;  %v3604_v26 = vmul.f32 %v11457_v20, %v11457_v20 }
 0x757   :  { %v11471_v46 = vadd.f32 %v11388_v51, %v3402_v31  ;;  %v3602_v11 = vmul.f32 %v11467_v28, %v11467_v28 }
 0x758   :  { %3520 = vadd.xlane.f32.xlu1 %v11460_v12  ;;  %v3605_v27 = vmul.f32 %v11460_v12, %v11460_v12 }
 0x759   :  { %v3603_v17 = vmul.f32 %v11471_v46, %v11471_v46 }
 0x75a   :  { %3514 = vadd.xlane.f32.xlu0 %v11467_v28 }
 0x75c   :  { %3516 = vadd.xlane.f32.xlu1 %v11471_v46 }
 0x75e   :  { %3646 = vadd.xlane.f32.xlu0 %v3604_v26 }
 0x760   :  { %3648 = vadd.xlane.f32.xlu1 %v3605_v27 }
 0x762   :  { %3642 = vadd.xlane.f32.xlu0 %v3602_v11 }
 0x763   :  { %v8191_v7 = vpop.f32.mrb[60].mxu0 }
 0x764   :  { %v11487_v36 = vadd.f32 %v8191_v7, %v11388_v51  ;;  %3644 = vadd.xlane.f32.xlu1 %v3603_v17  ;;  %v3415_v14 = vpop.f32.mrb[61].mxu0 }
 0x765   :  { %v8192_v34 = vpop.f32.mrb[62].mxu0  ;;  %v11494_v53 = vadd.f32 %v11388_v51, %v3415_v14 }
 0x766   :  { %v11490_v55 = vadd.f32 %v8192_v34, %v11388_v51  ;;  %3526 = vadd.xlane.f32.xlu0 %v11487_v36  ;;  %v3418_v61 = vpop.f32.mrb[63].mxu0  ;;  %v3608_v16 = vmul.f32 %v11487_v36, %v11487_v36 }
 0x767   :  { %v11498_v9 = vadd.f32 %v11388_v51, %v3418_v61  ;;  %v3606_v8 = vmul.f32 %v11494_v53, %v11494_v53 }
 0x768   :  { %3528 = vadd.xlane.f32.xlu1 %v11490_v55  ;;  %v3609_v2 = vmul.f32 %v11490_v55, %v11490_v55 }
 0x769   :  { %v3607_v45 = vmul.f32 %v11498_v9, %v11498_v9 }
 0x76a   :  { %3522 = vadd.xlane.f32.xlu0 %v11494_v53 }
 0x76c   :  { %3524 = vadd.xlane.f32.xlu1 %v11498_v9 }
 0x76e   :  { %3654 = vadd.xlane.f32.xlu0 %v3608_v16 }
 0x770   :  { %3656 = vadd.xlane.f32.xlu1 %v3609_v2 }
 0x772   :  { %3650 = vadd.xlane.f32.xlu0 %v3606_v8 }
 0x773   :  { %v8195_v35 = vpop.f32.mrb[64].mxu0 }
 0x774   :  { %v11511_v10 = vadd.f32 %v8195_v35, %v11388_v51  ;;  %3652 = vadd.xlane.f32.xlu1 %v3607_v45  ;;  %v3431_v43 = vpop.f32.mrb[65].mxu0 }
 0x775   :  { %v8196_v25 = vpop.f32.mrb[66].mxu0  ;;  %v11518_v13 = vadd.f32 %v11388_v51, %v3431_v43 }
 0x776   :  { %v11514_v32 = vadd.f32 %v8196_v25, %v11388_v51  ;;  %3534 = vadd.xlane.f32.xlu0 %v11511_v10  ;;  %v3434_v24 = vpop.f32.mrb[67].mxu0  ;;  %v3612_v3 = vmul.f32 %v11511_v10, %v11511_v10 }
 0x777   :  { %v11522_v52 = vadd.f32 %v11388_v51, %v3434_v24  ;;  %v3610_v59 = vmul.f32 %v11518_v13, %v11518_v13 }
 0x778   :  { %3536 = vadd.xlane.f32.xlu1 %v11514_v32  ;;  %v3613_v49 = vmul.f32 %v11514_v32, %v11514_v32 }
 0x779   :  { %v3611_v47 = vmul.f32 %v11522_v52, %v11522_v52 }
 0x77a   :  { %3530 = vadd.xlane.f32.xlu0 %v11518_v13 }
 0x77c   :  { %3532 = vadd.xlane.f32.xlu1 %v11522_v52 }
 0x77e   :  { %3662 = vadd.xlane.f32.xlu0 %v3612_v3 }
 0x780   :  { %3664 = vadd.xlane.f32.xlu1 %v3613_v49 }
 0x782   :  { %3658 = vadd.xlane.f32.xlu0 %v3610_v59 }
 0x783   :  { %v8199_v30 = vpop.f32.mrb[68].mxu0 }
 0x784   :  { %v11535_v29 = vadd.f32 %v8199_v30, %v11388_v51  ;;  %3660 = vadd.xlane.f32.xlu1 %v3611_v47  ;;  %v3447_v1 = vpop.f32.mrb[69].mxu0 }
 0x785   :  { %v8200_v23 = vpop.f32.mrb[70].mxu0  ;;  %v11542_v54 = vadd.f32 %v11388_v51, %v3447_v1 }
 0x786   :  { %v11538_v50 = vadd.f32 %v8200_v23, %v11388_v51  ;;  %3542 = vadd.xlane.f32.xlu0 %v11535_v29  ;;  %v3450_v38 = vpop.f32.mrb[71].mxu0  ;;  %v3616_v56 = vmul.f32 %v11535_v29, %v11535_v29 }
 0x787   :  { %v11546_v39 = vadd.f32 %v11388_v51, %v3450_v38  ;;  %v3614_v63 = vmul.f32 %v11542_v54, %v11542_v54 }
 0x788   :  { %3544 = vadd.xlane.f32.xlu1 %v11538_v50  ;;  %v3617_v41 = vmul.f32 %v11538_v50, %v11538_v50 }
 0x789   :  { %v3615_v33 = vmul.f32 %v11546_v39, %v11546_v39 }
 0x78a   :  { %3538 = vadd.xlane.f32.xlu0 %v11542_v54 }
 0x78c   :  { %3540 = vadd.xlane.f32.xlu1 %v11546_v39 }
 0x78e   :  { %3670 = vadd.xlane.f32.xlu0 %v3616_v56 }
 0x790   :  { %3672 = vadd.xlane.f32.xlu1 %v3617_v41 }
 0x792   :  { %3666 = vadd.xlane.f32.xlu0 %v3614_v63 }
 0x793   :  { %v8203_v15 = vpop.f32.mrb[72].mxu0 }
 0x794   :  { %v11559_v44 = vadd.f32 %v8203_v15, %v11388_v51  ;;  %3668 = vadd.xlane.f32.xlu1 %v3615_v33  ;;  %v3463_v22 = vpop.f32.mrb[73].mxu0 }
 0x795   :  { %v8204_v31 = vpop.f32.mrb[74].mxu0  ;;  %v11566_v26 = vadd.f32 %v11388_v51, %v3463_v22 }
 0x796   :  { %v11562_v57 = vadd.f32 %v8204_v31, %v11388_v51  ;;  %3550 = vadd.xlane.f32.xlu0 %v11559_v44  ;;  %v3466_v40 = vpop.f32.mrb[75].mxu0  ;;  %v3620_v11 = vmul.f32 %v11559_v44, %v11559_v44 }
 0x797   :  { %v11570_v27 = vadd.f32 %v11388_v51, %v3466_v40  ;;  %v3618_v7 = vmul.f32 %v11566_v26, %v11566_v26 }
 0x798   :  { %3552 = vadd.xlane.f32.xlu1 %v11562_v57  ;;  %v3621_v17 = vmul.f32 %v11562_v57, %v11562_v57 }
 0x799   :  { %v3619_v34 = vmul.f32 %v11570_v27, %v11570_v27 }
 0x79a   :  { %3546 = vadd.xlane.f32.xlu0 %v11566_v26 }
 0x79c   :  { %3548 = vadd.xlane.f32.xlu1 %v11570_v27 }
 0x79e   :  { %3678 = vadd.xlane.f32.xlu0 %v3620_v11 }
 0x7a0   :  { %3680 = vadd.xlane.f32.xlu1 %v3621_v17 }
 0x7a2   :  { %3674 = vadd.xlane.f32.xlu0 %v3618_v7  ;;  %v8207_v14 = vpop.f32.mrb[76].mxu0 }
 0x7a3   :  { %v11583_v61 = vadd.f32 %v8207_v14, %v11388_v51  ;;  %v3479_v16 = vpop.f32.mrb[77].mxu0 }
 0x7a4   :  { %3676 = vadd.xlane.f32.xlu1 %v3619_v34  ;;  %v8208_v2 = vpop.f32.mrb[78].mxu0  ;;  %v11590_v35 = vadd.f32 %v11388_v51, %v3479_v16 }
 0x7a5   :  { %v11586_v8 = vadd.f32 %v8208_v2, %v11388_v51  ;;  %v3482_v45 = vpop.f32.mrb[79].mxu0  ;;  %v3624_v3 = vmul.f32 %v11583_v61, %v11583_v61 }
 0x7a6   :  { %3558 = vadd.xlane.f32.xlu0 %v11583_v61  ;;  %v11594_v43 = vadd.f32 %v11388_v51, %v3482_v45  ;;  %v3622_v25 = vmul.f32 %v11590_v35, %v11590_v35 }
 0x7a7   :  { %v3625_v51 = vmul.f32 %v11586_v8, %v11586_v8 }
 0x7a8   :  { %3560 = vadd.xlane.f32.xlu1 %v11586_v8  ;;  %v3623_v24 = vmul.f32 %v11594_v43, %v11594_v43 }
 0x7aa   :  { %3554 = vadd.xlane.f32.xlu0 %v11590_v35 }
 0x7ac   :  { %3556 = vadd.xlane.f32.xlu1 %v11594_v43 }
 0x7ae   :  { %3682 = vadd.xlane.f32.xlu0 %v3622_v25 }
 0x7b0   :  { %3684 = vadd.xlane.f32.xlu1 %v3623_v24 }
 0x7b2   :  { %3686 = vadd.xlane.f32.xlu0 %v3624_v3  ;;  %v3503_v49 = vpop.xlane.xlu0 %3502 }
 0x7b3   :  { %v3564_v30 = vmul.f32 0.0078125, %v3503_v49 }
 0x7b4   :  { %3688 = vadd.xlane.f32.xlu1 %v3625_v51  ;;  %v3505_v59 = vpop.xlane.xlu1 %3504 }
 0x7b5   :  { %v3565_v23 = vmul.f32 0.0078125, %v3505_v59  ;;  %v3724_v56 = vmul.f32 %v3564_v30, %v3564_v30  ;;  %v3788_v59 = vsub.f32 %v11391_v21, %v3564_v30  ;;  %v11618_v21 = vld [vmem:[%s14262_s8 + $0x3] ss:$0 sm:$0xff] }
 0x7b6   :  { %v3499_v47 = vpop.xlane.xlu0 %3498 }
 0x7b7   :  { %v3562_v41 = vmul.f32 0.0078125, %v3499_v47  ;;  %v3725_v22 = vmul.f32 %v3565_v23, %v3565_v23 }
 0x7b8   :  { %v3501_v1 = vpop.xlane.xlu1 %3500 }
 0x7b9   :  { %v3563_v33 = vmul.f32 0.0078125, %v3501_v1  ;;  %v3722_v17 = vmul.f32 %v3562_v41, %v3562_v41  ;;  %v11610_v1 = vld [vmem:[%s14261_s7 + $0x3] ss:$0 sm:$0xff] }
 0x7ba   :  { %v3631_v38 = vpop.xlane.xlu0 %3630 }
 0x7bb   :  { %v3692_v63 = vmul.f32 0.0078125, %v3631_v38  ;;  %v3723_v16 = vmul.f32 %v3563_v33, %v3563_v33  ;;  %v3789_v38 = vsub.f32 %v11394_v48, %v3565_v23  ;;  %v3787_v30 = vsub.f32 %v11402_v0, %v3563_v33 }
 0x7bc   :  { %v3633_v15 = vpop.xlane.xlu1 %3632  ;;  %v14584_v0 = vmax.f32 %v10542_v4, 0.0  ;;  %v14587_v4 = vld [vmem:[#allocation13_spill] sm:$0xff] }
 0x7bd   :  { %v3756_v31 = vsub.f32 %v3692_v63, %v3724_v56  ;;  %v3693_v40 = vmul.f32 0.0078125, %v3633_v15  ;;  %v3786_v15 = vsub.f32 %v11398_v42, %v3562_v41 }
 0x7be   :  { %v3627_v11 = vpop.xlane.xlu0 %3626 }
 0x7bf   :  { %v3820_v7 = vadd.f32 1e-05, %v3756_v31  ;;  %v3757_v14 = vsub.f32 %v3693_v40, %v3725_v22  ;;  %v3690_v34 = vmul.f32 0.0078125, %v3627_v11 }
 0x7c0   :  { %v3629_v2 = vpop.xlane.xlu1 %3628 }
 0x7c1   :  { %8748 = vrsqrt.f32 %v3820_v7  ;;  %v3821_v45 = vadd.f32 1e-05, %v3757_v14  ;;  %v3754_v25 = vsub.f32 %v3690_v34, %v3722_v17  ;;  %v3691_v24 = vmul.f32 0.0078125, %v3629_v2 }
 0x7c3   :  { %8750 = vrsqrt.f32 %v3821_v45  ;;  %v3818_v3 = vadd.f32 1e-05, %v3754_v25  ;;  %v3755_v51 = vsub.f32 %v3691_v24, %v3723_v16 }
 0x7c5   :  { %8752 = vrsqrt.f32 %v3818_v3  ;;  %v3819_v49 = vadd.f32 1e-05, %v3755_v51 }
 0x7c7   :  { %8754 = vrsqrt.f32 %v3819_v49 }
 0x7cb   :  { %v8749_v47 = vpop.eup %8748 }
 0x7cc   :  { %v3884_v56 = vmul.f32 %v8749_v47, %v3788_v59  ;;  %v14585_v59 = vmax.f32 %v10546_v5, 0.0 }
 0x7cd   :  { %v8751_v63 = vpop.eup %8750 }
 0x7ce   :  { %v3922_v22 = vmul.f32 %v11610_v1, %v3884_v56  ;;  %v3885_v31 = vmul.f32 %v8751_v63, %v3789_v38  ;;  %v14586_v38 = vmax.f32 %v10549_v19, 0.0 }
 0x7cf   :  { %v3511_v40 = vpop.xlane.xlu0 %3510  ;;  %v8753_v11 = vpop.eup %8752 }
 0x7d0   :  { %v3923_v17 = vmul.f32 %v11610_v1, %v3885_v31  ;;  %v3882_v48 = vmul.f32 %v8753_v11, %v3786_v15  ;;  %v3960_v41 = vadd.f32 %v11618_v21, %v3922_v22  ;;  %v3568_v2 = vmul.f32 0.0078125, %v3511_v40 }
 0x7d1   :  { %v3513_v7 = vpop.xlane.xlu1 %3512  ;;  %v8755_v23 = vpop.eup %8754  ;;  %v14588_v11 = vmax.f32 %v14587_v4, 0.0 }
 0x7d2   :  { %v3883_v34 = vmul.f32 %v8755_v23, %v3787_v30  ;;  %v3920_v42 = vmul.f32 %v11610_v1, %v3882_v48  ;;  %v3961_v16 = vadd.f32 %v11618_v21, %v3923_v17  ;;  %v3569_v3 = vmul.f32 0.0078125, %v3513_v7 }
 0x7d3   :  { %v3507_v14 = vpop.xlane.xlu0 %3506  ;;  %v11638_v56 = vadd.f32 %v3960_v41, %v14586_v38  ;;  %v3728_v63 = vmul.f32 %v3568_v2, %v3568_v2 }
 0x7d4   :  { %v3921_v25 = vmul.f32 %v11610_v1, %v3883_v34  ;;  %v3958_v24 = vadd.f32 %v11618_v21, %v3920_v42  ;;  %v11629_v33 = vadd.f32 %v3961_v16, %v14584_v0  ;;  %v3566_v15 = vmul.f32 0.0078125, %v3507_v14 }
 0x7d5   :  { %v3509_v45 = vpop.xlane.xlu1 %3508  ;;  %v3729_v7 = vmul.f32 %v3569_v3, %v3569_v3  ;;  %v14387_v42 = vmax.f32 %v11638_v56, 0.0 }
 0x7d6   :  { %v3959_v49 = vadd.f32 %v11618_v21, %v3921_v25  ;;  %v11634_v47 = vadd.f32 %v3958_v24, %v14585_v59  ;;  %v3567_v31 = vmul.f32 0.0078125, %v3509_v45  ;;  %v14389_v17 = vmax.f32 %v11629_v33, 0.0 }
 0x7d7   :  { %v3639_v51 = vpop.xlane.xlu0 %3638  ;;  %v3726_v14 = vmul.f32 %v3566_v15, %v3566_v15 }
 0x7d8   :  { %v3696_v22 = vmul.f32 0.0078125, %v3639_v51  ;;  %v11642_v30 = vadd.f32 %v3959_v49, %v14588_v11  ;;  %v14388_v34 = vmax.f32 %v11634_v47, 0.0  ;;  %v3727_v25 = vmul.f32 %v3567_v31, %v3567_v31 }
 0x7d9   :  { %v3641_v40 = vpop.xlane.xlu1 %3640  ;;  %v4055_v51 = vpack.c.bf16 %v14389_v17, %v14387_v42 }
 0x7da   :  { %v3760_v48 = vsub.f32 %v3696_v22, %v3728_v63  ;;  %v3697_v5 = vmul.f32 0.0078125, %v3641_v40  ;;  %v14386_v19 = vmax.f32 %v11642_v30, 0.0 }
 0x7db   :  { %v3635_v23 = vpop.xlane.xlu0 %3634 }
 0x7dc   :  { %v3824_v41 = vadd.f32 1e-05, %v3760_v48  ;;  %v3761_v16 = vsub.f32 %v3697_v5, %v3729_v7  ;;  %v3694_v45 = vmul.f32 0.0078125, %v3635_v23  ;;  %v4054_v0 = vpack.c.bf16 %v14386_v19, %v14388_v34 }
 0x7dd   :  { %v3637_v24 = vpop.xlane.xlu1 %3636  ;;  %v3792_v7 = vsub.f32 %v11421_v6, %v3568_v2 }
 0x7de   :  { %8756 = vrsqrt.f32 %v3824_v41  ;;  %v3825_v49 = vadd.f32 1e-05, %v3761_v16  ;;  %v3758_v59 = vsub.f32 %v3694_v45, %v3726_v14  ;;  %v3695_v38 = vmul.f32 0.0078125, %v3637_v24  ;;  %8225 = vmatprep.mubr.bf16.mxu1 %v4054_v0 }
 0x7df   :  { %8226 = vmatmul.mubr.bf16.vlgmr.msra.gmra.mrb[80].mxu1 %v4055_v51  ;;  %v3793_v41 = vsub.f32 %v11424_v60, %v3569_v3  ;;  %v3791_v60 = vsub.f32 %v11432_v18, %v3567_v31 }
 0x7e0   :  { %8758 = vrsqrt.f32 %v3825_v49  ;;  %v3822_v63 = vadd.f32 1e-05, %v3758_v59  ;;  %v3759_v22 = vsub.f32 %v3695_v38, %v3727_v25  ;;  %v3790_v25 = vsub.f32 %v11428_v58, %v3566_v15 }
 0x7e2   :  { %8760 = vrsqrt.f32 %v3822_v63  ;;  %v3823_v40 = vadd.f32 1e-05, %v3759_v22 }
 0x7e3   :  { %v3519_v4 = vpop.xlane.xlu0 %3518 }
 0x7e4   :  { %8762 = vrsqrt.f32 %v3823_v40  ;;  %v11657_v23 = vmul.f32 0.0078125, %v3519_v4 }
 0x7e5   :  { %v3521_v11 = vpop.xlane.xlu1 %3520 }
 0x7e6   :  { %v11660_v24 = vmul.f32 0.0078125, %v3521_v11  ;;  %v3732_v6 = vmul.f32 %v11657_v23, %v11657_v23 }
 0x7e7   :  { %v3515_v48 = vpop.xlane.xlu0 %3514 }
 0x7e8   :  { %v8757_v5 = vpop.eup %8756  ;;  %v11663_v0 = vmul.f32 0.0078125, %v3515_v48  ;;  %v3733_v15 = vmul.f32 %v11660_v24, %v11660_v24 }
 0x7e9   :  { %v3517_v14 = vpop.xlane.xlu1 %3516  ;;  %v3888_v16 = vmul.f32 %v8757_v5, %v3792_v7 }
 0x7ea   :  { %v8759_v45 = vpop.eup %8758  ;;  %v11669_v3 = vmul.f32 0.0078125, %v3517_v14  ;;  %v3730_v7 = vmul.f32 %v11663_v0, %v11663_v0 }
 0x7eb   :  { %v3647_v51 = vpop.xlane.xlu0 %3646  ;;  %v3889_v49 = vmul.f32 %v8759_v45, %v3793_v41  ;;  %v3926_v38 = vmul.f32 %v11610_v1, %v3888_v16 }
 0x7ec   :  { %v8761_v59 = vpop.eup %8760  ;;  %v3700_v2 = vmul.f32 0.0078125, %v3647_v51 }
 0x7ed   :  { %v3649_v63 = vpop.xlane.xlu1 %3648  ;;  %v3886_v22 = vmul.f32 %v8761_v59, %v3790_v25  ;;  %v3927_v40 = vmul.f32 %v11610_v1, %v3889_v49  ;;  %v3964_v45 = vadd.f32 %v11618_v21, %v3926_v38  ;;  %v3731_v25 = vmul.f32 %v11669_v3, %v11669_v3 }
 0x7ee   :  { %v8763_v58 = vpop.eup %8762  ;;  %v3764_v4 = vsub.f32 %v3700_v2, %v3732_v6  ;;  %v3701_v11 = vmul.f32 0.0078125, %v3649_v63  ;;  %v14589_v6 = vmax.f32 %v10594_v37, 0.0  ;;  %v14590_v38 = vmax.f32 %v10598_v62, 0.0 }
 0x7ef   :  { %v3643_v48 = vpop.xlane.xlu0 %3642  ;;  %v3887_v5 = vmul.f32 %v8763_v58, %v3791_v60  ;;  %v3924_v41 = vmul.f32 %v11610_v1, %v3886_v22  ;;  %v3965_v18 = vadd.f32 %v11618_v21, %v3927_v40 }
 0x7f0   :  { %v3828_v31 = vadd.f32 1e-05, %v3764_v4  ;;  %v3765_v14 = vsub.f32 %v3701_v11, %v3733_v15  ;;  %v3698_v16 = vmul.f32 0.0078125, %v3643_v48  ;;  %v14592_v48 = vld [vmem:[#allocation14_spill] sm:$0xff] }
 0x7f1   :  { %v3645_v51 = vpop.xlane.xlu1 %3644  ;;  %v3925_v49 = vmul.f32 %v11610_v1, %v3887_v5  ;;  %v3962_v59 = vadd.f32 %v11618_v21, %v3924_v41  ;;  %v11685_v2 = vadd.f32 %v3965_v18, %v14589_v6  ;;  %v14593_v5 = vmax.f32 %v14592_v48, 0.0  ;;  %v14595_v18 = vld [vmem:[#allocation15_spill] sm:$0xff] }
 0x7f2   :  { %8764 = vrsqrt.f32 %v3828_v31  ;;  %v3829_v60 = vadd.f32 1e-05, %v3765_v14  ;;  %v3762_v63 = vsub.f32 %v3698_v16, %v3730_v7  ;;  %v3699_v22 = vmul.f32 0.0078125, %v3645_v51 }
 0x7f3   :  { %v3527_v40 = vpop.xlane.xlu0 %3526  ;;  %v3963_v58 = vadd.f32 %v11618_v21, %v3925_v49  ;;  %v11690_v15 = vadd.f32 %v3962_v59, %v14590_v38  ;;  %v11694_v41 = vadd.f32 %v3964_v45, %v14593_v5  ;;  %v14596_v31 = vmax.f32 %v14595_v18, 0.0 }
 0x7f4   :  { %8766 = vrsqrt.f32 %v3829_v60  ;;  %v3826_v4 = vadd.f32 1e-05, %v3762_v63  ;;  %v3763_v11 = vsub.f32 %v3699_v22, %v3731_v25  ;;  %v14385_v16 = vmax.f32 %v11685_v2, 0.0 }
 0x7f5   :  { %14591 = vst [vmem:[#allocation13_spill] sm:$0xff] %v11690_v15  ;;  %14594 = vst [vmem:[#allocation14_spill] sm:$0xff] %v11694_v41  ;;  %v3529_v37 = vpop.xlane.xlu1 %3528  ;;  %v11698_v14 = vadd.f32 %v3963_v58, %v14596_v31  ;;  %v14360_v62 = vmax.f32 %v11690_v15, 0.0  ;;  %v11703_v25 = vmul.f32 0.0078125, %v3527_v40  ;;  %v14359_v45 = vmax.f32 %v11694_v41, 0.0 }
 0x7f6   :  { %8768 = vrsqrt.f32 %v3826_v4  ;;  %v3827_v7 = vadd.f32 1e-05, %v3763_v11  ;;  %v11710_v60 = vmul.f32 0.0078125, %v3529_v37  ;;  %v3796_v22 = vsub.f32 %v11457_v20, %v11657_v23 }
 0x7f7   :  { %14597 = vst [vmem:[#allocation15_spill] sm:$0xff] %v11698_v14  ;;  %v3523_v51 = vpop.xlane.xlu0 %3522  ;;  %v14358_v49 = vmax.f32 %v11698_v14, 0.0  ;;  %v4057_v63 = vpack.c.bf16 %v14385_v16, %v14359_v45  ;;  %v3736_v4 = vmul.f32 %v11703_v25, %v11703_v25  ;;  %v3797_v48 = vsub.f32 %v11460_v12, %v11660_v24 }
 0x7f8   :  { %8770 = vrsqrt.f32 %v3827_v7  ;;  %v11718_v40 = vmul.f32 0.0078125, %v3523_v51  ;;  %v3737_v20 = vmul.f32 %v11710_v60, %v11710_v60  ;;  %v3794_v51 = vsub.f32 %v11467_v28, %v11663_v0 }
 0x7f9   :  { %v3525_v59 = vpop.xlane.xlu1 %3524  ;;  %v4056_v6 = vpack.c.bf16 %v14358_v49, %v14360_v62 }
 0x7fa   :  { %v11724_v5 = vmul.f32 0.0078125, %v3525_v59 }
 0x7fb   :  { %8229 = vmatprep.mubr.bf16.mxu1 %v4056_v6  ;;  %v3655_v58 = vpop.xlane.xlu0 %3654  ;;  %v3734_v6 = vmul.f32 %v11718_v40, %v11718_v40 }
 0x7fc   :  { %v8765_v38 = vpop.eup %8764  ;;  %v3704_v11 = vmul.f32 0.0078125, %v3655_v58  ;;  %8230 = vmatmul.mubr.bf16.gmra.mrb[84].mxu1 %v4057_v63 }
 0x7fd   :  { %v3657_v37 = vpop.xlane.xlu1 %3656  ;;  %v3892_v18 = vmul.f32 %v8765_v38, %v3796_v22  ;;  %v3795_v38 = vsub.f32 %v11471_v46, %v11669_v3 }
 0x7fe   :  { %v8767_v31 = vpop.eup %8766  ;;  %v3768_v23 = vsub.f32 %v3704_v11, %v3736_v4  ;;  %v3705_v7 = vmul.f32 0.0078125, %v3657_v37  ;;  %v3735_v4 = vmul.f32 %v11724_v5, %v11724_v5 }
 0x7ff   :  { %v3651_v63 = vpop.xlane.xlu0 %3650  ;;  %v3893_v58 = vmul.f32 %v8767_v31, %v3797_v48  ;;  %v3930_v22 = vmul.f32 %v11610_v1, %v3892_v18 }
 0x800   :  { %v8769_v49 = vpop.eup %8768  ;;  %v3832_v12 = vadd.f32 1e-05, %v3768_v23  ;;  %v3769_v24 = vsub.f32 %v3705_v7, %v3737_v20  ;;  %v3702_v59 = vmul.f32 0.0078125, %v3651_v63 }
 0x801   :  { %v3653_v11 = vpop.xlane.xlu1 %3652  ;;  %v3890_v37 = vmul.f32 %v8769_v49, %v3794_v51  ;;  %v3931_v28 = vmul.f32 %v11610_v1, %v3893_v58  ;;  %v3968_v63 = vadd.f32 %v11618_v21, %v3930_v22 }
 0x802   :  { %v8771_v0 = vpop.eup %8770  ;;  %8772 = vrsqrt.f32 %v3832_v12  ;;  %v3833_v45 = vadd.f32 1e-05, %v3769_v24  ;;  %v3766_v48 = vsub.f32 %v3702_v59, %v3734_v6  ;;  %v3703_v31 = vmul.f32 0.0078125, %v3653_v11  ;;  %v14598_v6 = vld [vmem:[#allocation12_spill] sm:$0xff]  ;;  %v14601_v11 = vld [vmem:[#allocation18_spill] sm:$0xff] }
 0x803   :  { %v3535_v23 = vpop.xlane.xlu0 %3534  ;;  %v3891_v20 = vmul.f32 %v8771_v0, %v3795_v38  ;;  %v3928_v7 = vmul.f32 %v11610_v1, %v3890_v37  ;;  %v3969_v18 = vadd.f32 %v11618_v21, %v3931_v28  ;;  %v14599_v12 = vmax.f32 %v14598_v6, 0.0 }
 0x804   :  { %8774 = vrsqrt.f32 %v3833_v45  ;;  %v3830_v46 = vadd.f32 1e-05, %v3766_v48  ;;  %v3767_v3 = vsub.f32 %v3703_v31, %v3735_v4  ;;  %v14602_v45 = vmax.f32 %v14601_v11, 0.0  ;;  %v14604_v4 = vld [vmem:[#allocation17_spill] sm:$0xff]  ;;  %v14607_v31 = vld [vmem:[#allocation16_spill] sm:$0xff] }
 0x805   :  { %v3537_v62 = vpop.xlane.xlu1 %3536  ;;  %v3929_v49 = vmul.f32 %v11610_v1, %v3891_v20  ;;  %v3966_v51 = vadd.f32 %v11618_v21, %v3928_v7  ;;  %v11745_v24 = vadd.f32 %v3969_v18, %v14599_v12  ;;  %v11752_v22 = vmul.f32 0.0078125, %v3535_v23 }
 0x806   :  { %8776 = vrsqrt.f32 %v3830_v46  ;;  %v3831_v58 = vadd.f32 1e-05, %v3767_v3  ;;  %v14605_v28 = vmax.f32 %v14604_v4, 0.0  ;;  %v14608_v20 = vmax.f32 %v14607_v31, 0.0 }
 0x807   :  { %14600 = vst [vmem:[#allocation12_spill] sm:$0xff] %v11745_v24  ;;  %v3531_v59 = vpop.xlane.xlu0 %3530  ;;  %v3967_v38 = vadd.f32 %v11618_v21, %v3929_v49  ;;  %v11750_v37 = vadd.f32 %v3966_v51, %v14602_v45  ;;  %v11762_v18 = vmul.f32 0.0078125, %v3537_v62  ;;  %v14364_v46 = vmax.f32 %v11745_v24, 0.0 }
 0x808   :  { %8778 = vrsqrt.f32 %v3831_v58  ;;  %v11756_v0 = vadd.f32 %v3968_v63, %v14605_v28  ;;  %v3800_v3 = vsub.f32 %v11487_v36, %v11703_v25  ;;  %v11767_v49 = vmul.f32 0.0078125, %v3531_v59 }
 0x809   :  { %14603 = vst [vmem:[#allocation18_spill] sm:$0xff] %v11750_v37  ;;  %v3533_v48 = vpop.xlane.xlu1 %3532  ;;  %v11760_v7 = vadd.f32 %v3967_v38, %v14608_v20  ;;  %v14362_v51 = vmax.f32 %v11750_v37, 0.0  ;;  %v3740_v6 = vmul.f32 %v11752_v22, %v11752_v22  ;;  %v3801_v38 = vsub.f32 %v11490_v55, %v11710_v60 }
 0x80a   :  { %14606 = vst [vmem:[#allocation17_spill] sm:$0xff] %v11756_v0  ;;  %v14363_v62 = vmax.f32 %v11756_v0, 0.0  ;;  %v11776_v11 = vmul.f32 0.0078125, %v3533_v48  ;;  %v3741_v4 = vmul.f32 %v11762_v18, %v11762_v18  ;;  %v3798_v60 = vsub.f32 %v11494_v53, %v11718_v40 }
 0x80b   :  { %14609 = vst [vmem:[#allocation16_spill] sm:$0xff] %v11760_v7  ;;  %v3663_v23 = vpop.xlane.xlu0 %3662  ;;  %v14361_v63 = vmax.f32 %v11760_v7, 0.0  ;;  %v3738_v48 = vmul.f32 %v11767_v49, %v11767_v49 }
 0x80c   :  { %v8773_v58 = vpop.eup %8772  ;;  %v3708_v12 = vmul.f32 0.0078125, %v3663_v23  ;;  %v4059_v55 = vpack.c.bf16 %v14364_v46, %v14363_v62 }
 0x80d   :  { %v3665_v36 = vpop.xlane.xlu1 %3664  ;;  %v4058_v25 = vpack.c.bf16 %v14361_v63, %v14362_v51  ;;  %v3896_v59 = vmul.f32 %v8773_v58, %v3800_v3 }
 0x80e   :  { %v8775_v45 = vpop.eup %8774  ;;  %v3772_v28 = vsub.f32 %v3708_v12, %v3740_v6  ;;  %v3709_v31 = vmul.f32 0.0078125, %v3665_v36  ;;  %v3799_v12 = vsub.f32 %v11498_v9, %v11724_v5  ;;  %v3739_v36 = vmul.f32 %v11776_v11, %v11776_v11 }
 0x80f   :  { %8233 = vmatprep.mubr.bf16.mxu1 %v4058_v25  ;;  %v3659_v20 = vpop.xlane.xlu0 %3658  ;;  %v3897_v3 = vmul.f32 %v8775_v45, %v3801_v38  ;;  %v3934_v6 = vmul.f32 %v11610_v1, %v3896_v59 }
 0x810   :  { %v8777_v23 = vpop.eup %8776  ;;  %v3836_v58 = vadd.f32 1e-05, %v3772_v28  ;;  %v3773_v63 = vsub.f32 %v3709_v31, %v3741_v4  ;;  %v3706_v51 = vmul.f32 0.0078125, %v3659_v20  ;;  %8234 = vmatmul.mubr.bf16.gmra.mrb[88].mxu1 %v4059_v55 }
 0x811   :  { %v3661_v53 = vpop.xlane.xlu1 %3660  ;;  %v3894_v40 = vmul.f32 %v8777_v23, %v3798_v60  ;;  %v3935_v62 = vmul.f32 %v11610_v1, %v3897_v3  ;;  %v3972_v20 = vadd.f32 %v11618_v21, %v3934_v6 }
 0x812   :  { %v8779_v25 = vpop.eup %8778  ;;  %8780 = vrsqrt.f32 %v3836_v58  ;;  %v3837_v38 = vadd.f32 1e-05, %v3773_v63  ;;  %v3770_v45 = vsub.f32 %v3706_v51, %v3738_v48  ;;  %v3707_v28 = vmul.f32 0.0078125, %v3661_v53  ;;  %v14610_v51 = vld [vmem:[#allocation21_spill] sm:$0xff] }
 0x813   :  { %v3543_v4 = vpop.xlane.xlu0 %3542  ;;  %v3895_v31 = vmul.f32 %v8779_v25, %v3799_v12  ;;  %v3932_v55 = vmul.f32 %v11610_v1, %v3894_v40  ;;  %v3973_v59 = vadd.f32 %v11618_v21, %v3935_v62  ;;  %v14611_v48 = vmax.f32 %v14610_v51, 0.0  ;;  %v14613_v62 = vld [vmem:[#allocation24_spill] sm:$0xff] }
 0x814   :  { %8782 = vrsqrt.f32 %v3837_v38  ;;  %v3834_v9 = vadd.f32 1e-05, %v3770_v45  ;;  %v3771_v5 = vsub.f32 %v3707_v28, %v3739_v36  ;;  %v14614_v53 = vmax.f32 %v14613_v62, 0.0  ;;  %v14616_v36 = vld [vmem:[#allocation23_spill] sm:$0xff]  ;;  %v14619_v28 = vld [vmem:[#allocation20_spill] sm:$0xff] }
 0x815   :  { %v3545_v46 = vpop.xlane.xlu1 %3544  ;;  %v3933_v60 = vmul.f32 %v11610_v1, %v3895_v31  ;;  %v3970_v3 = vadd.f32 %v11618_v21, %v3932_v55  ;;  %v11805_v23 = vadd.f32 %v3973_v59, %v14611_v48  ;;  %v11812_v6 = vmul.f32 0.0078125, %v3543_v4 }
 0x816   :  { %8784 = vrsqrt.f32 %v3834_v9  ;;  %v3835_v63 = vadd.f32 1e-05, %v3771_v5  ;;  %v14617_v25 = vmax.f32 %v14616_v36, 0.0  ;;  %v14620_v31 = vmax.f32 %v14619_v28, 0.0 }
 0x817   :  { %14612 = vst [vmem:[#allocation21_spill] sm:$0xff] %v11805_v23  ;;  %v3539_v58 = vpop.xlane.xlu0 %3538  ;;  %v3971_v12 = vadd.f32 %v11618_v21, %v3933_v60  ;;  %v11810_v40 = vadd.f32 %v3970_v3, %v14614_v53  ;;  %v11822_v59 = vmul.f32 0.0078125, %v3545_v46  ;;  %v14368_v9 = vmax.f32 %v11805_v23, 0.0 }
 0x818   :  { %8786 = vrsqrt.f32 %v3835_v63  ;;  %v11816_v38 = vadd.f32 %v3972_v20, %v14617_v25  ;;  %v3804_v5 = vsub.f32 %v11511_v10, %v11752_v22  ;;  %v11827_v60 = vmul.f32 0.0078125, %v3539_v58 }
 0x819   :  { %14615 = vst [vmem:[#allocation24_spill] sm:$0xff] %v11810_v40  ;;  %v3541_v45 = vpop.xlane.xlu1 %3540  ;;  %v11820_v55 = vadd.f32 %v3971_v12, %v14620_v31  ;;  %v14366_v3 = vmax.f32 %v11810_v40, 0.0  ;;  %v3744_v51 = vmul.f32 %v11812_v6, %v11812_v6  ;;  %v3805_v12 = vsub.f32 %v11514_v32, %v11762_v18 }
 0x81a   :  { %14618 = vst [vmem:[#allocation23_spill] sm:$0xff] %v11816_v38  ;;  %v14367_v46 = vmax.f32 %v11816_v38, 0.0  ;;  %v11836_v62 = vmul.f32 0.0078125, %v3541_v45  ;;  %v3745_v36 = vmul.f32 %v11822_v59, %v11822_v59  ;;  %v3802_v18 = vsub.f32 %v11518_v13, %v11767_v49 }
 0x81b   :  { %14621 = vst [vmem:[#allocation20_spill] sm:$0xff] %v11820_v55  ;;  %v3671_v4 = vpop.xlane.xlu0 %3670  ;;  %v14365_v20 = vmax.f32 %v11820_v55, 0.0  ;;  %v3742_v45 = vmul.f32 %v11827_v60, %v11827_v60 }
 0x81c   :  { %v8781_v63 = vpop.eup %8780  ;;  %v3712_v48 = vmul.f32 0.0078125, %v3671_v4  ;;  %v4061_v32 = vpack.c.bf16 %v14368_v9, %v14367_v46 }
 0x81d   :  { %v3673_v10 = vpop.xlane.xlu1 %3672  ;;  %v4060_v22 = vpack.c.bf16 %v14365_v20, %v14366_v3  ;;  %v3900_v58 = vmul.f32 %v8781_v63, %v3804_v5 }
 0x81e   :  { %v8783_v53 = vpop.eup %8782  ;;  %v3776_v25 = vsub.f32 %v3712_v48, %v3744_v51  ;;  %v3713_v28 = vmul.f32 0.0078125, %v3673_v10  ;;  %v3803_v48 = vsub.f32 %v11522_v52, %v11776_v11  ;;  %v3743_v10 = vmul.f32 %v11836_v62, %v11836_v62 }
 0x81f   :  { %8237 = vmatprep.mubr.bf16.mxu1 %v4060_v22  ;;  %v3667_v31 = vpop.xlane.xlu0 %3666  ;;  %v3901_v5 = vmul.f32 %v8783_v53, %v3805_v12  ;;  %v3938_v51 = vmul.f32 %v11610_v1, %v3900_v58 }
 0x820   :  { %v8785_v4 = vpop.eup %8784  ;;  %v3840_v63 = vadd.f32 1e-05, %v3776_v25  ;;  %v3777_v20 = vsub.f32 %v3713_v28, %v3745_v36  ;;  %v3710_v3 = vmul.f32 0.0078125, %v3667_v31  ;;  %8238 = vmatmul.mubr.bf16.gmra.mrb[92].mxu1 %v4061_v32 }
 0x821   :  { %v3669_v13 = vpop.xlane.xlu1 %3668  ;;  %v3898_v49 = vmul.f32 %v8785_v4, %v3802_v18  ;;  %v3939_v46 = vmul.f32 %v11610_v1, %v3901_v5  ;;  %v3976_v31 = vadd.f32 %v11618_v21, %v3938_v51 }
 0x822   :  { %v8787_v22 = vpop.eup %8786  ;;  %8788 = vrsqrt.f32 %v3840_v63  ;;  %v3841_v12 = vadd.f32 1e-05, %v3777_v20  ;;  %v3774_v53 = vsub.f32 %v3710_v3, %v3742_v45  ;;  %v3711_v25 = vmul.f32 0.0078125, %v3669_v13  ;;  %v14622_v3 = vld [vmem:[#allocation25_spill] sm:$0xff] }
 0x823   :  { %v3551_v36 = vpop.xlane.xlu0 %3550  ;;  %v3899_v28 = vmul.f32 %v8787_v22, %v3803_v48  ;;  %v3936_v32 = vmul.f32 %v11610_v1, %v3898_v49  ;;  %v3977_v58 = vadd.f32 %v11618_v21, %v3939_v46  ;;  %v14623_v45 = vmax.f32 %v14622_v3, 0.0  ;;  %v14625_v46 = vld [vmem:[#allocation22_spill] sm:$0xff] }
 0x824   :  { %8790 = vrsqrt.f32 %v3841_v12  ;;  %v3838_v52 = vadd.f32 1e-05, %v3774_v53  ;;  %v3775_v11 = vsub.f32 %v3711_v25, %v3743_v10  ;;  %v14626_v13 = vmax.f32 %v14625_v46, 0.0  ;;  %v14628_v10 = vld [vmem:[#allocation26_spill] sm:$0xff]  ;;  %v14631_v25 = vld [vmem:[#allocation19_spill] sm:$0xff] }
 0x825   :  { %v3553_v9 = vpop.xlane.xlu1 %3552  ;;  %v3937_v18 = vmul.f32 %v11610_v1, %v3899_v28  ;;  %v3974_v5 = vadd.f32 %v11618_v21, %v3936_v32  ;;  %v11865_v4 = vadd.f32 %v3977_v58, %v14623_v45  ;;  %v11872_v51 = vmul.f32 0.0078125, %v3551_v36 }
 0x826   :  { %8792 = vrsqrt.f32 %v3838_v52  ;;  %v3839_v20 = vadd.f32 1e-05, %v3775_v11  ;;  %v14629_v22 = vmax.f32 %v14628_v10, 0.0  ;;  %v14632_v28 = vmax.f32 %v14631_v25, 0.0 }
 0x827   :  { %14624 = vst [vmem:[#allocation25_spill] sm:$0xff] %v11865_v4  ;;  %v3547_v63 = vpop.xlane.xlu0 %3546  ;;  %v3975_v48 = vadd.f32 %v11618_v21, %v3937_v18  ;;  %v11870_v49 = vadd.f32 %v3974_v5, %v14626_v13  ;;  %v11882_v58 = vmul.f32 0.0078125, %v3553_v9  ;;  %v14372_v52 = vmax.f32 %v11865_v4, 0.0 }
 0x828   :  { %8794 = vrsqrt.f32 %v3839_v20  ;;  %v11876_v12 = vadd.f32 %v3976_v31, %v14629_v22  ;;  %v3808_v11 = vsub.f32 %v11535_v29, %v11812_v6  ;;  %v11887_v18 = vmul.f32 0.0078125, %v3547_v63 }
 0x829   :  { %14627 = vst [vmem:[#allocation22_spill] sm:$0xff] %v11870_v49  ;;  %v3549_v53 = vpop.xlane.xlu1 %3548  ;;  %v11880_v32 = vadd.f32 %v3975_v48, %v14632_v28  ;;  %v14370_v5 = vmax.f32 %v11870_v49, 0.0  ;;  %v3748_v3 = vmul.f32 %v11872_v51, %v11872_v51  ;;  %v3809_v48 = vsub.f32 %v11538_v50, %v11822_v59 }
 0x82a   :  { %14630 = vst [vmem:[#allocation26_spill] sm:$0xff] %v11876_v12  ;;  %v14371_v9 = vmax.f32 %v11876_v12, 0.0  ;;  %v11896_v46 = vmul.f32 0.0078125, %v3549_v53  ;;  %v3749_v10 = vmul.f32 %v11882_v58, %v11882_v58  ;;  %v3806_v59 = vsub.f32 %v11542_v54, %v11827_v60 }
 0x82b   :  { %14633 = vst [vmem:[#allocation19_spill] sm:$0xff] %v11880_v32  ;;  %v3679_v36 = vpop.xlane.xlu0 %3678  ;;  %v14369_v31 = vmax.f32 %v11880_v32, 0.0  ;;  %v3746_v53 = vmul.f32 %v11887_v18, %v11887_v18 }
 0x82c   :  { %v8789_v20 = vpop.eup %8788  ;;  %v3716_v45 = vmul.f32 0.0078125, %v3679_v36  ;;  %v4063_v50 = vpack.c.bf16 %v14372_v52, %v14371_v9 }
 0x82d   :  { %v3681_v29 = vpop.xlane.xlu1 %3680  ;;  %v4062_v6 = vpack.c.bf16 %v14369_v31, %v14370_v5  ;;  %v3904_v63 = vmul.f32 %v8789_v20, %v3808_v11 }
 0x82e   :  { %v8791_v13 = vpop.eup %8790  ;;  %v3780_v22 = vsub.f32 %v3716_v45, %v3748_v3  ;;  %v3717_v25 = vmul.f32 0.0078125, %v3681_v29  ;;  %v3807_v45 = vsub.f32 %v11546_v39, %v11836_v62  ;;  %v3747_v29 = vmul.f32 %v11896_v46, %v11896_v46 }
 0x82f   :  { %8241 = vmatprep.mubr.bf16.mxu1 %v4062_v6  ;;  %v3675_v28 = vpop.xlane.xlu0 %3674  ;;  %v3905_v11 = vmul.f32 %v8791_v13, %v3809_v48  ;;  %v3942_v3 = vmul.f32 %v11610_v1, %v3904_v63 }
 0x830   :  { %v8793_v36 = vpop.eup %8792  ;;  %v3844_v20 = vadd.f32 1e-05, %v3780_v22  ;;  %v3781_v31 = vsub.f32 %v3717_v25, %v3749_v10  ;;  %v3714_v5 = vmul.f32 0.0078125, %v3675_v28  ;;  %8242 = vmatmul.mubr.bf16.gmra.mrb[96].mxu1 %v4063_v50 }
 0x831   :  { %v3677_v54 = vpop.xlane.xlu1 %3676  ;;  %v3902_v60 = vmul.f32 %v8793_v36, %v3806_v59  ;;  %v3943_v9 = vmul.f32 %v11610_v1, %v3905_v11  ;;  %v3980_v28 = vadd.f32 %v11618_v21, %v3942_v3 }
 0x832   :  { %v8795_v6 = vpop.eup %8794  ;;  %8796 = vrsqrt.f32 %v3844_v20  ;;  %v3845_v48 = vadd.f32 1e-05, %v3781_v31  ;;  %v3778_v13 = vsub.f32 %v3714_v5, %v3746_v53  ;;  %v3715_v22 = vmul.f32 0.0078125, %v3677_v54  ;;  %v14634_v5 = vld [vmem:[#allocation6_spill] sm:$0xff] }
 0x833   :  { %v3559_v10 = vpop.xlane.xlu0 %3558  ;;  %v3903_v25 = vmul.f32 %v8795_v6, %v3807_v45  ;;  %v3940_v50 = vmul.f32 %v11610_v1, %v3902_v60  ;;  %v3981_v63 = vadd.f32 %v11618_v21, %v3943_v9  ;;  %v14635_v53 = vmax.f32 %v14634_v5, 0.0  ;;  %v14637_v9 = vld [vmem:[#allocation27_spill] sm:$0xff] }
 0x834   :  { %8798 = vrsqrt.f32 %v3845_v48  ;;  %v3842_v39 = vadd.f32 1e-05, %v3778_v13  ;;  %v3779_v62 = vsub.f32 %v3715_v22, %v3747_v29  ;;  %v14638_v54 = vmax.f32 %v14637_v9, 0.0  ;;  %v14640_v29 = vld [vmem:[#allocation7_spill] sm:$0xff]  ;;  %v14643_v22 = vld [vmem:[#allocation28_spill] sm:$0xff] }
 0x835   :  { %v3561_v52 = vpop.xlane.xlu1 %3560  ;;  %v3941_v59 = vmul.f32 %v11610_v1, %v3903_v25  ;;  %v3978_v11 = vadd.f32 %v11618_v21, %v3940_v50  ;;  %v11925_v36 = vadd.f32 %v3981_v63, %v14635_v53  ;;  %v14641_v6 = vmax.f32 %v14640_v29, 0.0 }
 0x836   :  { %8800 = vrsqrt.f32 %v3842_v39  ;;  %v3843_v31 = vadd.f32 1e-05, %v3779_v62  ;;  %v14644_v25 = vmax.f32 %v14643_v22, 0.0  ;;  %v3812_v62 = vsub.f32 %v11559_v44, %v11872_v51 }
 0x837   :  { %14636 = vst [vmem:[#allocation6_spill] sm:$0xff] %v11925_v36  ;;  %v3555_v20 = vpop.xlane.xlu0 %3554  ;;  %v3979_v45 = vadd.f32 %v11618_v21, %v3941_v59  ;;  %v11930_v60 = vadd.f32 %v3978_v11, %v14638_v54  ;;  %v11936_v48 = vadd.f32 %v3980_v28, %v14641_v6  ;;  %v14384_v39 = vmax.f32 %v11925_v36, 0.0 }
 0x838   :  { %8802 = vrsqrt.f32 %v3843_v31  ;;  %v11932_v3 = vmul.f32 0.0078125, %v3555_v20  ;;  %v11947_v59 = vmul.f32 0.0078125, %v3559_v10  ;;  %v3813_v9 = vsub.f32 %v11562_v57, %v11882_v58 }
 0x839   :  { %14639 = vst [vmem:[#allocation27_spill] sm:$0xff] %v11930_v60  ;;  %14642 = vst [vmem:[#allocation7_spill] sm:$0xff] %v11936_v48  ;;  %v3557_v13 = vpop.xlane.xlu1 %3556  ;;  %v11940_v50 = vadd.f32 %v3979_v45, %v14644_v25  ;;  %v14374_v31 = vmax.f32 %v11930_v60, 0.0  ;;  %v14375_v45 = vmax.f32 %v11936_v48, 0.0  ;;  %v11956_v54 = vmul.f32 0.0078125, %v3561_v52 }
 0x83a   :  { %v11942_v63 = vmul.f32 0.0078125, %v3557_v13  ;;  %v3750_v53 = vmul.f32 %v11932_v3, %v11932_v3  ;;  %v3810_v58 = vsub.f32 %v11566_v26, %v11887_v18  ;;  %v3752_v52 = vmul.f32 %v11947_v59, %v11947_v59 }
 0x83b   :  { %14645 = vst [vmem:[#allocation28_spill] sm:$0xff] %v11940_v50  ;;  %v3683_v11 = vpop.xlane.xlu0 %3682  ;;  %v14373_v28 = vmax.f32 %v11940_v50, 0.0  ;;  %v4065_v57 = vpack.c.bf16 %v14384_v39, %v14375_v45 }
 0x83c   :  { %v8797_v5 = vpop.eup %8796  ;;  %v3718_v20 = vmul.f32 0.0078125, %v3683_v11  ;;  %v3751_v6 = vmul.f32 %v11942_v63, %v11942_v63 }
 0x83d   :  { %v3685_v44 = vpop.xlane.xlu1 %3684  ;;  %v4064_v51 = vpack.c.bf16 %v14373_v28, %v14374_v31  ;;  %v3908_v10 = vmul.f32 %v8797_v5, %v3812_v62 }
 0x83e   :  { %v8799_v29 = vpop.eup %8798  ;;  %v3782_v13 = vsub.f32 %v3718_v20, %v3750_v53  ;;  %v3719_v22 = vmul.f32 0.0078125, %v3685_v44  ;;  %v3811_v20 = vsub.f32 %v11570_v27, %v11896_v46  ;;  %v3753_v44 = vmul.f32 %v11956_v54, %v11956_v54 }
 0x83f   :  { %8245 = vmatprep.mubr.bf16.mxu1 %v4064_v51  ;;  %v3687_v25 = vpop.xlane.xlu0 %3686  ;;  %v3909_v62 = vmul.f32 %v8799_v29, %v3813_v9  ;;  %v3946_v53 = vmul.f32 %v11610_v1, %v3908_v10 }
 0x840   :  { %v8801_v11 = vpop.eup %8800  ;;  %v3846_v5 = vadd.f32 1e-05, %v3782_v13  ;;  %v3783_v28 = vsub.f32 %v3719_v22, %v3751_v6  ;;  %v3720_v31 = vmul.f32 0.0078125, %v3687_v25  ;;  %8246 = vmatmul.mubr.bf16.gmra.mrb[100].mxu1 %v4065_v57 }
 0x841   :  { %v3689_v26 = vpop.xlane.xlu1 %3688  ;;  %v3906_v18 = vmul.f32 %v8801_v11, %v3810_v58  ;;  %v3947_v45 = vmul.f32 %v11610_v1, %v3909_v62  ;;  %v3984_v46 = vadd.f32 %v11618_v21, %v3946_v53  ;;  %v14646_v11 = vld [vmem:[#allocation32_spill] sm:$0xff] }
 0x842   :  { %v8803_v51 = vpop.eup %8802  ;;  %8804 = vrsqrt.f32 %v3846_v5  ;;  %v3847_v9 = vadd.f32 1e-05, %v3783_v28  ;;  %v3784_v29 = vsub.f32 %v3720_v31, %v3752_v52  ;;  %v3721_v13 = vmul.f32 0.0078125, %v3689_v26  ;;  %v14649_v5 = vld [vmem:[#allocation29_spill] sm:$0xff] }
 0x843   :  { %v3907_v6 = vmul.f32 %v8803_v51, %v3811_v20  ;;  %v3944_v22 = vmul.f32 %v11610_v1, %v3906_v18  ;;  %v3985_v10 = vadd.f32 %v11618_v21, %v3947_v45  ;;  %v14647_v28 = vmax.f32 %v14646_v11, 0.0  ;;  %v14655_v18 = vld [vmem:[#allocation30_spill] sm:$0xff] }
 0x844   :  { %8806 = vrsqrt.f32 %v3847_v9  ;;  %v3848_v57 = vadd.f32 1e-05, %v3784_v29  ;;  %v3785_v27 = vsub.f32 %v3721_v13, %v3753_v44  ;;  %v14650_v20 = vmax.f32 %v14649_v5, 0.0  ;;  %v14652_v44 = vld [vmem:[#allocation31_spill] sm:$0xff] }
 0x845   :  { %v3945_v25 = vmul.f32 %v11610_v1, %v3907_v6  ;;  %v3982_v58 = vadd.f32 %v11618_v21, %v3944_v22  ;;  %v11985_v31 = vadd.f32 %v3985_v10, %v14647_v28  ;;  %v14653_v26 = vmax.f32 %v14652_v44, 0.0 }
 0x846   :  { %8808 = vrsqrt.f32 %v3848_v57  ;;  %v3849_v62 = vadd.f32 1e-05, %v3785_v27  ;;  %v14656_v51 = vmax.f32 %v14655_v18, 0.0  ;;  %v3814_v13 = vsub.f32 %v11590_v35, %v11932_v3 }
 0x847   :  { %14648 = vst [vmem:[#allocation32_spill] sm:$0xff] %v11985_v31  ;;  %v3983_v52 = vadd.f32 %v11618_v21, %v3945_v25  ;;  %v11990_v45 = vadd.f32 %v3982_v58, %v14650_v20  ;;  %v11994_v53 = vadd.f32 %v3984_v46, %v14653_v26  ;;  %v14383_v29 = vmax.f32 %v11985_v31, 0.0  ;;  %v14658_v26 = vld [vmem:[#allocation9_spill] sm:$0xff] }
 0x848   :  { %8810 = vrsqrt.f32 %v3849_v62  ;;  %v3815_v27 = vsub.f32 %v11594_v43, %v11942_v63  ;;  %v3816_v3 = vsub.f32 %v11583_v61, %v11947_v59  ;;  %v3817_v63 = vsub.f32 %v11586_v8, %v11956_v54 }
 0x849   :  { %14651 = vst [vmem:[#allocation29_spill] sm:$0xff] %v11990_v45  ;;  %14654 = vst [vmem:[#allocation31_spill] sm:$0xff] %v11994_v53  ;;  %v11998_v9 = vadd.f32 %v3983_v52, %v14656_v51  ;;  %v14382_v6 = vmax.f32 %v11990_v45, 0.0  ;;  %v14381_v57 = vmax.f32 %v11994_v53, 0.0  ;;  %v14659_v18 = vmax.f32 %v14658_v26, 0.0 }
 0x84b   :  { %14657 = vst [vmem:[#allocation30_spill] sm:$0xff] %v11998_v9  ;;  %v14380_v22 = vmax.f32 %v11998_v9, 0.0  ;;  %v4067_v35 = vpack.c.bf16 %v14383_v29, %v14381_v57 }
 0x84c   :  { %v8805_v10 = vpop.eup %8804 }
 0x84d   :  { %v4066_v46 = vpack.c.bf16 %v14380_v22, %v14382_v6  ;;  %v3910_v25 = vmul.f32 %v8805_v10, %v3814_v13  ;;  %v14661_v13 = vld [vmem:[#allocation11_spill] sm:$0xff] }
 0x84e   :  { %v8807_v58 = vpop.eup %8806  ;;  %v14662_v10 = vmax.f32 %v14661_v13, 0.0 }
 0x84f   :  { %8249 = vmatprep.mubr.bf16.mxu1 %v4066_v46  ;;  %v3911_v62 = vmul.f32 %v8807_v58, %v3815_v27  ;;  %v3948_v11 = vmul.f32 %v11610_v1, %v3910_v25 }
 0x850   :  { %v8809_v43 = vpop.eup %8808  ;;  %8250 = vmatmul.mubr.bf16.gmra.mrb[104].mxu1 %v4067_v35  ;;  %v14664_v35 = vld [vmem:[#allocation8_spill] sm:$0xff] }
 0x851   :  { %v3949_v28 = vmul.f32 %v11610_v1, %v3911_v62  ;;  %v3986_v52 = vadd.f32 %v11618_v21, %v3948_v11  ;;  %v3912_v5 = vmul.f32 %v8809_v43, %v3816_v3  ;;  %v14665_v3 = vmax.f32 %v14664_v35, 0.0  ;;  %v14667_v43 = vld [vmem:[#allocation10_spill] sm:$0xff] }
 0x852   :  { %v8811_v20 = vpop.eup %8810 }
 0x853   :  { %v3987_v44 = vadd.f32 %v11618_v21, %v3949_v28  ;;  %v12026_v61 = vadd.f32 %v3986_v52, %v14659_v18  ;;  %v3913_v59 = vmul.f32 %v8811_v20, %v3817_v63  ;;  %v3950_v51 = vmul.f32 %v11610_v1, %v3912_v5  ;;  %v12059_v5 = vld [vmem:[%s14260_s6 + $0x4] ss:$0 sm:$0xff] }
 0x854   :  { %v14668_v63 = vmax.f32 %v14667_v43, 0.0 }
 0x855   :  { %14660 = vst [vmem:[#allocation9_spill] sm:$0xff] %v12026_v61  ;;  %v12031_v27 = vadd.f32 %v3987_v44, %v14662_v10  ;;  %v3951_v8 = vmul.f32 %v11610_v1, %v3913_v59  ;;  %v3988_v54 = vadd.f32 %v11618_v21, %v3950_v51  ;;  %v14379_v46 = vmax.f32 %v12026_v61, 0.0 }
 0x857   :  { %14663 = vst [vmem:[#allocation11_spill] sm:$0xff] %v12031_v27  ;;  %v14378_v25 = vmax.f32 %v12031_v27, 0.0  ;;  %v3989_v58 = vadd.f32 %v11618_v21, %v3951_v8  ;;  %v12040_v62 = vadd.f32 %v3988_v54, %v14665_v3  ;;  %v8468_v54 = vld [vmem:[%s14259_s5 + $0x140] sm:$0xff]  }
 0x858   :  { %8257 = vmatprep.subr.bf16.mxu0 %v8468_v54 }
 0x859   :  { %14666 = vst [vmem:[#allocation8_spill] sm:$0xff] %v12040_v62  ;;  %v4068_v11 = vpack.c.bf16 %v14378_v25, %v14379_v46  ;;  %v12048_v1 = vadd.f32 %v3989_v58, %v14668_v63  ;;  %v14377_v28 = vmax.f32 %v12040_v62, 0.0  ;;  %8258 = vmatpush3.bf16.msra.mxu0 %v8468_v54 }
 0x85b   :  { %14669 = vst [vmem:[#allocation10_spill] sm:$0xff] %v12048_v1  ;;  %8253 = vmatprep.mubr.bf16.mxu1 %v4068_v11  ;;  %v14376_v52 = vmax.f32 %v12048_v1, 0.0  ;;  %v8469_v11 = vld [vmem:[%s14259_s5 + $0x148] sm:$0xff]  }
 0x85c   :  { %8259 = vmatprep.subr.bf16.mxu0 %v8469_v11 }
 0x85d   :  { %v4069_v21 = vpack.c.bf16 %v14376_v52, %v14377_v28  ;;  %8260 = vmatpush3.bf16.msra.mxu0 %v8469_v11 }
 0x85f   :  { %8254 = vmatmul.mubr.bf16.gmra.mrb[108].mxu1 %v4069_v21 }
 0x8b2   :  { %v8227_v20 = vpop.f32.mrb[80].mxu1 }
 0x8b3   :  { %v12062_v44 = vadd.f32 %v8227_v20, %v12059_v5  ;;  %v4177_v26 = vpop.f32.mrb[81].mxu1 }
 0x8b4   :  { %v8228_v18 = vpop.f32.mrb[82].mxu1  ;;  %v12069_v13 = vadd.f32 %v12059_v5, %v4177_v26 }
 0x8b5   :  { %v12065_v59 = vadd.f32 %v8228_v18, %v12059_v5  ;;  %4312 = vadd.xlane.f32.xlu0 %v12062_v44  ;;  %v4180_v51 = vpop.f32.mrb[83].mxu1  ;;  %v4406_v8 = vmul.f32 %v12062_v44, %v12062_v44 }
 0x8b6   :  { %v12073_v10 = vadd.f32 %v12059_v5, %v4180_v51  ;;  %v4404_v35 = vmul.f32 %v12069_v13, %v12069_v13 }
 0x8b7   :  { %4314 = vadd.xlane.f32.xlu1 %v12065_v59  ;;  %v4407_v58 = vmul.f32 %v12065_v59, %v12065_v59 }
 0x8b8   :  { %v4405_v3 = vmul.f32 %v12073_v10, %v12073_v10 }
 0x8b9   :  { %4308 = vadd.xlane.f32.xlu0 %v12069_v13 }
 0x8bb   :  { %4310 = vadd.xlane.f32.xlu1 %v12073_v10 }
 0x8bd   :  { %4440 = vadd.xlane.f32.xlu0 %v4406_v8  ;;  %v8470_v8 = vld [vmem:[%s14259_s5 + $0x150] sm:$0xff]  }
 0x8be   :  { %8261 = vmatprep.subr.bf16.mxu0 %v8470_v8 }
 0x8bf   :  { %4442 = vadd.xlane.f32.xlu1 %v4407_v58  ;;  %8262 = vmatpush3.bf16.msra.mxu0 %v8470_v8 }
 0x8c1   :  { %4436 = vadd.xlane.f32.xlu0 %v4404_v35  ;;  %v8471_v35 = vld [vmem:[%s14259_s5 + $0x158] sm:$0xff]  }
 0x8c2   :  { %8263 = vmatprep.subr.bf16.mxu0 %v8471_v35 }
 0x8c3   :  { %4438 = vadd.xlane.f32.xlu1 %v4405_v3  ;;  %8264 = vmatpush3.bf16.msra.mxu0 %v8471_v35 }
 0x8cf   :  { %v8231_v43 = vpop.f32.mrb[84].mxu1 }
 0x8d0   :  { %v12092_v63 = vadd.f32 %v8231_v43, %v12059_v5  ;;  %v4193_v21 = vpop.f32.mrb[85].mxu1  ;;  %v8472_v43 = vld [vmem:[%s14259_s5 + $0x160] sm:$0xff]  }
 0x8d1   :  { %v8232_v20 = vpop.f32.mrb[86].mxu1  ;;  %v12099_v51 = vadd.f32 %v12059_v5, %v4193_v21  ;;  %8265 = vmatprep.subr.bf16.mxu0 %v8472_v43 }
 0x8d2   :  { %v12095_v26 = vadd.f32 %v8232_v20, %v12059_v5  ;;  %4320 = vadd.xlane.f32.xlu0 %v12092_v63  ;;  %v4196_v18 = vpop.f32.mrb[87].mxu1  ;;  %v4410_v58 = vmul.f32 %v12092_v63, %v12092_v63  ;;  %8266 = vmatpush3.bf16.msra.mxu0 %v8472_v43  ;;  %v8473_v20 = vld [vmem:[%s14259_s5 + $0x168] sm:$0xff]  }
 0x8d3   :  { %v12106_v54 = vadd.f32 %v12059_v5, %v4196_v18  ;;  %v4408_v11 = vmul.f32 %v12099_v51, %v12099_v51  ;;  %8267 = vmatprep.subr.bf16.mxu0 %v8473_v20 }
 0x8d4   :  { %4322 = vadd.xlane.f32.xlu1 %v12095_v26  ;;  %v4411_v3 = vmul.f32 %v12095_v26, %v12095_v26 }
 0x8d5   :  { %v4409_v21 = vmul.f32 %v12106_v54, %v12106_v54 }
 0x8d6   :  { %4316 = vadd.xlane.f32.xlu0 %v12099_v51  ;;  %8268 = vmatpush3.bf16.msra.mxu0 %v8473_v20  ;;  %v8475_v20 = vld [vmem:[%s14259_s5 + $0x178] sm:$0xff]  }
 0x8d8   :  { %4318 = vadd.xlane.f32.xlu1 %v12106_v54 }
 0x8da   :  { %4448 = vadd.xlane.f32.xlu0 %v4410_v58 }
 0x8dc   :  { %4450 = vadd.xlane.f32.xlu1 %v4411_v3  ;;  %v8474_v3 = vld [vmem:[%s14259_s5 + $0x170] sm:$0xff]  }
 0x8dd   :  { %8269 = vmatprep.subr.bf16.mxu0 %v8474_v3 }
 0x8de   :  { %4444 = vadd.xlane.f32.xlu0 %v4408_v11  ;;  %8270 = vmatpush3.bf16.msra.mxu0 %v8474_v3 }
 0x8df   :  { %8271 = vmatprep.subr.bf16.mxu0 %v8475_v20 }
 0x8e0   :  { %4446 = vadd.xlane.f32.xlu1 %v4409_v21 }
 0x8e2   :  { %8272 = vmatpush3.bf16.msra.mxu0 %v8475_v20 }
 0x8e3   :  { %v8235_v18 = vpop.f32.mrb[88].mxu1 }
 0x8e4   :  { %v12128_v8 = vadd.f32 %v8235_v18, %v12059_v5  ;;  %v4209_v58 = vpop.f32.mrb[89].mxu1 }
 0x8e5   :  { %v8236_v35 = vpop.f32.mrb[90].mxu1  ;;  %v12138_v21 = vadd.f32 %v12059_v5, %v4209_v58 }
 0x8e6   :  { %v12134_v11 = vadd.f32 %v8236_v35, %v12059_v5  ;;  %4328 = vadd.xlane.f32.xlu0 %v12128_v8  ;;  %v4212_v43 = vpop.f32.mrb[91].mxu1  ;;  %v4414_v35 = vmul.f32 %v12128_v8, %v12128_v8 }
 0x8e7   :  { %v12145_v18 = vadd.f32 %v12059_v5, %v4212_v43  ;;  %v4412_v3 = vmul.f32 %v12138_v21, %v12138_v21 }
 0x8e8   :  { %4330 = vadd.xlane.f32.xlu1 %v12134_v11  ;;  %v4415_v58 = vmul.f32 %v12134_v11, %v12134_v11 }
 0x8e9   :  { %v4413_v43 = vmul.f32 %v12145_v18, %v12145_v18 }
 0x8ea   :  { %4324 = vadd.xlane.f32.xlu0 %v12138_v21 }
 0x8ec   :  { %4326 = vadd.xlane.f32.xlu1 %v12145_v18 }
 0x8ee   :  { %4456 = vadd.xlane.f32.xlu0 %v4414_v35 }
 0x8f0   :  { %4458 = vadd.xlane.f32.xlu1 %v4415_v58 }
 0x8f2   :  { %4452 = vadd.xlane.f32.xlu0 %v4412_v3 }
 0x8f3   :  { %v8239_v52 = vpop.f32.mrb[92].mxu1 }
 0x8f4   :  { %v12158_v28 = vadd.f32 %v8239_v52, %v12059_v5  ;;  %4454 = vadd.xlane.f32.xlu1 %v4413_v43  ;;  %v4225_v25 = vpop.f32.mrb[93].mxu1 }
 0x8f5   :  { %v8240_v46 = vpop.f32.mrb[94].mxu1  ;;  %v12165_v58 = vadd.f32 %v12059_v5, %v4225_v25 }
 0x8f6   :  { %v12161_v20 = vadd.f32 %v8240_v46, %v12059_v5  ;;  %4336 = vadd.xlane.f32.xlu0 %v12158_v28  ;;  %v4228_v35 = vpop.f32.mrb[95].mxu1  ;;  %v4418_v52 = vmul.f32 %v12158_v28, %v12158_v28 }
 0x8f7   :  { %v12169_v3 = vadd.f32 %v12059_v5, %v4228_v35  ;;  %v4416_v25 = vmul.f32 %v12165_v58, %v12165_v58 }
 0x8f8   :  { %4338 = vadd.xlane.f32.xlu1 %v12161_v20  ;;  %v4419_v46 = vmul.f32 %v12161_v20, %v12161_v20 }
 0x8f9   :  { %v4417_v43 = vmul.f32 %v12169_v3, %v12169_v3 }
 0x8fa   :  { %4332 = vadd.xlane.f32.xlu0 %v12165_v58 }
 0x8fc   :  { %4334 = vadd.xlane.f32.xlu1 %v12169_v3 }
 0x8fe   :  { %4464 = vadd.xlane.f32.xlu0 %v4418_v52 }
 0x900   :  { %4466 = vadd.xlane.f32.xlu1 %v4419_v46 }
 0x902   :  { %4460 = vadd.xlane.f32.xlu0 %v4416_v25 }
 0x903   :  { %v8243_v35 = vpop.f32.mrb[96].mxu1 }
 0x904   :  { %v12182_v22 = vadd.f32 %v8243_v35, %v12059_v5  ;;  %4462 = vadd.xlane.f32.xlu1 %v4417_v43  ;;  %v4241_v57 = vpop.f32.mrb[97].mxu1 }
 0x905   :  { %v8244_v6 = vpop.f32.mrb[98].mxu1  ;;  %v12189_v29 = vadd.f32 %v12059_v5, %v4241_v57 }
 0x906   :  { %v12185_v52 = vadd.f32 %v8244_v6, %v12059_v5  ;;  %4344 = vadd.xlane.f32.xlu0 %v12182_v22  ;;  %v4244_v46 = vpop.f32.mrb[99].mxu1  ;;  %v4422_v43 = vmul.f32 %v12182_v22, %v12182_v22 }
 0x907   :  { %v12193_v25 = vadd.f32 %v12059_v5, %v4244_v46  ;;  %v4420_v57 = vmul.f32 %v12189_v29, %v12189_v29 }
 0x908   :  { %4346 = vadd.xlane.f32.xlu1 %v12185_v52  ;;  %v4423_v6 = vmul.f32 %v12185_v52, %v12185_v52 }
 0x909   :  { %v4421_v35 = vmul.f32 %v12193_v25, %v12193_v25 }
 0x90a   :  { %4340 = vadd.xlane.f32.xlu0 %v12189_v29 }
 0x90c   :  { %4342 = vadd.xlane.f32.xlu1 %v12193_v25 }
 0x90e   :  { %4472 = vadd.xlane.f32.xlu0 %v4422_v43 }
 0x910   :  { %4474 = vadd.xlane.f32.xlu1 %v4423_v6 }
 0x912   :  { %4468 = vadd.xlane.f32.xlu0 %v4420_v57 }
 0x913   :  { %v8247_v46 = vpop.f32.mrb[100].mxu1 }
 0x914   :  { %v12206_v39 = vadd.f32 %v8247_v46, %v12059_v5  ;;  %4470 = vadd.xlane.f32.xlu1 %v4421_v35  ;;  %v4257_v16 = vpop.f32.mrb[101].mxu1 }
 0x915   :  { %v8248_v19 = vpop.f32.mrb[102].mxu1  ;;  %v12213_v42 = vadd.f32 %v12059_v5, %v4257_v16 }
 0x916   :  { %v12209_v43 = vadd.f32 %v8248_v19, %v12059_v5  ;;  %4352 = vadd.xlane.f32.xlu0 %v12206_v39  ;;  %v4260_v6 = vpop.f32.mrb[103].mxu1  ;;  %v4426_v35 = vmul.f32 %v12206_v39, %v12206_v39 }
 0x917   :  { %v12217_v57 = vadd.f32 %v12059_v5, %v4260_v6  ;;  %v4424_v16 = vmul.f32 %v12213_v42, %v12213_v42 }
 0x918   :  { %4354 = vadd.xlane.f32.xlu1 %v12209_v43  ;;  %v4427_v19 = vmul.f32 %v12209_v43, %v12209_v43 }
 0x919   :  { %v4425_v46 = vmul.f32 %v12217_v57, %v12217_v57 }
 0x91a   :  { %4348 = vadd.xlane.f32.xlu0 %v12213_v42 }
 0x91c   :  { %4350 = vadd.xlane.f32.xlu1 %v12217_v57 }
 0x91e   :  { %4480 = vadd.xlane.f32.xlu0 %v4426_v35 }
 0x920   :  { %4482 = vadd.xlane.f32.xlu1 %v4427_v19 }
 0x922   :  { %4476 = vadd.xlane.f32.xlu0 %v4424_v16 }
 0x923   :  { %v8251_v6 = vpop.f32.mrb[104].mxu1 }
 0x924   :  { %v12230_v34 = vadd.f32 %v8251_v6, %v12059_v5  ;;  %4478 = vadd.xlane.f32.xlu1 %v4425_v46  ;;  %v4273_v17 = vpop.f32.mrb[105].mxu1 }
 0x925   :  { %v8252_v1 = vpop.f32.mrb[106].mxu1  ;;  %v12237_v62 = vadd.f32 %v12059_v5, %v4273_v17 }
 0x926   :  { %v12233_v35 = vadd.f32 %v8252_v1, %v12059_v5  ;;  %4360 = vadd.xlane.f32.xlu0 %v12230_v34  ;;  %v4276_v19 = vpop.f32.mrb[107].mxu1  ;;  %v4430_v46 = vmul.f32 %v12230_v34, %v12230_v34 }
 0x927   :  { %v12241_v16 = vadd.f32 %v12059_v5, %v4276_v19  ;;  %v4428_v17 = vmul.f32 %v12237_v62, %v12237_v62 }
 0x928   :  { %4362 = vadd.xlane.f32.xlu1 %v12233_v35  ;;  %v4431_v1 = vmul.f32 %v12233_v35, %v12233_v35 }
 0x929   :  { %v4429_v19 = vmul.f32 %v12241_v16, %v12241_v16 }
 0x92a   :  { %4356 = vadd.xlane.f32.xlu0 %v12237_v62 }
 0x92c   :  { %4358 = vadd.xlane.f32.xlu1 %v12241_v16 }
 0x92e   :  { %4488 = vadd.xlane.f32.xlu0 %v4430_v46 }
 0x930   :  { %4490 = vadd.xlane.f32.xlu1 %v4431_v1 }
 0x932   :  { %4484 = vadd.xlane.f32.xlu0 %v4428_v17  ;;  %v8255_v6 = vpop.f32.mrb[108].mxu1 }
 0x933   :  { %v12254_v27 = vadd.f32 %v8255_v6, %v12059_v5  ;;  %v4289_v61 = vpop.f32.mrb[109].mxu1 }
 0x934   :  { %4486 = vadd.xlane.f32.xlu1 %v4429_v19  ;;  %v8256_v9 = vpop.f32.mrb[110].mxu1  ;;  %v12261_v1 = vadd.f32 %v12059_v5, %v4289_v61 }
 0x935   :  { %v12257_v46 = vadd.f32 %v8256_v9, %v12059_v5  ;;  %v4292_v53 = vpop.f32.mrb[111].mxu1  ;;  %v4434_v61 = vmul.f32 %v12254_v27, %v12254_v27 }
 0x936   :  { %4368 = vadd.xlane.f32.xlu0 %v12254_v27  ;;  %v12265_v17 = vadd.f32 %v12059_v5, %v4292_v53  ;;  %v4432_v6 = vmul.f32 %v12261_v1, %v12261_v1 }
 0x937   :  { %v4435_v53 = vmul.f32 %v12257_v46, %v12257_v46 }
 0x938   :  { %4370 = vadd.xlane.f32.xlu1 %v12257_v46  ;;  %v4433_v9 = vmul.f32 %v12265_v17, %v12265_v17 }
 0x93a   :  { %4364 = vadd.xlane.f32.xlu0 %v12261_v1 }
 0x93c   :  { %4366 = vadd.xlane.f32.xlu1 %v12265_v17 }
 0x93e   :  { %4492 = vadd.xlane.f32.xlu0 %v4432_v6 }
 0x940   :  { %4494 = vadd.xlane.f32.xlu1 %v4433_v9 }
 0x942   :  { %4496 = vadd.xlane.f32.xlu0 %v4434_v61  ;;  %v4313_v5 = vpop.xlane.xlu0 %4312 }
 0x943   :  { %v4374_v31 = vmul.f32 0.0078125, %v4313_v5 }
 0x944   :  { %4498 = vadd.xlane.f32.xlu1 %v4435_v53  ;;  %v4315_v19 = vpop.xlane.xlu1 %4314 }
 0x945   :  { %v4375_v48 = vmul.f32 0.0078125, %v4315_v19  ;;  %v4534_v6 = vmul.f32 %v4374_v31, %v4374_v31 }
 0x946   :  { %v4309_v45 = vpop.xlane.xlu0 %4308 }
 0x947   :  { %v4372_v36 = vmul.f32 0.0078125, %v4309_v45  ;;  %v4535_v49 = vmul.f32 %v4375_v48, %v4375_v48 }
 0x948   :  { %v4311_v50 = vpop.xlane.xlu1 %4310 }
 0x949   :  { %v4373_v12 = vmul.f32 0.0078125, %v4311_v50  ;;  %v4532_v38 = vmul.f32 %v4372_v36, %v4372_v36 }
 0x94a   :  { %v4441_v60 = vpop.xlane.xlu0 %4440 }
 0x94b   :  { %v4502_v32 = vmul.f32 0.0078125, %v4441_v60  ;;  %v4533_v53 = vmul.f32 %v4373_v12, %v4373_v12 }
 0x94c   :  { %v4443_v9 = vpop.xlane.xlu1 %4442 }
 0x94d   :  { %v4566_v4 = vsub.f32 %v4502_v32, %v4534_v6  ;;  %v4503_v55 = vmul.f32 0.0078125, %v4443_v9  ;;  %v4598_v32 = vsub.f32 %v12062_v44, %v4374_v31  ;;  %v4599_v6 = vsub.f32 %v12065_v59, %v4375_v48 }
 0x94e   :  { %v4437_v61 = vpop.xlane.xlu0 %4436 }
 0x94f   :  { %v4630_v40 = vadd.f32 1e-05, %v4566_v4  ;;  %v4567_v23 = vsub.f32 %v4503_v55, %v4535_v49  ;;  %v4500_v7 = vmul.f32 0.0078125, %v4437_v61  ;;  %v4596_v49 = vsub.f32 %v12069_v13, %v4372_v36  ;;  %v12291_v36 = vld [vmem:[%s14262_s8 + $0x4] ss:$0 sm:$0xff] }
 0x950   :  { %v4439_v0 = vpop.xlane.xlu1 %4438 }
 0x951   :  { %8812 = vrsqrt.f32 %v4630_v40  ;;  %v4631_v5 = vadd.f32 1e-05, %v4567_v23  ;;  %v4564_v37 = vsub.f32 %v4500_v7, %v4532_v38  ;;  %v4501_v19 = vmul.f32 0.0078125, %v4439_v0  ;;  %v12283_v0 = vld [vmem:[%s14261_s7 + $0x4] ss:$0 sm:$0xff] }
 0x953   :  { %8814 = vrsqrt.f32 %v4631_v5  ;;  %v4628_v24 = vadd.f32 1e-05, %v4564_v37  ;;  %v4565_v45 = vsub.f32 %v4501_v19, %v4533_v53 }
 0x955   :  { %8816 = vrsqrt.f32 %v4628_v24  ;;  %v4629_v60 = vadd.f32 1e-05, %v4565_v45  ;;  %v4597_v24 = vsub.f32 %v12073_v10, %v4373_v12 }
 0x957   :  { %8818 = vrsqrt.f32 %v4629_v60 }
 0x95b   :  { %v8813_v50 = vpop.eup %8812 }
 0x95c   :  { %v4694_v55 = vmul.f32 %v8813_v50, %v4598_v32 }
 0x95d   :  { %v8815_v4 = vpop.eup %8814 }
 0x95e   :  { %v4695_v9 = vmul.f32 %v8815_v4, %v4599_v6  ;;  %v4732_v48 = vmul.f32 %v12283_v0, %v4694_v55 }
 0x95f   :  { %v4321_v40 = vpop.xlane.xlu0 %4320  ;;  %v8817_v37 = vpop.eup %8816 }
 0x960   :  { %v4692_v23 = vmul.f32 %v8817_v37, %v4596_v49  ;;  %v4733_v38 = vmul.f32 %v12283_v0, %v4695_v9  ;;  %v4378_v61 = vmul.f32 0.0078125, %v4321_v40  ;;  %v4770_v45 = vadd.f32 %v12291_v36, %v4732_v48 }
 0x961   :  { %v4323_v7 = vpop.xlane.xlu1 %4322  ;;  %v8819_v31 = vpop.eup %8818 }
 0x962   :  { %v4693_v59 = vmul.f32 %v8819_v31, %v4597_v24  ;;  %v4730_v13 = vmul.f32 %v12283_v0, %v4692_v23  ;;  %v4771_v53 = vadd.f32 %v12291_v36, %v4733_v38  ;;  %v4379_v19 = vmul.f32 0.0078125, %v4323_v7 }
 0x963   :  { %v4317_v44 = vpop.xlane.xlu0 %4316  ;;  %v4538_v6 = vmul.f32 %v4378_v61, %v4378_v61  ;;  %v4802_v31 = vmax.f32 %v4770_v45, 0.0 }
 0x964   :  { %v4731_v10 = vmul.f32 %v12283_v0, %v4693_v59  ;;  %v4768_v5 = vadd.f32 %v12291_v36, %v4730_v13  ;;  %v4376_v60 = vmul.f32 0.0078125, %v4317_v44  ;;  %v4803_v55 = vmax.f32 %v4771_v53, 0.0 }
 0x965   :  { %v4319_v12 = vpop.xlane.xlu1 %4318  ;;  %v4539_v24 = vmul.f32 %v4379_v19, %v4379_v19 }
 0x966   :  { %v4769_v32 = vadd.f32 %v12291_v36, %v4731_v10  ;;  %v4377_v49 = vmul.f32 0.0078125, %v4319_v12  ;;  %v4800_v40 = vmax.f32 %v4768_v5, 0.0  ;;  %v4536_v59 = vmul.f32 %v4376_v60, %v4376_v60 }
 0x967   :  { %v4449_v50 = vpop.xlane.xlu0 %4448  ;;  %v4833_v41 = vpack.c.bf16 %v4803_v55, %v4802_v31 }
 0x968   :  { %v4506_v4 = vmul.f32 0.0078125, %v4449_v50  ;;  %v4801_v37 = vmax.f32 %v4769_v32, 0.0  ;;  %v4537_v15 = vmul.f32 %v4377_v49, %v4377_v49 }
 0x969   :  { %v4451_v9 = vpop.xlane.xlu1 %4450 }
 0x96a   :  { %v4570_v23 = vsub.f32 %v4506_v4, %v4538_v6  ;;  %v4507_v38 = vmul.f32 0.0078125, %v4451_v9  ;;  %v4832_v7 = vpack.c.bf16 %v4801_v37, %v4800_v40  ;;  %v4602_v9 = vsub.f32 %v12092_v63, %v4378_v61 }
 0x96b   :  { %v4445_v13 = vpop.xlane.xlu0 %4444  ;;  %v4601_v63 = vsub.f32 %v12106_v54, %v4377_v49 }
 0x96c   :  { %v4634_v14 = vadd.f32 1e-05, %v4570_v23  ;;  %v4571_v48 = vsub.f32 %v4507_v38, %v4539_v24  ;;  %v4504_v44 = vmul.f32 0.0078125, %v4445_v13  ;;  %8273 = vmatprep.mubr.bf16.mxu0 %v4832_v7 }
 0x96d   :  { %v4447_v10 = vpop.xlane.xlu1 %4446  ;;  %8274 = vmatmul.mubr.bf16.vlgmr.msra.gmra.mrb[80].mxu0 %v4833_v41 }
 0x96e   :  { %8820 = vrsqrt.f32 %v4634_v14  ;;  %v4635_v53 = vadd.f32 1e-05, %v4571_v48  ;;  %v4568_v12 = vsub.f32 %v4504_v44, %v4536_v59  ;;  %v4505_v50 = vmul.f32 0.0078125, %v4447_v10 }
 0x96f   :  { %v4603_v14 = vsub.f32 %v12095_v26, %v4379_v19 }
 0x970   :  { %8822 = vrsqrt.f32 %v4635_v53  ;;  %v4632_v5 = vadd.f32 1e-05, %v4568_v12  ;;  %v4569_v32 = vsub.f32 %v4505_v50, %v4537_v15  ;;  %v4600_v15 = vsub.f32 %v12099_v51, %v4376_v60 }
 0x972   :  { %8824 = vrsqrt.f32 %v4632_v5  ;;  %v4633_v45 = vadd.f32 1e-05, %v4569_v32 }
 0x973   :  { %v4329_v6 = vpop.xlane.xlu0 %4328 }
 0x974   :  { %8826 = vrsqrt.f32 %v4633_v45  ;;  %v12300_v37 = vmul.f32 0.0078125, %v4329_v6 }
 0x975   :  { %v4331_v4 = vpop.xlane.xlu1 %4330 }
 0x976   :  { %v12303_v41 = vmul.f32 0.0078125, %v4331_v4  ;;  %v4542_v61 = vmul.f32 %v12300_v37, %v12300_v37 }
 0x977   :  { %v4325_v40 = vpop.xlane.xlu0 %4324 }
 0x978   :  { %v8821_v55 = vpop.eup %8820  ;;  %v12306_v31 = vmul.f32 0.0078125, %v4325_v40  ;;  %v4543_v60 = vmul.f32 %v12303_v41, %v12303_v41 }
 0x979   :  { %v4327_v24 = vpop.xlane.xlu1 %4326  ;;  %v4698_v23 = vmul.f32 %v8821_v55, %v4602_v9 }
 0x97a   :  { %v8823_v38 = vpop.eup %8822  ;;  %v12311_v44 = vmul.f32 0.0078125, %v4327_v24  ;;  %v4540_v54 = vmul.f32 %v12306_v31, %v12306_v31 }
 0x97b   :  { %v4457_v59 = vpop.xlane.xlu0 %4456  ;;  %v4699_v13 = vmul.f32 %v8823_v38, %v4603_v14  ;;  %v4736_v10 = vmul.f32 %v12283_v0, %v4698_v23 }
 0x97c   :  { %v8825_v7 = vpop.eup %8824  ;;  %v4510_v48 = vmul.f32 0.0078125, %v4457_v59  ;;  %v4541_v40 = vmul.f32 %v12311_v44, %v12311_v44 }
 0x97d   :  { %v4459_v26 = vpop.xlane.xlu1 %4458  ;;  %v4696_v19 = vmul.f32 %v8825_v7, %v4600_v15  ;;  %v4737_v53 = vmul.f32 %v12283_v0, %v4699_v13  ;;  %v4774_v23 = vadd.f32 %v12291_v36, %v4736_v10 }
 0x97e   :  { %v8827_v51 = vpop.eup %8826  ;;  %v4574_v12 = vsub.f32 %v4510_v48, %v4542_v61  ;;  %v4511_v50 = vmul.f32 0.0078125, %v4459_v26 }
 0x97f   :  { %v4453_v49 = vpop.xlane.xlu0 %4452  ;;  %v4697_v5 = vmul.f32 %v8827_v51, %v4601_v63  ;;  %v4734_v32 = vmul.f32 %v12283_v0, %v4696_v19  ;;  %v4775_v9 = vadd.f32 %v12291_v36, %v4737_v53 }
 0x980   :  { %v4638_v45 = vadd.f32 1e-05, %v4574_v12  ;;  %v4575_v6 = vsub.f32 %v4511_v50, %v4543_v60  ;;  %v4508_v4 = vmul.f32 0.0078125, %v4453_v49  ;;  %v4806_v60 = vmax.f32 %v4774_v23, 0.0 }
 0x981   :  { %v4455_v55 = vpop.xlane.xlu1 %4454  ;;  %v4735_v14 = vmul.f32 %v12283_v0, %v4697_v5  ;;  %v4772_v24 = vadd.f32 %v12291_v36, %v4734_v32  ;;  %v4807_v48 = vmax.f32 %v4775_v9, 0.0  ;;  %v4606_v32 = vsub.f32 %v12128_v8, %v12300_v37 }
 0x982   :  { %8828 = vrsqrt.f32 %v4638_v45  ;;  %v4639_v38 = vadd.f32 1e-05, %v4575_v6  ;;  %v4572_v15 = vsub.f32 %v4508_v4, %v4540_v54  ;;  %v4509_v59 = vmul.f32 0.0078125, %v4455_v55 }
 0x983   :  { %v4337_v13 = vpop.xlane.xlu0 %4336  ;;  %v4773_v7 = vadd.f32 %v12291_v36, %v4735_v14  ;;  %v4804_v19 = vmax.f32 %v4772_v24, 0.0  ;;  %v4835_v54 = vpack.c.bf16 %v4807_v48, %v4806_v60  ;;  %v4607_v55 = vsub.f32 %v12134_v11, %v12303_v41 }
 0x984   :  { %8830 = vrsqrt.f32 %v4639_v38  ;;  %v4636_v63 = vadd.f32 1e-05, %v4572_v15  ;;  %v4573_v61 = vsub.f32 %v4509_v59, %v4541_v40  ;;  %v12327_v10 = vmul.f32 0.0078125, %v4337_v13 }
 0x985   :  { %v4339_v26 = vpop.xlane.xlu1 %4338  ;;  %v4805_v53 = vmax.f32 %v4773_v7, 0.0  ;;  %v4604_v59 = vsub.f32 %v12138_v21, %v12306_v31  ;;  %v4605_v13 = vsub.f32 %v12145_v18, %v12311_v44 }
 0x986   :  { %8832 = vrsqrt.f32 %v4636_v63  ;;  %v4637_v51 = vadd.f32 1e-05, %v4573_v61  ;;  %v12329_v5 = vmul.f32 0.0078125, %v4339_v26  ;;  %v4546_v4 = vmul.f32 %v12327_v10, %v12327_v10 }
 0x987   :  { %v4333_v12 = vpop.xlane.xlu0 %4332  ;;  %v4834_v50 = vpack.c.bf16 %v4805_v53, %v4804_v19 }
 0x988   :  { %8834 = vrsqrt.f32 %v4637_v51  ;;  %v12335_v9 = vmul.f32 0.0078125, %v4333_v12  ;;  %v4547_v15 = vmul.f32 %v12329_v5, %v12329_v5 }
 0x989   :  { %v4335_v49 = vpop.xlane.xlu1 %4334  ;;  %8277 = vmatprep.mubr.bf16.mxu0 %v4834_v50 }
 0x98a   :  { %8278 = vmatmul.mubr.bf16.gmra.mrb[84].mxu0 %v4835_v54  ;;  %v12339_v14 = vmul.f32 0.0078125, %v4335_v49  ;;  %v4544_v11 = vmul.f32 %v12335_v9, %v12335_v9 }
 0x98b   :  { %v4465_v45 = vpop.xlane.xlu0 %4464 }
 0x98c   :  { %v8829_v6 = vpop.eup %8828  ;;  %v4514_v40 = vmul.f32 0.0078125, %v4465_v45  ;;  %v4545_v19 = vmul.f32 %v12339_v14, %v12339_v14 }
 0x98d   :  { %v4467_v24 = vpop.xlane.xlu1 %4466  ;;  %v4702_v23 = vmul.f32 %v8829_v6, %v4606_v32 }
 0x98e   :  { %v8831_v38 = vpop.eup %8830  ;;  %v4578_v8 = vsub.f32 %v4514_v40, %v4546_v4  ;;  %v4515_v37 = vmul.f32 0.0078125, %v4467_v24 }
 0x98f   :  { %v4461_v7 = vpop.xlane.xlu0 %4460  ;;  %v4703_v63 = vmul.f32 %v8831_v38, %v4607_v55  ;;  %v4740_v60 = vmul.f32 %v12283_v0, %v4702_v23 }
 0x990   :  { %v8833_v61 = vpop.eup %8832  ;;  %v4642_v41 = vadd.f32 1e-05, %v4578_v8  ;;  %v4579_v48 = vsub.f32 %v4515_v37, %v4547_v15  ;;  %v4512_v26 = vmul.f32 0.0078125, %v4461_v7 }
 0x991   :  { %v4463_v53 = vpop.xlane.xlu1 %4462  ;;  %v4700_v51 = vmul.f32 %v8833_v61, %v4604_v59  ;;  %v4741_v21 = vmul.f32 %v12283_v0, %v4703_v63  ;;  %v4778_v23 = vadd.f32 %v12291_v36, %v4740_v60 }
 0x992   :  { %v8835_v31 = vpop.eup %8834  ;;  %8836 = vrsqrt.f32 %v4642_v41  ;;  %v4643_v18 = vadd.f32 1e-05, %v4579_v48  ;;  %v4576_v44 = vsub.f32 %v4512_v26, %v4544_v11  ;;  %v4513_v12 = vmul.f32 0.0078125, %v4463_v53 }
 0x993   :  { %v4345_v50 = vpop.xlane.xlu0 %4344  ;;  %v4701_v54 = vmul.f32 %v8835_v31, %v4605_v13  ;;  %v4738_v49 = vmul.f32 %v12283_v0, %v4700_v51  ;;  %v4779_v6 = vadd.f32 %v12291_v36, %v4741_v21  ;;  %v4810_v61 = vmax.f32 %v4778_v23, 0.0 }
 0x994   :  { %8838 = vrsqrt.f32 %v4643_v18  ;;  %v4640_v32 = vadd.f32 1e-05, %v4576_v44  ;;  %v4577_v45 = vsub.f32 %v4513_v12, %v4545_v19  ;;  %v12359_v8 = vmul.f32 0.0078125, %v4345_v50 }
 0x995   :  { %v4347_v4 = vpop.xlane.xlu1 %4346  ;;  %v4739_v40 = vmul.f32 %v12283_v0, %v4701_v54  ;;  %v4776_v55 = vadd.f32 %v12291_v36, %v4738_v49  ;;  %v4811_v37 = vmax.f32 %v4779_v6, 0.0  ;;  %v4610_v11 = vsub.f32 %v12158_v28, %v12327_v10 }
 0x996   :  { %8840 = vrsqrt.f32 %v4640_v32  ;;  %v4641_v24 = vadd.f32 1e-05, %v4577_v45  ;;  %v12361_v63 = vmul.f32 0.0078125, %v4347_v4  ;;  %v4550_v19 = vmul.f32 %v12359_v8, %v12359_v8 }
 0x997   :  { %v4341_v38 = vpop.xlane.xlu0 %4340  ;;  %v4777_v15 = vadd.f32 %v12291_v36, %v4739_v40  ;;  %v4808_v13 = vmax.f32 %v4776_v55, 0.0  ;;  %v4837_v60 = vpack.c.bf16 %v4811_v37, %v4810_v61  ;;  %v4611_v21 = vsub.f32 %v12161_v20, %v12329_v5 }
 0x998   :  { %8842 = vrsqrt.f32 %v4641_v24  ;;  %v12367_v53 = vmul.f32 0.0078125, %v4341_v38  ;;  %v4551_v28 = vmul.f32 %v12361_v63, %v12361_v63  ;;  %v4608_v54 = vsub.f32 %v12165_v58, %v12335_v9 }
 0x999   :  { %v4343_v59 = vpop.xlane.xlu1 %4342  ;;  %v4809_v7 = vmax.f32 %v4777_v15, 0.0  ;;  %v4609_v49 = vsub.f32 %v12169_v3, %v12339_v14 }
 0x99a   :  { %v12371_v31 = vmul.f32 0.0078125, %v4343_v59  ;;  %v4548_v45 = vmul.f32 %v12367_v53, %v12367_v53 }
 0x99b   :  { %v4473_v41 = vpop.xlane.xlu0 %4472  ;;  %v4836_v48 = vpack.c.bf16 %v4809_v7, %v4808_v13 }
 0x99c   :  { %v8837_v26 = vpop.eup %8836  ;;  %v4518_v51 = vmul.f32 0.0078125, %v4473_v41  ;;  %v4549_v55 = vmul.f32 %v12371_v31, %v12371_v31 }
 0x99d   :  { %v4475_v18 = vpop.xlane.xlu1 %4474  ;;  %8281 = vmatprep.mubr.bf16.mxu0 %v4836_v48  ;;  %v4706_v44 = vmul.f32 %v8837_v26, %v4610_v11 }
 0x99e   :  { %v8839_v12 = vpop.eup %8838  ;;  %v4582_v10 = vsub.f32 %v4518_v51, %v4550_v19  ;;  %v4519_v50 = vmul.f32 0.0078125, %v4475_v18  ;;  %8282 = vmatmul.mubr.bf16.gmra.mrb[88].mxu0 %v4837_v60 }
 0x99f   :  { %v4469_v32 = vpop.xlane.xlu0 %4468  ;;  %v4707_v20 = vmul.f32 %v8839_v12, %v4611_v21  ;;  %v4744_v38 = vmul.f32 %v12283_v0, %v4706_v44 }
 0x9a0   :  { %v8841_v5 = vpop.eup %8840  ;;  %v4646_v6 = vadd.f32 1e-05, %v4582_v10  ;;  %v4583_v4 = vsub.f32 %v4519_v50, %v4551_v28  ;;  %v4516_v40 = vmul.f32 0.0078125, %v4469_v32 }
 0x9a1   :  { %v4471_v24 = vpop.xlane.xlu1 %4470  ;;  %v4704_v23 = vmul.f32 %v8841_v5, %v4608_v54  ;;  %v4745_v58 = vmul.f32 %v12283_v0, %v4707_v20  ;;  %v4782_v51 = vadd.f32 %v12291_v36, %v4744_v38 }
 0x9a2   :  { %v8843_v9 = vpop.eup %8842  ;;  %8844 = vrsqrt.f32 %v4646_v6  ;;  %v4647_v3 = vadd.f32 1e-05, %v4583_v4  ;;  %v4580_v14 = vsub.f32 %v4516_v40, %v4548_v45  ;;  %v4517_v15 = vmul.f32 0.0078125, %v4471_v24 }
 0x9a3   :  { %v4353_v37 = vpop.xlane.xlu0 %4352  ;;  %v4705_v59 = vmul.f32 %v8843_v9, %v4609_v49  ;;  %v4742_v13 = vmul.f32 %v12283_v0, %v4704_v23  ;;  %v4783_v11 = vadd.f32 %v12291_v36, %v4745_v58  ;;  %v4814_v54 = vmax.f32 %v4782_v51, 0.0 }
 0x9a4   :  { %8846 = vrsqrt.f32 %v4647_v3  ;;  %v4644_v7 = vadd.f32 1e-05, %v4580_v14  ;;  %v4581_v61 = vsub.f32 %v4517_v15, %v4549_v55  ;;  %v12391_v18 = vmul.f32 0.0078125, %v4353_v37 }
 0x9a5   :  { %v4355_v41 = vpop.xlane.xlu1 %4354  ;;  %v4743_v48 = vmul.f32 %v12283_v0, %v4705_v59  ;;  %v4780_v26 = vadd.f32 %v12291_v36, %v4742_v13  ;;  %v4815_v44 = vmax.f32 %v4783_v11, 0.0  ;;  %v4614_v49 = vsub.f32 %v12182_v22, %v12359_v8 }
 0x9a6   :  { %8848 = vrsqrt.f32 %v4644_v7  ;;  %v4645_v19 = vadd.f32 1e-05, %v4581_v61  ;;  %v12393_v50 = vmul.f32 0.0078125, %v4355_v41  ;;  %v4554_v45 = vmul.f32 %v12391_v18, %v12391_v18 }
 0x9a7   :  { %v4349_v60 = vpop.xlane.xlu0 %4348  ;;  %v4781_v21 = vadd.f32 %v12291_v36, %v4743_v48  ;;  %v4812_v28 = vmax.f32 %v4780_v26, 0.0  ;;  %v4839_v40 = vpack.c.bf16 %v4815_v44, %v4814_v54  ;;  %v4615_v55 = vsub.f32 %v12185_v52, %v12361_v63 }
 0x9a8   :  { %8850 = vrsqrt.f32 %v4645_v19  ;;  %v12399_v6 = vmul.f32 0.0078125, %v4349_v60  ;;  %v4555_v22 = vmul.f32 %v12393_v50, %v12393_v50  ;;  %v4612_v3 = vsub.f32 %v12189_v29, %v12367_v53 }
 0x9a9   :  { %v4351_v12 = vpop.xlane.xlu1 %4350  ;;  %v4813_v10 = vmax.f32 %v4781_v21, 0.0  ;;  %v4613_v14 = vsub.f32 %v12193_v25, %v12371_v31 }
 0x9aa   :  { %v12403_v24 = vmul.f32 0.0078125, %v4351_v12  ;;  %v4552_v37 = vmul.f32 %v12399_v6, %v12399_v6 }
 0x9ab   :  { %v4481_v32 = vpop.xlane.xlu0 %4480  ;;  %v4838_v20 = vpack.c.bf16 %v4813_v10, %v4812_v28 }
 0x9ac   :  { %v8845_v5 = vpop.eup %8844  ;;  %v4522_v4 = vmul.f32 0.0078125, %v4481_v32  ;;  %v4553_v61 = vmul.f32 %v12403_v24, %v12403_v24 }
 0x9ad   :  { %v4483_v23 = vpop.xlane.xlu1 %4482  ;;  %8285 = vmatprep.mubr.bf16.mxu0 %v4838_v20  ;;  %v4710_v38 = vmul.f32 %v8845_v5, %v4614_v49 }
 0x9ae   :  { %v8847_v58 = vpop.eup %8846  ;;  %v4586_v8 = vsub.f32 %v4522_v4, %v4554_v45  ;;  %v4523_v9 = vmul.f32 0.0078125, %v4483_v23  ;;  %8286 = vmatmul.mubr.bf16.gmra.mrb[92].mxu0 %v4839_v40 }
 0x9af   :  { %v4477_v15 = vpop.xlane.xlu0 %4476  ;;  %v4711_v52 = vmul.f32 %v8847_v58, %v4615_v55  ;;  %v4748_v48 = vmul.f32 %v12283_v0, %v4710_v38 }
 0x9b0   :  { %v8849_v63 = vpop.eup %8848  ;;  %v4650_v59 = vadd.f32 1e-05, %v4586_v8  ;;  %v4587_v13 = vsub.f32 %v4523_v9, %v4555_v22  ;;  %v4520_v7 = vmul.f32 0.0078125, %v4477_v15  ;;  %v4618_v22 = vsub.f32 %v12206_v39, %v12391_v18 }
 0x9b1   :  { %v4479_v11 = vpop.xlane.xlu1 %4478  ;;  %v4708_v41 = vmul.f32 %v8849_v63, %v4612_v3  ;;  %v4749_v29 = vmul.f32 %v12283_v0, %v4711_v52  ;;  %v4786_v32 = vadd.f32 %v12291_v36, %v4748_v48  ;;  %v4617_v48 = vsub.f32 %v12217_v57, %v12403_v24 }
 0x9b2   :  { %v8851_v53 = vpop.eup %8850  ;;  %8852 = vrsqrt.f32 %v4650_v59  ;;  %v4651_v25 = vadd.f32 1e-05, %v4587_v13  ;;  %v4584_v31 = vsub.f32 %v4520_v7, %v4552_v37  ;;  %v4521_v26 = vmul.f32 0.0078125, %v4479_v11 }
 0x9b3   :  { %v4361_v19 = vpop.xlane.xlu0 %4360  ;;  %v4709_v51 = vmul.f32 %v8851_v53, %v4613_v14  ;;  %v4746_v60 = vmul.f32 %v12283_v0, %v4708_v41  ;;  %v4787_v12 = vadd.f32 %v12291_v36, %v4749_v29  ;;  %v4818_v58 = vmax.f32 %v4786_v32, 0.0 }
 0x9b4   :  { %8854 = vrsqrt.f32 %v4651_v25  ;;  %v4648_v21 = vadd.f32 1e-05, %v4584_v31  ;;  %v4585_v44 = vsub.f32 %v4521_v26, %v4553_v61  ;;  %v12423_v45 = vmul.f32 0.0078125, %v4361_v19 }
 0x9b5   :  { %v4363_v28 = vpop.xlane.xlu1 %4362  ;;  %v4747_v10 = vmul.f32 %v12283_v0, %v4709_v51  ;;  %v4784_v54 = vadd.f32 %v12291_v36, %v4746_v60  ;;  %v4819_v4 = vmax.f32 %v4787_v12, 0.0  ;;  %v4619_v37 = vsub.f32 %v12209_v43, %v12393_v50 }
 0x9b6   :  { %8856 = vrsqrt.f32 %v4648_v21  ;;  %v4649_v49 = vadd.f32 1e-05, %v4585_v44  ;;  %v12425_v38 = vmul.f32 0.0078125, %v4363_v28  ;;  %v4558_v14 = vmul.f32 %v12423_v45, %v12423_v45 }
 0x9b7   :  { %v4357_v20 = vpop.xlane.xlu0 %4356  ;;  %v4785_v5 = vadd.f32 %v12291_v36, %v4747_v10  ;;  %v4816_v55 = vmax.f32 %v4784_v54, 0.0  ;;  %v4841_v63 = vpack.c.bf16 %v4819_v4, %v4818_v58  ;;  %v4616_v41 = vsub.f32 %v12213_v42, %v12399_v6 }
 0x9b8   :  { %8858 = vrsqrt.f32 %v4649_v49  ;;  %v12431_v15 = vmul.f32 0.0078125, %v4357_v20  ;;  %v4559_v39 = vmul.f32 %v12425_v38, %v12425_v38 }
 0x9b9   :  { %v4359_v40 = vpop.xlane.xlu1 %4358  ;;  %v4817_v23 = vmax.f32 %v4785_v5, 0.0 }
 0x9ba   :  { %v12435_v59 = vmul.f32 0.0078125, %v4359_v40  ;;  %v4556_v53 = vmul.f32 %v12431_v15, %v12431_v15 }
 0x9bb   :  { %v4489_v8 = vpop.xlane.xlu0 %4488  ;;  %v4840_v9 = vpack.c.bf16 %v4817_v23, %v4816_v55 }
 0x9bc   :  { %v8853_v3 = vpop.eup %8852  ;;  %v4526_v52 = vmul.f32 0.0078125, %v4489_v8  ;;  %v4557_v19 = vmul.f32 %v12435_v59, %v12435_v59 }
 0x9bd   :  { %v4491_v13 = vpop.xlane.xlu1 %4490  ;;  %8289 = vmatprep.mubr.bf16.mxu0 %v4840_v9  ;;  %v4714_v7 = vmul.f32 %v8853_v3, %v4618_v22 }
 0x9be   :  { %v8855_v61 = vpop.eup %8854  ;;  %v4590_v18 = vsub.f32 %v4526_v52, %v4558_v14  ;;  %v4527_v11 = vmul.f32 0.0078125, %v4491_v13  ;;  %8290 = vmatmul.mubr.bf16.gmra.mrb[96].mxu0 %v4841_v63 }
 0x9bf   :  { %v4485_v29 = vpop.xlane.xlu0 %4484  ;;  %v4715_v43 = vmul.f32 %v8855_v61, %v4619_v37  ;;  %v4752_v21 = vmul.f32 %v12283_v0, %v4714_v7  ;;  %v4622_v37 = vsub.f32 %v12230_v34, %v12423_v45 }
 0x9c0   :  { %v8857_v50 = vpop.eup %8856  ;;  %v4654_v25 = vadd.f32 1e-05, %v4590_v18  ;;  %v4591_v31 = vsub.f32 %v4527_v11, %v4559_v39  ;;  %v4524_v26 = vmul.f32 0.0078125, %v4485_v29 }
 0x9c1   :  { %v4487_v51 = vpop.xlane.xlu1 %4486  ;;  %v4712_v60 = vmul.f32 %v8857_v50, %v4616_v41  ;;  %v4753_v42 = vmul.f32 %v12283_v0, %v4715_v43  ;;  %v4790_v55 = vadd.f32 %v12291_v36, %v4752_v21 }
 0x9c2   :  { %v8859_v6 = vpop.eup %8858  ;;  %8860 = vrsqrt.f32 %v4654_v25  ;;  %v4655_v57 = vadd.f32 1e-05, %v4591_v31  ;;  %v4588_v24 = vsub.f32 %v4524_v26, %v4556_v53  ;;  %v4525_v44 = vmul.f32 0.0078125, %v4487_v51 }
 0x9c3   :  { %v4369_v12 = vpop.xlane.xlu0 %4368  ;;  %v4713_v28 = vmul.f32 %v8859_v6, %v4617_v48  ;;  %v4750_v10 = vmul.f32 %v12283_v0, %v4712_v60  ;;  %v4791_v32 = vadd.f32 %v12291_v36, %v4753_v42  ;;  %v4822_v63 = vmax.f32 %v4790_v55, 0.0 }
 0x9c4   :  { %8862 = vrsqrt.f32 %v4655_v57  ;;  %v4652_v54 = vadd.f32 1e-05, %v4588_v24  ;;  %v4589_v49 = vsub.f32 %v4525_v44, %v4557_v19  ;;  %v12461_v39 = vmul.f32 0.0078125, %v4369_v12 }
 0x9c5   :  { %v4371_v20 = vpop.xlane.xlu1 %4370  ;;  %v4751_v5 = vmul.f32 %v12283_v0, %v4713_v28  ;;  %v4788_v4 = vadd.f32 %v12291_v36, %v4750_v10  ;;  %v4823_v8 = vmax.f32 %v4791_v32, 0.0  ;;  %v4623_v48 = vsub.f32 %v12233_v35, %v12425_v38 }
 0x9c6   :  { %8864 = vrsqrt.f32 %v4652_v54  ;;  %v4653_v40 = vadd.f32 1e-05, %v4589_v49  ;;  %v12467_v29 = vmul.f32 0.0078125, %v4371_v20  ;;  %v4620_v31 = vsub.f32 %v12237_v62, %v12431_v15 }
 0x9c7   :  { %v4365_v23 = vpop.xlane.xlu0 %4364  ;;  %v4789_v58 = vadd.f32 %v12291_v36, %v4751_v5  ;;  %v4820_v3 = vmax.f32 %v4788_v4, 0.0  ;;  %v4843_v41 = vpack.c.bf16 %v4823_v8, %v4822_v63  ;;  %v4621_v26 = vsub.f32 %v12241_v16, %v12435_v59 }
 0x9c8   :  { %8866 = vrsqrt.f32 %v4653_v40  ;;  %v12455_v22 = vmul.f32 0.0078125, %v4365_v23  ;;  %v4562_v51 = vmul.f32 %v12461_v39, %v12461_v39  ;;  %v4563_v6 = vmul.f32 %v12467_v29, %v12467_v29 }
 0x9c9   :  { %v4367_v9 = vpop.xlane.xlu1 %4366  ;;  %v4821_v14 = vmax.f32 %v4789_v58, 0.0 }
 0x9ca   :  { %v12457_v52 = vmul.f32 0.0078125, %v4367_v9  ;;  %v4560_v18 = vmul.f32 %v12455_v22, %v12455_v22 }
 0x9cb   :  { %v4493_v13 = vpop.xlane.xlu0 %4492  ;;  %v4842_v7 = vpack.c.bf16 %v4821_v14, %v4820_v3  ;;  %v4624_v3 = vsub.f32 %v12261_v1, %v12455_v22  ;;  %v4627_v1 = vsub.f32 %v12257_v46, %v12467_v29 }
 0x9cc   :  { %v8861_v61 = vpop.eup %8860  ;;  %v4528_v11 = vmul.f32 0.0078125, %v4493_v13  ;;  %v4561_v34 = vmul.f32 %v12457_v52, %v12457_v52  ;;  %v4625_v13 = vsub.f32 %v12265_v17, %v12457_v52 }
 0x9cd   :  { %v4495_v43 = vpop.xlane.xlu1 %4494  ;;  %8293 = vmatprep.mubr.bf16.mxu0 %v4842_v7  ;;  %v4718_v50 = vmul.f32 %v8861_v61, %v4622_v37 }
 0x9ce   :  { %v8863_v53 = vpop.eup %8862  ;;  %v4592_v45 = vsub.f32 %v4528_v11, %v4560_v18  ;;  %v4529_v25 = vmul.f32 0.0078125, %v4495_v43  ;;  %8294 = vmatmul.mubr.bf16.gmra.mrb[100].mxu0 %v4843_v41  ;;  %v4626_v18 = vsub.f32 %v12254_v27, %v12461_v39 }
 0x9cf   :  { %v4497_v19 = vpop.xlane.xlu0 %4496  ;;  %v4719_v35 = vmul.f32 %v8863_v53, %v4623_v48  ;;  %v4756_v44 = vmul.f32 %v12283_v0, %v4718_v50 }
 0x9d0   :  { %v8865_v38 = vpop.eup %8864  ;;  %v4656_v60 = vadd.f32 1e-05, %v4592_v45  ;;  %v4593_v21 = vsub.f32 %v4529_v25, %v4561_v34  ;;  %v4530_v42 = vmul.f32 0.0078125, %v4497_v19 }
 0x9d1   :  { %v4499_v57 = vpop.xlane.xlu1 %4498  ;;  %v4716_v24 = vmul.f32 %v8865_v38, %v4620_v31  ;;  %v4757_v62 = vmul.f32 %v12283_v0, %v4719_v35  ;;  %v4794_v40 = vadd.f32 %v12291_v36, %v4756_v44  ;;  %v12506_v35 = vld [vmem:[%s14260_s6 + $0x5] ss:$0 sm:$0xff] }
 0x9d2   :  { %v8867_v15 = vpop.eup %8866  ;;  %8868 = vrsqrt.f32 %v4656_v60  ;;  %v4657_v16 = vadd.f32 1e-05, %v4593_v21  ;;  %v4594_v59 = vsub.f32 %v4530_v42, %v4562_v51  ;;  %v4531_v12 = vmul.f32 0.0078125, %v4499_v57  ;;  %v8476_v44 = vld [vmem:[%s14259_s5 + $0x180] sm:$0xff]  }
 0x9d3   :  { %v4717_v28 = vmul.f32 %v8867_v15, %v4621_v26  ;;  %v4754_v10 = vmul.f32 %v12283_v0, %v4716_v24  ;;  %v4795_v32 = vadd.f32 %v12291_v36, %v4757_v62  ;;  %v4826_v9 = vmax.f32 %v4794_v40, 0.0  ;;  %8305 = vmatprep.subr.bf16.mxu1 %v8476_v44 }
 0x9d4   :  { %8870 = vrsqrt.f32 %v4657_v16  ;;  %v4658_v54 = vadd.f32 1e-05, %v4594_v59  ;;  %v4595_v49 = vsub.f32 %v4531_v12, %v4563_v6  ;;  %8306 = vmatpush3.bf16.msra.mxu1 %v8476_v44  ;;  %v8477_v16 = vld [vmem:[%s14259_s5 + $0x188] sm:$0xff]  }
 0x9d5   :  { %v4755_v20 = vmul.f32 %v12283_v0, %v4717_v28  ;;  %v4792_v5 = vadd.f32 %v12291_v36, %v4754_v10  ;;  %v4827_v23 = vmax.f32 %v4795_v32, 0.0  ;;  %8307 = vmatprep.subr.bf16.mxu1 %v8477_v16 }
 0x9d6   :  { %8872 = vrsqrt.f32 %v4658_v54  ;;  %v4659_v4 = vadd.f32 1e-05, %v4595_v49 }
 0x9d7   :  { %v4793_v55 = vadd.f32 %v12291_v36, %v4755_v20  ;;  %v4824_v58 = vmax.f32 %v4792_v5, 0.0  ;;  %v4845_v37 = vpack.c.bf16 %v4827_v23, %v4826_v9  ;;  %v8478_v5 = vld [vmem:[%s14259_s5 + $0x190] sm:$0xff]  }
 0x9d8   :  { %8874 = vrsqrt.f32 %v4659_v4  ;;  %8308 = vmatpush3.bf16.msra.mxu1 %v8477_v16 }
 0x9d9   :  { %v4825_v8 = vmax.f32 %v4793_v55, 0.0  ;;  %8309 = vmatprep.subr.bf16.mxu1 %v8478_v5  ;;  %v8479_v55 = vld [vmem:[%s14259_s5 + $0x198] sm:$0xff]  }
 0x9db   :  { %v4844_v14 = vpack.c.bf16 %v4825_v8, %v4824_v58  ;;  %v8480_v8 = vld [vmem:[%s14259_s5 + $0x1a0] sm:$0xff]  }
 0x9dc   :  { %v8869_v63 = vpop.eup %8868  ;;  %8310 = vmatpush3.bf16.msra.mxu1 %v8478_v5 }
 0x9dd   :  { %8297 = vmatprep.mubr.bf16.mxu0 %v4844_v14  ;;  %v4720_v7 = vmul.f32 %v8869_v63, %v4624_v3  ;;  %8311 = vmatprep.subr.bf16.mxu1 %v8479_v55  ;;  %v8481_v3 = vld [vmem:[%s14259_s5 + $0x1a8] sm:$0xff]  }
 0x9de   :  { %v8871_v61 = vpop.eup %8870  ;;  %8298 = vmatmul.mubr.bf16.gmra.mrb[104].mxu0 %v4845_v37 }
 0x9df   :  { %v4721_v11 = vmul.f32 %v8871_v61, %v4625_v13  ;;  %v4758_v41 = vmul.f32 %v12283_v0, %v4720_v7  ;;  %v8482_v61 = vld [vmem:[%s14259_s5 + $0x1b0] sm:$0xff]  }
 0x9e0   :  { %v8873_v48 = vpop.eup %8872  ;;  %8312 = vmatpush3.bf16.msra.mxu1 %v8479_v55 }
 0x9e1   :  { %v4759_v22 = vmul.f32 %v12283_v0, %v4721_v11  ;;  %v4796_v43 = vadd.f32 %v12291_v36, %v4758_v41  ;;  %v4722_v50 = vmul.f32 %v8873_v48, %v4626_v18  ;;  %8313 = vmatprep.subr.bf16.mxu1 %v8480_v8  ;;  %v8483_v41 = vld [vmem:[%s14259_s5 + $0x1b8] sm:$0xff]  }
 0x9e2   :  { %v8875_v17 = vpop.eup %8874 }
 0x9e3   :  { %v4797_v52 = vadd.f32 %v12291_v36, %v4759_v22  ;;  %v4723_v53 = vmul.f32 %v8875_v17, %v4627_v1  ;;  %v4760_v34 = vmul.f32 %v12283_v0, %v4722_v50  ;;  %v4828_v45 = vmax.f32 %v4796_v43, 0.0 }
 0x9e4   :  { %8314 = vmatpush3.bf16.msra.mxu1 %v8480_v8 }
 0x9e5   :  { %v4829_v27 = vmax.f32 %v4797_v52, 0.0  ;;  %v4761_v39 = vmul.f32 %v12283_v0, %v4723_v53  ;;  %v4798_v25 = vadd.f32 %v12291_v36, %v4760_v34  ;;  %8315 = vmatprep.subr.bf16.mxu1 %v8481_v3 }
 0x9e7   :  { %v4846_v31 = vpack.c.bf16 %v4829_v27, %v4828_v45  ;;  %v4799_v46 = vadd.f32 %v12291_v36, %v4761_v39  ;;  %v4830_v29 = vmax.f32 %v4798_v25, 0.0 }
 0x9e8   :  { %8316 = vmatpush3.bf16.msra.mxu1 %v8481_v3 }
 0x9e9   :  { %8301 = vmatprep.mubr.bf16.mxu0 %v4846_v31  ;;  %v4831_v26 = vmax.f32 %v4799_v46, 0.0  ;;  %8317 = vmatprep.subr.bf16.mxu1 %v8482_v61 }
 0x9eb   :  { %v4847_v19 = vpack.c.bf16 %v4831_v26, %v4830_v29 }
 0x9ec   :  { %8318 = vmatpush3.bf16.msra.mxu1 %v8482_v61 }
 0x9ed   :  { %8302 = vmatmul.mubr.bf16.gmra.mrb[108].mxu0 %v4847_v19  ;;  %8319 = vmatprep.subr.bf16.mxu1 %v8483_v41 }
 0x9f0   :  { %8320 = vmatpush3.bf16.msra.mxu1 %v8483_v41 }
 0xa40   :  { %v8275_v38 = vpop.f32.mrb[80].mxu0 }
 0xa41   :  { %v12509_v51 = vadd.f32 %v8275_v38, %v12506_v35  ;;  %v4955_v0 = vpop.f32.mrb[81].mxu0 }
 0xa42   :  { %v8276_v60 = vpop.f32.mrb[82].mxu0  ;;  %v12516_v42 = vadd.f32 %v12506_v35, %v4955_v0 }
 0xa43   :  { %v12512_v21 = vadd.f32 %v8276_v60, %v12506_v35  ;;  %5090 = vadd.xlane.f32.xlu0 %v12509_v51  ;;  %v4958_v36 = vpop.f32.mrb[83].mxu0  ;;  %v5184_v57 = vmul.f32 %v12509_v51, %v12509_v51 }
 0xa44   :  { %v12520_v6 = vadd.f32 %v12506_v35, %v4958_v36  ;;  %v5182_v62 = vmul.f32 %v12516_v42, %v12516_v42 }
 0xa45   :  { %5092 = vadd.xlane.f32.xlu1 %v12512_v21  ;;  %v5185_v24 = vmul.f32 %v12512_v21, %v12512_v21 }
 0xa46   :  { %v5183_v15 = vmul.f32 %v12520_v6, %v12520_v6 }
 0xa47   :  { %5086 = vadd.xlane.f32.xlu0 %v12516_v42 }
 0xa49   :  { %5088 = vadd.xlane.f32.xlu1 %v12520_v6 }
 0xa4b   :  { %5218 = vadd.xlane.f32.xlu0 %v5184_v57 }
 0xa4d   :  { %5220 = vadd.xlane.f32.xlu1 %v5185_v24 }
 0xa4f   :  { %5214 = vadd.xlane.f32.xlu0 %v5182_v62 }
 0xa51   :  { %5216 = vadd.xlane.f32.xlu1 %v5183_v15 }
 0xa5d   :  { %v8279_v59 = vpop.f32.mrb[84].mxu0 }
 0xa5e   :  { %v12539_v12 = vadd.f32 %v8279_v59, %v12506_v35  ;;  %v4971_v28 = vpop.f32.mrb[85].mxu0 }
 0xa5f   :  { %v8280_v10 = vpop.f32.mrb[86].mxu0  ;;  %v12546_v32 = vadd.f32 %v12506_v35, %v4971_v28 }
 0xa60   :  { %v12542_v54 = vadd.f32 %v8280_v10, %v12506_v35  ;;  %5098 = vadd.xlane.f32.xlu0 %v12539_v12  ;;  %v4974_v49 = vpop.f32.mrb[87].mxu0  ;;  %v5188_v4 = vmul.f32 %v12539_v12, %v12539_v12 }
 0xa61   :  { %v12550_v20 = vadd.f32 %v12506_v35, %v4974_v49  ;;  %v5186_v23 = vmul.f32 %v12546_v32, %v12546_v32 }
 0xa62   :  { %5100 = vadd.xlane.f32.xlu1 %v12542_v54  ;;  %v5189_v40 = vmul.f32 %v12542_v54, %v12542_v54 }
 0xa63   :  { %v5187_v58 = vmul.f32 %v12550_v20, %v12550_v20 }
 0xa64   :  { %5094 = vadd.xlane.f32.xlu0 %v12546_v32 }
 0xa66   :  { %5096 = vadd.xlane.f32.xlu1 %v12550_v20 }
 0xa68   :  { %5226 = vadd.xlane.f32.xlu0 %v5188_v4 }
 0xa6a   :  { %5228 = vadd.xlane.f32.xlu1 %v5189_v40 }
 0xa6c   :  { %5222 = vadd.xlane.f32.xlu0 %v5186_v23 }
 0xa6e   :  { %5224 = vadd.xlane.f32.xlu1 %v5187_v58 }
 0xa71   :  { %v8283_v9 = vpop.f32.mrb[88].mxu0 }
 0xa72   :  { %v12575_v14 = vadd.f32 %v8283_v9, %v12506_v35  ;;  %v4987_v63 = vpop.f32.mrb[89].mxu0 }
 0xa73   :  { %v8284_v37 = vpop.f32.mrb[90].mxu0  ;;  %v12585_v18 = vadd.f32 %v12506_v35, %v4987_v63 }
 0xa74   :  { %v12578_v13 = vadd.f32 %v8284_v37, %v12506_v35  ;;  %5106 = vadd.xlane.f32.xlu0 %v12575_v14  ;;  %v4990_v7 = vpop.f32.mrb[91].mxu0  ;;  %v5192_v48 = vmul.f32 %v12575_v14, %v12575_v14 }
 0xa75   :  { %v12589_v11 = vadd.f32 %v12506_v35, %v4990_v7  ;;  %v5190_v22 = vmul.f32 %v12585_v18, %v12585_v18 }
 0xa76   :  { %5108 = vadd.xlane.f32.xlu1 %v12578_v13  ;;  %v5193_v1 = vmul.f32 %v12578_v13, %v12578_v13 }
 0xa77   :  { %v5191_v43 = vmul.f32 %v12589_v11, %v12589_v11 }
 0xa78   :  { %5102 = vadd.xlane.f32.xlu0 %v12585_v18 }
 0xa7a   :  { %5104 = vadd.xlane.f32.xlu1 %v12589_v11 }
 0xa7c   :  { %5234 = vadd.xlane.f32.xlu0 %v5192_v48 }
 0xa7e   :  { %5236 = vadd.xlane.f32.xlu1 %v5193_v1 }
 0xa80   :  { %5230 = vadd.xlane.f32.xlu0 %v5190_v22 }
 0xa81   :  { %v8287_v50 = vpop.f32.mrb[92].mxu0 }
 0xa82   :  { %v12605_v17 = vadd.f32 %v8287_v50, %v12506_v35  ;;  %5232 = vadd.xlane.f32.xlu1 %v5191_v43  ;;  %v5003_v52 = vpop.f32.mrb[93].mxu0 }
 0xa83   :  { %v8288_v53 = vpop.f32.mrb[94].mxu0  ;;  %v12612_v27 = vadd.f32 %v12506_v35, %v5003_v52 }
 0xa84   :  { %v12608_v34 = vadd.f32 %v8288_v53, %v12506_v35  ;;  %5114 = vadd.xlane.f32.xlu0 %v12605_v17  ;;  %v5006_v45 = vpop.f32.mrb[95].mxu0  ;;  %v5196_v25 = vmul.f32 %v12605_v17, %v12605_v17 }
 0xa85   :  { %v12616_v39 = vadd.f32 %v12506_v35, %v5006_v45  ;;  %v5194_v46 = vmul.f32 %v12612_v27, %v12612_v27 }
 0xa86   :  { %5116 = vadd.xlane.f32.xlu1 %v12608_v34  ;;  %v5197_v31 = vmul.f32 %v12608_v34, %v12608_v34 }
 0xa87   :  { %v5195_v29 = vmul.f32 %v12616_v39, %v12616_v39 }
 0xa88   :  { %5110 = vadd.xlane.f32.xlu0 %v12612_v27 }
 0xa8a   :  { %5112 = vadd.xlane.f32.xlu1 %v12616_v39 }
 0xa8c   :  { %5242 = vadd.xlane.f32.xlu0 %v5196_v25 }
 0xa8e   :  { %5244 = vadd.xlane.f32.xlu1 %v5197_v31 }
 0xa90   :  { %5238 = vadd.xlane.f32.xlu0 %v5194_v46 }
 0xa91   :  { %v8291_v26 = vpop.f32.mrb[96].mxu0 }
 0xa92   :  { %v12629_v19 = vadd.f32 %v8291_v26, %v12506_v35  ;;  %5240 = vadd.xlane.f32.xlu1 %v5195_v29  ;;  %v5019_v38 = vpop.f32.mrb[97].mxu0 }
 0xa93   :  { %v8292_v0 = vpop.f32.mrb[98].mxu0  ;;  %v12636_v57 = vadd.f32 %v12506_v35, %v5019_v38 }
 0xa94   :  { %v12632_v60 = vadd.f32 %v8292_v0, %v12506_v35  ;;  %5122 = vadd.xlane.f32.xlu0 %v12629_v19  ;;  %v5022_v36 = vpop.f32.mrb[99].mxu0  ;;  %v5200_v44 = vmul.f32 %v12629_v19, %v12629_v19 }
 0xa95   :  { %v12640_v24 = vadd.f32 %v12506_v35, %v5022_v36  ;;  %v5198_v15 = vmul.f32 %v12636_v57, %v12636_v57 }
 0xa96   :  { %5124 = vadd.xlane.f32.xlu1 %v12632_v60  ;;  %v5201_v62 = vmul.f32 %v12632_v60, %v12632_v60 }
 0xa97   :  { %v5199_v16 = vmul.f32 %v12640_v24, %v12640_v24 }
 0xa98   :  { %5118 = vadd.xlane.f32.xlu0 %v12636_v57 }
 0xa9a   :  { %5120 = vadd.xlane.f32.xlu1 %v12640_v24 }
 0xa9c   :  { %5250 = vadd.xlane.f32.xlu0 %v5200_v44 }
 0xa9e   :  { %5252 = vadd.xlane.f32.xlu1 %v5201_v62 }
 0xaa0   :  { %5246 = vadd.xlane.f32.xlu0 %v5198_v15 }
 0xaa1   :  { %v8295_v59 = vpop.f32.mrb[100].mxu0 }
 0xaa2   :  { %v12653_v28 = vadd.f32 %v8295_v59, %v12506_v35  ;;  %5248 = vadd.xlane.f32.xlu1 %v5199_v16  ;;  %v5035_v10 = vpop.f32.mrb[101].mxu0 }
 0xaa3   :  { %v8296_v49 = vpop.f32.mrb[102].mxu0  ;;  %v12660_v40 = vadd.f32 %v12506_v35, %v5035_v10 }
 0xaa4   :  { %v12656_v5 = vadd.f32 %v8296_v49, %v12506_v35  ;;  %5130 = vadd.xlane.f32.xlu0 %v12653_v28  ;;  %v5038_v4 = vpop.f32.mrb[103].mxu0  ;;  %v5204_v23 = vmul.f32 %v12653_v28, %v12653_v28 }
 0xaa5   :  { %v12664_v55 = vadd.f32 %v12506_v35, %v5038_v4  ;;  %v5202_v8 = vmul.f32 %v12660_v40, %v12660_v40 }
 0xaa6   :  { %5132 = vadd.xlane.f32.xlu1 %v12656_v5  ;;  %v5205_v58 = vmul.f32 %v12656_v5, %v12656_v5 }
 0xaa7   :  { %v5203_v9 = vmul.f32 %v12664_v55, %v12664_v55 }
 0xaa8   :  { %5126 = vadd.xlane.f32.xlu0 %v12660_v40 }
 0xaaa   :  { %5128 = vadd.xlane.f32.xlu1 %v12664_v55 }
 0xaac   :  { %5258 = vadd.xlane.f32.xlu0 %v5204_v23 }
 0xaae   :  { %5260 = vadd.xlane.f32.xlu1 %v5205_v58 }
 0xab0   :  { %5254 = vadd.xlane.f32.xlu0 %v5202_v8 }
 0xab1   :  { %v8299_v3 = vpop.f32.mrb[104].mxu0 }
 0xab2   :  { %v12677_v63 = vadd.f32 %v8299_v3, %v12506_v35  ;;  %5256 = vadd.xlane.f32.xlu1 %v5203_v9  ;;  %v5051_v37 = vpop.f32.mrb[105].mxu0 }
 0xab3   :  { %v8300_v7 = vpop.f32.mrb[106].mxu0  ;;  %v12684_v48 = vadd.f32 %v12506_v35, %v5051_v37 }
 0xab4   :  { %v12680_v61 = vadd.f32 %v8300_v7, %v12506_v35  ;;  %5138 = vadd.xlane.f32.xlu0 %v12677_v63  ;;  %v5054_v41 = vpop.f32.mrb[107].mxu0  ;;  %v5208_v22 = vmul.f32 %v12677_v63, %v12677_v63 }
 0xab5   :  { %v12688_v1 = vadd.f32 %v12506_v35, %v5054_v41  ;;  %v5206_v50 = vmul.f32 %v12684_v48, %v12684_v48 }
 0xab6   :  { %5140 = vadd.xlane.f32.xlu1 %v12680_v61  ;;  %v5209_v43 = vmul.f32 %v12680_v61, %v12680_v61 }
 0xab7   :  { %v5207_v53 = vmul.f32 %v12688_v1, %v12688_v1 }
 0xab8   :  { %5134 = vadd.xlane.f32.xlu0 %v12684_v48 }
 0xaba   :  { %5136 = vadd.xlane.f32.xlu1 %v12688_v1 }
 0xabc   :  { %5266 = vadd.xlane.f32.xlu0 %v5208_v22 }
 0xabe   :  { %5268 = vadd.xlane.f32.xlu1 %v5209_v43 }
 0xac0   :  { %5262 = vadd.xlane.f32.xlu0 %v5206_v50  ;;  %v8303_v52 = vpop.f32.mrb[108].mxu0 }
 0xac1   :  { %v12701_v45 = vadd.f32 %v8303_v52, %v12506_v35  ;;  %v5067_v25 = vpop.f32.mrb[109].mxu0 }
 0xac2   :  { %5264 = vadd.xlane.f32.xlu1 %v5207_v53  ;;  %v8304_v31 = vpop.f32.mrb[110].mxu0  ;;  %v12708_v26 = vadd.f32 %v12506_v35, %v5067_v25 }
 0xac3   :  { %v12704_v46 = vadd.f32 %v8304_v31, %v12506_v35  ;;  %v5070_v29 = vpop.f32.mrb[111].mxu0  ;;  %v5212_v44 = vmul.f32 %v12701_v45, %v12701_v45 }
 0xac4   :  { %5146 = vadd.xlane.f32.xlu0 %v12701_v45  ;;  %v12712_v38 = vadd.f32 %v12506_v35, %v5070_v29  ;;  %v5210_v0 = vmul.f32 %v12708_v26, %v12708_v26 }
 0xac5   :  { %v5213_v35 = vmul.f32 %v12704_v46, %v12704_v46 }
 0xac6   :  { %5148 = vadd.xlane.f32.xlu1 %v12704_v46  ;;  %v5211_v36 = vmul.f32 %v12712_v38, %v12712_v38 }
 0xac8   :  { %5142 = vadd.xlane.f32.xlu0 %v12708_v26 }
 0xaca   :  { %5144 = vadd.xlane.f32.xlu1 %v12712_v38 }
 0xacc   :  { %5270 = vadd.xlane.f32.xlu0 %v5210_v0 }
 0xace   :  { %5272 = vadd.xlane.f32.xlu1 %v5211_v36 }
 0xad0   :  { %5274 = vadd.xlane.f32.xlu0 %v5212_v44  ;;  %v5091_v62 = vpop.xlane.xlu0 %5090 }
 0xad1   :  { %v5152_v59 = vmul.f32 0.0078125, %v5091_v62 }
 0xad2   :  { %5276 = vadd.xlane.f32.xlu1 %v5213_v35  ;;  %v5093_v15 = vpop.xlane.xlu1 %5092 }
 0xad3   :  { %v5153_v49 = vmul.f32 0.0078125, %v5093_v15  ;;  %v5312_v23 = vmul.f32 %v5152_v59, %v5152_v59  ;;  %v5376_v15 = vsub.f32 %v12509_v51, %v5152_v59  ;;  %v12736_v51 = vld [vmem:[%s14262_s8 + $0x5] ss:$0 sm:$0xff] }
 0xad4   :  { %v5087_v16 = vpop.xlane.xlu0 %5086 }
 0xad5   :  { %v5150_v58 = vmul.f32 0.0078125, %v5087_v16  ;;  %v5313_v37 = vmul.f32 %v5153_v49, %v5153_v49 }
 0xad6   :  { %v5089_v10 = vpop.xlane.xlu1 %5088 }
 0xad7   :  { %v5151_v9 = vmul.f32 0.0078125, %v5089_v10  ;;  %v5310_v43 = vmul.f32 %v5150_v58, %v5150_v58  ;;  %v12728_v10 = vld [vmem:[%s14261_s7 + $0x5] ss:$0 sm:$0xff] }
 0xad8   :  { %v5219_v4 = vpop.xlane.xlu0 %5218 }
 0xad9   :  { %v5280_v8 = vmul.f32 0.0078125, %v5219_v4  ;;  %v5311_v25 = vmul.f32 %v5151_v9, %v5151_v9  ;;  %v5377_v4 = vsub.f32 %v12512_v21, %v5153_v49  ;;  %v5375_v59 = vsub.f32 %v12520_v6, %v5151_v9 }
 0xada   :  { %v5221_v3 = vpop.xlane.xlu1 %5220  ;;  %v14670_v6 = vmax.f32 %v11629_v33, 0.0  ;;  %v14673_v33 = vmax.f32 %v11642_v30, 0.0 }
 0xadb   :  { %v5344_v7 = vsub.f32 %v5280_v8, %v5312_v23  ;;  %v5281_v41 = vmul.f32 0.0078125, %v5221_v3  ;;  %v5374_v3 = vsub.f32 %v12516_v42, %v5150_v58 }
 0xadc   :  { %v5215_v22 = vpop.xlane.xlu0 %5214 }
 0xadd   :  { %v5408_v50 = vadd.f32 1e-05, %v5344_v7  ;;  %v5345_v52 = vsub.f32 %v5281_v41, %v5313_v37  ;;  %v5278_v53 = vmul.f32 0.0078125, %v5215_v22 }
 0xade   :  { %v5217_v31 = vpop.xlane.xlu1 %5216 }
 0xadf   :  { %8876 = vrsqrt.f32 %v5408_v50  ;;  %v5409_v29 = vadd.f32 1e-05, %v5345_v52  ;;  %v5342_v0 = vsub.f32 %v5278_v53, %v5310_v43  ;;  %v5279_v36 = vmul.f32 0.0078125, %v5217_v31 }
 0xae1   :  { %8878 = vrsqrt.f32 %v5409_v29  ;;  %v5406_v44 = vadd.f32 1e-05, %v5342_v0  ;;  %v5343_v35 = vsub.f32 %v5279_v36, %v5311_v25 }
 0xae3   :  { %8880 = vrsqrt.f32 %v5406_v44  ;;  %v5407_v62 = vadd.f32 1e-05, %v5343_v35 }
 0xae5   :  { %8882 = vrsqrt.f32 %v5407_v62 }
 0xae9   :  { %v8877_v16 = vpop.eup %8876 }
 0xaea   :  { %v5472_v23 = vmul.f32 %v8877_v16, %v5376_v15  ;;  %v14671_v15 = vmax.f32 %v11634_v47, 0.0 }
 0xaeb   :  { %v8879_v8 = vpop.eup %8878 }
 0xaec   :  { %v5510_v37 = vmul.f32 %v12728_v10, %v5472_v23  ;;  %v5473_v7 = vmul.f32 %v8879_v8, %v5377_v4  ;;  %v14672_v4 = vmax.f32 %v11638_v56, 0.0 }
 0xaed   :  { %v5099_v41 = vpop.xlane.xlu0 %5098  ;;  %v8881_v22 = vpop.eup %8880 }
 0xaee   :  { %v5511_v43 = vmul.f32 %v12728_v10, %v5473_v7  ;;  %v5470_v21 = vmul.f32 %v8881_v22, %v5374_v3  ;;  %v5548_v58 = vadd.f32 %v12736_v51, %v5510_v37  ;;  %v5156_v31 = vmul.f32 0.0078125, %v5099_v41 }
 0xaef   :  { %v5101_v50 = vpop.xlane.xlu1 %5100  ;;  %v8883_v49 = vpop.eup %8882 }
 0xaf0   :  { %v5471_v53 = vmul.f32 %v8883_v49, %v5375_v59  ;;  %v5508_v42 = vmul.f32 %v12728_v10, %v5470_v21  ;;  %v5549_v25 = vadd.f32 %v12736_v51, %v5511_v43  ;;  %v5157_v44 = vmul.f32 0.0078125, %v5101_v50 }
 0xaf1   :  { %v5095_v52 = vpop.xlane.xlu0 %5094  ;;  %v12756_v23 = vadd.f32 %v5548_v58, %v14672_v4  ;;  %v5316_v8 = vmul.f32 %v5156_v31, %v5156_v31 }
 0xaf2   :  { %v5509_v0 = vmul.f32 %v12728_v10, %v5471_v53  ;;  %v5546_v36 = vadd.f32 %v12736_v51, %v5508_v42  ;;  %v12747_v9 = vadd.f32 %v5549_v25, %v14670_v6  ;;  %v5154_v3 = vmul.f32 0.0078125, %v5095_v52 }
 0xaf3   :  { %v5097_v29 = vpop.xlane.xlu1 %5096  ;;  %v5317_v43 = vmul.f32 %v5157_v44, %v5157_v44  ;;  %v14446_v53 = vmax.f32 %v12756_v23, 0.0 }
 0xaf4   :  { %v5547_v62 = vadd.f32 %v12736_v51, %v5509_v0  ;;  %v12752_v16 = vadd.f32 %v5546_v36, %v14671_v15  ;;  %v5155_v7 = vmul.f32 0.0078125, %v5097_v29  ;;  %v14445_v59 = vmax.f32 %v12747_v9, 0.0 }
 0xaf5   :  { %v5227_v35 = vpop.xlane.xlu0 %5226  ;;  %v5314_v52 = vmul.f32 %v5154_v3, %v5154_v3 }
 0xaf6   :  { %v5284_v37 = vmul.f32 0.0078125, %v5227_v35  ;;  %v12760_v22 = vadd.f32 %v5547_v62, %v14673_v33  ;;  %v14448_v49 = vmax.f32 %v12752_v16, 0.0  ;;  %v5315_v29 = vmul.f32 %v5155_v7, %v5155_v7 }
 0xaf7   :  { %v5229_v41 = vpop.xlane.xlu1 %5228  ;;  %v5643_v36 = vpack.c.bf16 %v14445_v59, %v14446_v53  ;;  %v5380_v33 = vsub.f32 %v12539_v12, %v5156_v31 }
 0xaf8   :  { %v5348_v50 = vsub.f32 %v5284_v37, %v5316_v8  ;;  %v5285_v47 = vmul.f32 0.0078125, %v5229_v41  ;;  %v14447_v56 = vmax.f32 %v12760_v22, 0.0 }
 0xaf9   :  { %v5223_v21 = vpop.xlane.xlu0 %5222 }
 0xafa   :  { %v5412_v42 = vadd.f32 1e-05, %v5348_v50  ;;  %v5349_v58 = vsub.f32 %v5285_v47, %v5317_v43  ;;  %v5282_v25 = vmul.f32 0.0078125, %v5223_v21  ;;  %v5642_v0 = vpack.c.bf16 %v14447_v56, %v14448_v49 }
 0xafb   :  { %v5225_v30 = vpop.xlane.xlu1 %5224  ;;  %v5381_v21 = vsub.f32 %v12542_v54, %v5157_v44  ;;  %v5379_v54 = vsub.f32 %v12550_v20, %v5155_v7 }
 0xafc   :  { %8884 = vrsqrt.f32 %v5412_v42  ;;  %v5413_v6 = vadd.f32 1e-05, %v5349_v58  ;;  %v5346_v35 = vsub.f32 %v5282_v25, %v5314_v52  ;;  %v5283_v62 = vmul.f32 0.0078125, %v5225_v30  ;;  %8321 = vmatprep.mubr.bf16.mxu1 %v5642_v0 }
 0xafd   :  { %8322 = vmatmul.mubr.bf16.vlgmr.msra.gmra.mrb[112].mxu1 %v5643_v36 }
 0xafe   :  { %8886 = vrsqrt.f32 %v5413_v6  ;;  %v5410_v15 = vadd.f32 1e-05, %v5346_v35  ;;  %v5347_v4 = vsub.f32 %v5283_v62, %v5315_v29  ;;  %v5378_v29 = vsub.f32 %v12546_v32, %v5154_v3 }
 0xb00   :  { %8888 = vrsqrt.f32 %v5410_v15  ;;  %v5411_v8 = vadd.f32 1e-05, %v5347_v4 }
 0xb01   :  { %v5107_v37 = vpop.xlane.xlu0 %5106 }
 0xb02   :  { %8890 = vrsqrt.f32 %v5411_v8  ;;  %v12775_v47 = vmul.f32 0.0078125, %v5107_v37 }
 0xb03   :  { %v5109_v41 = vpop.xlane.xlu1 %5108 }
 0xb04   :  { %v12778_v25 = vmul.f32 0.0078125, %v5109_v41  ;;  %v5320_v12 = vmul.f32 %v12775_v47, %v12775_v47 }
 0xb05   :  { %v5103_v43 = vpop.xlane.xlu0 %5102 }
 0xb06   :  { %v8885_v50 = vpop.eup %8884  ;;  %v12781_v30 = vmul.f32 0.0078125, %v5103_v43  ;;  %v5321_v3 = vmul.f32 %v12778_v25, %v12778_v25 }
 0xb07   :  { %v5105_v52 = vpop.xlane.xlu1 %5104  ;;  %v5476_v42 = vmul.f32 %v8885_v50, %v5380_v33 }
 0xb08   :  { %v8887_v58 = vpop.eup %8886  ;;  %v12787_v44 = vmul.f32 0.0078125, %v5105_v52  ;;  %v5318_v41 = vmul.f32 %v12781_v30, %v12781_v30 }
 0xb09   :  { %v5235_v0 = vpop.xlane.xlu0 %5234  ;;  %v5477_v36 = vmul.f32 %v8887_v58, %v5381_v21  ;;  %v5514_v35 = vmul.f32 %v12728_v10, %v5476_v42 }
 0xb0a   :  { %v8889_v6 = vpop.eup %8888  ;;  %v5288_v31 = vmul.f32 0.0078125, %v5235_v0  ;;  %v5319_v58 = vmul.f32 %v12787_v44, %v12787_v44 }
 0xb0b   :  { %v5237_v62 = vpop.xlane.xlu1 %5236  ;;  %v5474_v15 = vmul.f32 %v8889_v6, %v5378_v29  ;;  %v5515_v4 = vmul.f32 %v12728_v10, %v5477_v36  ;;  %v5552_v42 = vadd.f32 %v12736_v51, %v5514_v35  ;;  %v14674_v6 = vmax.f32 %v11685_v2, 0.0  ;;  %v14675_v35 = vld [vmem:[#allocation13_spill] sm:$0xff] }
 0xb0c   :  { %v8891_v32 = vpop.eup %8890  ;;  %v5352_v8 = vsub.f32 %v5288_v31, %v5320_v12  ;;  %v5289_v37 = vmul.f32 0.0078125, %v5237_v62 }
 0xb0d   :  { %v5231_v33 = vpop.xlane.xlu0 %5230  ;;  %v5475_v43 = vmul.f32 %v8891_v32, %v5379_v54  ;;  %v5512_v50 = vmul.f32 %v12728_v10, %v5474_v15  ;;  %v5553_v20 = vadd.f32 %v12736_v51, %v5515_v4  ;;  %v14676_v32 = vmax.f32 %v14675_v35, 0.0 }
 0xb0e   :  { %v5416_v7 = vadd.f32 1e-05, %v5352_v8  ;;  %v5353_v21 = vsub.f32 %v5289_v37, %v5321_v3  ;;  %v5286_v52 = vmul.f32 0.0078125, %v5231_v33  ;;  %v14677_v33 = vld [vmem:[#allocation14_spill] sm:$0xff] }
 0xb0f   :  { %v5233_v29 = vpop.xlane.xlu1 %5232  ;;  %v5513_v0 = vmul.f32 %v12728_v10, %v5475_v43  ;;  %v5550_v36 = vadd.f32 %v12736_v51, %v5512_v50  ;;  %v12803_v12 = vadd.f32 %v5553_v20, %v14674_v6  ;;  %v14678_v43 = vmax.f32 %v14677_v33, 0.0  ;;  %v14679_v20 = vld [vmem:[#allocation15_spill] sm:$0xff] }
 0xb10   :  { %8892 = vrsqrt.f32 %v5416_v7  ;;  %v5417_v31 = vadd.f32 1e-05, %v5353_v21  ;;  %v5350_v54 = vsub.f32 %v5286_v52, %v5318_v41  ;;  %v5287_v62 = vmul.f32 0.0078125, %v5233_v29 }
 0xb11   :  { %v5115_v15 = vpop.xlane.xlu0 %5114  ;;  %v5551_v4 = vadd.f32 %v12736_v51, %v5513_v0  ;;  %v12808_v3 = vadd.f32 %v5550_v36, %v14676_v32  ;;  %v12812_v50 = vadd.f32 %v5552_v42, %v14678_v43  ;;  %v14680_v7 = vmax.f32 %v14679_v20, 0.0 }
 0xb12   :  { %8894 = vrsqrt.f32 %v5417_v31  ;;  %v5414_v8 = vadd.f32 1e-05, %v5350_v54  ;;  %v5351_v37 = vsub.f32 %v5287_v62, %v5319_v58  ;;  %v14417_v52 = vmax.f32 %v12803_v12, 0.0 }
 0xb13   :  { %v5117_v2 = vpop.xlane.xlu1 %5116  ;;  %v12816_v21 = vadd.f32 %v5551_v4, %v14680_v7  ;;  %v14444_v0 = vmax.f32 %v12808_v3, 0.0  ;;  %v12821_v58 = vmul.f32 0.0078125, %v5115_v15  ;;  %v14418_v42 = vmax.f32 %v12812_v50, 0.0 }
 0xb14   :  { %8896 = vrsqrt.f32 %v5414_v8  ;;  %v5415_v41 = vadd.f32 1e-05, %v5351_v37  ;;  %v12828_v54 = vmul.f32 0.0078125, %v5117_v2  ;;  %v5384_v4 = vsub.f32 %v12575_v14, %v12775_v47 }
 0xb15   :  { %v5111_v29 = vpop.xlane.xlu0 %5110  ;;  %v14419_v36 = vmax.f32 %v12816_v21, 0.0  ;;  %v5645_v62 = vpack.c.bf16 %v14417_v52, %v14418_v42  ;;  %v5324_v8 = vmul.f32 %v12821_v58, %v12821_v58  ;;  %v5385_v33 = vsub.f32 %v12578_v13, %v12778_v25 }
 0xb16   :  { %8898 = vrsqrt.f32 %v5415_v41  ;;  %v12836_v15 = vmul.f32 0.0078125, %v5111_v29  ;;  %v5325_v14 = vmul.f32 %v12828_v54, %v12828_v54  ;;  %v5382_v29 = vsub.f32 %v12585_v18, %v12781_v30 }
 0xb17   :  { %v5113_v6 = vpop.xlane.xlu1 %5112  ;;  %v5644_v31 = vpack.c.bf16 %v14419_v36, %v14444_v0 }
 0xb18   :  { %v12842_v43 = vmul.f32 0.0078125, %v5113_v6 }
 0xb19   :  { %8325 = vmatprep.mubr.bf16.mxu1 %v5644_v31  ;;  %v5243_v35 = vpop.xlane.xlu0 %5242  ;;  %v5322_v31 = vmul.f32 %v12836_v15, %v12836_v15 }
 0xb1a   :  { %v8893_v32 = vpop.eup %8892  ;;  %v5292_v37 = vmul.f32 0.0078125, %v5243_v35  ;;  %8326 = vmatmul.mubr.bf16.gmra.mrb[116].mxu1 %v5645_v62 }
 0xb1b   :  { %v5245_v2 = vpop.xlane.xlu1 %5244  ;;  %v5480_v20 = vmul.f32 %v8893_v32, %v5384_v4  ;;  %v5383_v32 = vsub.f32 %v12589_v11, %v12787_v44 }
 0xb1c   :  { %v8895_v7 = vpop.eup %8894  ;;  %v5356_v47 = vsub.f32 %v5292_v37, %v5324_v8  ;;  %v5293_v41 = vmul.f32 0.0078125, %v5245_v2  ;;  %v5323_v8 = vmul.f32 %v12842_v43, %v12842_v43 }
 0xb1d   :  { %v5239_v62 = vpop.xlane.xlu0 %5238  ;;  %v5481_v35 = vmul.f32 %v8895_v7, %v5385_v33  ;;  %v5518_v4 = vmul.f32 %v12728_v10, %v5480_v20 }
 0xb1e   :  { %v8897_v52 = vpop.eup %8896  ;;  %v5420_v13 = vadd.f32 1e-05, %v5356_v47  ;;  %v5357_v25 = vsub.f32 %v5293_v41, %v5325_v14  ;;  %v5290_v6 = vmul.f32 0.0078125, %v5239_v62 }
 0xb1f   :  { %v5241_v37 = vpop.xlane.xlu1 %5240  ;;  %v5478_v2 = vmul.f32 %v8897_v52, %v5382_v29  ;;  %v5519_v18 = vmul.f32 %v12728_v10, %v5481_v35  ;;  %v5556_v62 = vadd.f32 %v12736_v51, %v5518_v4 }
 0xb20   :  { %v8899_v30 = vpop.eup %8898  ;;  %8900 = vrsqrt.f32 %v5420_v13  ;;  %v5421_v42 = vadd.f32 1e-05, %v5357_v25  ;;  %v5354_v33 = vsub.f32 %v5290_v6, %v5322_v31  ;;  %v5291_v7 = vmul.f32 0.0078125, %v5241_v37  ;;  %v14681_v31 = vld [vmem:[#allocation12_spill] sm:$0xff]  ;;  %v14684_v37 = vld [vmem:[#allocation18_spill] sm:$0xff] }
 0xb21   :  { %v5123_v47 = vpop.xlane.xlu0 %5122  ;;  %v5479_v14 = vmul.f32 %v8899_v30, %v5383_v32  ;;  %v5516_v41 = vmul.f32 %v12728_v10, %v5478_v2  ;;  %v5557_v20 = vadd.f32 %v12736_v51, %v5519_v18  ;;  %v14682_v13 = vmax.f32 %v14681_v31, 0.0 }
 0xb22   :  { %8902 = vrsqrt.f32 %v5421_v42  ;;  %v5418_v11 = vadd.f32 1e-05, %v5354_v33  ;;  %v5355_v44 = vsub.f32 %v5291_v7, %v5323_v8  ;;  %v14685_v42 = vmax.f32 %v14684_v37, 0.0  ;;  %v14687_v8 = vld [vmem:[#allocation17_spill] sm:$0xff]  ;;  %v14690_v7 = vld [vmem:[#allocation16_spill] sm:$0xff] }
 0xb23   :  { %v5125_v36 = vpop.xlane.xlu1 %5124  ;;  %v5517_v52 = vmul.f32 %v12728_v10, %v5479_v14  ;;  %v5554_v29 = vadd.f32 %v12736_v51, %v5516_v41  ;;  %v12863_v25 = vadd.f32 %v5557_v20, %v14682_v13  ;;  %v12870_v4 = vmul.f32 0.0078125, %v5123_v47 }
 0xb24   :  { %8904 = vrsqrt.f32 %v5418_v11  ;;  %v5419_v35 = vadd.f32 1e-05, %v5355_v44  ;;  %v14688_v18 = vmax.f32 %v14687_v8, 0.0  ;;  %v14691_v14 = vmax.f32 %v14690_v7, 0.0 }
 0xb25   :  { %14683 = vst [vmem:[#allocation13_spill] sm:$0xff] %v12863_v25  ;;  %v5119_v6 = vpop.xlane.xlu0 %5118  ;;  %v5555_v32 = vadd.f32 %v12736_v51, %v5517_v52  ;;  %v12868_v2 = vadd.f32 %v5554_v29, %v14685_v42  ;;  %v12880_v20 = vmul.f32 0.0078125, %v5125_v36  ;;  %v14422_v11 = vmax.f32 %v12863_v25, 0.0 }
 0xb26   :  { %8906 = vrsqrt.f32 %v5419_v35  ;;  %v12874_v30 = vadd.f32 %v5556_v62, %v14688_v18  ;;  %v5388_v44 = vsub.f32 %v12605_v17, %v12821_v58  ;;  %v12885_v52 = vmul.f32 0.0078125, %v5119_v6 }
 0xb27   :  { %14686 = vst [vmem:[#allocation14_spill] sm:$0xff] %v12868_v2  ;;  %v5121_v33 = vpop.xlane.xlu1 %5120  ;;  %v12878_v41 = vadd.f32 %v5555_v32, %v14691_v14  ;;  %v14421_v29 = vmax.f32 %v12868_v2, 0.0  ;;  %v5328_v31 = vmul.f32 %v12870_v4, %v12870_v4  ;;  %v5389_v32 = vsub.f32 %v12608_v34, %v12828_v54 }
 0xb28   :  { %14689 = vst [vmem:[#allocation15_spill] sm:$0xff] %v12874_v30  ;;  %v14423_v36 = vmax.f32 %v12874_v30, 0.0  ;;  %v12894_v37 = vmul.f32 0.0078125, %v5121_v33  ;;  %v5329_v8 = vmul.f32 %v12880_v20, %v12880_v20  ;;  %v5386_v54 = vsub.f32 %v12612_v27, %v12836_v15 }
 0xb29   :  { %14692 = vst [vmem:[#allocation12_spill] sm:$0xff] %v12878_v41  ;;  %v5251_v47 = vpop.xlane.xlu0 %5250  ;;  %v14420_v62 = vmax.f32 %v12878_v41, 0.0  ;;  %v5326_v33 = vmul.f32 %v12885_v52, %v12885_v52 }
 0xb2a   :  { %v8901_v35 = vpop.eup %8900  ;;  %v5296_v13 = vmul.f32 0.0078125, %v5251_v47  ;;  %v5647_v34 = vpack.c.bf16 %v14422_v11, %v14423_v36 }
 0xb2b   :  { %v5253_v17 = vpop.xlane.xlu1 %5252  ;;  %v5646_v58 = vpack.c.bf16 %v14420_v62, %v14421_v29  ;;  %v5484_v6 = vmul.f32 %v8901_v35, %v5388_v44 }
 0xb2c   :  { %v8903_v42 = vpop.eup %8902  ;;  %v5360_v18 = vsub.f32 %v5296_v13, %v5328_v31  ;;  %v5297_v7 = vmul.f32 0.0078125, %v5253_v17  ;;  %v5387_v13 = vsub.f32 %v12616_v39, %v12842_v43  ;;  %v5327_v17 = vmul.f32 %v12894_v37, %v12894_v37 }
 0xb2d   :  { %8329 = vmatprep.mubr.bf16.mxu1 %v5646_v58  ;;  %v5247_v14 = vpop.xlane.xlu0 %5246  ;;  %v5485_v44 = vmul.f32 %v8903_v42, %v5389_v32  ;;  %v5522_v31 = vmul.f32 %v12728_v10, %v5484_v6 }
 0xb2e   :  { %v8905_v47 = vpop.eup %8904  ;;  %v5424_v35 = vadd.f32 1e-05, %v5360_v18  ;;  %v5361_v62 = vsub.f32 %v5297_v7, %v5329_v8  ;;  %v5294_v29 = vmul.f32 0.0078125, %v5247_v14  ;;  %8330 = vmatmul.mubr.bf16.gmra.mrb[120].mxu1 %v5647_v34 }
 0xb2f   :  { %v5249_v27 = vpop.xlane.xlu1 %5248  ;;  %v5482_v15 = vmul.f32 %v8905_v47, %v5386_v54  ;;  %v5523_v11 = vmul.f32 %v12728_v10, %v5485_v44  ;;  %v5560_v14 = vadd.f32 %v12736_v51, %v5522_v31 }
 0xb30   :  { %v8907_v58 = vpop.eup %8906  ;;  %8908 = vrsqrt.f32 %v5424_v35  ;;  %v5425_v32 = vadd.f32 1e-05, %v5361_v62  ;;  %v5358_v42 = vsub.f32 %v5294_v29, %v5326_v33  ;;  %v5295_v18 = vmul.f32 0.0078125, %v5249_v27  ;;  %v14693_v29 = vld [vmem:[#allocation21_spill] sm:$0xff] }
 0xb31   :  { %v5131_v8 = vpop.xlane.xlu0 %5130  ;;  %v5483_v7 = vmul.f32 %v8907_v58, %v5387_v13  ;;  %v5520_v34 = vmul.f32 %v12728_v10, %v5482_v15  ;;  %v5561_v6 = vadd.f32 %v12736_v51, %v5523_v11  ;;  %v14694_v33 = vmax.f32 %v14693_v29, 0.0  ;;  %v14696_v11 = vld [vmem:[#allocation24_spill] sm:$0xff] }
 0xb32   :  { %8910 = vrsqrt.f32 %v5425_v32  ;;  %v5422_v39 = vadd.f32 1e-05, %v5358_v42  ;;  %v5359_v43 = vsub.f32 %v5295_v18, %v5327_v17  ;;  %v14697_v27 = vmax.f32 %v14696_v11, 0.0  ;;  %v14699_v17 = vld [vmem:[#allocation23_spill] sm:$0xff]  ;;  %v14702_v18 = vld [vmem:[#allocation20_spill] sm:$0xff] }
 0xb33   :  { %v5133_v36 = vpop.xlane.xlu1 %5132  ;;  %v5521_v54 = vmul.f32 %v12728_v10, %v5483_v7  ;;  %v5558_v44 = vadd.f32 %v12736_v51, %v5520_v34  ;;  %v12923_v47 = vadd.f32 %v5561_v6, %v14694_v33  ;;  %v12930_v31 = vmul.f32 0.0078125, %v5131_v8 }
 0xb34   :  { %8912 = vrsqrt.f32 %v5422_v39  ;;  %v5423_v62 = vadd.f32 1e-05, %v5359_v43  ;;  %v14700_v58 = vmax.f32 %v14699_v17, 0.0  ;;  %v14703_v7 = vmax.f32 %v14702_v18, 0.0 }
 0xb35   :  { %14695 = vst [vmem:[#allocation18_spill] sm:$0xff] %v12923_v47  ;;  %v5127_v35 = vpop.xlane.xlu0 %5126  ;;  %v5559_v13 = vadd.f32 %v12736_v51, %v5521_v54  ;;  %v12928_v15 = vadd.f32 %v5558_v44, %v14697_v27  ;;  %v12940_v6 = vmul.f32 0.0078125, %v5133_v36  ;;  %v14426_v39 = vmax.f32 %v12923_v47, 0.0 }
 0xb36   :  { %8914 = vrsqrt.f32 %v5423_v62  ;;  %v12934_v32 = vadd.f32 %v5560_v14, %v14700_v58  ;;  %v5392_v43 = vsub.f32 %v12629_v19, %v12870_v4  ;;  %v12945_v54 = vmul.f32 0.0078125, %v5127_v35 }
 0xb37   :  { %14698 = vst [vmem:[#allocation17_spill] sm:$0xff] %v12928_v15  ;;  %v5129_v42 = vpop.xlane.xlu1 %5128  ;;  %v12938_v34 = vadd.f32 %v5559_v13, %v14703_v7  ;;  %v14425_v44 = vmax.f32 %v12928_v15, 0.0  ;;  %v5332_v29 = vmul.f32 %v12930_v31, %v12930_v31  ;;  %v5393_v13 = vsub.f32 %v12632_v60, %v12880_v20 }
 0xb38   :  { %14701 = vst [vmem:[#allocation16_spill] sm:$0xff] %v12934_v32  ;;  %v14427_v36 = vmax.f32 %v12934_v32, 0.0  ;;  %v12954_v11 = vmul.f32 0.0078125, %v5129_v42  ;;  %v5333_v17 = vmul.f32 %v12940_v6, %v12940_v6  ;;  %v5390_v20 = vsub.f32 %v12636_v57, %v12885_v52 }
 0xb39   :  { %14704 = vst [vmem:[#allocation21_spill] sm:$0xff] %v12938_v34  ;;  %v5259_v8 = vpop.xlane.xlu0 %5258  ;;  %v14424_v14 = vmax.f32 %v12938_v34, 0.0  ;;  %v5330_v42 = vmul.f32 %v12945_v54, %v12945_v54 }
 0xb3a   :  { %v8909_v62 = vpop.eup %8908  ;;  %v5300_v33 = vmul.f32 0.0078125, %v5259_v8  ;;  %v5649_v60 = vpack.c.bf16 %v14426_v39, %v14427_v36 }
 0xb3b   :  { %v5261_v19 = vpop.xlane.xlu1 %5260  ;;  %v5648_v4 = vpack.c.bf16 %v14424_v14, %v14425_v44  ;;  %v5488_v35 = vmul.f32 %v8909_v62, %v5392_v43 }
 0xb3c   :  { %v8911_v27 = vpop.eup %8910  ;;  %v5364_v58 = vsub.f32 %v5300_v33, %v5332_v29  ;;  %v5301_v18 = vmul.f32 0.0078125, %v5261_v19  ;;  %v5391_v33 = vsub.f32 %v12640_v24, %v12894_v37  ;;  %v5331_v19 = vmul.f32 %v12954_v11, %v12954_v11 }
 0xb3d   :  { %8333 = vmatprep.mubr.bf16.mxu1 %v5648_v4  ;;  %v5255_v7 = vpop.xlane.xlu0 %5254  ;;  %v5489_v43 = vmul.f32 %v8911_v27, %v5393_v13  ;;  %v5526_v29 = vmul.f32 %v12728_v10, %v5488_v35 }
 0xb3e   :  { %v8913_v8 = vpop.eup %8912  ;;  %v5428_v62 = vadd.f32 1e-05, %v5364_v58  ;;  %v5365_v14 = vsub.f32 %v5301_v18, %v5333_v17  ;;  %v5298_v44 = vmul.f32 0.0078125, %v5255_v7  ;;  %8334 = vmatmul.mubr.bf16.gmra.mrb[124].mxu1 %v5649_v60 }
 0xb3f   :  { %v5257_v57 = vpop.xlane.xlu1 %5256  ;;  %v5486_v52 = vmul.f32 %v8913_v8, %v5390_v20  ;;  %v5527_v39 = vmul.f32 %v12728_v10, %v5489_v43  ;;  %v5564_v7 = vadd.f32 %v12736_v51, %v5526_v29 }
 0xb40   :  { %v8915_v4 = vpop.eup %8914  ;;  %8916 = vrsqrt.f32 %v5428_v62  ;;  %v5429_v13 = vadd.f32 1e-05, %v5365_v14  ;;  %v5362_v27 = vsub.f32 %v5298_v44, %v5330_v42  ;;  %v5299_v58 = vmul.f32 0.0078125, %v5257_v57  ;;  %v14705_v44 = vld [vmem:[#allocation25_spill] sm:$0xff] }
 0xb41   :  { %v5139_v17 = vpop.xlane.xlu0 %5138  ;;  %v5487_v18 = vmul.f32 %v8915_v4, %v5391_v33  ;;  %v5524_v60 = vmul.f32 %v12728_v10, %v5486_v52  ;;  %v5565_v35 = vadd.f32 %v12736_v51, %v5527_v39  ;;  %v14706_v42 = vmax.f32 %v14705_v44, 0.0  ;;  %v14708_v39 = vld [vmem:[#allocation22_spill] sm:$0xff] }
 0xb42   :  { %8918 = vrsqrt.f32 %v5429_v13  ;;  %v5426_v24 = vadd.f32 1e-05, %v5362_v27  ;;  %v5363_v37 = vsub.f32 %v5299_v58, %v5331_v19  ;;  %v14709_v57 = vmax.f32 %v14708_v39, 0.0  ;;  %v14711_v19 = vld [vmem:[#allocation26_spill] sm:$0xff]  ;;  %v14714_v58 = vld [vmem:[#allocation19_spill] sm:$0xff] }
 0xb43   :  { %v5141_v36 = vpop.xlane.xlu1 %5140  ;;  %v5525_v20 = vmul.f32 %v12728_v10, %v5487_v18  ;;  %v5562_v43 = vadd.f32 %v12736_v51, %v5524_v60  ;;  %v12983_v8 = vadd.f32 %v5565_v35, %v14706_v42  ;;  %v12990_v29 = vmul.f32 0.0078125, %v5139_v17 }
 0xb44   :  { %8920 = vrsqrt.f32 %v5426_v24  ;;  %v5427_v14 = vadd.f32 1e-05, %v5363_v37  ;;  %v14712_v4 = vmax.f32 %v14711_v19, 0.0  ;;  %v14715_v18 = vmax.f32 %v14714_v58, 0.0 }
 0xb45   :  { %14707 = vst [vmem:[#allocation24_spill] sm:$0xff] %v12983_v8  ;;  %v5135_v62 = vpop.xlane.xlu0 %5134  ;;  %v5563_v33 = vadd.f32 %v12736_v51, %v5525_v20  ;;  %v12988_v52 = vadd.f32 %v5562_v43, %v14709_v57  ;;  %v13000_v35 = vmul.f32 0.0078125, %v5141_v36  ;;  %v14430_v24 = vmax.f32 %v12983_v8, 0.0 }
 0xb46   :  { %8922 = vrsqrt.f32 %v5427_v14  ;;  %v12994_v13 = vadd.f32 %v5564_v7, %v14712_v4  ;;  %v5396_v37 = vsub.f32 %v12653_v28, %v12930_v31  ;;  %v13005_v20 = vmul.f32 0.0078125, %v5135_v62 }
 0xb47   :  { %14710 = vst [vmem:[#allocation23_spill] sm:$0xff] %v12988_v52  ;;  %v5137_v27 = vpop.xlane.xlu1 %5136  ;;  %v12998_v60 = vadd.f32 %v5563_v33, %v14715_v18  ;;  %v14429_v43 = vmax.f32 %v12988_v52, 0.0  ;;  %v5336_v44 = vmul.f32 %v12990_v29, %v12990_v29  ;;  %v5397_v33 = vsub.f32 %v12656_v5, %v12940_v6 }
 0xb48   :  { %14713 = vst [vmem:[#allocation20_spill] sm:$0xff] %v12994_v13  ;;  %v14431_v36 = vmax.f32 %v12994_v13, 0.0  ;;  %v13014_v39 = vmul.f32 0.0078125, %v5137_v27  ;;  %v5337_v19 = vmul.f32 %v13000_v35, %v13000_v35  ;;  %v5394_v6 = vsub.f32 %v12660_v40, %v12945_v54 }
 0xb49   :  { %14716 = vst [vmem:[#allocation25_spill] sm:$0xff] %v12998_v60  ;;  %v5267_v17 = vpop.xlane.xlu0 %5266  ;;  %v14428_v7 = vmax.f32 %v12998_v60, 0.0  ;;  %v5334_v27 = vmul.f32 %v13005_v20, %v13005_v20 }
 0xb4a   :  { %v8917_v14 = vpop.eup %8916  ;;  %v5304_v42 = vmul.f32 0.0078125, %v5267_v17  ;;  %v5651_v5 = vpack.c.bf16 %v14430_v24, %v14431_v36 }
 0xb4b   :  { %v5269_v28 = vpop.xlane.xlu1 %5268  ;;  %v5650_v31 = vpack.c.bf16 %v14428_v7, %v14429_v43  ;;  %v5492_v62 = vmul.f32 %v8917_v14, %v5396_v37 }
 0xb4c   :  { %v8919_v57 = vpop.eup %8918  ;;  %v5368_v4 = vsub.f32 %v5304_v42, %v5336_v44  ;;  %v5305_v58 = vmul.f32 0.0078125, %v5269_v28  ;;  %v5395_v42 = vsub.f32 %v12664_v55, %v12954_v11  ;;  %v5335_v28 = vmul.f32 %v13014_v39, %v13014_v39 }
 0xb4d   :  { %8337 = vmatprep.mubr.bf16.mxu1 %v5650_v31  ;;  %v5263_v18 = vpop.xlane.xlu0 %5262  ;;  %v5493_v37 = vmul.f32 %v8919_v57, %v5397_v33  ;;  %v5530_v44 = vmul.f32 %v12728_v10, %v5492_v62 }
 0xb4e   :  { %v8921_v17 = vpop.eup %8920  ;;  %v5432_v14 = vadd.f32 1e-05, %v5368_v4  ;;  %v5369_v7 = vsub.f32 %v5305_v58, %v5337_v19  ;;  %v5302_v43 = vmul.f32 0.0078125, %v5263_v18  ;;  %8338 = vmatmul.mubr.bf16.gmra.mrb[128].mxu1 %v5651_v5 }
 0xb4f   :  { %v5265_v40 = vpop.xlane.xlu1 %5264  ;;  %v5490_v54 = vmul.f32 %v8921_v17, %v5394_v6  ;;  %v5531_v24 = vmul.f32 %v12728_v10, %v5493_v37  ;;  %v5568_v18 = vadd.f32 %v12736_v51, %v5530_v44 }
 0xb50   :  { %v8923_v31 = vpop.eup %8922  ;;  %8924 = vrsqrt.f32 %v5432_v14  ;;  %v5433_v33 = vadd.f32 1e-05, %v5369_v7  ;;  %v5366_v57 = vsub.f32 %v5302_v43, %v5334_v27  ;;  %v5303_v4 = vmul.f32 0.0078125, %v5265_v40  ;;  %v14717_v43 = vld [vmem:[#allocation6_spill] sm:$0xff] }
 0xb51   :  { %v5147_v19 = vpop.xlane.xlu0 %5146  ;;  %v5491_v58 = vmul.f32 %v8923_v31, %v5395_v42  ;;  %v5528_v5 = vmul.f32 %v12728_v10, %v5490_v54  ;;  %v5569_v62 = vadd.f32 %v12736_v51, %v5531_v24  ;;  %v14718_v27 = vmax.f32 %v14717_v43, 0.0  ;;  %v14720_v24 = vld [vmem:[#allocation27_spill] sm:$0xff] }
 0xb52   :  { %8926 = vrsqrt.f32 %v5433_v33  ;;  %v5430_v55 = vadd.f32 1e-05, %v5366_v57  ;;  %v5367_v11 = vsub.f32 %v5303_v4, %v5335_v28  ;;  %v14721_v40 = vmax.f32 %v14720_v24, 0.0  ;;  %v14723_v28 = vld [vmem:[#allocation7_spill] sm:$0xff]  ;;  %v14726_v4 = vld [vmem:[#allocation28_spill] sm:$0xff] }
 0xb53   :  { %v5149_v36 = vpop.xlane.xlu1 %5148  ;;  %v5529_v6 = vmul.f32 %v12728_v10, %v5491_v58  ;;  %v5566_v37 = vadd.f32 %v12736_v51, %v5528_v5  ;;  %v13043_v17 = vadd.f32 %v5569_v62, %v14718_v27  ;;  %v14724_v31 = vmax.f32 %v14723_v28, 0.0 }
 0xb54   :  { %8928 = vrsqrt.f32 %v5430_v55  ;;  %v5431_v7 = vadd.f32 1e-05, %v5367_v11  ;;  %v14727_v58 = vmax.f32 %v14726_v4, 0.0  ;;  %v5400_v11 = vsub.f32 %v12677_v63, %v12990_v29 }
 0xb55   :  { %14719 = vst [vmem:[#allocation22_spill] sm:$0xff] %v13043_v17  ;;  %v5143_v14 = vpop.xlane.xlu0 %5142  ;;  %v5567_v42 = vadd.f32 %v12736_v51, %v5529_v6  ;;  %v13048_v54 = vadd.f32 %v5566_v37, %v14721_v40  ;;  %v13054_v33 = vadd.f32 %v5568_v18, %v14724_v31  ;;  %v14434_v55 = vmax.f32 %v13043_v17, 0.0 }
 0xb56   :  { %8930 = vrsqrt.f32 %v5431_v7  ;;  %v13050_v44 = vmul.f32 0.0078125, %v5143_v14  ;;  %v13065_v6 = vmul.f32 0.0078125, %v5147_v19  ;;  %v5401_v24 = vsub.f32 %v12680_v61, %v13000_v35 }
 0xb57   :  { %14722 = vst [vmem:[#allocation26_spill] sm:$0xff] %v13048_v54  ;;  %14725 = vst [vmem:[#allocation19_spill] sm:$0xff] %v13054_v33  ;;  %v5145_v57 = vpop.xlane.xlu1 %5144  ;;  %v13058_v5 = vadd.f32 %v5567_v42, %v14727_v58  ;;  %v14433_v7 = vmax.f32 %v13048_v54, 0.0  ;;  %v14443_v42 = vmax.f32 %v13054_v33, 0.0  ;;  %v13074_v40 = vmul.f32 0.0078125, %v5149_v36 }
 0xb58   :  { %v13060_v62 = vmul.f32 0.0078125, %v5145_v57  ;;  %v5338_v27 = vmul.f32 %v13050_v44, %v13050_v44  ;;  %v5398_v35 = vsub.f32 %v12684_v48, %v13005_v20  ;;  %v5340_v36 = vmul.f32 %v13065_v6, %v13065_v6 }
 0xb59   :  { %14728 = vst [vmem:[#allocation6_spill] sm:$0xff] %v13058_v5  ;;  %v5271_v37 = vpop.xlane.xlu0 %5270  ;;  %v14432_v18 = vmax.f32 %v13058_v5, 0.0  ;;  %v5653_v61 = vpack.c.bf16 %v14434_v55, %v14443_v42 }
 0xb5a   :  { %v8925_v43 = vpop.eup %8924  ;;  %v5306_v14 = vmul.f32 0.0078125, %v5271_v37  ;;  %v5339_v31 = vmul.f32 %v13060_v62, %v13060_v62 }
 0xb5b   :  { %v5273_v63 = vpop.xlane.xlu1 %5272  ;;  %v5652_v29 = vpack.c.bf16 %v14432_v18, %v14433_v7  ;;  %v5496_v19 = vmul.f32 %v8925_v43, %v5400_v11 }
 0xb5c   :  { %v8927_v28 = vpop.eup %8926  ;;  %v5370_v57 = vsub.f32 %v5306_v14, %v5338_v27  ;;  %v5307_v4 = vmul.f32 0.0078125, %v5273_v63  ;;  %v5399_v14 = vsub.f32 %v12688_v1, %v13014_v39  ;;  %v5341_v63 = vmul.f32 %v13074_v40, %v13074_v40 }
 0xb5d   :  { %8341 = vmatprep.mubr.bf16.mxu1 %v5652_v29  ;;  %v5275_v58 = vpop.xlane.xlu0 %5274  ;;  %v5497_v11 = vmul.f32 %v8927_v28, %v5401_v24  ;;  %v5534_v27 = vmul.f32 %v12728_v10, %v5496_v19 }
 0xb5e   :  { %v8929_v37 = vpop.eup %8928  ;;  %v5434_v43 = vadd.f32 1e-05, %v5370_v57  ;;  %v5371_v18 = vsub.f32 %v5307_v4, %v5339_v31  ;;  %v5308_v7 = vmul.f32 0.0078125, %v5275_v58  ;;  %8342 = vmatmul.mubr.bf16.gmra.mrb[132].mxu1 %v5653_v61 }
 0xb5f   :  { %v5277_v48 = vpop.xlane.xlu1 %5276  ;;  %v5494_v20 = vmul.f32 %v8929_v37, %v5398_v35  ;;  %v5535_v55 = vmul.f32 %v12728_v10, %v5497_v11  ;;  %v5572_v39 = vadd.f32 %v12736_v51, %v5534_v27  ;;  %v14729_v37 = vld [vmem:[#allocation32_spill] sm:$0xff] }
 0xb60   :  { %v8931_v29 = vpop.eup %8930  ;;  %8932 = vrsqrt.f32 %v5434_v43  ;;  %v5435_v24 = vadd.f32 1e-05, %v5371_v18  ;;  %v5372_v28 = vsub.f32 %v5308_v7, %v5340_v36  ;;  %v5309_v57 = vmul.f32 0.0078125, %v5277_v48  ;;  %v14732_v43 = vld [vmem:[#allocation29_spill] sm:$0xff] }
 0xb61   :  { %v5495_v31 = vmul.f32 %v8931_v29, %v5399_v14  ;;  %v5532_v4 = vmul.f32 %v12728_v10, %v5494_v20  ;;  %v5573_v19 = vadd.f32 %v12736_v51, %v5535_v55  ;;  %v14730_v18 = vmax.f32 %v14729_v37, 0.0  ;;  %v14738_v20 = vld [vmem:[#allocation30_spill] sm:$0xff] }
 0xb62   :  { %8934 = vrsqrt.f32 %v5435_v24  ;;  %v5436_v61 = vadd.f32 1e-05, %v5372_v28  ;;  %v5373_v1 = vsub.f32 %v5309_v57, %v5341_v63  ;;  %v14733_v14 = vmax.f32 %v14732_v43, 0.0  ;;  %v14735_v63 = vld [vmem:[#allocation31_spill] sm:$0xff] }
 0xb63   :  { %v5533_v58 = vmul.f32 %v12728_v10, %v5495_v31  ;;  %v5570_v35 = vadd.f32 %v12736_v51, %v5532_v4  ;;  %v13103_v7 = vadd.f32 %v5573_v19, %v14730_v18  ;;  %v14736_v48 = vmax.f32 %v14735_v63, 0.0 }
 0xb64   :  { %8936 = vrsqrt.f32 %v5436_v61  ;;  %v5437_v11 = vadd.f32 1e-05, %v5373_v1  ;;  %v14739_v29 = vmax.f32 %v14738_v20, 0.0  ;;  %v5402_v57 = vsub.f32 %v12708_v26, %v13050_v44 }
 0xb65   :  { %14731 = vst [vmem:[#allocation27_spill] sm:$0xff] %v13103_v7  ;;  %v5571_v36 = vadd.f32 %v12736_v51, %v5533_v58  ;;  %v13108_v55 = vadd.f32 %v5570_v35, %v14733_v14  ;;  %v13112_v27 = vadd.f32 %v5572_v39, %v14736_v48  ;;  %v14439_v28 = vmax.f32 %v13103_v7, 0.0  ;;  %v14741_v48 = vld [vmem:[#allocation9_spill] sm:$0xff] }
 0xb66   :  { %8938 = vrsqrt.f32 %v5437_v11  ;;  %v5403_v1 = vsub.f32 %v12712_v38, %v13060_v62  ;;  %v5404_v44 = vsub.f32 %v12701_v45, %v13065_v6  ;;  %v5405_v62 = vsub.f32 %v12704_v46, %v13074_v40 }
 0xb67   :  { %14734 = vst [vmem:[#allocation7_spill] sm:$0xff] %v13108_v55  ;;  %14737 = vst [vmem:[#allocation28_spill] sm:$0xff] %v13112_v27  ;;  %v13116_v24 = vadd.f32 %v5571_v36, %v14739_v29  ;;  %v14442_v31 = vmax.f32 %v13108_v55, 0.0  ;;  %v14440_v61 = vmax.f32 %v13112_v27, 0.0  ;;  %v14742_v20 = vmax.f32 %v14741_v48, 0.0 }
 0xb69   :  { %14740 = vst [vmem:[#allocation32_spill] sm:$0xff] %v13116_v24  ;;  %v14441_v4 = vmax.f32 %v13116_v24, 0.0  ;;  %v5655_v26 = vpack.c.bf16 %v14439_v28, %v14440_v61 }
 0xb6a   :  { %v8933_v19 = vpop.eup %8932 }
 0xb6b   :  { %v5654_v39 = vpack.c.bf16 %v14441_v4, %v14442_v31  ;;  %v5498_v58 = vmul.f32 %v8933_v19, %v5402_v57  ;;  %v14744_v57 = vld [vmem:[#allocation11_spill] sm:$0xff] }
 0xb6c   :  { %v8935_v35 = vpop.eup %8934  ;;  %v14745_v19 = vmax.f32 %v14744_v57, 0.0 }
 0xb6d   :  { %8345 = vmatprep.mubr.bf16.mxu1 %v5654_v39  ;;  %v5499_v11 = vmul.f32 %v8935_v35, %v5403_v1  ;;  %v5536_v37 = vmul.f32 %v12728_v10, %v5498_v58 }
 0xb6e   :  { %v8937_v38 = vpop.eup %8936  ;;  %8346 = vmatmul.mubr.bf16.gmra.mrb[136].mxu1 %v5655_v26  ;;  %v14747_v26 = vld [vmem:[#allocation8_spill] sm:$0xff] }
 0xb6f   :  { %v5537_v18 = vmul.f32 %v12728_v10, %v5499_v11  ;;  %v5574_v36 = vadd.f32 %v12736_v51, %v5536_v37  ;;  %v5500_v43 = vmul.f32 %v8937_v38, %v5404_v44  ;;  %v14748_v44 = vmax.f32 %v14747_v26, 0.0  ;;  %v14750_v38 = vld [vmem:[#allocation10_spill] sm:$0xff] }
 0xb70   :  { %v8939_v14 = vpop.eup %8938 }
 0xb71   :  { %v5575_v63 = vadd.f32 %v12736_v51, %v5537_v18  ;;  %v13144_v45 = vadd.f32 %v5574_v36, %v14742_v20  ;;  %v5501_v6 = vmul.f32 %v8939_v14, %v5405_v62  ;;  %v5538_v29 = vmul.f32 %v12728_v10, %v5500_v43  ;;  %v13177_v43 = vld [vmem:[%s14260_s6 + $0x6] ss:$0 sm:$0xff] }
 0xb72   :  { %v14751_v62 = vmax.f32 %v14750_v38, 0.0 }
 0xb73   :  { %14743 = vst [vmem:[#allocation29_spill] sm:$0xff] %v13144_v45  ;;  %v13149_v1 = vadd.f32 %v5575_v63, %v14745_v19  ;;  %v5539_v46 = vmul.f32 %v12728_v10, %v5501_v6  ;;  %v5576_v40 = vadd.f32 %v12736_v51, %v5538_v29  ;;  %v14438_v39 = vmax.f32 %v13144_v45, 0.0 }
 0xb75   :  { %14746 = vst [vmem:[#allocation31_spill] sm:$0xff] %v13149_v1  ;;  %v14437_v58 = vmax.f32 %v13149_v1, 0.0  ;;  %v5577_v35 = vadd.f32 %v12736_v51, %v5539_v46  ;;  %v13158_v11 = vadd.f32 %v5576_v40, %v14748_v44  ;;  %v8484_v40 = vld [vmem:[%s14259_s5 + $0x1c0] sm:$0xff]  }
 0xb76   :  { %8353 = vmatprep.subr.bf16.mxu0 %v8484_v40 }
 0xb77   :  { %14749 = vst [vmem:[#allocation30_spill] sm:$0xff] %v13158_v11  ;;  %v5656_v37 = vpack.c.bf16 %v14437_v58, %v14438_v39  ;;  %v13166_v10 = vadd.f32 %v5577_v35, %v14751_v62  ;;  %v14436_v18 = vmax.f32 %v13158_v11, 0.0  ;;  %8354 = vmatpush3.bf16.msra.mxu0 %v8484_v40 }
 0xb79   :  { %14752 = vst [vmem:[#allocation9_spill] sm:$0xff] %v13166_v10  ;;  %8349 = vmatprep.mubr.bf16.mxu1 %v5656_v37  ;;  %v14435_v36 = vmax.f32 %v13166_v10, 0.0  ;;  %v8485_v37 = vld [vmem:[%s14259_s5 + $0x1c8] sm:$0xff]  }
 0xb7a   :  { %8355 = vmatprep.subr.bf16.mxu0 %v8485_v37 }
 0xb7b   :  { %v5657_v51 = vpack.c.bf16 %v14435_v36, %v14436_v18  ;;  %8356 = vmatpush3.bf16.msra.mxu0 %v8485_v37 }
 0xb7d   :  { %8350 = vmatmul.mubr.bf16.gmra.mrb[140].mxu1 %v5657_v51 }
 0xbd0   :  { %v8323_v14 = vpop.f32.mrb[112].mxu1 }
 0xbd1   :  { %v13180_v63 = vadd.f32 %v8323_v14, %v13177_v43  ;;  %v5765_v48 = vpop.f32.mrb[113].mxu1 }
 0xbd2   :  { %v8324_v20 = vpop.f32.mrb[114].mxu1  ;;  %v13187_v57 = vadd.f32 %v13177_v43, %v5765_v48 }
 0xbd3   :  { %v13183_v6 = vadd.f32 %v8324_v20, %v13177_v43  ;;  %5900 = vadd.xlane.f32.xlu0 %v13180_v63  ;;  %v5768_v29 = vpop.f32.mrb[115].mxu1  ;;  %v5994_v46 = vmul.f32 %v13180_v63, %v13180_v63 }
 0xbd4   :  { %v13191_v19 = vadd.f32 %v13177_v43, %v5768_v29  ;;  %v5992_v26 = vmul.f32 %v13187_v57, %v13187_v57 }
 0xbd5   :  { %5902 = vadd.xlane.f32.xlu1 %v13183_v6  ;;  %v5995_v35 = vmul.f32 %v13183_v6, %v13183_v6 }
 0xbd6   :  { %v5993_v44 = vmul.f32 %v13191_v19, %v13191_v19 }
 0xbd7   :  { %5896 = vadd.xlane.f32.xlu0 %v13187_v57 }
 0xbd9   :  { %5898 = vadd.xlane.f32.xlu1 %v13191_v19 }
 0xbdb   :  { %6028 = vadd.xlane.f32.xlu0 %v5994_v46  ;;  %v8486_v46 = vld [vmem:[%s14259_s5 + $0x1d0] sm:$0xff]  }
 0xbdc   :  { %8357 = vmatprep.subr.bf16.mxu0 %v8486_v46 }
 0xbdd   :  { %6030 = vadd.xlane.f32.xlu1 %v5995_v35  ;;  %8358 = vmatpush3.bf16.msra.mxu0 %v8486_v46 }
 0xbdf   :  { %6024 = vadd.xlane.f32.xlu0 %v5992_v26  ;;  %v8487_v26 = vld [vmem:[%s14259_s5 + $0x1d8] sm:$0xff]  }
 0xbe0   :  { %8359 = vmatprep.subr.bf16.mxu0 %v8487_v26 }
 0xbe1   :  { %6026 = vadd.xlane.f32.xlu1 %v5993_v44  ;;  %8360 = vmatpush3.bf16.msra.mxu0 %v8487_v26 }
 0xbed   :  { %v8327_v38 = vpop.f32.mrb[116].mxu1 }
 0xbee   :  { %v13210_v62 = vadd.f32 %v8327_v38, %v13177_v43  ;;  %v5781_v51 = vpop.f32.mrb[117].mxu1  ;;  %v8488_v38 = vld [vmem:[%s14259_s5 + $0x1e0] sm:$0xff]  }
 0xbef   :  { %v8328_v14 = vpop.f32.mrb[118].mxu1  ;;  %v13217_v29 = vadd.f32 %v13177_v43, %v5781_v51  ;;  %8361 = vmatprep.subr.bf16.mxu0 %v8488_v38 }
 0xbf0   :  { %v13213_v48 = vadd.f32 %v8328_v14, %v13177_v43  ;;  %5908 = vadd.xlane.f32.xlu0 %v13210_v62  ;;  %v5784_v20 = vpop.f32.mrb[119].mxu1  ;;  %v5998_v35 = vmul.f32 %v13210_v62, %v13210_v62  ;;  %8362 = vmatpush3.bf16.msra.mxu0 %v8488_v38  ;;  %v8489_v14 = vld [vmem:[%s14259_s5 + $0x1e8] sm:$0xff]  }
 0xbf1   :  { %v13224_v40 = vadd.f32 %v13177_v43, %v5784_v20  ;;  %v5996_v37 = vmul.f32 %v13217_v29, %v13217_v29  ;;  %8363 = vmatprep.subr.bf16.mxu0 %v8489_v14 }
 0xbf2   :  { %5910 = vadd.xlane.f32.xlu1 %v13213_v48  ;;  %v5999_v44 = vmul.f32 %v13213_v48, %v13213_v48 }
 0xbf3   :  { %v5997_v51 = vmul.f32 %v13224_v40, %v13224_v40 }
 0xbf4   :  { %5904 = vadd.xlane.f32.xlu0 %v13217_v29  ;;  %8364 = vmatpush3.bf16.msra.mxu0 %v8489_v14  ;;  %v8491_v14 = vld [vmem:[%s14259_s5 + $0x1f8] sm:$0xff]  }
 0xbf6   :  { %5906 = vadd.xlane.f32.xlu1 %v13224_v40 }
 0xbf8   :  { %6036 = vadd.xlane.f32.xlu0 %v5998_v35 }
 0xbfa   :  { %6038 = vadd.xlane.f32.xlu1 %v5999_v44  ;;  %v8490_v44 = vld [vmem:[%s14259_s5 + $0x1f0] sm:$0xff]  }
 0xbfb   :  { %8365 = vmatprep.subr.bf16.mxu0 %v8490_v44 }
 0xbfc   :  { %6032 = vadd.xlane.f32.xlu0 %v5996_v37  ;;  %8366 = vmatpush3.bf16.msra.mxu0 %v8490_v44 }
 0xbfd   :  { %8367 = vmatprep.subr.bf16.mxu0 %v8491_v14 }
 0xbfe   :  { %6034 = vadd.xlane.f32.xlu1 %v5997_v51 }
 0xc00   :  { %8368 = vmatpush3.bf16.msra.mxu0 %v8491_v14 }
 0xc01   :  { %v8331_v20 = vpop.f32.mrb[120].mxu1 }
 0xc02   :  { %v13246_v46 = vadd.f32 %v8331_v20, %v13177_v43  ;;  %v5797_v35 = vpop.f32.mrb[121].mxu1 }
 0xc03   :  { %v8332_v26 = vpop.f32.mrb[122].mxu1  ;;  %v13256_v51 = vadd.f32 %v13177_v43, %v5797_v35 }
 0xc04   :  { %v13252_v37 = vadd.f32 %v8332_v26, %v13177_v43  ;;  %5916 = vadd.xlane.f32.xlu0 %v13246_v46  ;;  %v5800_v38 = vpop.f32.mrb[123].mxu1  ;;  %v6002_v26 = vmul.f32 %v13246_v46, %v13246_v46 }
 0xc05   :  { %v13263_v20 = vadd.f32 %v13177_v43, %v5800_v38  ;;  %v6000_v44 = vmul.f32 %v13256_v51, %v13256_v51 }
 0xc06   :  { %5918 = vadd.xlane.f32.xlu1 %v13252_v37  ;;  %v6003_v35 = vmul.f32 %v13252_v37, %v13252_v37 }
 0xc07   :  { %v6001_v38 = vmul.f32 %v13263_v20, %v13263_v20 }
 0xc08   :  { %5912 = vadd.xlane.f32.xlu0 %v13256_v51 }
 0xc0a   :  { %5914 = vadd.xlane.f32.xlu1 %v13263_v20 }
 0xc0c   :  { %6044 = vadd.xlane.f32.xlu0 %v6002_v26 }
 0xc0e   :  { %6046 = vadd.xlane.f32.xlu1 %v6003_v35 }
 0xc10   :  { %6040 = vadd.xlane.f32.xlu0 %v6000_v44 }
 0xc11   :  { %v8335_v36 = vpop.f32.mrb[124].mxu1 }
 0xc12   :  { %v13276_v18 = vadd.f32 %v8335_v36, %v13177_v43  ;;  %6042 = vadd.xlane.f32.xlu1 %v6001_v38  ;;  %v5813_v58 = vpop.f32.mrb[125].mxu1 }
 0xc13   :  { %v8336_v39 = vpop.f32.mrb[126].mxu1  ;;  %v13283_v35 = vadd.f32 %v13177_v43, %v5813_v58 }
 0xc14   :  { %v13279_v14 = vadd.f32 %v8336_v39, %v13177_v43  ;;  %5924 = vadd.xlane.f32.xlu0 %v13276_v18  ;;  %v5816_v26 = vpop.f32.mrb[127].mxu1  ;;  %v6006_v36 = vmul.f32 %v13276_v18, %v13276_v18 }
 0xc15   :  { %v13287_v44 = vadd.f32 %v13177_v43, %v5816_v26  ;;  %v6004_v58 = vmul.f32 %v13283_v35, %v13283_v35 }
 0xc16   :  { %5926 = vadd.xlane.f32.xlu1 %v13279_v14  ;;  %v6007_v39 = vmul.f32 %v13279_v14, %v13279_v14 }
 0xc17   :  { %v6005_v38 = vmul.f32 %v13287_v44, %v13287_v44 }
 0xc18   :  { %5920 = vadd.xlane.f32.xlu0 %v13283_v35 }
 0xc1a   :  { %5922 = vadd.xlane.f32.xlu1 %v13287_v44 }
 0xc1c   :  { %6052 = vadd.xlane.f32.xlu0 %v6006_v36 }
 0xc1e   :  { %6054 = vadd.xlane.f32.xlu1 %v6007_v39 }
 0xc20   :  { %6048 = vadd.xlane.f32.xlu0 %v6004_v58 }
 0xc21   :  { %v8339_v26 = vpop.f32.mrb[128].mxu1 }
 0xc22   :  { %v13300_v28 = vadd.f32 %v8339_v26, %v13177_v43  ;;  %6050 = vadd.xlane.f32.xlu1 %v6005_v38  ;;  %v5829_v61 = vpop.f32.mrb[129].mxu1 }
 0xc23   :  { %v8340_v4 = vpop.f32.mrb[130].mxu1  ;;  %v13307_v31 = vadd.f32 %v13177_v43, %v5829_v61 }
 0xc24   :  { %v13303_v36 = vadd.f32 %v8340_v4, %v13177_v43  ;;  %5932 = vadd.xlane.f32.xlu0 %v13300_v28  ;;  %v5832_v39 = vpop.f32.mrb[131].mxu1  ;;  %v6010_v38 = vmul.f32 %v13300_v28, %v13300_v28 }
 0xc25   :  { %v13311_v58 = vadd.f32 %v13177_v43, %v5832_v39  ;;  %v6008_v61 = vmul.f32 %v13307_v31, %v13307_v31 }
 0xc26   :  { %5934 = vadd.xlane.f32.xlu1 %v13303_v36  ;;  %v6011_v4 = vmul.f32 %v13303_v36, %v13303_v36 }
 0xc27   :  { %v6009_v26 = vmul.f32 %v13311_v58, %v13311_v58 }
 0xc28   :  { %5928 = vadd.xlane.f32.xlu0 %v13307_v31 }
 0xc2a   :  { %5930 = vadd.xlane.f32.xlu1 %v13311_v58 }
 0xc2c   :  { %6060 = vadd.xlane.f32.xlu0 %v6010_v38 }
 0xc2e   :  { %6062 = vadd.xlane.f32.xlu1 %v6011_v4 }
 0xc30   :  { %6056 = vadd.xlane.f32.xlu0 %v6008_v61 }
 0xc31   :  { %v8343_v39 = vpop.f32.mrb[132].mxu1 }
 0xc32   :  { %v13324_v42 = vadd.f32 %v8343_v39, %v13177_v43  ;;  %6058 = vadd.xlane.f32.xlu1 %v6009_v26  ;;  %v5845_v0 = vpop.f32.mrb[133].mxu1 }
 0xc33   :  { %v8344_v59 = vpop.f32.mrb[134].mxu1  ;;  %v13331_v53 = vadd.f32 %v13177_v43, %v5845_v0 }
 0xc34   :  { %v13327_v38 = vadd.f32 %v8344_v59, %v13177_v43  ;;  %5940 = vadd.xlane.f32.xlu0 %v13324_v42  ;;  %v5848_v4 = vpop.f32.mrb[135].mxu1  ;;  %v6014_v26 = vmul.f32 %v13324_v42, %v13324_v42 }
 0xc35   :  { %v13335_v61 = vadd.f32 %v13177_v43, %v5848_v4  ;;  %v6012_v0 = vmul.f32 %v13331_v53, %v13331_v53 }
 0xc36   :  { %5942 = vadd.xlane.f32.xlu1 %v13327_v38  ;;  %v6015_v59 = vmul.f32 %v13327_v38, %v13327_v38 }
 0xc37   :  { %v6013_v39 = vmul.f32 %v13335_v61, %v13335_v61 }
 0xc38   :  { %5936 = vadd.xlane.f32.xlu0 %v13331_v53 }
 0xc3a   :  { %5938 = vadd.xlane.f32.xlu1 %v13335_v61 }
 0xc3c   :  { %6068 = vadd.xlane.f32.xlu0 %v6014_v26 }
 0xc3e   :  { %6070 = vadd.xlane.f32.xlu1 %v6015_v59 }
 0xc40   :  { %6064 = vadd.xlane.f32.xlu0 %v6012_v0 }
 0xc41   :  { %v8347_v4 = vpop.f32.mrb[136].mxu1 }
 0xc42   :  { %v13348_v56 = vadd.f32 %v8347_v4, %v13177_v43  ;;  %6066 = vadd.xlane.f32.xlu1 %v6013_v39  ;;  %v5861_v49 = vpop.f32.mrb[137].mxu1 }
 0xc43   :  { %v8348_v10 = vpop.f32.mrb[138].mxu1  ;;  %v13355_v11 = vadd.f32 %v13177_v43, %v5861_v49 }
 0xc44   :  { %v13351_v26 = vadd.f32 %v8348_v10, %v13177_v43  ;;  %5948 = vadd.xlane.f32.xlu0 %v13348_v56  ;;  %v5864_v59 = vpop.f32.mrb[139].mxu1  ;;  %v6018_v39 = vmul.f32 %v13348_v56, %v13348_v56 }
 0xc45   :  { %v13359_v0 = vadd.f32 %v13177_v43, %v5864_v59  ;;  %v6016_v49 = vmul.f32 %v13355_v11, %v13355_v11 }
 0xc46   :  { %5950 = vadd.xlane.f32.xlu1 %v13351_v26  ;;  %v6019_v10 = vmul.f32 %v13351_v26, %v13351_v26 }
 0xc47   :  { %v6017_v59 = vmul.f32 %v13359_v0, %v13359_v0 }
 0xc48   :  { %5944 = vadd.xlane.f32.xlu0 %v13355_v11 }
 0xc4a   :  { %5946 = vadd.xlane.f32.xlu1 %v13359_v0 }
 0xc4c   :  { %6076 = vadd.xlane.f32.xlu0 %v6018_v39 }
 0xc4e   :  { %6078 = vadd.xlane.f32.xlu1 %v6019_v10 }
 0xc50   :  { %6072 = vadd.xlane.f32.xlu0 %v6016_v49  ;;  %v8351_v4 = vpop.f32.mrb[140].mxu1 }
 0xc51   :  { %v13372_v1 = vadd.f32 %v8351_v4, %v13177_v43  ;;  %v5877_v45 = vpop.f32.mrb[141].mxu1 }
 0xc52   :  { %6074 = vadd.xlane.f32.xlu1 %v6017_v59  ;;  %v8352_v7 = vpop.f32.mrb[142].mxu1  ;;  %v13379_v10 = vadd.f32 %v13177_v43, %v5877_v45 }
 0xc53   :  { %v13375_v39 = vadd.f32 %v8352_v7, %v13177_v43  ;;  %v5880_v27 = vpop.f32.mrb[143].mxu1  ;;  %v6022_v45 = vmul.f32 %v13372_v1, %v13372_v1 }
 0xc54   :  { %5956 = vadd.xlane.f32.xlu0 %v13372_v1  ;;  %v13383_v49 = vadd.f32 %v13177_v43, %v5880_v27  ;;  %v6020_v4 = vmul.f32 %v13379_v10, %v13379_v10 }
 0xc55   :  { %v6023_v27 = vmul.f32 %v13375_v39, %v13375_v39 }
 0xc56   :  { %5958 = vadd.xlane.f32.xlu1 %v13375_v39  ;;  %v6021_v7 = vmul.f32 %v13383_v49, %v13383_v49 }
 0xc58   :  { %5952 = vadd.xlane.f32.xlu0 %v13379_v10 }
 0xc5a   :  { %5954 = vadd.xlane.f32.xlu1 %v13383_v49 }
 0xc5c   :  { %6080 = vadd.xlane.f32.xlu0 %v6020_v4 }
 0xc5e   :  { %6082 = vadd.xlane.f32.xlu1 %v6021_v7 }
 0xc60   :  { %6084 = vadd.xlane.f32.xlu0 %v6022_v45  ;;  %v5901_v43 = vpop.xlane.xlu0 %5900 }
 0xc61   :  { %v5962_v55 = vmul.f32 0.0078125, %v5901_v43 }
 0xc62   :  { %6086 = vadd.xlane.f32.xlu1 %v6023_v27  ;;  %v5903_v59 = vpop.xlane.xlu1 %5902 }
 0xc63   :  { %v5963_v33 = vmul.f32 0.0078125, %v5903_v59  ;;  %v6122_v4 = vmul.f32 %v5962_v55, %v5962_v55 }
 0xc64   :  { %v5897_v24 = vpop.xlane.xlu0 %5896 }
 0xc65   :  { %v5960_v54 = vmul.f32 0.0078125, %v5897_v24  ;;  %v6123_v60 = vmul.f32 %v5963_v33, %v5963_v33 }
 0xc66   :  { %v5899_v17 = vpop.xlane.xlu1 %5898 }
 0xc67   :  { %v5961_v13 = vmul.f32 0.0078125, %v5899_v17  ;;  %v6120_v32 = vmul.f32 %v5960_v54, %v5960_v54 }
 0xc68   :  { %v6029_v5 = vpop.xlane.xlu0 %6028 }
 0xc69   :  { %v6090_v8 = vmul.f32 0.0078125, %v6029_v5  ;;  %v6121_v27 = vmul.f32 %v5961_v13, %v5961_v13  ;;  %v14473_v5 = vmov 0  }
 0xc6a   :  { %v6031_v7 = vpop.xlane.xlu1 %6030  ;;  %8408 = vset.pattern.permute.xlu1 %v14473_v5 }
 0xc6b   :  { %v6154_v52 = vsub.f32 %v6090_v8, %v6122_v4  ;;  %v6091_v47 = vmul.f32 0.0078125, %v6031_v7  ;;  %v7294_v8 = vld [vmem:[%s14263_s9] sm:$0xff] }
 0xc6c   :  { %v6025_v45 = vpop.xlane.xlu0 %6024  ;;  %v13414_v7 = vld [vmem:[%s14261_s7 + $0x6] ss:$0 sm:$0xff] }
 0xc6d   :  { %v6218_v34 = vadd.f32 1e-05, %v6154_v52  ;;  %v6155_v15 = vsub.f32 %v6091_v47, %v6123_v60  ;;  %v6088_v25 = vmul.f32 0.0078125, %v6025_v45  ;;  %v6184_v60 = vsub.f32 %v13187_v57, %v5960_v54  ;;  %v7298_v54 = vld [vmem:[%s14263_s9 + $0x20] sm:$0xff] }
 0xc6e   :  { %v6027_v30 = vpop.xlane.xlu1 %6026 }
 0xc6f   :  { %8940 = vrsqrt.f32 %v6218_v34  ;;  %v6219_v43 = vadd.f32 1e-05, %v6155_v15  ;;  %v6152_v41 = vsub.f32 %v6088_v25, %v6120_v32  ;;  %v6089_v59 = vmul.f32 0.0078125, %v6027_v30  ;;  %v7295_v15 = vld [vmem:[%s14263_s9 + $0x8] sm:$0xff]  ;;  %v7296_v25 = vld [vmem:[%s14263_s9 + $0x10] sm:$0xff] }
 0xc70   :  { %v6187_v32 = vsub.f32 %v13183_v6, %v5963_v33 }
 0xc71   :  { %8942 = vrsqrt.f32 %v6219_v43  ;;  %v6216_v2 = vadd.f32 1e-05, %v6152_v41  ;;  %v6153_v24 = vsub.f32 %v6089_v59, %v6121_v27  ;;  %v6186_v41 = vsub.f32 %v13180_v63, %v5962_v55  ;;  %v13425_v59 = vld [vmem:[%s14262_s8 + $0x6] ss:$0 sm:$0xff] }
 0xc72   :  { %v6185_v55 = vsub.f32 %v13191_v19, %v5961_v13 }
 0xc73   :  { %7312 = vperm.xlu1 %8408, %v7294_v8   ;;  %8944 = vrsqrt.f32 %v6216_v2  ;;  %v6217_v47 = vadd.f32 1e-05, %v6153_v24  ;;  %v7297_v2 = vld [vmem:[%s14263_s9 + $0x18] sm:$0xff] }
 0xc75   :  { %8946 = vrsqrt.f32 %v6217_v47 }
 0xc77   :  { %7317 = vperm.xlu1 %8408, %v7295_v15  }
 0xc79   :  { %v8941_v30 = vpop.eup %8940 }
 0xc7a   :  { %v6282_v52 = vmul.f32 %v8941_v30, %v6186_v41 }
 0xc7b   :  { %7322 = vperm.xlu1 %8408, %v7296_v25   ;;  %v8943_v34 = vpop.eup %8942 }
 0xc7c   :  { %v6283_v17 = vmul.f32 %v8943_v34, %v6187_v32  ;;  %v6320_v43 = vmul.f32 %v13414_v7, %v6282_v52  ;;  %v7299_v32 = vld [vmem:[%s14263_s9 + $0x28] sm:$0xff] }
 0xc7d   :  { %v5909_v4 = vpop.xlane.xlu0 %5908  ;;  %v8945_v45 = vpop.eup %8944 }
 0xc7e   :  { %v6280_v63 = vmul.f32 %v8945_v45, %v6184_v60  ;;  %v6321_v6 = vmul.f32 %v13414_v7, %v6283_v17  ;;  %v5966_v19 = vmul.f32 0.0078125, %v5909_v4  ;;  %v6358_v41 = vadd.f32 %v13425_v59, %v6320_v43 }
 0xc7f   :  { %v5911_v33 = vpop.xlane.xlu1 %5910  ;;  %7327 = vperm.xlu1 %8408, %v7297_v2   ;;  %v8947_v27 = vpop.eup %8946 }
 0xc80   :  { %v6281_v24 = vmul.f32 %v8947_v27, %v6185_v55  ;;  %v6318_v13 = vmul.f32 %v13414_v7, %v6280_v63  ;;  %v6359_v8 = vadd.f32 %v13425_v59, %v6321_v6  ;;  %v13431_v30 = vmul.f32 0.0078125, %v5911_v33 }
 0xc81   :  { %v5905_v57 = vpop.xlane.xlu0 %5904  ;;  %v6126_v60 = vmul.f32 %v5966_v19, %v5966_v19 }
 0xc82   :  { %v6319_v15 = vmul.f32 %v13414_v7, %v6281_v24  ;;  %v6356_v25 = vadd.f32 %v13425_v59, %v6318_v13  ;;  %v13437_v34 = vmul.f32 0.0078125, %v5905_v57  ;;  %v6391_v4 = vmax.f32 %v6359_v8, 0.0  ;;  %v7300_v57 = vld [vmem:[%s14263_s9 + $0x30] sm:$0xff] }
 0xc83   :  { %v5907_v47 = vpop.xlane.xlu1 %5906  ;;  %7332 = vperm.xlu1 %8408, %v7298_v54   ;;  %v6127_v6 = vmul.f32 %v13431_v30, %v13431_v30  ;;  %v6390_v54 = vmax.f32 %v6358_v41, 0.0 }
 0xc84   :  { %v6357_v2 = vadd.f32 %v13425_v59, %v6319_v15  ;;  %v13440_v45 = vmul.f32 0.0078125, %v5907_v47  ;;  %v6388_v63 = vmax.f32 %v6356_v25, 0.0  ;;  %v6124_v24 = vmul.f32 %v13437_v34, %v13437_v34 }
 0xc85   :  { %v6037_v52 = vpop.xlane.xlu0 %6036 }
 0xc86   :  { %v6094_v17 = vmul.f32 0.0078125, %v6037_v52  ;;  %v6389_v33 = vmax.f32 %v6357_v2, 0.0  ;;  %v6421_v52 = vpack.c.bf16 %v6391_v4, %v6390_v54  ;;  %v7303_v54 = vld [vmem:[%s14263_s9 + $0x48] sm:$0xff] }
 0xc87   :  { %v6039_v55 = vpop.xlane.xlu1 %6038  ;;  %7337 = vperm.xlu1 %8408, %v7299_v32   ;;  %v6125_v32 = vmul.f32 %v13440_v45, %v13440_v45 }
 0xc88   :  { %v6158_v27 = vsub.f32 %v6094_v17, %v6126_v60  ;;  %v6095_v43 = vmul.f32 0.0078125, %v6039_v55  ;;  %v6420_v8 = vpack.c.bf16 %v6389_v33, %v6388_v63  ;;  %v7301_v55 = vld [vmem:[%s14263_s9 + $0x38] sm:$0xff] }
 0xc89   :  { %v6033_v13 = vpop.xlane.xlu0 %6032 }
 0xc8a   :  { %v6222_v47 = vadd.f32 1e-05, %v6158_v27  ;;  %v6159_v15 = vsub.f32 %v6095_v43, %v6127_v6  ;;  %v6092_v25 = vmul.f32 0.0078125, %v6033_v13  ;;  %8369 = vmatprep.mubr.bf16.mxu0 %v6420_v8  ;;  %v7302_v6 = vld [vmem:[%s14263_s9 + $0x40] sm:$0xff] }
 0xc8b   :  { %v6035_v2 = vpop.xlane.xlu1 %6034  ;;  %7342 = vperm.xlu1 %8408, %v7300_v57   ;;  %8370 = vmatmul.mubr.bf16.vlgmr.msra.gmra.mrb[112].mxu0 %v6421_v52  ;;  %v6190_v57 = vsub.f32 %v13210_v62, %v5966_v19  ;;  %v6188_v62 = vsub.f32 %v13217_v29, %v13437_v34 }
 0xc8c   :  { %8948 = vrsqrt.f32 %v6222_v47  ;;  %v6223_v41 = vadd.f32 1e-05, %v6159_v15  ;;  %v6156_v60 = vsub.f32 %v6092_v25, %v6124_v24  ;;  %v6093_v17 = vmul.f32 0.0078125, %v6035_v2  ;;  %v7304_v2 = vld [vmem:[%s14263_s9 + $0x50] sm:$0xff] }
 0xc8d   :  { %v6191_v47 = vsub.f32 %v13213_v48, %v13431_v30  ;;  %v6189_v48 = vsub.f32 %v13224_v40, %v13440_v45  ;;  %v7305_v40 = vld [vmem:[%s14263_s9 + $0x58] sm:$0xff] }
 0xc8e   :  { %8950 = vrsqrt.f32 %v6223_v41  ;;  %v6220_v63 = vadd.f32 1e-05, %v6156_v60  ;;  %v6157_v33 = vsub.f32 %v6093_v17, %v6125_v32 }
 0xc8f   :  { %7347 = vperm.xlu1 %8408, %v7301_v55  }
 0xc90   :  { %8952 = vrsqrt.f32 %v6220_v63  ;;  %v6221_v4 = vadd.f32 1e-05, %v6157_v33 }
 0xc91   :  { %v5917_v27 = vpop.xlane.xlu0 %5916 }
 0xc92   :  { %8954 = vrsqrt.f32 %v6221_v4  ;;  %v13461_v8 = vmul.f32 0.0078125, %v5917_v27 }
 0xc93   :  { %v5919_v43 = vpop.xlane.xlu1 %5918  ;;  %7352 = vperm.xlu1 %8408, %v7302_v6  }
 0xc94   :  { %v13465_v32 = vmul.f32 0.0078125, %v5919_v43  ;;  %v6130_v30 = vmul.f32 %v13461_v8, %v13461_v8 }
 0xc95   :  { %v5913_v24 = vpop.xlane.xlu0 %5912 }
 0xc96   :  { %v8949_v13 = vpop.eup %8948  ;;  %v13472_v19 = vmul.f32 0.0078125, %v5913_v24  ;;  %v6131_v27 = vmul.f32 %v13465_v32, %v13465_v32 }
 0xc97   :  { %v5915_v15 = vpop.xlane.xlu1 %5914  ;;  %v6286_v25 = vmul.f32 %v8949_v13, %v6190_v57  ;;  %7357 = vperm.xlu1 %8408, %v7303_v54  }
 0xc98   :  { %v8951_v52 = vpop.eup %8950  ;;  %v13478_v63 = vmul.f32 0.0078125, %v5915_v15  ;;  %v6128_v45 = vmul.f32 %v13472_v19, %v13472_v19 }
 0xc99   :  { %v6045_v41 = vpop.xlane.xlu0 %6044  ;;  %v6287_v60 = vmul.f32 %v8951_v52, %v6191_v47  ;;  %v6324_v6 = vmul.f32 %v13414_v7, %v6286_v25 }
 0xc9a   :  { %v8953_v17 = vpop.eup %8952  ;;  %v6098_v55 = vmul.f32 0.0078125, %v6045_v41 }
 0xc9b   :  { %v6047_v33 = vpop.xlane.xlu1 %6046  ;;  %v6284_v4 = vmul.f32 %v8953_v17, %v6188_v62  ;;  %v6325_v29 = vmul.f32 %v13414_v7, %v6287_v60  ;;  %7362 = vperm.xlu1 %8408, %v7304_v2   ;;  %v6129_v2 = vmul.f32 %v13478_v63, %v13478_v63  ;;  %v6362_v17 = vadd.f32 %v13425_v59, %v6324_v6 }
 0xc9c   :  { %v8955_v34 = vpop.eup %8954  ;;  %v6162_v43 = vsub.f32 %v6098_v55, %v6130_v30  ;;  %v6099_v54 = vmul.f32 0.0078125, %v6047_v33  ;;  %v7306_v33 = vld [vmem:[%s14263_s9 + $0x60] sm:$0xff] }
 0xc9d   :  { %v6041_v57 = vpop.xlane.xlu0 %6040  ;;  %v6285_v24 = vmul.f32 %v8955_v34, %v6189_v48  ;;  %v6322_v13 = vmul.f32 %v13414_v7, %v6284_v4  ;;  %v6363_v52 = vadd.f32 %v13425_v59, %v6325_v29 }
 0xc9e   :  { %v6226_v47 = vadd.f32 1e-05, %v6162_v43  ;;  %v6163_v15 = vsub.f32 %v6099_v54, %v6131_v27  ;;  %v6096_v25 = vmul.f32 0.0078125, %v6041_v57 }
 0xc9f   :  { %v6043_v62 = vpop.xlane.xlu1 %6042  ;;  %v6323_v41 = vmul.f32 %v13414_v7, %v6285_v24  ;;  %v6360_v60 = vadd.f32 %v13425_v59, %v6322_v13  ;;  %7367 = vperm.xlu1 %8408, %v7305_v40   ;;  %v6395_v43 = vmax.f32 %v6363_v52, 0.0  ;;  %v6394_v40 = vmax.f32 %v6362_v17, 0.0 }
 0xca0   :  { %8956 = vrsqrt.f32 %v6226_v47  ;;  %v6227_v48 = vadd.f32 1e-05, %v6163_v15  ;;  %v6160_v30 = vsub.f32 %v6096_v25, %v6128_v45  ;;  %v6097_v55 = vmul.f32 0.0078125, %v6043_v62  ;;  %v7307_v45 = vld [vmem:[%s14263_s9 + $0x68] sm:$0xff] }
 0xca1   :  { %v5925_v4 = vpop.xlane.xlu0 %5924  ;;  %v6361_v29 = vadd.f32 %v13425_v59, %v6323_v41  ;;  %v6392_v57 = vmax.f32 %v6360_v60, 0.0  ;;  %v6423_v25 = vpack.c.bf16 %v6395_v43, %v6394_v40  ;;  %v6194_v41 = vsub.f32 %v13246_v46, %v13461_v8 }
 0xca2   :  { %8958 = vrsqrt.f32 %v6227_v48  ;;  %v6224_v34 = vadd.f32 1e-05, %v6160_v30  ;;  %v6161_v27 = vsub.f32 %v6097_v55, %v6129_v2  ;;  %v13503_v15 = vmul.f32 0.0078125, %v5925_v4  ;;  %v7308_v2 = vld [vmem:[%s14263_s9 + $0x70] sm:$0xff] }
 0xca3   :  { %v5927_v54 = vpop.xlane.xlu1 %5926  ;;  %v6393_v24 = vmax.f32 %v6361_v29, 0.0  ;;  %7372 = vperm.xlu1 %8408, %v7306_v33   ;;  %v6195_v33 = vsub.f32 %v13252_v37, %v13465_v32 }
 0xca4   :  { %8960 = vrsqrt.f32 %v6224_v34  ;;  %v6225_v6 = vadd.f32 1e-05, %v6161_v27  ;;  %v13505_v52 = vmul.f32 0.0078125, %v5927_v54  ;;  %v6134_v48 = vmul.f32 %v13503_v15, %v13503_v15 }
 0xca5   :  { %v5921_v13 = vpop.xlane.xlu0 %5920  ;;  %v6422_v47 = vpack.c.bf16 %v6393_v24, %v6392_v57  ;;  %v6192_v54 = vsub.f32 %v13256_v51, %v13472_v19  ;;  %v6193_v57 = vsub.f32 %v13263_v20, %v13478_v63 }
 0xca6   :  { %8962 = vrsqrt.f32 %v6225_v6  ;;  %v13514_v30 = vmul.f32 0.0078125, %v5921_v13  ;;  %v6135_v46 = vmul.f32 %v13505_v52, %v13505_v52 }
 0xca7   :  { %v5923_v62 = vpop.xlane.xlu1 %5922  ;;  %8373 = vmatprep.mubr.bf16.mxu0 %v6422_v47  ;;  %7377 = vperm.xlu1 %8408, %v7307_v45  }
 0xca8   :  { %8374 = vmatmul.mubr.bf16.gmra.mrb[116].mxu0 %v6423_v25  ;;  %v13518_v4 = vmul.f32 0.0078125, %v5923_v62  ;;  %v6132_v32 = vmul.f32 %v13514_v30, %v13514_v30 }
 0xca9   :  { %v6053_v60 = vpop.xlane.xlu0 %6052 }
 0xcaa   :  { %v8957_v17 = vpop.eup %8956  ;;  %v6102_v55 = vmul.f32 0.0078125, %v6053_v60  ;;  %v6133_v47 = vmul.f32 %v13518_v4, %v13518_v4 }
 0xcab   :  { %v6055_v29 = vpop.xlane.xlu1 %6054  ;;  %v6290_v34 = vmul.f32 %v8957_v17, %v6194_v41  ;;  %7382 = vperm.xlu1 %8408, %v7308_v2  }
 0xcac   :  { %v8959_v27 = vpop.eup %8958  ;;  %v6166_v8 = vsub.f32 %v6102_v55, %v6134_v48  ;;  %v6103_v43 = vmul.f32 0.0078125, %v6055_v29 }
 0xcad   :  { %v6049_v24 = vpop.xlane.xlu0 %6048  ;;  %v6291_v6 = vmul.f32 %v8959_v27, %v6195_v33  ;;  %v6328_v2 = vmul.f32 %v13414_v7, %v6290_v34 }
 0xcae   :  { %v8961_v37 = vpop.eup %8960  ;;  %v6230_v40 = vadd.f32 1e-05, %v6166_v8  ;;  %v6167_v45 = vsub.f32 %v6103_v43, %v6135_v46  ;;  %v6100_v13 = vmul.f32 0.0078125, %v6049_v24 }
 0xcaf   :  { %v6051_v25 = vpop.xlane.xlu1 %6050  ;;  %v6288_v62 = vmul.f32 %v8961_v37, %v6192_v54  ;;  %v6329_v51 = vmul.f32 %v13414_v7, %v6291_v6  ;;  %v6366_v43 = vadd.f32 %v13425_v59, %v6328_v2 }
 0xcb0   :  { %v8963_v19 = vpop.eup %8962  ;;  %8964 = vrsqrt.f32 %v6230_v40  ;;  %v6231_v20 = vadd.f32 1e-05, %v6167_v45  ;;  %v6164_v63 = vsub.f32 %v6100_v13, %v6132_v32  ;;  %v6101_v41 = vmul.f32 0.0078125, %v6051_v25 }
 0xcb1   :  { %v5933_v60 = vpop.xlane.xlu0 %5932  ;;  %v6289_v17 = vmul.f32 %v8963_v19, %v6193_v57  ;;  %v6326_v48 = vmul.f32 %v13414_v7, %v6288_v62  ;;  %v6367_v29 = vadd.f32 %v13425_v59, %v6329_v51  ;;  %v6398_v13 = vmax.f32 %v6366_v43, 0.0 }
 0xcb2   :  { %8966 = vrsqrt.f32 %v6231_v20  ;;  %v6228_v55 = vadd.f32 1e-05, %v6164_v63  ;;  %v6165_v33 = vsub.f32 %v6101_v41, %v6133_v47  ;;  %v13538_v57 = vmul.f32 0.0078125, %v5933_v60 }
 0xcb3   :  { %v5935_v27 = vpop.xlane.xlu1 %5934  ;;  %v6327_v46 = vmul.f32 %v13414_v7, %v6289_v17  ;;  %v6364_v34 = vadd.f32 %v13425_v59, %v6326_v48  ;;  %v6399_v6 = vmax.f32 %v6367_v29, 0.0  ;;  %v6198_v47 = vsub.f32 %v13276_v18, %v13503_v15 }
 0xcb4   :  { %8968 = vrsqrt.f32 %v6228_v55  ;;  %v6229_v8 = vadd.f32 1e-05, %v6165_v33  ;;  %v13540_v45 = vmul.f32 0.0078125, %v5935_v27  ;;  %v6138_v2 = vmul.f32 %v13538_v57, %v13538_v57 }
 0xcb5   :  { %v5929_v54 = vpop.xlane.xlu0 %5928  ;;  %v6365_v24 = vadd.f32 %v13425_v59, %v6327_v46  ;;  %v6396_v32 = vmax.f32 %v6364_v34, 0.0  ;;  %v6425_v63 = vpack.c.bf16 %v6399_v6, %v6398_v13  ;;  %v6199_v41 = vsub.f32 %v13279_v14, %v13505_v52 }
 0xcb6   :  { %8970 = vrsqrt.f32 %v6229_v8  ;;  %v13546_v19 = vmul.f32 0.0078125, %v5929_v54  ;;  %v6139_v18 = vmul.f32 %v13540_v45, %v13540_v45  ;;  %v6196_v29 = vsub.f32 %v13283_v35, %v13514_v30 }
 0xcb7   :  { %v5931_v37 = vpop.xlane.xlu1 %5930  ;;  %v6397_v40 = vmax.f32 %v6365_v24, 0.0  ;;  %v6197_v27 = vsub.f32 %v13287_v44, %v13518_v4 }
 0xcb8   :  { %v13550_v60 = vmul.f32 0.0078125, %v5931_v37  ;;  %v6136_v34 = vmul.f32 %v13546_v19, %v13546_v19 }
 0xcb9   :  { %v6061_v25 = vpop.xlane.xlu0 %6060  ;;  %v6424_v62 = vpack.c.bf16 %v6397_v40, %v6396_v32 }
 0xcba   :  { %v8965_v51 = vpop.eup %8964  ;;  %v6106_v20 = vmul.f32 0.0078125, %v6061_v25  ;;  %v6137_v24 = vmul.f32 %v13550_v60, %v13550_v60 }
 0xcbb   :  { %v6063_v17 = vpop.xlane.xlu1 %6062  ;;  %8377 = vmatprep.mubr.bf16.mxu0 %v6424_v62  ;;  %v6294_v48 = vmul.f32 %v8965_v51, %v6198_v47 }
 0xcbc   :  { %v8967_v55 = vpop.eup %8966  ;;  %v6170_v15 = vsub.f32 %v6106_v20, %v6138_v2  ;;  %v6107_v33 = vmul.f32 0.0078125, %v6063_v17  ;;  %8378 = vmatmul.mubr.bf16.gmra.mrb[120].mxu0 %v6425_v63 }
 0xcbd   :  { %v6057_v46 = vpop.xlane.xlu0 %6056  ;;  %v6295_v14 = vmul.f32 %v8967_v55, %v6199_v41  ;;  %v6332_v32 = vmul.f32 %v13414_v7, %v6294_v48 }
 0xcbe   :  { %v8969_v52 = vpop.eup %8968  ;;  %v6234_v8 = vadd.f32 1e-05, %v6170_v15  ;;  %v6171_v43 = vsub.f32 %v6107_v33, %v6139_v18  ;;  %v6104_v54 = vmul.f32 0.0078125, %v6057_v46 }
 0xcbf   :  { %v6059_v6 = vpop.xlane.xlu1 %6058  ;;  %v6292_v37 = vmul.f32 %v8969_v52, %v6196_v29  ;;  %v6333_v35 = vmul.f32 %v13414_v7, %v6295_v14  ;;  %v6370_v48 = vadd.f32 %v13425_v59, %v6332_v32 }
 0xcc0   :  { %v8971_v30 = vpop.eup %8970  ;;  %8972 = vrsqrt.f32 %v6234_v8  ;;  %v6235_v44 = vadd.f32 1e-05, %v6171_v43  ;;  %v6168_v4 = vsub.f32 %v6104_v54, %v6136_v34  ;;  %v6105_v40 = vmul.f32 0.0078125, %v6059_v6 }
 0xcc1   :  { %v5941_v13 = vpop.xlane.xlu0 %5940  ;;  %v6293_v47 = vmul.f32 %v8971_v30, %v6197_v27  ;;  %v6330_v25 = vmul.f32 %v13414_v7, %v6292_v37  ;;  %v6371_v2 = vadd.f32 %v13425_v59, %v6333_v35  ;;  %v6402_v52 = vmax.f32 %v6370_v48, 0.0 }
 0xcc2   :  { %8974 = vrsqrt.f32 %v6235_v44  ;;  %v6232_v62 = vadd.f32 1e-05, %v6168_v4  ;;  %v6169_v51 = vsub.f32 %v6105_v40, %v6137_v24  ;;  %v13570_v15 = vmul.f32 0.0078125, %v5941_v13 }
 0xcc3   :  { %v5943_v20 = vpop.xlane.xlu1 %5942  ;;  %v6331_v63 = vmul.f32 %v13414_v7, %v6293_v47  ;;  %v6368_v41 = vadd.f32 %v13425_v59, %v6330_v25  ;;  %v6403_v33 = vmax.f32 %v6371_v2, 0.0  ;;  %v6202_v34 = vsub.f32 %v13300_v28, %v13538_v57 }
 0xcc4   :  { %8976 = vrsqrt.f32 %v6232_v62  ;;  %v6233_v17 = vadd.f32 1e-05, %v6169_v51  ;;  %v13572_v14 = vmul.f32 0.0078125, %v5943_v20  ;;  %v6142_v24 = vmul.f32 %v13570_v15, %v13570_v15 }
 0xcc5   :  { %v5937_v55 = vpop.xlane.xlu0 %5936  ;;  %v6369_v18 = vadd.f32 %v13425_v59, %v6331_v63  ;;  %v6400_v27 = vmax.f32 %v6368_v41, 0.0  ;;  %v6427_v32 = vpack.c.bf16 %v6403_v33, %v6402_v52  ;;  %v6203_v35 = vsub.f32 %v13303_v36, %v13540_v45 }
 0xcc6   :  { %8978 = vrsqrt.f32 %v6233_v17  ;;  %v13578_v6 = vmul.f32 0.0078125, %v5937_v55  ;;  %v6143_v28 = vmul.f32 %v13572_v14, %v13572_v14  ;;  %v6200_v47 = vsub.f32 %v13307_v31, %v13546_v19 }
 0xcc7   :  { %v5939_v29 = vpop.xlane.xlu1 %5938  ;;  %v6401_v46 = vmax.f32 %v6369_v18, 0.0  ;;  %v6201_v25 = vsub.f32 %v13311_v58, %v13550_v60 }
 0xcc8   :  { %v13582_v30 = vmul.f32 0.0078125, %v5939_v29  ;;  %v6140_v51 = vmul.f32 %v13578_v6, %v13578_v6 }
 0xcc9   :  { %v6069_v8 = vpop.xlane.xlu0 %6068  ;;  %v6426_v43 = vpack.c.bf16 %v6401_v46, %v6400_v27 }
 0xcca   :  { %v8973_v54 = vpop.eup %8972  ;;  %v6110_v37 = vmul.f32 0.0078125, %v6069_v8  ;;  %v6141_v41 = vmul.f32 %v13582_v30, %v13582_v30 }
 0xccb   :  { %v6071_v44 = vpop.xlane.xlu1 %6070  ;;  %8381 = vmatprep.mubr.bf16.mxu0 %v6426_v43  ;;  %v6298_v4 = vmul.f32 %v8973_v54, %v6202_v34 }
 0xccc   :  { %v8975_v40 = vpop.eup %8974  ;;  %v6174_v57 = vsub.f32 %v6110_v37, %v6142_v24  ;;  %v6111_v13 = vmul.f32 0.0078125, %v6071_v44  ;;  %8382 = vmatmul.mubr.bf16.gmra.mrb[124].mxu0 %v6427_v32 }
 0xccd   :  { %v6065_v62 = vpop.xlane.xlu0 %6064  ;;  %v6299_v36 = vmul.f32 %v8975_v40, %v6203_v35  ;;  %v6336_v55 = vmul.f32 %v13414_v7, %v6298_v4 }
 0xcce   :  { %v8977_v45 = vpop.eup %8976  ;;  %v6238_v2 = vadd.f32 1e-05, %v6174_v57  ;;  %v6175_v20 = vsub.f32 %v6111_v13, %v6143_v28  ;;  %v6108_v63 = vmul.f32 0.0078125, %v6065_v62 }
 0xccf   :  { %v6067_v17 = vpop.xlane.xlu1 %6066  ;;  %v6296_v48 = vmul.f32 %v8977_v45, %v6200_v47  ;;  %v6337_v31 = vmul.f32 %v13414_v7, %v6299_v36  ;;  %v6374_v37 = vadd.f32 %v13425_v59, %v6336_v55 }
 0xcd0   :  { %v8979_v19 = vpop.eup %8978  ;;  %8980 = vrsqrt.f32 %v6238_v2  ;;  %v6239_v58 = vadd.f32 1e-05, %v6175_v20  ;;  %v6172_v60 = vsub.f32 %v6108_v63, %v6140_v51  ;;  %v6109_v18 = vmul.f32 0.0078125, %v6067_v17 }
 0xcd1   :  { %v5949_v33 = vpop.xlane.xlu0 %5948  ;;  %v6297_v29 = vmul.f32 %v8979_v19, %v6201_v25  ;;  %v6334_v27 = vmul.f32 %v13414_v7, %v6296_v48  ;;  %v6375_v34 = vadd.f32 %v13425_v59, %v6337_v31  ;;  %v6406_v47 = vmax.f32 %v6374_v37, 0.0 }
 0xcd2   :  { %8982 = vrsqrt.f32 %v6239_v58  ;;  %v6236_v46 = vadd.f32 1e-05, %v6172_v60  ;;  %v6173_v52 = vsub.f32 %v6109_v18, %v6141_v41  ;;  %v13602_v44 = vmul.f32 0.0078125, %v5949_v33 }
 0xcd3   :  { %v5951_v8 = vpop.xlane.xlu1 %5950  ;;  %v6335_v43 = vmul.f32 %v13414_v7, %v6297_v29  ;;  %v6372_v54 = vadd.f32 %v13425_v59, %v6334_v27  ;;  %v6407_v4 = vmax.f32 %v6375_v34, 0.0  ;;  %v6206_v25 = vsub.f32 %v13324_v42, %v13570_v15 }
 0xcd4   :  { %8984 = vrsqrt.f32 %v6236_v46  ;;  %v6237_v24 = vadd.f32 1e-05, %v6173_v52  ;;  %v13604_v13 = vmul.f32 0.0078125, %v5951_v8  ;;  %v6146_v51 = vmul.f32 %v13602_v44, %v13602_v44 }
 0xcd5   :  { %v5945_v32 = vpop.xlane.xlu0 %5944  ;;  %v6373_v35 = vadd.f32 %v13425_v59, %v6335_v43  ;;  %v6404_v28 = vmax.f32 %v6372_v54, 0.0  ;;  %v6429_v63 = vpack.c.bf16 %v6407_v4, %v6406_v47  ;;  %v6207_v41 = vsub.f32 %v13327_v38, %v13572_v14 }
 0xcd6   :  { %8986 = vrsqrt.f32 %v6237_v24  ;;  %v13610_v2 = vmul.f32 0.0078125, %v5945_v32  ;;  %v6147_v42 = vmul.f32 %v13604_v13, %v13604_v13  ;;  %v6204_v58 = vsub.f32 %v13331_v53, %v13578_v6 }
 0xcd7   :  { %v5947_v40 = vpop.xlane.xlu1 %5946  ;;  %v6405_v57 = vmax.f32 %v6373_v35, 0.0  ;;  %v6205_v60 = vsub.f32 %v13335_v61, %v13582_v30 }
 0xcd8   :  { %v13614_v17 = vmul.f32 0.0078125, %v5947_v40  ;;  %v6144_v33 = vmul.f32 %v13610_v2, %v13610_v2 }
 0xcd9   :  { %v6077_v62 = vpop.xlane.xlu0 %6076  ;;  %v6428_v36 = vpack.c.bf16 %v6405_v57, %v6404_v28 }
 0xcda   :  { %v8981_v45 = vpop.eup %8980  ;;  %v6114_v20 = vmul.f32 0.0078125, %v6077_v62  ;;  %v6145_v52 = vmul.f32 %v13614_v17, %v13614_v17 }
 0xcdb   :  { %v6079_v48 = vpop.xlane.xlu1 %6078  ;;  %8385 = vmatprep.mubr.bf16.mxu0 %v6428_v36  ;;  %v6302_v55 = vmul.f32 %v8981_v45, %v6206_v25 }
 0xcdc   :  { %v8983_v31 = vpop.eup %8982  ;;  %v6178_v15 = vsub.f32 %v6114_v20, %v6146_v51  ;;  %v6115_v19 = vmul.f32 0.0078125, %v6079_v48  ;;  %8386 = vmatmul.mubr.bf16.gmra.mrb[128].mxu0 %v6429_v63 }
 0xcdd   :  { %v6073_v18 = vpop.xlane.xlu0 %6072  ;;  %v6303_v38 = vmul.f32 %v8983_v31, %v6207_v41  ;;  %v6340_v43 = vmul.f32 %v13414_v7, %v6302_v55 }
 0xcde   :  { %v8985_v14 = vpop.eup %8984  ;;  %v6242_v29 = vadd.f32 1e-05, %v6178_v15  ;;  %v6179_v27 = vsub.f32 %v6115_v19, %v6147_v42  ;;  %v6112_v46 = vmul.f32 0.0078125, %v6073_v18  ;;  %v6210_v42 = vsub.f32 %v13348_v56, %v13602_v44 }
 0xcdf   :  { %v6075_v34 = vpop.xlane.xlu1 %6074  ;;  %v6300_v8 = vmul.f32 %v8985_v14, %v6204_v58  ;;  %v6341_v53 = vmul.f32 %v13414_v7, %v6303_v38  ;;  %v6378_v62 = vadd.f32 %v13425_v59, %v6340_v43  ;;  %v6209_v43 = vsub.f32 %v13359_v0, %v13614_v17 }
 0xce0   :  { %v8987_v6 = vpop.eup %8986  ;;  %8988 = vrsqrt.f32 %v6242_v29  ;;  %v6243_v61 = vadd.f32 1e-05, %v6179_v27  ;;  %v6176_v30 = vsub.f32 %v6112_v46, %v6144_v33  ;;  %v6113_v54 = vmul.f32 0.0078125, %v6075_v34 }
 0xce1   :  { %v5957_v24 = vpop.xlane.xlu0 %5956  ;;  %v6301_v37 = vmul.f32 %v8987_v6, %v6205_v60  ;;  %v6338_v32 = vmul.f32 %v13414_v7, %v6300_v8  ;;  %v6379_v40 = vadd.f32 %v13425_v59, %v6341_v53  ;;  %v6410_v31 = vmax.f32 %v6378_v62, 0.0 }
 0xce2   :  { %8990 = vrsqrt.f32 %v6243_v61  ;;  %v6240_v35 = vadd.f32 1e-05, %v6176_v30  ;;  %v6177_v4 = vsub.f32 %v6113_v54, %v6145_v52  ;;  %v13640_v60 = vmul.f32 0.0078125, %v5957_v24 }
 0xce3   :  { %v5959_v28 = vpop.xlane.xlu1 %5958  ;;  %v6339_v57 = vmul.f32 %v13414_v7, %v6301_v37  ;;  %v6376_v47 = vadd.f32 %v13425_v59, %v6338_v32  ;;  %v6411_v20 = vmax.f32 %v6379_v40, 0.0  ;;  %v6211_v33 = vsub.f32 %v13351_v26, %v13604_v13 }
 0xce4   :  { %8992 = vrsqrt.f32 %v6240_v35  ;;  %v6241_v25 = vadd.f32 1e-05, %v6177_v4  ;;  %v13646_v29 = vmul.f32 0.0078125, %v5959_v28  ;;  %v6208_v8 = vsub.f32 %v13355_v11, %v13610_v2 }
 0xce5   :  { %v5953_v36 = vpop.xlane.xlu0 %5952  ;;  %v6377_v45 = vadd.f32 %v13425_v59, %v6339_v57  ;;  %v6408_v41 = vmax.f32 %v6376_v47, 0.0  ;;  %v6431_v14 = vpack.c.bf16 %v6411_v20, %v6410_v31  ;;  %v6150_v6 = vmul.f32 %v13640_v60, %v13640_v60 }
 0xce6   :  { %8994 = vrsqrt.f32 %v6241_v25  ;;  %v13634_v51 = vmul.f32 0.0078125, %v5953_v36  ;;  %v6151_v24 = vmul.f32 %v13646_v29, %v13646_v29 }
 0xce7   :  { %v5955_v63 = vpop.xlane.xlu1 %5954  ;;  %v6409_v48 = vmax.f32 %v6377_v45, 0.0 }
 0xce8   :  { %v13636_v55 = vmul.f32 0.0078125, %v5955_v63  ;;  %v6148_v18 = vmul.f32 %v13634_v51, %v13634_v51 }
 0xce9   :  { %v6081_v15 = vpop.xlane.xlu0 %6080  ;;  %v6430_v19 = vpack.c.bf16 %v6409_v48, %v6408_v41 }
 0xcea   :  { %v8989_v58 = vpop.eup %8988  ;;  %v6116_v38 = vmul.f32 0.0078125, %v6081_v15  ;;  %v6149_v56 = vmul.f32 %v13636_v55, %v13636_v55  ;;  %v6212_v15 = vsub.f32 %v13379_v10, %v13634_v51  ;;  %v6215_v10 = vsub.f32 %v13375_v39, %v13646_v29 }
 0xceb   :  { %v6083_v27 = vpop.xlane.xlu1 %6082  ;;  %8389 = vmatprep.mubr.bf16.mxu0 %v6430_v19  ;;  %v6306_v46 = vmul.f32 %v8989_v58, %v6210_v42 }
 0xcec   :  { %v8991_v52 = vpop.eup %8990  ;;  %v6180_v44 = vsub.f32 %v6116_v38, %v6148_v18  ;;  %v6117_v34 = vmul.f32 0.0078125, %v6083_v27  ;;  %8390 = vmatmul.mubr.bf16.gmra.mrb[132].mxu0 %v6431_v14  ;;  %v6213_v38 = vsub.f32 %v13383_v49, %v13636_v55  ;;  %v6214_v27 = vsub.f32 %v13372_v1, %v13640_v60 }
 0xced   :  { %v6085_v53 = vpop.xlane.xlu0 %6084  ;;  %v6307_v26 = vmul.f32 %v8991_v52, %v6211_v33  ;;  %v6344_v35 = vmul.f32 %v13414_v7, %v6306_v46 }
 0xcee   :  { %v8993_v13 = vpop.eup %8992  ;;  %v6244_v61 = vadd.f32 1e-05, %v6180_v44  ;;  %v6181_v30 = vsub.f32 %v6117_v34, %v6149_v56  ;;  %v6118_v54 = vmul.f32 0.0078125, %v6085_v53 }
 0xcef   :  { %v6087_v37 = vpop.xlane.xlu1 %6086  ;;  %v6304_v32 = vmul.f32 %v8993_v13, %v6208_v8  ;;  %v6345_v11 = vmul.f32 %v13414_v7, %v6307_v26  ;;  %v6382_v20 = vadd.f32 %v13425_v59, %v6344_v35 }
 0xcf0   :  { %v8995_v2 = vpop.eup %8994  ;;  %8996 = vrsqrt.f32 %v6244_v61  ;;  %v6245_v0 = vadd.f32 1e-05, %v6181_v30  ;;  %v6182_v17 = vsub.f32 %v6118_v54, %v6150_v6  ;;  %v6119_v4 = vmul.f32 0.0078125, %v6087_v37  ;;  %v13685_v30 = vld [vmem:[%s14260_s6 + $0x7] ss:$0 sm:$0xff] }
 0xcf1   :  { %v6305_v40 = vmul.f32 %v8995_v2, %v6209_v43  ;;  %v6342_v28 = vmul.f32 %v13414_v7, %v6304_v32  ;;  %v6383_v25 = vadd.f32 %v13425_v59, %v6345_v11  ;;  %v6414_v42 = vmax.f32 %v6382_v20, 0.0 }
 0xcf2   :  { %8998 = vrsqrt.f32 %v6245_v0  ;;  %v6246_v57 = vadd.f32 1e-05, %v6182_v17  ;;  %v6183_v47 = vsub.f32 %v6119_v4, %v6151_v24 }
 0xcf3   :  { %v6343_v62 = vmul.f32 %v13414_v7, %v6305_v40  ;;  %v6380_v36 = vadd.f32 %v13425_v59, %v6342_v28  ;;  %v6415_v41 = vmax.f32 %v6383_v25, 0.0 }
 0xcf4   :  { %9000 = vrsqrt.f32 %v6246_v57  ;;  %v6247_v45 = vadd.f32 1e-05, %v6183_v47 }
 0xcf5   :  { %v6381_v63 = vadd.f32 %v13425_v59, %v6343_v62  ;;  %v6412_v48 = vmax.f32 %v6380_v36, 0.0  ;;  %v6433_v18 = vpack.c.bf16 %v6415_v41, %v6414_v42 }
 0xcf6   :  { %9002 = vrsqrt.f32 %v6247_v45 }
 0xcf7   :  { %v6413_v31 = vmax.f32 %v6381_v63, 0.0 }
 0xcf9   :  { %v6432_v19 = vpack.c.bf16 %v6413_v31, %v6412_v48 }
 0xcfa   :  { %v8997_v58 = vpop.eup %8996 }
 0xcfb   :  { %8393 = vmatprep.mubr.bf16.mxu0 %v6432_v19  ;;  %v6308_v14 = vmul.f32 %v8997_v58, %v6212_v15 }
 0xcfc   :  { %v8999_v33 = vpop.eup %8998  ;;  %8394 = vmatmul.mubr.bf16.gmra.mrb[136].mxu0 %v6433_v18 }
 0xcfd   :  { %v6309_v46 = vmul.f32 %v8999_v33, %v6213_v38  ;;  %v6346_v52 = vmul.f32 %v13414_v7, %v6308_v14 }
 0xcfe   :  { %v9001_v56 = vpop.eup %9000 }
 0xcff   :  { %v6347_v51 = vmul.f32 %v13414_v7, %v6309_v46  ;;  %v6384_v44 = vadd.f32 %v13425_v59, %v6346_v52  ;;  %v6310_v34 = vmul.f32 %v9001_v56, %v6214_v27  ;;  %v13753_v27 = vpop.permute.xlu1 %7312 }
 0xd00   :  { %v9003_v49 = vpop.eup %9002  ;;  %14753 = vst [vmem:[#allocation11_spill] sm:$0xff] %v13753_v27 }
 0xd01   :  { %v6385_v55 = vadd.f32 %v13425_v59, %v6347_v51  ;;  %v6311_v8 = vmul.f32 %v9003_v49, %v6215_v10  ;;  %v6348_v43 = vmul.f32 %v13414_v7, %v6310_v34  ;;  %v6416_v53 = vmax.f32 %v6384_v44, 0.0 }
 0xd03   :  { %v6417_v1 = vmax.f32 %v6385_v55, 0.0  ;;  %v6349_v60 = vmul.f32 %v13414_v7, %v6311_v8  ;;  %v6386_v26 = vadd.f32 %v13425_v59, %v6348_v43  ;;  %v13757_v52 = vpop.permute.xlu1 %7317 }
 0xd04   :  { %14754 = vst [vmem:[#allocation8_spill] sm:$0xff] %v13757_v52 }
 0xd05   :  { %v6434_v13 = vpack.c.bf16 %v6417_v1, %v6416_v53  ;;  %v6387_v39 = vadd.f32 %v13425_v59, %v6349_v60  ;;  %v6418_v29 = vmax.f32 %v6386_v26, 0.0 }
 0xd07   :  { %8397 = vmatprep.mubr.bf16.mxu0 %v6434_v13  ;;  %v6419_v6 = vmax.f32 %v6387_v39, 0.0  ;;  %v13767_v8 = vpop.permute.xlu1 %7322 }
 0xd08   :  { %14755 = vst [vmem:[#allocation10_spill] sm:$0xff] %v13767_v8 }
 0xd09   :  { %v6435_v61 = vpack.c.bf16 %v6419_v6, %v6418_v29 }
 0xd0b   :  { %8398 = vmatmul.mubr.bf16.gmra.mrb[140].mxu0 %v6435_v61  ;;  %v13777_v1 = vpop.permute.xlu1 %7327 }
 0xd0c   :  { %14756 = vst [vmem:[#allocation33_spill] sm:$0xff] %v13777_v1 }
 0xd0f   :  { %v13785_v29 = vpop.permute.xlu1 %7332 }
 0xd10   :  { %14757 = vst [vmem:[#allocation34_spill] sm:$0xff] %v13785_v29 }
 0xd5e   :  { %v8371_v54 = vpop.f32.mrb[112].mxu0 }
 0xd5f   :  { %v13688_v24 = vadd.f32 %v8371_v54, %v13685_v30  ;;  %v6543_v7 = vpop.f32.mrb[113].mxu0 }
 0xd60   :  { %v8372_v37 = vpop.f32.mrb[114].mxu0  ;;  %v13695_v35 = vadd.f32 %v13685_v30, %v6543_v7 }
 0xd61   :  { %v13691_v32 = vadd.f32 %v8372_v37, %v13685_v30  ;;  %6678 = vadd.xlane.f32.xlu0 %v13688_v24  ;;  %v6546_v59 = vpop.f32.mrb[115].mxu0  ;;  %v6772_v2 = vmul.f32 %v13688_v24, %v13688_v24 }
 0xd62   :  { %v13699_v11 = vadd.f32 %v13685_v30, %v6546_v59  ;;  %v6770_v17 = vmul.f32 %v13695_v35, %v13695_v35  ;;  %v13796_v59 = vpop.permute.xlu1 %7337 }
 0xd63   :  { %6680 = vadd.xlane.f32.xlu1 %v13691_v32  ;;  %v6773_v0 = vmul.f32 %v13691_v32, %v13691_v32  ;;  %14758 = vst [vmem:[#allocation35_spill] sm:$0xff] %v13796_v59 }
 0xd64   :  { %v6771_v4 = vmul.f32 %v13699_v11, %v13699_v11 }
 0xd65   :  { %6674 = vadd.xlane.f32.xlu0 %v13695_v35 }
 0xd67   :  { %6676 = vadd.xlane.f32.xlu1 %v13699_v11 }
 0xd69   :  { %6806 = vadd.xlane.f32.xlu0 %v6772_v2 }
 0xd6b   :  { %6808 = vadd.xlane.f32.xlu1 %v6773_v0 }
 0xd6d   :  { %6802 = vadd.xlane.f32.xlu0 %v6770_v17 }
 0xd6f   :  { %6804 = vadd.xlane.f32.xlu1 %v6771_v4  ;;  %v13805_v4 = vpop.permute.xlu1 %7342 }
 0xd70   :  { %14759 = vst [vmem:[#allocation36_spill] sm:$0xff] %v13805_v4 }
 0xd7b   :  { %v8375_v40 = vpop.f32.mrb[116].mxu0 }
 0xd7c   :  { %v13712_v28 = vadd.f32 %v8375_v40, %v13685_v30  ;;  %v6559_v57 = vpop.f32.mrb[117].mxu0 }
 0xd7d   :  { %v8376_v47 = vpop.f32.mrb[118].mxu0  ;;  %v13719_v36 = vadd.f32 %v13685_v30, %v6559_v57 }
 0xd7e   :  { %v13715_v25 = vadd.f32 %v8376_v47, %v13685_v30  ;;  %6686 = vadd.xlane.f32.xlu0 %v13712_v28  ;;  %v6562_v62 = vpop.f32.mrb[119].mxu0  ;;  %v6776_v20 = vmul.f32 %v13712_v28, %v13712_v28 }
 0xd7f   :  { %v13723_v45 = vadd.f32 %v13685_v30, %v6562_v62  ;;  %v6774_v41 = vmul.f32 %v13719_v36, %v13719_v36 }
 0xd80   :  { %6688 = vadd.xlane.f32.xlu1 %v13715_v25  ;;  %v6777_v63 = vmul.f32 %v13715_v25, %v13715_v25 }
 0xd81   :  { %v6775_v48 = vmul.f32 %v13723_v45, %v13723_v45 }
 0xd82   :  { %6682 = vadd.xlane.f32.xlu0 %v13719_v36 }
 0xd84   :  { %6684 = vadd.xlane.f32.xlu1 %v13723_v45 }
 0xd86   :  { %6814 = vadd.xlane.f32.xlu0 %v6776_v20 }
 0xd88   :  { %6816 = vadd.xlane.f32.xlu1 %v6777_v63 }
 0xd8a   :  { %6810 = vadd.xlane.f32.xlu0 %v6774_v41 }
 0xd8c   :  { %6812 = vadd.xlane.f32.xlu1 %v6775_v48  ;;  %v13816_v48 = vpop.permute.xlu1 %7347 }
 0xd8d   :  { %14760 = vst [vmem:[#allocation37_spill] sm:$0xff] %v13816_v48 }
 0xd8f   :  { %v8379_v31 = vpop.f32.mrb[120].mxu0 }
 0xd90   :  { %v13736_v42 = vadd.f32 %v8379_v31, %v13685_v30  ;;  %v6575_v15 = vpop.f32.mrb[121].mxu0 }
 0xd91   :  { %v8380_v19 = vpop.f32.mrb[122].mxu0  ;;  %v13743_v38 = vadd.f32 %v13685_v30, %v6575_v15 }
 0xd92   :  { %v13739_v58 = vadd.f32 %v8380_v19, %v13685_v30  ;;  %6694 = vadd.xlane.f32.xlu0 %v13736_v42  ;;  %v6578_v18 = vpop.f32.mrb[123].mxu0  ;;  %v6780_v33 = vmul.f32 %v13736_v42, %v13736_v42 }
 0xd93   :  { %v13747_v14 = vadd.f32 %v13685_v30, %v6578_v18  ;;  %v6778_v46 = vmul.f32 %v13743_v38, %v13743_v38  ;;  %v13829_v18 = vpop.permute.xlu1 %7352 }
 0xd94   :  { %6696 = vadd.xlane.f32.xlu1 %v13739_v58  ;;  %v6781_v51 = vmul.f32 %v13739_v58, %v13739_v58  ;;  %14761 = vst [vmem:[#allocation38_spill] sm:$0xff] %v13829_v18 }
 0xd95   :  { %v6779_v55 = vmul.f32 %v13747_v14, %v13747_v14 }
 0xd96   :  { %6690 = vadd.xlane.f32.xlu0 %v13743_v38 }
 0xd98   :  { %6692 = vadd.xlane.f32.xlu1 %v13747_v14 }
 0xd9a   :  { %6822 = vadd.xlane.f32.xlu0 %v6780_v33 }
 0xd9e   :  { %6818 = vadd.xlane.f32.xlu0 %v6778_v46 }
 0xd9f   :  { %v8383_v56 = vpop.f32.mrb[124].mxu0 }
 0xda0   :  { %v6591_v10 = vpop.f32.mrb[125].mxu0  ;;  %v13773_v53 = vadd.f32 %v8383_v56, %v13685_v30 }
 0xda1   :  { %v8384_v44 = vpop.f32.mrb[126].mxu0  ;;  %v13780_v60 = vadd.f32 %v13685_v30, %v6591_v10  ;;  %v13837_v10 = vpop.permute.xlu1 %7357 }
 0xda2   :  { %v13762_v34 = vadd.f32 %v8384_v44, %v13685_v30  ;;  %6824 = vadd.xlane.f32.xlu0 %v6781_v51  ;;  %v6594_v49 = vpop.f32.mrb[127].mxu0  ;;  %v6784_v39 = vmul.f32 %v13773_v53, %v13773_v53  ;;  %14762 = vst [vmem:[#allocation39_spill] sm:$0xff] %v13837_v10 }
 0xda3   :  { %v13770_v43 = vadd.f32 %v13685_v30, %v6594_v49  ;;  %v6782_v7 = vmul.f32 %v13780_v60, %v13780_v60 }
 0xda4   :  { %6704 = vadd.xlane.f32.xlu1 %v13762_v34  ;;  %v6785_v2 = vmul.f32 %v13762_v34, %v13762_v34 }
 0xda5   :  { %v6783_v17 = vmul.f32 %v13770_v43, %v13770_v43 }
 0xda6   :  { %6820 = vadd.xlane.f32.xlu0 %v6779_v55 }
 0xda8   :  { %6700 = vadd.xlane.f32.xlu1 %v13770_v43 }
 0xdaa   :  { %6702 = vadd.xlane.f32.xlu0 %v13773_v53 }
 0xdae   :  { %6698 = vadd.xlane.f32.xlu0 %v13780_v60 }
 0xdaf   :  { %v8387_v26 = vpop.f32.mrb[128].mxu0 }
 0xdb0   :  { %v6607_v13 = vpop.f32.mrb[129].mxu0  ;;  %v13810_v47 = vadd.f32 %v8387_v26, %v13685_v30 }
 0xdb1   :  { %v8388_v6 = vpop.f32.mrb[130].mxu0  ;;  %v13819_v31 = vadd.f32 %v13685_v30, %v6607_v13 }
 0xdb2   :  { %v13788_v61 = vadd.f32 %v8388_v6, %v13685_v30  ;;  %6830 = vadd.xlane.f32.xlu0 %v6784_v39  ;;  %v6610_v54 = vpop.f32.mrb[131].mxu0  ;;  %v6788_v19 = vmul.f32 %v13810_v47, %v13810_v47 }
 0xdb3   :  { %v13794_v37 = vadd.f32 %v13685_v30, %v6610_v54  ;;  %v6786_v46 = vmul.f32 %v13819_v31, %v13819_v31  ;;  %v13853_v54 = vpop.permute.xlu1 %7362 }
 0xdb4   :  { %6712 = vadd.xlane.f32.xlu1 %v13788_v61  ;;  %v6789_v0 = vmul.f32 %v13788_v61, %v13788_v61  ;;  %14763 = vst [vmem:[#allocation40_spill] sm:$0xff] %v13853_v54 }
 0xdb5   :  { %v6787_v40 = vmul.f32 %v13794_v37, %v13794_v37 }
 0xdb6   :  { %6826 = vadd.xlane.f32.xlu0 %v6782_v7 }
 0xdb8   :  { %6708 = vadd.xlane.f32.xlu1 %v13794_v37 }
 0xdba   :  { %6832 = vadd.xlane.f32.xlu0 %v6785_v2 }
 0xdbc   :  { %6840 = vadd.xlane.f32.xlu1 %v6789_v0 }
 0xdbe   :  { %6828 = vadd.xlane.f32.xlu0 %v6783_v17 }
 0xdbf   :  { %v8391_v57 = vpop.f32.mrb[132].mxu0 }
 0xdc0   :  { %6836 = vadd.xlane.f32.xlu1 %v6787_v40  ;;  %v6623_v62 = vpop.f32.mrb[133].mxu0  ;;  %v13840_v44 = vadd.f32 %v8391_v57, %v13685_v30  ;;  %v13866_v40 = vpop.permute.xlu1 %7367 }
 0xdc1   :  { %v8392_v20 = vpop.f32.mrb[134].mxu0  ;;  %v13850_v6 = vadd.f32 %v13685_v30, %v6623_v62  ;;  %14764 = vst [vmem:[#allocation41_spill] sm:$0xff] %v13866_v40 }
 0xdc2   :  { %v13813_v63 = vadd.f32 %v8392_v20, %v13685_v30  ;;  %6710 = vadd.xlane.f32.xlu0 %v13810_v47  ;;  %v6626_v41 = vpop.f32.mrb[135].mxu0  ;;  %v6792_v2 = vmul.f32 %v13840_v44, %v13840_v44 }
 0xdc3   :  { %v13823_v15 = vadd.f32 %v13685_v30, %v6626_v41  ;;  %v6790_v57 = vmul.f32 %v13850_v6, %v13850_v6 }
 0xdc4   :  { %6720 = vadd.xlane.f32.xlu1 %v13813_v63  ;;  %v6793_v33 = vmul.f32 %v13813_v63, %v13813_v63 }
 0xdc5   :  { %v6791_v56 = vmul.f32 %v13823_v15, %v13823_v15 }
 0xdc6   :  { %6706 = vadd.xlane.f32.xlu0 %v13819_v31 }
 0xdc8   :  { %6716 = vadd.xlane.f32.xlu1 %v13823_v15 }
 0xdca   :  { %6838 = vadd.xlane.f32.xlu0 %v6788_v19 }
 0xdcc   :  { %6848 = vadd.xlane.f32.xlu1 %v6793_v33  ;;  %v13873_v33 = vpop.permute.xlu1 %7372 }
 0xdcd   :  { %14765 = vst [vmem:[#allocation42_spill] sm:$0xff] %v13873_v33 }
 0xdce   :  { %6834 = vadd.xlane.f32.xlu0 %v6786_v46 }
 0xdcf   :  { %v8395_v51 = vpop.f32.mrb[136].mxu0 }
 0xdd0   :  { %6844 = vadd.xlane.f32.xlu1 %v6791_v56  ;;  %v6639_v49 = vpop.f32.mrb[137].mxu0  ;;  %v13843_v26 = vadd.f32 %v8395_v51, %v13685_v30 }
 0xdd1   :  { %v8396_v55 = vpop.f32.mrb[138].mxu0  ;;  %v13861_v0 = vadd.f32 %v13685_v30, %v6639_v49  ;;  %v13881_v49 = vpop.permute.xlu1 %7377 }
 0xdd2   :  { %v13846_v13 = vadd.f32 %v8396_v55, %v13685_v30  ;;  %6718 = vadd.xlane.f32.xlu0 %v13840_v44  ;;  %v6642_v39 = vpop.f32.mrb[139].mxu0  ;;  %v6796_v7 = vmul.f32 %v13843_v26, %v13843_v26  ;;  %14766 = vst [vmem:[#allocation43_spill] sm:$0xff] %v13881_v49 }
 0xdd3   :  { %v13864_v17 = vadd.f32 %v13685_v30, %v6642_v39  ;;  %v6794_v20 = vmul.f32 %v13861_v0, %v13861_v0 }
 0xdd4   :  { %6728 = vadd.xlane.f32.xlu1 %v13846_v13  ;;  %v6797_v56 = vmul.f32 %v13846_v13, %v13846_v13 }
 0xdd5   :  { %v6795_v51 = vmul.f32 %v13864_v17, %v13864_v17 }
 0xdd6   :  { %6714 = vadd.xlane.f32.xlu0 %v13850_v6 }
 0xdd8   :  { %6854 = vadd.xlane.f32.xlu1 %v6796_v7 }
 0xdda   :  { %6846 = vadd.xlane.f32.xlu0 %v6792_v2  ;;  %v13894_v2 = vpop.permute.xlu1 %7382 }
 0xddb   :  { %14768 = vst [vmem:[#allocation45_spill] sm:$0xff] %v13894_v2 }
 0xddc   :  { %6724 = vadd.xlane.f32.xlu1 %v13864_v17 }
 0xdde   :  { %6842 = vadd.xlane.f32.xlu0 %v6790_v57  ;;  %v8399_v62 = vpop.f32.mrb[140].mxu0 }
 0xddf   :  { %v6655_v41 = vpop.f32.mrb[141].mxu0  ;;  %v13884_v55 = vadd.f32 %v8399_v62, %v13685_v30 }
 0xde0   :  { %6850 = vadd.xlane.f32.xlu1 %v6794_v20  ;;  %v8400_v19 = vpop.f32.mrb[142].mxu0  ;;  %v13891_v7 = vadd.f32 %v13685_v30, %v6655_v41 }
 0xde1   :  { %v6658_v46 = vpop.f32.mrb[143].mxu0  ;;  %v13887_v39 = vadd.f32 %v8400_v19, %v13685_v30  ;;  %v6800_v57 = vmul.f32 %v13884_v55, %v13884_v55 }
 0xde2   :  { %6726 = vadd.xlane.f32.xlu0 %v13843_v26  ;;  %v13900_v19 = vadd.f32 %v13685_v30, %v6658_v46  ;;  %v6798_v5 = vmul.f32 %v13891_v7, %v13891_v7 }
 0xde3   :  { %14767 = vst [vmem:[#allocation44_spill] sm:$0xff] %v13887_v39  ;;  %v6801_v30 = vmul.f32 %v13887_v39, %v13887_v39 }
 0xde4   :  { %6856 = vadd.xlane.f32.xlu1 %v6797_v56  ;;  %14769 = vst [vmem:[#allocation46_spill] sm:$0xff] %v13900_v19  ;;  %v6799_v29 = vmul.f32 %v13900_v19, %v13900_v19 }
 0xde6   :  { %6722 = vadd.xlane.f32.xlu0 %v13861_v0 }
 0xde8   :  { %6852 = vadd.xlane.f32.xlu1 %v6795_v51 }
 0xdea   :  { %6734 = vadd.xlane.f32.xlu0 %v13884_v55 }
 0xdec   :  { %6736 = vadd.xlane.f32.xlu1 %v13887_v39 }
 0xdee   :  { %6730 = vadd.xlane.f32.xlu0 %v13891_v7  ;;  %v6679_v62 = vpop.xlane.xlu0 %6678 }
 0xdef   :  { %v6740_v41 = vmul.f32 0.0078125, %v6679_v62 }
 0xdf0   :  { %6862 = vadd.xlane.f32.xlu1 %v6800_v57  ;;  %v6681_v20 = vpop.xlane.xlu1 %6680 }
 0xdf1   :  { %v6900_v40 = vmul.f32 %v6740_v41, %v6740_v41  ;;  %v6741_v10 = vmul.f32 0.0078125, %v6681_v20 }
 0xdf2   :  { %v6675_v56 = vpop.xlane.xlu0 %6674 }
 0xdf3   :  { %v6738_v49 = vmul.f32 0.0078125, %v6675_v56  ;;  %v6901_v56 = vmul.f32 %v6741_v10, %v6741_v10 }
 0xdf4   :  { %6732 = vadd.xlane.f32.xlu1 %v13900_v19  ;;  %v6677_v51 = vpop.xlane.xlu1 %6676 }
 0xdf5   :  { %v6739_v57 = vmul.f32 0.0078125, %v6677_v51  ;;  %v6898_v48 = vmul.f32 %v6738_v49, %v6738_v49 }
 0xdf6   :  { %v6807_v2 = vpop.xlane.xlu0 %6806 }
 0xdf7   :  { %v6868_v33 = vmul.f32 0.0078125, %v6807_v2  ;;  %v6899_v2 = vmul.f32 %v6739_v57, %v6739_v57  ;;  %v6963_v39 = vsub.f32 %v13699_v11, %v6739_v57  ;;  %v13923_v11 = vld [vmem:[%s14262_s8 + $0x7] ss:$0 sm:$0xff] }
 0xdf8   :  { %6858 = vadd.xlane.f32.xlu1 %v6798_v5  ;;  %v6809_v54 = vpop.xlane.xlu1 %6808 }
 0xdf9   :  { %v6932_v46 = vsub.f32 %v6868_v33, %v6900_v40  ;;  %v6869_v4 = vmul.f32 0.0078125, %v6809_v54 }
 0xdfa   :  { %v6803_v18 = vpop.xlane.xlu0 %6802 }
 0xdfb   :  { %v6866_v62 = vmul.f32 0.0078125, %v6803_v18  ;;  %v6996_v8 = vadd.f32 1e-05, %v6932_v46  ;;  %v6933_v20 = vsub.f32 %v6869_v4, %v6901_v56  ;;  %v6962_v18 = vsub.f32 %v13695_v35, %v6738_v49 }
 0xdfc   :  { %6864 = vadd.xlane.f32.xlu1 %v6801_v30  ;;  %v6805_v59 = vpop.xlane.xlu1 %6804 }
 0xdfd   :  { %v6930_v5 = vsub.f32 %v6866_v62, %v6898_v48  ;;  %v6867_v1 = vmul.f32 0.0078125, %v6805_v59  ;;  %v6997_v33 = vadd.f32 1e-05, %v6933_v20 }
 0xdff   :  { %v6994_v51 = vadd.f32 1e-05, %v6930_v5  ;;  %v6931_v27 = vsub.f32 %v6867_v1, %v6899_v2  ;;  %v13914_v1 = vld [vmem:[%s14261_s7 + $0x7] ss:$0 sm:$0xff] }
 0xe00   :  { %6860 = vadd.xlane.f32.xlu1 %v6799_v29 }
 0xe01   :  { %9004 = vrsqrt.f32 %v6994_v51  ;;  %v6995_v40 = vadd.f32 1e-05, %v6931_v27  ;;  %v6964_v27 = vsub.f32 %v13688_v24, %v6740_v41  ;;  %v6965_v24 = vsub.f32 %v13691_v32, %v6741_v10 }
 0xe02   :  { %9006 = vrsqrt.f32 %v6996_v8 }
 0xe03   :  { %9008 = vrsqrt.f32 %v6995_v40 }
 0xe04   :  { %9010 = vrsqrt.f32 %v6997_v33  ;;  %v14770_v33 = vmax.f32 %v12752_v16, 0.0  ;;  %v14771_v16 = vmax.f32 %v12760_v22, 0.0 }
 0xe0b   :  { %v6687_v54 = vpop.xlane.xlu0 %6686  ;;  %v9005_v30 = vpop.eup %9004 }
 0xe0c   :  { %v9007_v52 = vpop.eup %9006  ;;  %v7058_v59 = vmul.f32 %v9005_v30, %v6962_v18  ;;  %v13918_v35 = vmul.f32 0.0078125, %v6687_v54 }
 0xe0d   :  { %v6689_v48 = vpop.xlane.xlu1 %6688  ;;  %v9009_v46 = vpop.eup %9008  ;;  %v7060_v56 = vmul.f32 %v9007_v52, %v6964_v27 }
 0xe0e   :  { %v7096_v29 = vmul.f32 %v13914_v1, %v7058_v59  ;;  %v7059_v4 = vmul.f32 %v9009_v46, %v6963_v39  ;;  %v9011_v2 = vpop.eup %9010  ;;  %v13927_v5 = vmul.f32 0.0078125, %v6689_v48  ;;  %v6904_v39 = vmul.f32 %v13918_v35, %v13918_v35 }
 0xe0f   :  { %v6683_v8 = vpop.xlane.xlu0 %6682  ;;  %v7098_v30 = vmul.f32 %v13914_v1, %v7060_v56  ;;  %v7061_v52 = vmul.f32 %v9011_v2, %v6965_v24 }
 0xe10   :  { %v7134_v57 = vadd.f32 %v13923_v11, %v7096_v29  ;;  %v7097_v62 = vmul.f32 %v13914_v1, %v7059_v4  ;;  %v6742_v20 = vmul.f32 0.0078125, %v6683_v8  ;;  %v6905_v48 = vmul.f32 %v13927_v5, %v13927_v5 }
 0xe11   :  { %v6685_v49 = vpop.xlane.xlu1 %6684  ;;  %v7099_v56 = vmul.f32 %v13914_v1, %v7061_v52  ;;  %v14773_v52 = vmax.f32 %v12747_v9, 0.0 }
 0xe12   :  { %v7166_v18 = vadd.f32 %v7134_v57, %v14770_v33  ;;  %v7135_v54 = vadd.f32 %v13923_v11, %v7097_v62  ;;  %v6743_v59 = vmul.f32 0.0078125, %v6685_v49  ;;  %v6902_v27 = vmul.f32 %v6742_v20, %v6742_v20 }
 0xe13   :  { %v6815_v41 = vpop.xlane.xlu0 %6814  ;;  %v7136_v62 = vadd.f32 %v13923_v11, %v7098_v30 }
 0xe14   :  { %v6872_v51 = vmul.f32 0.0078125, %v6815_v41  ;;  %v7198_v19 = vmax.f32 %v7166_v18, 0.0  ;;  %v7167_v57 = vadd.f32 %v7135_v54, %v14771_v16  ;;  %v6903_v2 = vmul.f32 %v6743_v59, %v6743_v59 }
 0xe15   :  { %v6817_v40 = vpop.xlane.xlu1 %6816  ;;  %v7137_v18 = vadd.f32 %v13923_v11, %v7099_v56  ;;  %v6967_v56 = vsub.f32 %v13723_v45, %v6743_v59 }
 0xe16   :  { %v6936_v32 = vsub.f32 %v6872_v51, %v6904_v39  ;;  %v6873_v10 = vmul.f32 0.0078125, %v6817_v40  ;;  %v7199_v40 = vmax.f32 %v7167_v57, 0.0 }
 0xe17   :  { %v6811_v46 = vpop.xlane.xlu0 %6810 }
 0xe18   :  { %v7000_v29 = vadd.f32 1e-05, %v6936_v32  ;;  %v6937_v8 = vsub.f32 %v6873_v10, %v6905_v48  ;;  %v6870_v4 = vmul.f32 0.0078125, %v6811_v46  ;;  %v14772_v48 = vmax.f32 %v12756_v23, 0.0 }
 0xe19   :  { %v6813_v41 = vpop.xlane.xlu1 %6812  ;;  %v7169_v10 = vadd.f32 %v7137_v18, %v14773_v52  ;;  %v6968_v23 = vsub.f32 %v13712_v28, %v13918_v35  ;;  %v6969_v28 = vsub.f32 %v13715_v25, %v13927_v5 }
 0xe1a   :  { %v6934_v24 = vsub.f32 %v6870_v4, %v6902_v27  ;;  %v6871_v33 = vmul.f32 0.0078125, %v6813_v41  ;;  %v7001_v49 = vadd.f32 1e-05, %v6937_v8  ;;  %9012 = vrsqrt.f32 %v7000_v29 }
 0xe1b   :  { %7230 = vxpose.xlu0.b32.start [1/16] %v7198_v19, 128  ;;  %v7168_v32 = vadd.f32 %v7136_v62, %v14772_v48  ;;  %v7201_v27 = vmax.f32 %v7169_v10, 0.0  ;;  %v6966_v8 = vsub.f32 %v13719_v36, %v6742_v20 }
 0xe1c   :  { %v6998_v39 = vadd.f32 1e-05, %v6934_v24  ;;  %v6935_v51 = vsub.f32 %v6871_v33, %v6903_v2 }
 0xe1d   :  { %v7200_v30 = vmax.f32 %v7168_v32, 0.0 }
 0xe1e   :  { %9014 = vrsqrt.f32 %v6998_v39  ;;  %v6999_v22 = vadd.f32 1e-05, %v6935_v51 }
 0xe1f   :  { %9016 = vrsqrt.f32 %v7001_v49  ;;  %7231 = vxpose.xlu0.b32.cont [2/16] %v7199_v40, 128  ;;  %v6695_v54 = vpop.xlane.xlu0 %6694 }
 0xe20   :  { %9018 = vrsqrt.f32 %v6999_v22  ;;  %v13947_v46 = vmul.f32 0.0078125, %v6695_v54 }
 0xe21   :  { %v6697_v4 = vpop.xlane.xlu1 %6696 }
 0xe22   :  { %v6908_v2 = vmul.f32 %v13947_v46, %v13947_v46  ;;  %v13960_v51 = vmul.f32 0.0078125, %v6697_v4  ;;  %v14775_v4 = vmax.f32 %v12816_v21, 0.0 }
 0xe23   :  { %7232 = vxpose.xlu0.b32.cont [3/16] %v7200_v30, 128  ;;  %v6691_v19 = vpop.xlane.xlu0 %6690  ;;  %v14774_v30 = vmax.f32 %v12808_v3, 0.0 }
 0xe24   :  { %v9013_v29 = vpop.eup %9012  ;;  %v13952_v57 = vmul.f32 0.0078125, %v6691_v19  ;;  %v6909_v19 = vmul.f32 %v13960_v51, %v13960_v51 }
 0xe25   :  { %v7064_v33 = vmul.f32 %v9013_v29, %v6968_v23  ;;  %v6693_v59 = vpop.xlane.xlu1 %6692 }
 0xe26   :  { %v6906_v40 = vmul.f32 %v13952_v57, %v13952_v57 }
 0xe27   :  { %7233 = vxpose.xlu0.b32.cont [4/16] %v7201_v27, 128  ;;  %v6823_v41 = vpop.xlane.xlu0 %6822  ;;  %v7102_v18 = vmul.f32 %v13914_v1, %v7064_v33  ;;  %v6747_v27 = vmul.f32 0.0078125, %v6693_v59 }
 0xe28   :  { %v9015_v16 = vpop.eup %9014  ;;  %v6876_v62 = vmul.f32 0.0078125, %v6823_v41 }
 0xe29   :  { %v9017_v9 = vpop.eup %9016  ;;  %v7062_v24 = vmul.f32 %v9015_v16, %v6966_v8  ;;  %v7140_v16 = vadd.f32 %v13923_v11, %v7102_v18 }
 0xe2a   :  { %v9019_v49 = vpop.eup %9018  ;;  %v6940_v36 = vsub.f32 %v6876_v62, %v6908_v2  ;;  %v7065_v22 = vmul.f32 %v9017_v9, %v6969_v28 }
 0xe2b   :  { %v6819_v35 = vpop.xlane.xlu0 %6818  ;;  %v7100_v20 = vmul.f32 %v13914_v1, %v7062_v24  ;;  %v7063_v39 = vmul.f32 %v9019_v49, %v6967_v56  ;;  %v6907_v56 = vmul.f32 %v6747_v27, %v6747_v27  ;;  %v14776_v49 = vmax.f32 %v12812_v50, 0.0 }
 0xe2c   :  { %v6874_v45 = vmul.f32 0.0078125, %v6819_v35  ;;  %v7004_v5 = vadd.f32 1e-05, %v6940_v36  ;;  %v7103_v62 = vmul.f32 %v13914_v1, %v7065_v22 }
 0xe2d   :  { %v7138_v48 = vadd.f32 %v13923_v11, %v7100_v20  ;;  %v7101_v32 = vmul.f32 %v13914_v1, %v7063_v39  ;;  %v7172_v28 = vadd.f32 %v7140_v16, %v14776_v49  ;;  %v14778_v16 = vld [vmem:[#allocation14_spill] sm:$0xff] }
 0xe2e   :  { %v6938_v25 = vsub.f32 %v6874_v45, %v6906_v40  ;;  %v7141_v36 = vadd.f32 %v13923_v11, %v7103_v62  ;;  %v14777_v45 = vmax.f32 %v12803_v12, 0.0  ;;  %v14779_v62 = vmax.f32 %v14778_v16, 0.0 }
 0xe2f   :  { %v6825_v54 = vpop.xlane.xlu0 %6824  ;;  %v7170_v52 = vadd.f32 %v7138_v48, %v14774_v30  ;;  %v7139_v10 = vadd.f32 %v13923_v11, %v7101_v32  ;;  %v7204_v40 = vmax.f32 %v7172_v28, 0.0  ;;  %v6970_v48 = vsub.f32 %v13743_v38, %v13952_v57 }
 0xe30   :  { %v7002_v29 = vadd.f32 1e-05, %v6938_v25  ;;  %v6877_v23 = vmul.f32 0.0078125, %v6825_v54  ;;  %v7173_v59 = vadd.f32 %v7141_v36, %v14777_v45  ;;  %v6972_v30 = vsub.f32 %v13736_v42, %v13947_v46 }
 0xe31   :  { %v7202_v8 = vmax.f32 %v7170_v52, 0.0  ;;  %v7171_v41 = vadd.f32 %v7139_v10, %v14775_v4  ;;  %v6705_v35 = vpop.xlane.xlu1 %6704  ;;  %v6971_v42 = vsub.f32 %v13747_v14, %v6747_v27 }
 0xe32   :  { %9020 = vrsqrt.f32 %v7002_v29  ;;  %v6941_v9 = vsub.f32 %v6877_v23, %v6909_v19 }
 0xe33   :  { %9022 = vrsqrt.f32 %v7004_v5  ;;  %7234 = vxpose.xlu0.b32.cont [5/16] %v7202_v8, 128  ;;  %v6821_v3 = vpop.xlane.xlu0 %6820  ;;  %v7203_v33 = vmax.f32 %v7171_v41, 0.0  ;;  %v7205_v5 = vmax.f32 %v7173_v59, 0.0  ;;  %v6973_v41 = vsub.f32 %v13739_v58, %v13960_v51 }
 0xe34   :  { %v7005_v2 = vadd.f32 1e-05, %v6941_v9  ;;  %v6875_v24 = vmul.f32 0.0078125, %v6821_v3 }
 0xe35   :  { %v6701_v25 = vpop.xlane.xlu1 %6700 }
 0xe36   :  { %v6939_v21 = vsub.f32 %v6875_v24, %v6907_v56  ;;  %9024 = vrsqrt.f32 %v7005_v2  ;;  %v13998_v56 = vmul.f32 0.0078125, %v6705_v35 }
 0xe37   :  { %7235 = vxpose.xlu0.b32.cont [6/16] %v7203_v33, 128  ;;  %v6703_v20 = vpop.xlane.xlu0 %6702 }
 0xe38   :  { %v7003_v39 = vadd.f32 1e-05, %v6939_v21  ;;  %v13983_v18 = vmul.f32 0.0078125, %v6703_v20  ;;  %v6913_v35 = vmul.f32 %v13998_v56, %v13998_v56  ;;  %v14006_v20 = vmul.f32 0.0078125, %v6701_v25 }
 0xe3a   :  { %9026 = vrsqrt.f32 %v7003_v39  ;;  %v6912_v10 = vmul.f32 %v13983_v18, %v13983_v18  ;;  %v6911_v25 = vmul.f32 %v14006_v20, %v14006_v20 }
 0xe3b   :  { %7236 = vxpose.xlu0.b32.cont [7/16] %v7204_v40, 128  ;;  %v6699_v32 = vpop.xlane.xlu0 %6698 }
 0xe3c   :  { %v9021_v50 = vpop.eup %9020  ;;  %v13990_v38 = vmul.f32 0.0078125, %v6699_v32 }
 0xe3d   :  { %v9023_v22 = vpop.eup %9022  ;;  %v7066_v54 = vmul.f32 %v9021_v50, %v6970_v48 }
 0xe3e   :  { %v7068_v19 = vmul.f32 %v9023_v22, %v6972_v30  ;;  %v6910_v2 = vmul.f32 %v13990_v38, %v13990_v38 }
 0xe3f   :  { %7237 = vxpose.xlu0.b32.cont [8/16] %v7205_v5, 128  ;;  %v6831_v52 = vpop.xlane.xlu0 %6830  ;;  %v7104_v12 = vmul.f32 %v13914_v1, %v7066_v54  ;;  %v14780_v5 = vld [vmem:[#allocation12_spill] sm:$0xff] }
 0xe40   :  { %v6880_v57 = vmul.f32 0.0078125, %v6831_v52  ;;  %v9025_v8 = vpop.eup %9024  ;;  %v7106_v33 = vmul.f32 %v13914_v1, %v7068_v19  ;;  %v14781_v54 = vmax.f32 %v14780_v5, 0.0  ;;  %v14782_v19 = vld [vmem:[#allocation15_spill] sm:$0xff] }
 0xe41   :  { %v6713_v29 = vpop.xlane.xlu1 %6712  ;;  %v7142_v23 = vadd.f32 %v13923_v11, %v7104_v12  ;;  %v7069_v58 = vmul.f32 %v9025_v8, %v6973_v41 }
 0xe42   :  { %v6944_v4 = vsub.f32 %v6880_v57, %v6912_v10  ;;  %v7144_v48 = vadd.f32 %v13923_v11, %v7106_v33 }
 0xe43   :  { %v6827_v46 = vpop.xlane.xlu0 %6826  ;;  %v7174_v9 = vadd.f32 %v7142_v23, %v14779_v62  ;;  %v7107_v32 = vmul.f32 %v13914_v1, %v7069_v58  ;;  %v14783_v23 = vmax.f32 %v14782_v19, 0.0  ;;  %v14786_v19 = vld [vmem:[#allocation17_spill] sm:$0xff] }
 0xe44   :  { %v9027_v3 = vpop.eup %9026  ;;  %v6878_v24 = vmul.f32 0.0078125, %v6827_v46  ;;  %v7008_v49 = vadd.f32 1e-05, %v6944_v4 }
 0xe45   :  { %v6709_v28 = vpop.xlane.xlu1 %6708  ;;  %v7206_v36 = vmax.f32 %v7174_v9, 0.0  ;;  %v7067_v21 = vmul.f32 %v9027_v3, %v6971_v42  ;;  %v7176_v8 = vadd.f32 %v7144_v48, %v14783_v23  ;;  %v7145_v4 = vadd.f32 %v13923_v11, %v7107_v32 }
 0xe46   :  { %v6942_v51 = vsub.f32 %v6878_v24, %v6910_v2  ;;  %9028 = vrsqrt.f32 %v7008_v49  ;;  %v14018_v41 = vmul.f32 0.0078125, %v6709_v28  ;;  %v14020_v9 = vmul.f32 0.0078125, %v6713_v29  ;;  %v14784_v24 = vld [vmem:[#allocation13_spill] sm:$0xff] }
 0xe47   :  { %7238 = vxpose.xlu0.b32.cont [9/16] %v7206_v36, 128  ;;  %v6833_v14 = vpop.xlane.xlu0 %6832  ;;  %v7105_v27 = vmul.f32 %v13914_v1, %v7067_v21  ;;  %v7208_v2 = vmax.f32 %v7176_v8, 0.0  ;;  %v14785_v33 = vmax.f32 %v14784_v24, 0.0  ;;  %v6974_v21 = vsub.f32 %v13780_v60, %v13990_v38 }
 0xe48   :  { %v7006_v39 = vadd.f32 1e-05, %v6942_v51  ;;  %v6881_v40 = vmul.f32 0.0078125, %v6833_v14  ;;  %v6915_v36 = vmul.f32 %v14018_v41, %v14018_v41  ;;  %v14787_v23 = vmax.f32 %v14786_v19, 0.0 }
 0xe49   :  { %v6841_v45 = vpop.xlane.xlu1 %6840  ;;  %v7143_v59 = vadd.f32 %v13923_v11, %v7105_v27  ;;  %v7177_v49 = vadd.f32 %v7145_v4, %v14785_v33 }
 0xe4a   :  { %9030 = vrsqrt.f32 %v7006_v39  ;;  %v6945_v50 = vsub.f32 %v6881_v40, %v6913_v35  ;;  %v6885_v58 = vmul.f32 0.0078125, %v6841_v45  ;;  %v6976_v35 = vsub.f32 %v13773_v53, %v13983_v18 }
 0xe4b   :  { %v6829_v22 = vpop.xlane.xlu0 %6828  ;;  %v7175_v30 = vadd.f32 %v7143_v59, %v14781_v54  ;;  %v6917_v39 = vmul.f32 %v14020_v9, %v14020_v9  ;;  %v7209_v59 = vmax.f32 %v7177_v49, 0.0 }
 0xe4c   :  { %v7009_v52 = vadd.f32 1e-05, %v6945_v50  ;;  %v6879_v12 = vmul.f32 0.0078125, %v6829_v22 }
 0xe4d   :  { %v6837_v10 = vpop.xlane.xlu1 %6836  ;;  %v7207_v57 = vmax.f32 %v7175_v30, 0.0  ;;  %v6949_v32 = vsub.f32 %v6885_v58, %v6917_v39 }
 0xe4e   :  { %v6943_v42 = vsub.f32 %v6879_v12, %v6911_v25  ;;  %9032 = vrsqrt.f32 %v7009_v52  ;;  %v6883_v62 = vmul.f32 0.0078125, %v6837_v10  ;;  %v6977_v25 = vsub.f32 %v13762_v34, %v13998_v56 }
 0xe4f   :  { %7239 = vxpose.xlu0.b32.cont [10/16] %v7207_v57, 128  ;;  %v6711_v46 = vpop.xlane.xlu0 %6710  ;;  %v6975_v12 = vsub.f32 %v13770_v43, %v14006_v20  ;;  %v7013_v10 = vadd.f32 1e-05, %v6949_v32 }
 0xe50   :  { %v7007_v16 = vadd.f32 1e-05, %v6943_v42  ;;  %v9029_v28 = vpop.eup %9028  ;;  %v6947_v29 = vsub.f32 %v6883_v62, %v6915_v36  ;;  %v14030_v27 = vmul.f32 0.0078125, %v6711_v46 }
 0xe51   :  { %v14022_v3 = vpop.xlane.xlu1 %6720  ;;  %v7072_v38 = vmul.f32 %v9029_v28, %v6976_v35 }
 0xe52   :  { %9034 = vrsqrt.f32 %v7007_v16  ;;  %v7011_v45 = vadd.f32 1e-05, %v6947_v29  ;;  %v6916_v22 = vmul.f32 %v14030_v27, %v14030_v27 }
 0xe53   :  { %7240 = vxpose.xlu0.b32.cont [11/16] %v7208_v2, 128  ;;  %v6707_v51 = vpop.xlane.xlu0 %6706  ;;  %v7110_v4 = vmul.f32 %v13914_v1, %v7072_v38 }
 0xe54   :  { %v9031_v14 = vpop.eup %9030  ;;  %v14039_v5 = vmul.f32 0.0078125, %v6707_v51  ;;  %9036 = vrsqrt.f32 %v7011_v45  ;;  %v14790_v45 = vld [vmem:[#allocation16_spill] sm:$0xff] }
 0xe55   :  { %v6717_v40 = vpop.xlane.xlu1 %6716  ;;  %v7070_v48 = vmul.f32 %v9031_v14, %v6974_v21  ;;  %v7148_v14 = vadd.f32 %v13923_v11, %v7110_v4 }
 0xe56   :  { %v6914_v46 = vmul.f32 %v14039_v5, %v14039_v5  ;;  %v14051_v2 = vmul.f32 0.0078125, %v6717_v40  ;;  %v14788_v40 = vld [vmem:[#allocation21_spill] sm:$0xff] }
 0xe57   :  { %7241 = vxpose.xlu0.b32.cont [12/16] %v7209_v59, 128  ;;  %v6839_v50 = vpop.xlane.xlu0 %6838  ;;  %v7108_v60 = vmul.f32 %v13914_v1, %v7070_v48  ;;  %v14789_v59 = vmax.f32 %v14788_v40, 0.0 }
 0xe58   :  { %v6884_v54 = vmul.f32 0.0078125, %v6839_v50  ;;  %v9033_v30 = vpop.eup %9032  ;;  %v6919_v21 = vmul.f32 %v14051_v2, %v14051_v2  ;;  %v14066_v50 = vmul.f32 0.0078125, %v14022_v3 }
 0xe59   :  { %v6849_v53 = vpop.xlane.xlu1 %6848  ;;  %v7146_v18 = vadd.f32 %v13923_v11, %v7108_v60  ;;  %v7073_v43 = vmul.f32 %v9033_v30, %v6977_v25  ;;  %v6979_v25 = vsub.f32 %v13794_v37, %v14018_v41 }
 0xe5a   :  { %v6948_v52 = vsub.f32 %v6884_v54, %v6916_v22  ;;  %v14791_v22 = vmax.f32 %v14790_v45, 0.0 }
 0xe5b   :  { %v6835_v57 = vpop.xlane.xlu0 %6834  ;;  %v7178_v8 = vadd.f32 %v7146_v18, %v14787_v23  ;;  %v7111_v29 = vmul.f32 %v13914_v1, %v7073_v43 }
 0xe5c   :  { %v9035_v42 = vpop.eup %9034  ;;  %v7012_v16 = vadd.f32 1e-05, %v6948_v52  ;;  %v6882_v62 = vmul.f32 0.0078125, %v6835_v57  ;;  %v7180_v54 = vadd.f32 %v7148_v14, %v14791_v22  ;;  %v6889_v52 = vmul.f32 0.0078125, %v6849_v53 }
 0xe5d   :  { %v6845_v34 = vpop.xlane.xlu1 %6844  ;;  %v7210_v56 = vmax.f32 %v7178_v8, 0.0  ;;  %v7071_v24 = vmul.f32 %v9035_v42, %v6975_v12  ;;  %v7149_v18 = vadd.f32 %v13923_v11, %v7111_v29  ;;  %v6921_v8 = vmul.f32 %v14066_v50, %v14066_v50 }
 0xe5e   :  { %v6946_v20 = vsub.f32 %v6882_v62, %v6914_v46  ;;  %9038 = vrsqrt.f32 %v7012_v16  ;;  %v6887_v33 = vmul.f32 0.0078125, %v6845_v34  ;;  %v9037_v30 = vpop.eup %9036  ;;  %v7212_v42 = vmax.f32 %v7180_v54, 0.0  ;;  %v14792_v46 = vld [vmem:[#allocation18_spill] sm:$0xff]  ;;  %v14794_v54 = vld [vmem:[#allocation23_spill] sm:$0xff] }
 0xe5f   :  { %7242 = vxpose.xlu0.b32.cont [13/16] %v7210_v56, 128  ;;  %v6719_v49 = vpop.xlane.xlu0 %6718  ;;  %v7109_v36 = vmul.f32 %v13914_v1, %v7071_v24  ;;  %9040 = vrsqrt.f32 %v7013_v10  ;;  %v14793_v16 = vmax.f32 %v14792_v46, 0.0  ;;  %v7075_v37 = vmul.f32 %v9037_v30, %v6979_v25 }
 0xe60   :  { %v7010_v28 = vadd.f32 1e-05, %v6946_v20  ;;  %v6951_v35 = vsub.f32 %v6887_v33, %v6919_v21  ;;  %v14063_v32 = vmul.f32 0.0078125, %v6719_v49  ;;  %v6980_v53 = vsub.f32 %v13810_v47, %v14030_v27 }
 0xe61   :  { %v14056_v58 = vpop.xlane.xlu1 %6728  ;;  %v7147_v51 = vadd.f32 %v13923_v11, %v7109_v36  ;;  %v7181_v62 = vadd.f32 %v7149_v18, %v14793_v16  ;;  %v6978_v56 = vsub.f32 %v13819_v31, %v14039_v5  ;;  %v6953_v24 = vsub.f32 %v6889_v52, %v6921_v8 }
 0xe62   :  { %9042 = vrsqrt.f32 %v7010_v28  ;;  %v7015_v12 = vadd.f32 1e-05, %v6951_v35  ;;  %v6920_v3 = vmul.f32 %v14063_v32, %v14063_v32  ;;  %v6981_v21 = vsub.f32 %v13788_v61, %v14020_v9 }
 0xe63   :  { %v6715_v39 = vpop.xlane.xlu0 %6714  ;;  %v7179_v48 = vadd.f32 %v7147_v51, %v14789_v59  ;;  %v7213_v47 = vmax.f32 %v7181_v62, 0.0  ;;  %v7113_v14 = vmul.f32 %v13914_v1, %v7075_v37  ;;  %v7017_v5 = vadd.f32 1e-05, %v6953_v24 }
 0xe64   :  { %v14077_v57 = vmul.f32 0.0078125, %v6715_v39  ;;  %9044 = vrsqrt.f32 %v7015_v12  ;;  %v14795_v18 = vmax.f32 %v14794_v54, 0.0 }
 0xe65   :  { %v14068_v60 = vpop.xlane.xlu1 %6854  ;;  %v7211_v38 = vmax.f32 %v7179_v48, 0.0  ;;  %v7151_v9 = vadd.f32 %v13923_v11, %v7113_v14 }
 0xe66   :  { %v6918_v33 = vmul.f32 %v14077_v57, %v14077_v57  ;;  %v6892_v16 = vmul.f32 0.0078125, %v14068_v60  ;;  %v6982_v14 = vsub.f32 %v13850_v6, %v14077_v57  ;;  %v6985_v6 = vsub.f32 %v13813_v63, %v14066_v50  ;;  %v14802_v63 = vld [vmem:[#allocation26_spill] sm:$0xff] }
 0xe67   :  { %7243 = vxpose.xlu0.b32.cont [14/16] %v7211_v38, 128  ;;  %v6847_v10 = vpop.xlane.xlu0 %6846  ;;  %v14803_v50 = vmax.f32 %v14802_v63, 0.0 }
 0xe68   :  { %v6888_v19 = vmul.f32 0.0078125, %v6847_v10  ;;  %v9039_v23 = vpop.eup %9038 }
 0xe69   :  { %v6725_v4 = vpop.xlane.xlu1 %6724  ;;  %v9041_v41 = vpop.eup %9040  ;;  %v7076_v28 = vmul.f32 %v9039_v23, %v6980_v53 }
 0xe6a   :  { %v6952_v34 = vsub.f32 %v6888_v19, %v6920_v3  ;;  %v7077_v39 = vmul.f32 %v9041_v41, %v6981_v21  ;;  %v14098_v45 = vmul.f32 0.0078125, %v6725_v4  ;;  %v14109_v19 = vmul.f32 0.0078125, %v14056_v58  ;;  %v14796_v4 = vld [vmem:[#allocation25_spill] sm:$0xff] }
 0xe6b   :  { %7244 = vxpose.xlu0.b32.cont [15/16] %v7212_v42, 128  ;;  %v6843_v43 = vpop.xlane.xlu0 %6842  ;;  %v7114_v48 = vmul.f32 %v13914_v1, %v7076_v28  ;;  %v14797_v42 = vmax.f32 %v14796_v4, 0.0  ;;  %v6983_v41 = vsub.f32 %v13823_v15, %v14051_v2 }
 0xe6c   :  { %v9043_v20 = vpop.eup %9042  ;;  %v7016_v49 = vadd.f32 1e-05, %v6952_v34  ;;  %v6886_v36 = vmul.f32 0.0078125, %v6843_v43  ;;  %v7115_v10 = vmul.f32 %v13914_v1, %v7077_v39  ;;  %v6923_v53 = vmul.f32 %v14098_v45, %v14098_v45  ;;  %v14798_v43 = vld [vmem:[#allocation20_spill] sm:$0xff] }
 0xe6d   :  { %v6851_v51 = vpop.xlane.xlu1 %6850  ;;  %v7074_v27 = vmul.f32 %v9043_v20, %v6978_v56  ;;  %v7152_v12 = vadd.f32 %v13923_v11, %v7114_v48  ;;  %v7183_v46 = vadd.f32 %v7151_v9, %v14797_v42  ;;  %v14799_v20 = vmax.f32 %v14798_v43, 0.0 }
 0xe6e   :  { %v6950_v31 = vsub.f32 %v6886_v36, %v6918_v33  ;;  %9046 = vrsqrt.f32 %v7016_v49  ;;  %v9045_v3 = vpop.eup %9044  ;;  %v6890_v62 = vmul.f32 0.0078125, %v6851_v51  ;;  %v7153_v60 = vadd.f32 %v13923_v11, %v7115_v10 }
 0xe6f   :  { %7245 = vxpose.xlu0.b32.end [16/16] %v7213_v47, 128  ;;  %v6727_v29 = vpop.xlane.xlu0 %6726  ;;  %v7112_v35 = vmul.f32 %v13914_v1, %v7074_v27  ;;  %v7184_v33 = vadd.f32 %v7152_v12, %v14799_v20  ;;  %v6925_v49 = vmul.f32 %v14109_v19, %v14109_v19  ;;  %v7215_v15 = vmax.f32 %v7183_v46, 0.0 }
 0xe70   :  { %v7014_v40 = vadd.f32 1e-05, %v6950_v31  ;;  %v14093_v59 = vmul.f32 0.0078125, %v6727_v29  ;;  %v7079_v2 = vmul.f32 %v9045_v3, %v6983_v41  ;;  %v6984_v27 = vsub.f32 %v13840_v44, %v14063_v32 }
 0xe71   :  { %v6857_v38 = vpop.xlane.xlu1 %6856  ;;  %v7150_v61 = vadd.f32 %v13923_v11, %v7112_v35  ;;  %v7216_v39 = vmax.f32 %v7184_v33, 0.0 }
 0xe72   :  { %9048 = vrsqrt.f32 %v7014_v40  ;;  %v6924_v25 = vmul.f32 %v14093_v59, %v14093_v59  ;;  %v6893_v34 = vmul.f32 0.0078125, %v6857_v38  ;;  %v14800_v40 = vld [vmem:[#allocation24_spill] sm:$0xff]  ;;  %v7117_v54 = vmul.f32 %v13914_v1, %v7079_v2 }
 0xe73   :  { %9050 = vrsqrt.f32 %v7017_v5  ;;  %v6723_v22 = vpop.xlane.xlu0 %6722  ;;  %v7182_v30 = vadd.f32 %v7150_v61, %v14795_v18  ;;  %v14801_v48 = vmax.f32 %v14800_v40, 0.0 }
 0xe74   :  { %v14104_v52 = vmul.f32 0.0078125, %v6723_v22  ;;  %v6956_v56 = vsub.f32 %v6892_v16, %v6924_v25  ;;  %v6957_v31 = vsub.f32 %v6893_v34, %v6925_v49  ;;  %v7155_v3 = vadd.f32 %v13923_v11, %v7117_v54 }
 0xe75   :  { %v6853_v23 = vpop.xlane.xlu1 %6852  ;;  %v7214_v8 = vmax.f32 %v7182_v30, 0.0  ;;  %v7185_v38 = vadd.f32 %v7153_v60, %v14801_v48 }
 0xe76   :  { %v6922_v37 = vmul.f32 %v14104_v52, %v14104_v52  ;;  %v6891_v58 = vmul.f32 0.0078125, %v6853_v23  ;;  %v7020_v35 = vadd.f32 1e-05, %v6956_v56  ;;  %v7021_v32 = vadd.f32 1e-05, %v6957_v31 }
 0xe77   :  { %7262 = vxpose.xlu1.b32.start [1/16] %v7214_v8, 128  ;;  %v6735_v28 = vpop.xlane.xlu0 %6734  ;;  %v7217_v12 = vmax.f32 %v7185_v38, 0.0  ;;  %v14808_v38 = vld [vmem:[#allocation22_spill] sm:$0xff] }
 0xe78   :  { %v6954_v24 = vsub.f32 %v6890_v62, %v6922_v37  ;;  %v6955_v36 = vsub.f32 %v6891_v58, %v6923_v53  ;;  %v9047_v51 = vpop.eup %9046  ;;  %v14138_v8 = vmul.f32 0.0078125, %v6735_v28  ;;  %v6986_v62 = vsub.f32 %v13861_v0, %v14104_v52  ;;  %v14804_v53 = vld [vmem:[#allocation6_spill] sm:$0xff] }
 0xe79   :  { %v6737_v21 = vpop.xlane.xlu1 %6736  ;;  %v7080_v44 = vmul.f32 %v9047_v51, %v6984_v27  ;;  %v14805_v34 = vmax.f32 %v14804_v53, 0.0  ;;  %v6987_v0 = vsub.f32 %v13864_v17, %v14098_v45 }
 0xe7a   :  { %v7018_v47 = vadd.f32 1e-05, %v6954_v24  ;;  %v7019_v5 = vadd.f32 1e-05, %v6955_v36  ;;  %v6928_v43 = vmul.f32 %v14138_v8, %v14138_v8  ;;  %v14152_v20 = vmul.f32 0.0078125, %v6737_v21  ;;  %v14806_v21 = vld [vmem:[#allocation19_spill] sm:$0xff] }
 0xe7b   :  { %7263 = vxpose.xlu1.b32.cont [2/16] %v7215_v15, 128  ;;  %v6731_v57 = vpop.xlane.xlu0 %6730  ;;  %v7118_v23 = vmul.f32 %v13914_v1, %v7080_v44  ;;  %v7187_v58 = vadd.f32 %v7155_v3, %v14805_v34  ;;  %v14807_v27 = vmax.f32 %v14806_v21, 0.0 }
 0xe7c   :  { %v9049_v29 = vpop.eup %9048  ;;  %9052 = vrsqrt.f32 %v7018_v47  ;;  %v14140_v4 = vmul.f32 0.0078125, %v6731_v57 }
 0xe7d   :  { %v9051_v61 = vpop.eup %9050  ;;  %9054 = vrsqrt.f32 %v7019_v5  ;;  %v6863_v9 = vpop.xlane.xlu1 %6862  ;;  %v7078_v22 = vmul.f32 %v9049_v29, %v6982_v14  ;;  %v7156_v56 = vadd.f32 %v13923_v11, %v7118_v23  ;;  %v7219_v47 = vmax.f32 %v7187_v58, 0.0  ;;  %v14810_v23 = vld [vmem:[#allocation7_spill] sm:$0xff]  ;;  %v7309_v58 = vld [vmem:[%s14263_s9 + $0x78] sm:$0xff]  ;;  %s9094_s9 = smov [#allocation3]  }
 0xe7e   :  { %9056 = vrsqrt.f32 %v7020_v35  ;;  %v7081_v30 = vmul.f32 %v9051_v61, %v6985_v6  ;;  %v6896_v46 = vmul.f32 0.0078125, %v6863_v9  ;;  %v6926_v33 = vmul.f32 %v14140_v4, %v14140_v4  ;;  %s7505_s20 = sshll.u32 %s9094_s9, 4  ;;  %s7506_s20 = int_to_ptr.vmem [resolvable:$true] %s7505_s20 }
 0xe7f   :  { %7264 = vxpose.xlu1.b32.cont [3/16] %v7216_v39, 128  ;;  %v7116_v18 = vmul.f32 %v13914_v1, %v7078_v22  ;;  %9058 = vrsqrt.f32 %v7021_v32  ;;  %v7188_v14 = vadd.f32 %v7156_v56, %v14807_v27  ;;  %v6929_v29 = vmul.f32 %v14152_v20, %v14152_v20  ;;  %s9068_s21 = scalar_lea.vmem %s7506_s20, 32  ;;  %p9073_p1 = scmp.lt.s32.totalorder %s7506_s20, %s7506_s20 }
 0xe80   :  { %v7119_v16 = vmul.f32 %v13914_v1, %v7081_v30  ;;  %v6960_v36 = vsub.f32 %v6896_v46, %v6928_v43  ;;  %v6988_v39 = vsub.f32 %v13843_v26, %v14093_v59  ;;  %v14809_v61 = vmax.f32 %v14808_v38, 0.0  ;;  %p9069_p0 = scmp.ne.s32.totalorder %s7506_s20, %s9068_s21  ;;  %p9074_p2 = scmp.lt.s32.totalorder %s9068_s21, %s9068_s21 }
 0xe81   :  { %v6733_v25 = vpop.xlane.xlu1 %6732  ;;  %v7154_v10 = vadd.f32 %v13923_v11, %v7116_v18  ;;  %v7220_v32 = vmax.f32 %v7188_v14, 0.0  ;;  %v6989_v18 = vsub.f32 %v13846_v13, %v14109_v19  ;;  %v14811_v63 = vmax.f32 %v14810_v23, 0.0 }
 0xe82   :  { %v7157_v15 = vadd.f32 %v13923_v11, %v7119_v16  ;;  %v6767_v35 = vmul.f32 0.0078125, %v6733_v25  ;;  %v7024_v40 = vadd.f32 1e-05, %v6960_v36  ;;  %v6990_v16 = vsub.f32 %v13891_v7, %v14140_v4  ;;  %p9075_p3 = por %p9074_p2, %p9073_p1 }
 0xe83   :  { %7265 = vxpose.xlu1.b32.cont [4/16] %v7217_v12, 128  ;;  %v7186_v42 = vadd.f32 %v7154_v10, %v14803_v50  ;;  %v6992_v36 = vsub.f32 %v13884_v55, %v14138_v8  ;;  %v14821_v55 = vld [vmem:[#allocation29_spill] sm:$0xff] }
 0xe84   :  { %v7189_v9 = vadd.f32 %v7157_v15, %v14809_v61  ;;  %v6927_v30 = vmul.f32 %v6767_v35, %v6767_v35  ;;  %v14822_v8 = vmax.f32 %v14821_v55, 0.0  ;;  %v14836_v55 = vld [vmem:[#allocation37_spill] sm:$0xff]  ;;  %p9076_p4 = pnand %p9075_p3, %p9069_p0 }
 0xe85   :  { %v6859_v37 = vpop.xlane.xlu1 %6858  ;;  %v7218_v41 = vmax.f32 %v7186_v42, 0.0 }
 0xe86   :  { %v9053_v24 = vpop.eup %9052  ;;  %v6894_v60 = vmul.f32 0.0078125, %v6859_v37  ;;  %v7221_v3 = vmax.f32 %v7189_v9, 0.0  ;;  %v14812_v37 = vld [vmem:[#allocation32_spill] sm:$0xff] }
 0xe87   :  { %v9055_v49 = vpop.eup %9054  ;;  %v7082_v52 = vmul.f32 %v9053_v24, %v6986_v62  ;;  %7266 = vxpose.xlu1.b32.cont [5/16] %v7218_v41, 128  ;;  %v14813_v41 = vmax.f32 %v14812_v37, 0.0  ;;  %v14814_v24 = vmov 0  }
 0xe88   :  { %v6958_v28 = vsub.f32 %v6894_v60, %v6926_v33  ;;  %v7083_v31 = vmul.f32 %v9055_v49, %v6987_v0  ;;  %v9057_v5 = vpop.eup %9056  ;;  %v14815_v60 = vld [vmem:[#allocation28_spill] sm:$0xff] }
 0xe89   :  { %v7120_v2 = vmul.f32 %v13914_v1, %v7082_v52  ;;  %v6865_v51 = vpop.xlane.xlu1 %6864  ;;  %v9059_v22 = vpop.eup %9058  ;;  %v7084_v54 = vmul.f32 %v9057_v5, %v6988_v39  ;;  %v14816_v49 = vmax.f32 %v14815_v60, 0.0  ;;  %v7464_v52 = vld [vmem:[#allocation2] sm:$0x1] }
 0xe8a   :  { %v7022_v17 = vadd.f32 1e-05, %v6958_v28  ;;  %v6897_v45 = vmul.f32 0.0078125, %v6865_v51  ;;  %v7121_v57 = vmul.f32 %v13914_v1, %v7083_v31  ;;  %v7085_v12 = vmul.f32 %v9059_v22, %v6989_v18  ;;  %v14817_v28 = vld [vmem:[#allocation27_spill] sm:$0xff] }
 0xe8b   :  { %7267 = vxpose.xlu1.b32.cont [6/16] %v7219_v47, 128  ;;  %v7158_v44 = vadd.f32 %v13923_v11, %v7120_v2  ;;  %v7122_v10 = vmul.f32 %v13914_v1, %v7084_v54  ;;  %v14818_v15 = vmax.f32 %v14817_v28, 0.0  ;;  %v14819_v47 = vld [vmem:[#allocation46_spill] sm:$0xff]  ;;  %v14823_v22 = vld [vmem:[#allocation31_spill] sm:$0xff] }
 0xe8c   :  { %9060 = vrsqrt.f32 %v7022_v17  ;;  %v6961_v48 = vsub.f32 %v6897_v45, %v6929_v29  ;;  %v7159_v42 = vadd.f32 %v13923_v11, %v7121_v57  ;;  %v7123_v13 = vmul.f32 %v13914_v1, %v7085_v12  ;;  %v14820_v29 = vld [vmem:[#allocation44_spill] sm:$0xff]  ;;  %v14825_v57 = vld [vmem:[#allocation30_spill] sm:$0xff] }
 0xe8d   :  { %v6861_v6 = vpop.xlane.xlu1 %6860  ;;  %9062 = vrsqrt.f32 %v7024_v40  ;;  %v7190_v50 = vadd.f32 %v7158_v44, %v14811_v63  ;;  %v7160_v19 = vadd.f32 %v13923_v11, %v7122_v10  ;;  %v6991_v21 = vsub.f32 %v14819_v47, %v6767_v35 }
 0xe8e   :  { %v6895_v26 = vmul.f32 0.0078125, %v6861_v6  ;;  %v7025_v59 = vadd.f32 1e-05, %v6961_v48  ;;  %v7191_v53 = vadd.f32 %v7159_v42, %v14813_v41  ;;  %v7161_v43 = vadd.f32 %v13923_v11, %v7123_v13 }
 0xe8f   :  { %7268 = vxpose.xlu1.b32.cont [7/16] %v7220_v32, 128  ;;  %v7222_v62 = vmax.f32 %v7190_v50, 0.0  ;;  %v7192_v7 = vadd.f32 %v7160_v19, %v14816_v49  ;;  %v6993_v17 = vsub.f32 %v14820_v29, %v14152_v20  ;;  %v14824_v54 = vmax.f32 %v14823_v22, 0.0  ;;  %v14831_v49 = vld [vmem:[#allocation10_spill] sm:$0xff]  ;;  %v14835_v29 = vld [vmem:[#allocation36_spill] sm:$0xff] }
 0xe90   :  { %v6959_v25 = vsub.f32 %v6895_v26, %v6927_v30  ;;  %9064 = vrsqrt.f32 %v7025_v59  ;;  %v7223_v33 = vmax.f32 %v7191_v53, 0.0  ;;  %v7193_v2 = vadd.f32 %v7161_v43, %v14818_v15 }
 0xe91   :  { %v7224_v27 = vmax.f32 %v7192_v7, 0.0  ;;  %v14826_v18 = vmax.f32 %v14825_v57, 0.0  ;;  %v14839_v57 = vld [vmem:[#allocation40_spill] sm:$0xff] }
 0xe92   :  { %v7023_v46 = vadd.f32 1e-05, %v6959_v25  ;;  %v7225_v39 = vmax.f32 %v7193_v2, 0.0  ;;  %v14827_v25 = vld [vmem:[#allocation9_spill] sm:$0xff]  ;;  %v14833_v2 = vld [vmem:[#allocation34_spill] sm:$0xff] }
 0xe93   :  { %7269 = vxpose.xlu1.b32.cont [8/16] %v7221_v3, 128  ;;  %v14828_v12 = vmax.f32 %v14827_v25, 0.0 }
 0xe94   :  { %9066 = vrsqrt.f32 %v7023_v46 }
 0xe96   :  { %v9061_v34 = vpop.eup %9060 }
 0xe97   :  { %7270 = vxpose.xlu1.b32.cont [9/16] %v7222_v62, 128  ;;  %v7086_v56 = vmul.f32 %v9061_v34, %v6990_v16  ;;  %v9063_v0 = vpop.eup %9062 }
 0xe98   :  { %8409 = vset.pattern.permute.xlu0 %v14814_v24  ;;  %v7088_v31 = vmul.f32 %v9063_v0, %v6992_v36  ;;  %v14829_v24 = vld [vmem:[#allocation8_spill] sm:$0xff]  ;;  %v14832_v36 = vld [vmem:[#allocation33_spill] sm:$0xff] }
 0xe99   :  { %7387 = vperm.xlu0 %8409, %v7309_v58   ;;  %v7124_v4 = vmul.f32 %v13914_v1, %v7086_v56 }
 0xe9a   :  { %v9065_v51 = vpop.eup %9064  ;;  %v7126_v38 = vmul.f32 %v13914_v1, %v7088_v31 }
 0xe9b   :  { %7271 = vxpose.xlu1.b32.cont [10/16] %v7223_v33, 128  ;;  %v7162_v14 = vadd.f32 %v13923_v11, %v7124_v4  ;;  %v7089_v35 = vmul.f32 %v9065_v51, %v6993_v17  ;;  %v14830_v33 = vld [vmem:[#allocation11_spill] sm:$0xff] }
 0xe9c   :  { %v7164_v20 = vadd.f32 %v13923_v11, %v7126_v38 }
 0xe9d   :  { %7467 = vperm.xlu0 %8409, %v7464_v52   ;;  %v7194_v40 = vadd.f32 %v7162_v14, %v14822_v8  ;;  %v7127_v6 = vmul.f32 %v13914_v1, %v7089_v35 }
 0xe9e   :  { %v9067_v5 = vpop.eup %9066  ;;  %v7196_v30 = vadd.f32 %v7164_v20, %v14826_v18 }
 0xe9f   :  { %7272 = vxpose.xlu1.b32.cont [11/16] %v7224_v27, 128  ;;  %v7087_v45 = vmul.f32 %v9067_v5, %v6991_v21  ;;  %v7226_v9 = vmax.f32 %v7194_v40, 0.0  ;;  %v7165_v26 = vadd.f32 %v13923_v11, %v7127_v6  ;;  %v14834_v27 = vld [vmem:[#allocation35_spill] sm:$0xff] }
 0xea0   :  { %v7228_v59 = vmax.f32 %v7196_v30, 0.0 }
 0xea1   :  { %v7125_v48 = vmul.f32 %v13914_v1, %v7087_v45  ;;  %v7197_v10 = vadd.f32 %v7165_v26, %v14828_v12 }
 0xea3   :  { %7273 = vxpose.xlu1.b32.cont [12/16] %v7225_v39, 128  ;;  %v7163_v61 = vadd.f32 %v13923_v11, %v7125_v48  ;;  %v7229_v3 = vmax.f32 %v7197_v10, 0.0  ;;  %v14837_v48 = vld [vmem:[#allocation38_spill] sm:$0xff]  ;;  %v14840_v10 = vld [vmem:[#allocation41_spill] sm:$0xff] }
 0xea5   :  { %v7195_v44 = vadd.f32 %v7163_v61, %v14824_v54  ;;  %v14838_v54 = vld [vmem:[#allocation39_spill] sm:$0xff] }
 0xea7   :  { %7274 = vxpose.xlu1.b32.cont [13/16] %v7226_v9, 128  ;;  %v7227_v32 = vmax.f32 %v7195_v44, 0.0 }
 0xeab   :  { %7275 = vxpose.xlu1.b32.cont [14/16] %v7227_v32, 128 }
 0xeaf   :  { %7276 = vxpose.xlu1.b32.cont [15/16] %v7228_v59, 128 }
 0xeb3   :  { %7277 = vxpose.xlu1.b32.end [16/16] %v7229_v3, 128  ;;  %v7246_v23 = vpop.trf.xlu0 }
 0xeb4   :  { %v7390_v60 = vmul.f32 %v14830_v33, %v7246_v23 }
 0xeb7   :  { %v7247_v63 = vpop.trf.xlu0 }
 0xeb8   :  { %v7392_v43 = vmul.f32 %v14829_v24, %v7247_v63 }
 0xeba   :  { %v7422_v52 = vadd.f32 %v7392_v43, %v7390_v60 }
 0xebb   :  { %v7248_v50 = vpop.trf.xlu0 }
 0xebc   :  { %v7394_v7 = vmul.f32 %v14831_v49, %v7248_v50 }
 0xebe   :  { %v7423_v15 = vadd.f32 %v7422_v52, %v7394_v7 }
 0xebf   :  { %v7249_v42 = vpop.trf.xlu0 }
 0xec0   :  { %v7396_v28 = vmul.f32 %v14832_v36, %v7249_v42  ;;  %v14841_v42 = vld [vmem:[#allocation42_spill] sm:$0xff] }
 0xec2   :  { %v7424_v21 = vadd.f32 %v7423_v15, %v7396_v28 }
 0xec3   :  { %v7250_v1 = vpop.trf.xlu0 }
 0xec4   :  { %v7398_v51 = vmul.f32 %v14833_v2, %v7250_v1 }
 0xec6   :  { %v7425_v5 = vadd.f32 %v7424_v21, %v7398_v51 }
 0xec7   :  { %v7251_v46 = vpop.trf.xlu0 }
 0xec8   :  { %v7400_v14 = vmul.f32 %v14834_v27, %v7251_v46 }
 0xeca   :  { %v7426_v39 = vadd.f32 %v7425_v5, %v7400_v14 }
 0xecb   :  { %v7252_v13 = vpop.trf.xlu0 }
 0xecc   :  { %v7402_v17 = vmul.f32 %v14835_v29, %v7252_v13 }
 0xece   :  { %v7427_v40 = vadd.f32 %v7426_v39, %v7402_v17 }
 0xecf   :  { %v7253_v19 = vpop.trf.xlu0 }
 0xed0   :  { %v7404_v8 = vmul.f32 %v14836_v55, %v7253_v19 }
 0xed2   :  { %v7428_v22 = vadd.f32 %v7427_v40, %v7404_v8 }
 0xed3   :  { %v7254_v16 = vpop.trf.xlu0 }
 0xed4   :  { %v7406_v38 = vmul.f32 %v14837_v48, %v7254_v16 }
 0xed6   :  { %v7429_v32 = vadd.f32 %v7428_v22, %v7406_v38 }
 0xed7   :  { %v7255_v37 = vpop.trf.xlu0 }
 0xed8   :  { %v7408_v44 = vmul.f32 %v14838_v54, %v7255_v37 }
 0xeda   :  { %v7430_v12 = vadd.f32 %v7429_v32, %v7408_v44 }
 0xedb   :  { %v7256_v41 = vpop.trf.xlu0 }
 0xedc   :  { %v7410_v18 = vmul.f32 %v14839_v57, %v7256_v41 }
 0xede   :  { %v7431_v50 = vadd.f32 %v7430_v12, %v7410_v18 }
 0xedf   :  { %v7257_v58 = vpop.trf.xlu0 }
 0xee0   :  { %v7412_v3 = vmul.f32 %v14840_v10, %v7257_v58 }
 0xee2   :  { %v7432_v16 = vadd.f32 %v7431_v50, %v7412_v3 }
 0xee3   :  { %v7258_v4 = vpop.trf.xlu0 }
 0xee4   :  { %v7414_v1 = vmul.f32 %v14841_v42, %v7258_v4 }
 0xee7   :  { %v7259_v31 = vpop.trf.xlu0 }
 0xeeb   :  { %v7260_v61 = vpop.trf.xlu0 }
 0xeef   :  { %v7261_v59 = vpop.trf.xlu0 }
 0xef7   :  { %v7278_v62 = vpop.trf.xlu1 }
 0xef8   :  { %v7391_v20 = vmul.f32 %v14830_v33, %v7278_v62  ;;  %v14842_v62 = vld [vmem:[#allocation43_spill] sm:$0xff] }
 0xef9   :  { %v7416_v37 = vmul.f32 %v14842_v62, %v7259_v31 }
 0xefb   :  { %v7279_v11 = vpop.trf.xlu1 }
 0xefc   :  { %v7393_v35 = vmul.f32 %v14829_v24, %v7279_v11  ;;  %v14843_v24 = vld [vmem:[#allocation45_spill] sm:$0xff] }
 0xefd   :  { %v7418_v58 = vmul.f32 %v14843_v24, %v7260_v61 }
 0xefe   :  { %v7443_v30 = vadd.f32 %v7393_v35, %v7391_v20  ;;  %v7470_v35 = vlaneseq }
 0xeff   :  { %v7280_v53 = vpop.trf.xlu1 }
 0xf00   :  { %v7395_v6 = vmul.f32 %v14831_v49, %v7280_v53  ;;  %v7471_v44 = vshrl.u32 %v7470_v35, 7  ;;  %vm7496_vm1 = vcmp.lt.s32.totalorder %v7470_v35, 256 }
 0xf02   :  { %v7444_v23 = vadd.f32 %v7443_v30, %v7395_v6  ;;  %v9093_v30 = vmov 1966171168  }
 0xf03   :  { %v7281_v34 = vpop.trf.xlu1 }
 0xf04   :  { %v7397_v26 = vmul.f32 %v14832_v36, %v7281_v34  ;;  %v7433_v34 = vadd.f32 %v7432_v16, %v7414_v1 }
 0xf06   :  { %v7445_v46 = vadd.f32 %v7444_v23, %v7397_v26  ;;  %v7434_v60 = vadd.f32 %v7433_v34, %v7416_v37  ;;  %v7480_v26 = vunpack.c.l.s4 %v9093_v30 }
 0xf07   :  { %v7282_v56 = vpop.trf.xlu1 }
 0xf08   :  { %v7399_v63 = vmul.f32 %v14833_v2, %v7282_v56  ;;  %v7481_v23 = vunpack.c.0.s8 %v7480_v26 }
 0xf0a   :  { %v7446_v11 = vadd.f32 %v7445_v46, %v7399_v63  ;;  %v7484_v1 = vsub.s32 %v7481_v23, %v7471_v44 }
 0xf0b   :  { %v7283_v0 = vpop.trf.xlu1 }
 0xf0c   :  { %v7401_v13 = vmul.f32 %v14834_v27, %v7283_v0  ;;  %v7435_v0 = vadd.f32 %v7434_v60, %v7418_v58 }
 0xf0e   :  { %v7447_v43 = vadd.f32 %v7446_v11, %v7401_v13 }
 0xf0f   :  { %v7284_v47 = vpop.trf.xlu1 }
 0xf10   :  { %v7403_v41 = vmul.f32 %v14835_v29, %v7284_v47 }
 0xf12   :  { %v7448_v49 = vadd.f32 %v7447_v43, %v7403_v41 }
 0xf13   :  { %v7285_v45 = vpop.trf.xlu1 }
 0xf14   :  { %v7405_v56 = vmul.f32 %v14836_v55, %v7285_v45 }
 0xf16   :  { %v7449_v52 = vadd.f32 %v7448_v49, %v7405_v56 }
 0xf17   :  { %v7286_v9 = vpop.trf.xlu1 }
 0xf18   :  { %v7388_v53 = vpop.permute.xlu0 %7387  ;;  %v7407_v7 = vmul.f32 %v14837_v48, %v7286_v9 }
 0xf19   :  { %v7420_v4 = vmul.f32 %v7388_v53, %v7261_v59 }
 0xf1a   :  { %v7450_v15 = vadd.f32 %v7449_v52, %v7407_v7 }
 0xf1b   :  { %v7287_v25 = vpop.trf.xlu1  ;;  %v7436_v2 = vadd.f32 %v7435_v0, %v7420_v4 }
 0xf1c   :  { %v7409_v36 = vmul.f32 %v14838_v54, %v7287_v25  ;;  %v7468_v59 = vpop.permute.xlu0 %7467 }
 0xf1d   :  { %v7437_v14 = vrot.slane %v7436_v2, 4 }
 0xf1e   :  { %v7451_v47 = vadd.f32 %v7450_v15, %v7409_v36 }
 0xf1f   :  { %v7288_v19 = vpop.trf.xlu1  ;;  %v7438_v39 = vadd.f32 %v7437_v14, %v7436_v2 }
 0xf20   :  { %v7411_v51 = vmul.f32 %v14839_v57, %v7288_v19  ;;  %v7472_v57 = vsub.s32 0, %v7471_v44 }
 0xf21   :  { %v7439_v38 = vrot.slane %v7438_v39, 2 }
 0xf22   :  { %v7452_v31 = vadd.f32 %v7451_v47, %v7411_v51 }
 0xf23   :  { %v7289_v33 = vpop.trf.xlu1  ;;  %v7440_v54 = vadd.f32 %v7439_v38, %v7438_v39 }
 0xf24   :  { %v7413_v21 = vmul.f32 %v14840_v10, %v7289_v33  ;;  %v7473_v10 = vrot.slane %v7468_v59, %v7472_v57 }
 0xf25   :  { %v7441_v32 = vrot.slane %v7440_v54, 1 }
 0xf26   :  { %v7453_v29 = vadd.f32 %v7452_v31, %v7413_v21 }
 0xf27   :  { %v7290_v28 = vpop.trf.xlu1  ;;  %v7442_v12 = vadd.f32 %v7441_v32, %v7440_v54 }
 0xf28   :  { %v7415_v5 = vmul.f32 %v14841_v42, %v7290_v28 }
 0xf29   :  { %v7474_v50 = vadd.f32 %v7473_v10, %v7442_v12 }
 0xf2a   :  { %v7454_v55 = vadd.f32 %v7453_v29, %v7415_v5 }
 0xf2b   :  { %v7291_v27 = vpop.trf.xlu1 }
 0xf2c   :  { %v7417_v17 = vmul.f32 %v14842_v62, %v7291_v27 }
 0xf2e   :  { %v7455_v40 = vadd.f32 %v7454_v55, %v7417_v17 }
 0xf2f   :  { %v7292_v45 = vpop.trf.xlu1 }
 0xf30   :  { %v7419_v8 = vmul.f32 %v14843_v24, %v7292_v45 }
 0xf32   :  { %v7456_v61 = vadd.f32 %v7455_v40, %v7419_v8 }
 0xf33   :  { %v7293_v48 = vpop.trf.xlu1 }
 0xf34   :  { %v7421_v9 = vmul.f32 %v7388_v53, %v7293_v48 }
 0xf36   :  { %v7457_v22 = vadd.f32 %v7456_v61, %v7421_v9 }
 0xf38   :  { %v7458_v20 = vrot.slane %v7457_v22, 4 }
 0xf3a   :  { %v7459_v6 = vadd.f32 %v7458_v20, %v7457_v22 }
 0xf3c   :  { %v7460_v18 = vrot.slane %v7459_v6, 2 }
 0xf3e   :  { %v7461_v25 = vadd.f32 %v7460_v18, %v7459_v6 }
 0xf40   :  { %v7462_v3 = vrot.slane %v7461_v25, 1 }
 0xf42   :  { %v7463_v63 = vadd.f32 %v7462_v3, %v7461_v25 }
 0xf44   :  { %v7475_v42 = vadd.f32 %v7473_v10, %v7463_v63 }
 0xf46   :  { %v7478_v46 = vcombine.low %v7474_v50, %v7475_v42 }
 0xf48   :  { %v7485_v13 = vrot.slane %v7478_v46, %v7484_v1 }
 0xf4a   :  { %v7492_v19 = vrot.slane %v7485_v13, %v7484_v1 }
 0xf4c   :  { %7498 = vst.msk [vmem:[#allocation3] sm:$0x3] %vm7496_vm1, %v7492_v19 }
 0xf4d   :  { %9079 = shalt.err (!%p9076_p4)
}
 0xf4e   :  { %s9080_s24 = scalar_lea.hbm %s14265_s11, 32 }
 0xf4f   :  { %p9081_p5 = scmp.ne.s32.totalorder %s14265_s11, %s9080_s24  ;;  %p9084_p6 = scmp.lt.u32.totalorder %s9080_s24, %s14265_s11 }
 0xf51   :  { %p9086_p7 = pnand %p9084_p6, %p9081_p5 }
 0xf53   :  { %9089 = shalt.err (!%p9086_p7)
}
 0xf54   :  { %7508 = dma.vmem_to_hbm [thread:$0]  %s7506_s20, 32, %s14265_s11, [#allocation4]  }
 0xf55   :  { %9090 = dma.done.wait [#allocation4], 32  }
 0xf56   :  { %9091 = vsyncadd [#allocation4], 4294967264 }
 0xf57   :  { %7512 = vsyncpa [#allocation4], 1 }

</bundles_post_ra>
